<compile_context>
chip_gen: v7x
topology: tpu7x:2x2x1
jax: 0.10.0
libtpu: 0.0.40
codegen_flags: <defaults>
</compile_context>

<pallas_src>
import jax
import jax.numpy as jnp
from jax import lax
from jax.experimental import pallas as pl
from jax.experimental.pallas import tpu as pltpu


# ------------------------------ Pallas kernel ------------------------------- #

def _basic_block_kernel(x_ref, w1_ref, s1_ref, b1_ref, w2_ref, s2_ref, b2_ref,
                        o_ref, pad_ref):
    """Fused TSM('zero') -> conv3x3+BN1+ReLU -> conv3x3+BN2 -> +x -> ReLU.

    One FRAME per grid step; grid = (clips, frames) = (B, T).
      x_ref  : (T, H, W, C)  bf16  whole clip (t-invariant index map => DMA'd
                                   from HBM once per clip, revisited from VMEM)
      w*_ref : (9, C, C)     bf16  raw conv weights, tap-major (kh*3+kw), HWIO
      s*_ref : (1, C)        f32   BN scale  gamma / sqrt(var+eps)
      b*_ref : (1, C)        f32   BN bias   beta - mean*scale
      o_ref  : (1, H, W, C)  bf16  output frame
      pad_ref: (H+2, W+2, C) bf16  zero-ring scratch reused by both convs
    """
    T, H, W, C = x_ref.shape
    M = H * W
    fold = C // 4
    t = pl.program_id(1)

    # ---- TSM 'zero' (resnet_t2v / bLVNet-style tsm(): channels [0,C/4) come
    # from frame t-1, [C/4,C/2) from frame t+1, rest untouched), fused into the
    # single frame we convolve -- no whole-clip concatenate / select temporaries.
    cur = x_ref[t]                                              # (H, W, C) bf16
    prev_gate = (t > 0).astype(x_ref.dtype)
    next_gate = (t < T - 1).astype(x_ref.dtype)
    prev = x_ref[jnp.maximum(t - 1, 0)] * prev_gate             # 0 at t = 0
    nxt = x_ref[jnp.minimum(t + 1, T - 1)] * next_gate          # 0 at t = T-1
    c_idx = lax.broadcasted_iota(jnp.int32, (H, W, C), 2)
    shifted = jnp.where(c_idx < fold, prev,
                        jnp.where(c_idx < 2 * fold, nxt, cur))

    # Zero ring + interior store.  The ring is the conv "padding=1"; re-zeroing
    # this small per-frame scratch is ~2*(H+2) vreg stores per step (noise).
    pad_ref[...] = jnp.zeros(pad_ref.shape, pad_ref.dtype)
    pad_ref[1:H + 1, 1:W + 1, :] = shifted.astype(pad_ref.dtype)

    def conv3x3(w_ref):
        """3x3 / stride 1 / pad 1 conv of the pad_ref interior -> (M, C) f32.

        Nine per-tap MXU dots accumulated in f32; windows are loaded straight
        from pad_ref slices (no im2col staging buffer, no full padded value)."""
        acc = jnp.zeros((M, C), jnp.float32)
        for kh in range(3):
            for kw in range(3):
                win = pad_ref[kh:kh + H, kw:kw + W, :]          # (H, W, C) bf16
                acc = acc + jnp.dot(win.reshape(M, C), w_ref[kh * 3 + kw],
                                    preferred_element_type=jnp.float32)
        return acc

    # conv1 -> BN1 (f32 epilogue scale/bias) -> ReLU
    y1 = conv3x3(w1_ref)
    y1 = jnp.maximum(y1 * s1_ref[...] + b1_ref[...], 0.0)

    # feed y1 back through the same zero-ring scratch for conv2
    pad_ref[1:H + 1, 1:W + 1, :] = y1.reshape(H, W, C).astype(pad_ref.dtype)

    # conv2 -> BN2 -> + identity (pre-shift x) -> ReLU
    y2 = conv3x3(w2_ref)
    y2 = y2 * s2_ref[...] + b2_ref[...] + cur.astype(jnp.float32).reshape(M, C)
    o_ref[0] = jnp.maximum(y2, 0.0).reshape(H, W, C).astype(o_ref.dtype)


# ------------------------------ kernel wrapper ------------------------------ #

def basic_block_forward(x_nhwc, params, num_segments):
    """BasicBlock.forward (stride=1, downsample=None).

    NHWC bf16 in / NHWC bf16 out -- keep the surrounding network NHWC/bf16 so
    no layout or dtype conversion passes are needed at the HBM boundary.
    """
    NT, H, W, C = x_nhwc.shape
    T = num_segments
    assert NT % T == 0 and C % 4 == 0
    B = NT // T
    Cout = params["w1"].shape[2]
    assert Cout == C, "stride=1 / downsample=None implies inplanes == planes"

    if x_nhwc.dtype != jnp.bfloat16:          # callers should already pass bf16
        x_nhwc = x_nhwc.astype(jnp.bfloat16)

    return pl.pallas_call(
        _basic_block_kernel,
        out_shape=jax.ShapeDtypeStruct((NT, H, W, C), jnp.bfloat16),
        grid=(B, T),
        in_specs=[
            # whole clip; index map does not depend on t => fetched once per clip
            pl.BlockSpec((T, H, W, C), lambda b, t: (b, 0, 0, 0)),
            pl.BlockSpec((9, C, C), lambda b, t: (0, 0, 0)),
            pl.BlockSpec((1, C), lambda b, t: (0, 0)),
            pl.BlockSpec((1, C), lambda b, t: (0, 0)),
            pl.BlockSpec((9, C, C), lambda b, t: (0, 0, 0)),
            pl.BlockSpec((1, C), lambda b, t: (0, 0)),
            pl.BlockSpec((1, C), lambda b, t: (0, 0)),
        ],
        out_specs=pl.BlockSpec((1, H, W, C), lambda b, t: (b * T + t, 0, 0, 0)),
        scratch_shapes=[pltpu.VMEM((H + 2, W + 2, C), jnp.bfloat16)],
        compiler_params=pltpu.CompilerParams(
            dimension_semantics=("parallel", "parallel")),
    )(x_nhwc, params["w1"], params["s1"], params["b1"],
      params["w2"], params["s2"], params["b2"])


def prepare_params(w1_oihw, w2_oihw, bn1, bn2, eps=1e-5):
    """Raw bf16 conv weights (OIHW -> (9, Cin, Cout) tap-major) + f32 BN affine."""
    def prep(w_oihw, gamma, beta, mean, var):
        scale = gamma / jnp.sqrt(var + eps)
        bias = beta - mean * scale
        w_hwio = jnp.transpose(w_oihw, (2, 3, 1, 0))            # (3, 3, Cin, Cout)
        w_taps = w_hwio.reshape(9, w_hwio.shape[2], w_hwio.shape[3])
        return (w_taps.astype(jnp.bfloat16),
                scale.reshape(1, -1).astype(jnp.float32),
                bias.reshape(1, -1).astype(jnp.float32))

    w1, s1, b1 = prep(w1_oihw, *bn1)
    w2, s2, b2 = prep(w2_oihw, *bn2)
    return {"w1": w1, "s1": s1, "b1": b1, "w2": w2, "s2": s2, "b2": b2}


# ---------------------------- pure-JAX reference ----------------------------- #

def tsm_zero(x_nchw, num_segments):
    NT, C, H, W = x_nchw.shape
    B = NT // num_segments
    x = x_nchw.reshape(B, num_segments, C, H, W)
    fold = C // 4
    pre, post, peri = x[:, :, :fold], x[:, :, fold:2 * fold], x[:, :, 2 * fold:]
    pre_s = jnp.concatenate([jnp.zeros_like(pre[:, :1]), pre[:, :-1]], axis=1)
    post_s = jnp.concatenate([post[:, 1:], jnp.zeros_like(post[:, :1])], axis=1)
    return jnp.concatenate([pre_s, post_s, peri], axis=2).reshape(NT, C, H, W)


def reference_forward(x_nchw, w1_oihw, w2_oihw, bn1, bn2, num_segments, eps=1e-5):
    def conv(x, w):
        return lax.conv_general_dilated(
            x, w, (1, 1), "SAME",
            dimension_numbers=("NCHW", "OIHW", "NCHW"),
            precision=lax.Precision.HIGHEST)

    def affine(x, gamma, beta, mean, var):
        scale = gamma / jnp.sqrt(var + eps)
        bias = beta - mean * scale
        return x * scale[None, :, None, None] + bias[None, :, None, None]

    out = tsm_zero(x_nchw, num_segments)
    out = jnp.maximum(affine(conv(out, w1_oihw), *bn1), 0.0)
    out = affine(conv(out, w2_oihw), *bn2)
    return jnp.maximum(out + x_nchw, 0.0)


# ----------------------------------- main ------------------------------------ #

if __name__ == "__main__":
    key = jax.random.PRNGKey(0)
    batch, num_segments = 2, 4
    inplanes = planes = 128       # lane-dense channel count; expansion=1, stride=1
    H = W = 16
    NT = batch * num_segments

    ks = jax.random.split(key, 5)
    # Model I/O kept NHWC + bf16 end-to-end (the mem-bound kernel's HBM traffic
    # is dominated by x / out); quantize the input once here.
    x_nhwc = jax.random.normal(
        ks[0], (NT, H, W, inplanes), jnp.float32).astype(jnp.bfloat16)

    wstd = (2.0 / (9 * inplanes)) ** 0.5
    w1_oihw = wstd * jax.random.normal(ks[1], (planes, inplanes, 3, 3), jnp.float32)
    w2_oihw = wstd * jax.random.normal(ks[2], (planes, planes, 3, 3), jnp.float32)

    def bn_params(k):
        k1, k2, k3, k4 = jax.random.split(k, 4)
        gamma = 1.0 + 0.1 * jax.random.normal(k1, (planes,), jnp.float32)
        beta = 0.1 * jax.random.normal(k2, (planes,), jnp.float32)
        mean = 0.1 * jax.random.normal(k3, (planes,), jnp.float32)
        var = 1.0 + 0.1 * jnp.abs(jax.random.normal(k4, (planes,), jnp.float32))
        return gamma, beta, mean, var

    bn1, bn2 = bn_params(ks[3]), bn_params(ks[4])
    params = prepare_params(w1_oihw, w2_oihw, bn1, bn2)

    fwd = jax.jit(basic_block_forward, static_argnums=2)
    out_nhwc = jax.block_until_ready(fwd(x_nhwc, params, num_segments))

    # Reference: f32 / NCHW path on the same bf16-quantized input (the layout
    # transposes here are only for the correctness check, not the kernel path).
    x_nchw = jnp.transpose(x_nhwc.astype(jnp.float32), (0, 3, 1, 2))
    ref_nchw = jax.block_until_ready(
        reference_forward(x_nchw, w1_oihw, w2_oihw, bn1, bn2, num_segments))
    ref_nhwc = jnp.transpose(ref_nchw, (0, 2, 3, 1))

    out = out_nhwc.astype(jnp.float32)
    assert out.shape == ref_nhwc.shape == (NT, H, W, planes)
    diff = out - ref_nhwc
    max_err = float(jnp.max(jnp.abs(diff)))
    rel_l2 = float(jnp.sqrt(jnp.sum(diff * diff)) /
                   (jnp.sqrt(jnp.sum(ref_nhwc * ref_nhwc)) + 1e-12))
    # bf16 MXU operands + bf16 HBM I/O vs. an f32 (HIGHEST) reference.
    assert max_err < 1.5e-1 and rel_l2 < 2e-2, (max_err, rel_l2)
    print("KERNEL_OK")
</pallas_src>

<mosaic_0001>
module attributes {stable_mosaic.version = 11 : i64} {
  func.func @_basic_block_kernel(%arg0: i32, %arg1: i32, %arg2: memref<4x16x16x128xbf16, #tpu.memory_space<vmem>>, %arg3: memref<9x128x128xbf16, #tpu.memory_space<vmem>>, %arg4: memref<1x128xf32, #tpu.memory_space<vmem>>, %arg5: memref<1x128xf32, #tpu.memory_space<vmem>>, %arg6: memref<9x128x128xbf16, #tpu.memory_space<vmem>>, %arg7: memref<1x128xf32, #tpu.memory_space<vmem>>, %arg8: memref<1x128xf32, #tpu.memory_space<vmem>>, %arg9: memref<1x16x16x128xbf16, #tpu.memory_space<vmem>>, %arg10: memref<18x18x128xbf16, #tpu.memory_space<vmem>>) attributes {dimension_semantics = [#tpu.dimension_semantics<parallel>, #tpu.dimension_semantics<parallel>], iteration_bounds = array<i64: 2, 4>, scalar_prefetch = 0 : i64, scratch_operands = 1 : i64, tpu.core_type = #tpu.core_type<tc>, window_params = [{transform_indices = @transform_0, window_bounds = array<i64: 4, 16, 16, 128>}, {pipeline_mode = #tpu.pipeline_mode<synchronous>, transform_indices = @transform_1, window_bounds = array<i64: 9, 128, 128>}, {pipeline_mode = #tpu.pipeline_mode<synchronous>, transform_indices = @transform_2, window_bounds = array<i64: 1, 128>}, {pipeline_mode = #tpu.pipeline_mode<synchronous>, transform_indices = @transform_3, window_bounds = array<i64: 1, 128>}, {pipeline_mode = #tpu.pipeline_mode<synchronous>, transform_indices = @transform_4, window_bounds = array<i64: 9, 128, 128>}, {pipeline_mode = #tpu.pipeline_mode<synchronous>, transform_indices = @transform_5, window_bounds = array<i64: 1, 128>}, {pipeline_mode = #tpu.pipeline_mode<synchronous>, transform_indices = @transform_6, window_bounds = array<i64: 1, 128>}, {transform_indices = @transform_7, window_bounds = array<i64: 1, 16, 16, 128>}]} {
    %0 = arith.index_cast %arg1 : i32 to index
    %c0 = arith.constant 0 : index
    %c0_0 = arith.constant 0 : index
    %c0_1 = arith.constant 0 : index
    %1 = vector.load %arg2[%0, %c0, %c0_0, %c0_1] : memref<4x16x16x128xbf16, #tpu.memory_space<vmem>>, vector<1x16x16x128xbf16>
    %2 = vector.shape_cast %1 : vector<1x16x16x128xbf16> to vector<16x16x128xbf16>
    %c0_i32 = arith.constant 0 : i32
    %3 = arith.cmpi sgt, %arg1, %c0_i32 : i32
    %4 = arith.extui %3 : i1 to i32
    %5 = arith.sitofp %4 : i32 to f32
    %6 = arith.truncf %5 : f32 to bf16
    %c3_i32 = arith.constant 3 : i32
    %7 = arith.cmpi slt, %arg1, %c3_i32 : i32
    %8 = arith.extui %7 : i1 to i32
    %9 = arith.sitofp %8 : i32 to f32
    %10 = arith.truncf %9 : f32 to bf16
    %c1_i32 = arith.constant 1 : i32
    %11 = arith.subi %arg1, %c1_i32 : i32
    %c0_i32_2 = arith.constant 0 : i32
    %12 = arith.maxsi %11, %c0_i32_2 : i32
    %13 = arith.index_cast %12 : i32 to index
    %c0_3 = arith.constant 0 : index
    %c0_4 = arith.constant 0 : index
    %c0_5 = arith.constant 0 : index
    %14 = vector.load %arg2[%13, %c0_3, %c0_4, %c0_5] : memref<4x16x16x128xbf16, #tpu.memory_space<vmem>>, vector<1x16x16x128xbf16>
    %15 = vector.shape_cast %14 : vector<1x16x16x128xbf16> to vector<16x16x128xbf16>
    %16 = vector.broadcast %6 : bf16 to vector<16x16x128xbf16>
    %17 = arith.mulf %15, %16 : vector<16x16x128xbf16>
    %c1_i32_6 = arith.constant 1 : i32
    %18 = arith.addi %arg1, %c1_i32_6 : i32
    %c3_i32_7 = arith.constant 3 : i32
    %19 = arith.minsi %18, %c3_i32_7 : i32
    %20 = arith.index_cast %19 : i32 to index
    %c0_8 = arith.constant 0 : index
    %c0_9 = arith.constant 0 : index
    %c0_10 = arith.constant 0 : index
    %21 = vector.load %arg2[%20, %c0_8, %c0_9, %c0_10] : memref<4x16x16x128xbf16, #tpu.memory_space<vmem>>, vector<1x16x16x128xbf16>
    %22 = vector.shape_cast %21 : vector<1x16x16x128xbf16> to vector<16x16x128xbf16>
    %23 = vector.broadcast %10 : bf16 to vector<16x16x128xbf16>
    %24 = arith.mulf %22, %23 : vector<16x16x128xbf16>
    %25 = tpu.iota {dimensions = array<i32: 2>} : vector<16x16x128xi32>
    %c32_i32 = arith.constant 32 : i32
    %26 = vector.broadcast %c32_i32 : i32 to vector<16x16x128xi32>
    %27 = arith.cmpi slt, %25, %26 : vector<16x16x128xi32>
    %c64_i32 = arith.constant 64 : i32
    %28 = vector.broadcast %c64_i32 : i32 to vector<16x16x128xi32>
    %29 = arith.cmpi slt, %25, %28 : vector<16x16x128xi32>
    %30 = arith.select %29, %24, %2 : vector<16x16x128xi1>, vector<16x16x128xbf16>
    %31 = arith.select %27, %17, %30 : vector<16x16x128xi1>, vector<16x16x128xbf16>
    %cst = arith.constant 0.000000e+00 : bf16
    %32 = vector.broadcast %cst : bf16 to vector<18x18x128xbf16>
    %c0_11 = arith.constant 0 : index
    %c0_12 = arith.constant 0 : index
    %c0_13 = arith.constant 0 : index
    %33 = vector.load %arg10[%c0_11, %c0_12, %c0_13] : memref<18x18x128xbf16, #tpu.memory_space<vmem>>, vector<18x18x128xbf16>
    tpu.vector_store %arg10[%c0_11, %c0_12, %c0_13], %32 {strides = array<i32>} : memref<18x18x128xbf16, #tpu.memory_space<vmem>>, vector<18x18x128xbf16>,
    %c1 = arith.constant 1 : index
    %c1_14 = arith.constant 1 : index
    %c0_15 = arith.constant 0 : index
    %34 = vector.load %arg10[%c1, %c1_14, %c0_15] : memref<18x18x128xbf16, #tpu.memory_space<vmem>>, vector<16x16x128xbf16>
    tpu.vector_store %arg10[%c1, %c1_14, %c0_15], %31 {strides = array<i32>} : memref<18x18x128xbf16, #tpu.memory_space<vmem>>, vector<16x16x128xbf16>,
    %cst_16 = arith.constant 0.000000e+00 : f32
    %35 = vector.broadcast %cst_16 : f32 to vector<256x128xf32>
    %c0_17 = arith.constant 0 : index
    %c0_18 = arith.constant 0 : index
    %c0_19 = arith.constant 0 : index
    %36 = vector.load %arg10[%c0_17, %c0_18, %c0_19] : memref<18x18x128xbf16, #tpu.memory_space<vmem>>, vector<16x16x128xbf16>
    %37 = vector.shape_cast %36 : vector<16x16x128xbf16> to vector<256x128xbf16>
    %c0_20 = arith.constant 0 : index
    %c0_21 = arith.constant 0 : index
    %c0_22 = arith.constant 0 : index
    %38 = vector.load %arg3[%c0_20, %c0_21, %c0_22] : memref<9x128x128xbf16, #tpu.memory_space<vmem>>, vector<1x128x128xbf16>
    %39 = vector.shape_cast %38 : vector<1x128x128xbf16> to vector<128x128xbf16>
    %cst_23 = arith.constant dense<0.000000e+00> : vector<256x128xf32>
    %40 = tpu.matmul %37, %39, %cst_23 {dimension_numbers = #tpu.dot_dimension_numbers<[1], [0], [0], [1], [0, 0, 1, 1], [], []>} : vector<256x128xbf16>, vector<128x128xbf16>, vector<256x128xf32> -> vector<256x128xf32>
    %41 = arith.addf %35, %40 : vector<256x128xf32>
    %c0_24 = arith.constant 0 : index
    %c1_25 = arith.constant 1 : index
    %c0_26 = arith.constant 0 : index
    %42 = vector.load %arg10[%c0_24, %c1_25, %c0_26] : memref<18x18x128xbf16, #tpu.memory_space<vmem>>, vector<16x16x128xbf16>
    %43 = vector.shape_cast %42 : vector<16x16x128xbf16> to vector<256x128xbf16>
    %c1_27 = arith.constant 1 : index
    %c0_28 = arith.constant 0 : index
    %c0_29 = arith.constant 0 : index
    %44 = vector.load %arg3[%c1_27, %c0_28, %c0_29] : memref<9x128x128xbf16, #tpu.memory_space<vmem>>, vector<1x128x128xbf16>
    %45 = vector.shape_cast %44 : vector<1x128x128xbf16> to vector<128x128xbf16>
    %cst_30 = arith.constant dense<0.000000e+00> : vector<256x128xf32>
    %46 = tpu.matmul %43, %45, %cst_30 {dimension_numbers = #tpu.dot_dimension_numbers<[1], [0], [0], [1], [0, 0, 1, 1], [], []>} : vector<256x128xbf16>, vector<128x128xbf16>, vector<256x128xf32> -> vector<256x128xf32>
    %47 = arith.addf %41, %46 : vector<256x128xf32>
    %c0_31 = arith.constant 0 : index
    %c2 = arith.constant 2 : index
    %c0_32 = arith.constant 0 : index
    %48 = vector.load %arg10[%c0_31, %c2, %c0_32] : memref<18x18x128xbf16, #tpu.memory_space<vmem>>, vector<16x16x128xbf16>
    %49 = vector.shape_cast %48 : vector<16x16x128xbf16> to vector<256x128xbf16>
    %c2_33 = arith.constant 2 : index
    %c0_34 = arith.constant 0 : index
    %c0_35 = arith.constant 0 : index
    %50 = vector.load %arg3[%c2_33, %c0_34, %c0_35] : memref<9x128x128xbf16, #tpu.memory_space<vmem>>, vector<1x128x128xbf16>
    %51 = vector.shape_cast %50 : vector<1x128x128xbf16> to vector<128x128xbf16>
    %cst_36 = arith.constant dense<0.000000e+00> : vector<256x128xf32>
    %52 = tpu.matmul %49, %51, %cst_36 {dimension_numbers = #tpu.dot_dimension_numbers<[1], [0], [0], [1], [0, 0, 1, 1], [], []>} : vector<256x128xbf16>, vector<128x128xbf16>, vector<256x128xf32> -> vector<256x128xf32>
    %53 = arith.addf %47, %52 : vector<256x128xf32>
    %c1_37 = arith.constant 1 : index
    %c0_38 = arith.constant 0 : index
    %c0_39 = arith.constant 0 : index
    %54 = vector.load %arg10[%c1_37, %c0_38, %c0_39] : memref<18x18x128xbf16, #tpu.memory_space<vmem>>, vector<16x16x128xbf16>
    %55 = vector.shape_cast %54 : vector<16x16x128xbf16> to vector<256x128xbf16>
    %c3 = arith.constant 3 : index
    %c0_40 = arith.constant 0 : index
    %c0_41 = arith.constant 0 : index
    %56 = vector.load %arg3[%c3, %c0_40, %c0_41] : memref<9x128x128xbf16, #tpu.memory_space<vmem>>, vector<1x128x128xbf16>
    %57 = vector.shape_cast %56 : vector<1x128x128xbf16> to vector<128x128xbf16>
    %cst_42 = arith.constant dense<0.000000e+00> : vector<256x128xf32>
    %58 = tpu.matmul %55, %57, %cst_42 {dimension_numbers = #tpu.dot_dimension_numbers<[1], [0], [0], [1], [0, 0, 1, 1], [], []>} : vector<256x128xbf16>, vector<128x128xbf16>, vector<256x128xf32> -> vector<256x128xf32>
    %59 = arith.addf %53, %58 : vector<256x128xf32>
    %c1_43 = arith.constant 1 : index
    %c1_44 = arith.constant 1 : index
    %c0_45 = arith.constant 0 : index
    %60 = vector.load %arg10[%c1_43, %c1_44, %c0_45] : memref<18x18x128xbf16, #tpu.memory_space<vmem>>, vector<16x16x128xbf16>
    %61 = vector.shape_cast %60 : vector<16x16x128xbf16> to vector<256x128xbf16>
    %c4 = arith.constant 4 : index
    %c0_46 = arith.constant 0 : index
    %c0_47 = arith.constant 0 : index
    %62 = vector.load %arg3[%c4, %c0_46, %c0_47] : memref<9x128x128xbf16, #tpu.memory_space<vmem>>, vector<1x128x128xbf16>
    %63 = vector.shape_cast %62 : vector<1x128x128xbf16> to vector<128x128xbf16>
    %cst_48 = arith.constant dense<0.000000e+00> : vector<256x128xf32>
    %64 = tpu.matmul %61, %63, %cst_48 {dimension_numbers = #tpu.dot_dimension_numbers<[1], [0], [0], [1], [0, 0, 1, 1], [], []>} : vector<256x128xbf16>, vector<128x128xbf16>, vector<256x128xf32> -> vector<256x128xf32>
    %65 = arith.addf %59, %64 : vector<256x128xf32>
    %c1_49 = arith.constant 1 : index
    %c2_50 = arith.constant 2 : index
    %c0_51 = arith.constant 0 : index
    %66 = vector.load %arg10[%c1_49, %c2_50, %c0_51] : memref<18x18x128xbf16, #tpu.memory_space<vmem>>, vector<16x16x128xbf16>
    %67 = vector.shape_cast %66 : vector<16x16x128xbf16> to vector<256x128xbf16>
    %c5 = arith.constant 5 : index
    %c0_52 = arith.constant 0 : index
    %c0_53 = arith.constant 0 : index
    %68 = vector.load %arg3[%c5, %c0_52, %c0_53] : memref<9x128x128xbf16, #tpu.memory_space<vmem>>, vector<1x128x128xbf16>
    %69 = vector.shape_cast %68 : vector<1x128x128xbf16> to vector<128x128xbf16>
    %cst_54 = arith.constant dense<0.000000e+00> : vector<256x128xf32>
    %70 = tpu.matmul %67, %69, %cst_54 {dimension_numbers = #tpu.dot_dimension_numbers<[1], [0], [0], [1], [0, 0, 1, 1], [], []>} : vector<256x128xbf16>, vector<128x128xbf16>, vector<256x128xf32> -> vector<256x128xf32>
    %71 = arith.addf %65, %70 : vector<256x128xf32>
    %c2_55 = arith.constant 2 : index
    %c0_56 = arith.constant 0 : index
    %c0_57 = arith.constant 0 : index
    %72 = vector.load %arg10[%c2_55, %c0_56, %c0_57] : memref<18x18x128xbf16, #tpu.memory_space<vmem>>, vector<16x16x128xbf16>
    %73 = vector.shape_cast %72 : vector<16x16x128xbf16> to vector<256x128xbf16>
    %c6 = arith.constant 6 : index
    %c0_58 = arith.constant 0 : index
    %c0_59 = arith.constant 0 : index
    %74 = vector.load %arg3[%c6, %c0_58, %c0_59] : memref<9x128x128xbf16, #tpu.memory_space<vmem>>, vector<1x128x128xbf16>
    %75 = vector.shape_cast %74 : vector<1x128x128xbf16> to vector<128x128xbf16>
    %cst_60 = arith.constant dense<0.000000e+00> : vector<256x128xf32>
    %76 = tpu.matmul %73, %75, %cst_60 {dimension_numbers = #tpu.dot_dimension_numbers<[1], [0], [0], [1], [0, 0, 1, 1], [], []>} : vector<256x128xbf16>, vector<128x128xbf16>, vector<256x128xf32> -> vector<256x128xf32>
    %77 = arith.addf %71, %76 : vector<256x128xf32>
    %c2_61 = arith.constant 2 : index
    %c1_62 = arith.constant 1 : index
    %c0_63 = arith.constant 0 : index
    %78 = vector.load %arg10[%c2_61, %c1_62, %c0_63] : memref<18x18x128xbf16, #tpu.memory_space<vmem>>, vector<16x16x128xbf16>
    %79 = vector.shape_cast %78 : vector<16x16x128xbf16> to vector<256x128xbf16>
    %c7 = arith.constant 7 : index
    %c0_64 = arith.constant 0 : index
    %c0_65 = arith.constant 0 : index
    %80 = vector.load %arg3[%c7, %c0_64, %c0_65] : memref<9x128x128xbf16, #tpu.memory_space<vmem>>, vector<1x128x128xbf16>
    %81 = vector.shape_cast %80 : vector<1x128x128xbf16> to vector<128x128xbf16>
    %cst_66 = arith.constant dense<0.000000e+00> : vector<256x128xf32>
    %82 = tpu.matmul %79, %81, %cst_66 {dimension_numbers = #tpu.dot_dimension_numbers<[1], [0], [0], [1], [0, 0, 1, 1], [], []>} : vector<256x128xbf16>, vector<128x128xbf16>, vector<256x128xf32> -> vector<256x128xf32>
    %83 = arith.addf %77, %82 : vector<256x128xf32>
    %c2_67 = arith.constant 2 : index
    %c2_68 = arith.constant 2 : index
    %c0_69 = arith.constant 0 : index
    %84 = vector.load %arg10[%c2_67, %c2_68, %c0_69] : memref<18x18x128xbf16, #tpu.memory_space<vmem>>, vector<16x16x128xbf16>
    %85 = vector.shape_cast %84 : vector<16x16x128xbf16> to vector<256x128xbf16>
    %c8 = arith.constant 8 : index
    %c0_70 = arith.constant 0 : index
    %c0_71 = arith.constant 0 : index
    %86 = vector.load %arg3[%c8, %c0_70, %c0_71] : memref<9x128x128xbf16, #tpu.memory_space<vmem>>, vector<1x128x128xbf16>
    %87 = vector.shape_cast %86 : vector<1x128x128xbf16> to vector<128x128xbf16>
    %cst_72 = arith.constant dense<0.000000e+00> : vector<256x128xf32>
    %88 = tpu.matmul %85, %87, %cst_72 {dimension_numbers = #tpu.dot_dimension_numbers<[1], [0], [0], [1], [0, 0, 1, 1], [], []>} : vector<256x128xbf16>, vector<128x128xbf16>, vector<256x128xf32> -> vector<256x128xf32>
    %89 = arith.addf %83, %88 : vector<256x128xf32>
    %c0_73 = arith.constant 0 : index
    %c0_74 = arith.constant 0 : index
    %90 = vector.load %arg4[%c0_73, %c0_74] : memref<1x128xf32, #tpu.memory_space<vmem>>, vector<1x128xf32>
    %91 = vector.broadcast %90 : vector<1x128xf32> to vector<256x128xf32>
    %92 = arith.mulf %89, %91 : vector<256x128xf32>
    %c0_75 = arith.constant 0 : index
    %c0_76 = arith.constant 0 : index
    %93 = vector.load %arg5[%c0_75, %c0_76] : memref<1x128xf32, #tpu.memory_space<vmem>>, vector<1x128xf32>
    %94 = vector.broadcast %93 : vector<1x128xf32> to vector<256x128xf32>
    %95 = arith.addf %92, %94 : vector<256x128xf32>
    %cst_77 = arith.constant 0.000000e+00 : f32
    %96 = vector.broadcast %cst_77 : f32 to vector<256x128xf32>
    %97 = arith.maximumf %95, %96 : vector<256x128xf32>
    %98 = vector.shape_cast %97 : vector<256x128xf32> to vector<16x16x128xf32>
    %99 = arith.truncf %98 : vector<16x16x128xf32> to vector<16x16x128xbf16>
    %c1_78 = arith.constant 1 : index
    %c1_79 = arith.constant 1 : index
    %c0_80 = arith.constant 0 : index
    %100 = vector.load %arg10[%c1_78, %c1_79, %c0_80] : memref<18x18x128xbf16, #tpu.memory_space<vmem>>, vector<16x16x128xbf16>
    tpu.vector_store %arg10[%c1_78, %c1_79, %c0_80], %99 {strides = array<i32>} : memref<18x18x128xbf16, #tpu.memory_space<vmem>>, vector<16x16x128xbf16>,
    %cst_81 = arith.constant 0.000000e+00 : f32
    %101 = vector.broadcast %cst_81 : f32 to vector<256x128xf32>
    %c0_82 = arith.constant 0 : index
    %c0_83 = arith.constant 0 : index
    %c0_84 = arith.constant 0 : index
    %102 = vector.load %arg10[%c0_82, %c0_83, %c0_84] : memref<18x18x128xbf16, #tpu.memory_space<vmem>>, vector<16x16x128xbf16>
    %103 = vector.shape_cast %102 : vector<16x16x128xbf16> to vector<256x128xbf16>
    %c0_85 = arith.constant 0 : index
    %c0_86 = arith.constant 0 : index
    %c0_87 = arith.constant 0 : index
    %104 = vector.load %arg6[%c0_85, %c0_86, %c0_87] : memref<9x128x128xbf16, #tpu.memory_space<vmem>>, vector<1x128x128xbf16>
    %105 = vector.shape_cast %104 : vector<1x128x128xbf16> to vector<128x128xbf16>
    %cst_88 = arith.constant dense<0.000000e+00> : vector<256x128xf32>
    %106 = tpu.matmul %103, %105, %cst_88 {dimension_numbers = #tpu.dot_dimension_numbers<[1], [0], [0], [1], [0, 0, 1, 1], [], []>} : vector<256x128xbf16>, vector<128x128xbf16>, vector<256x128xf32> -> vector<256x128xf32>
    %107 = arith.addf %101, %106 : vector<256x128xf32>
    %c0_89 = arith.constant 0 : index
    %c1_90 = arith.constant 1 : index
    %c0_91 = arith.constant 0 : index
    %108 = vector.load %arg10[%c0_89, %c1_90, %c0_91] : memref<18x18x128xbf16, #tpu.memory_space<vmem>>, vector<16x16x128xbf16>
    %109 = vector.shape_cast %108 : vector<16x16x128xbf16> to vector<256x128xbf16>
    %c1_92 = arith.constant 1 : index
    %c0_93 = arith.constant 0 : index
    %c0_94 = arith.constant 0 : index
    %110 = vector.load %arg6[%c1_92, %c0_93, %c0_94] : memref<9x128x128xbf16, #tpu.memory_space<vmem>>, vector<1x128x128xbf16>
    %111 = vector.shape_cast %110 : vector<1x128x128xbf16> to vector<128x128xbf16>
    %cst_95 = arith.constant dense<0.000000e+00> : vector<256x128xf32>
    %112 = tpu.matmul %109, %111, %cst_95 {dimension_numbers = #tpu.dot_dimension_numbers<[1], [0], [0], [1], [0, 0, 1, 1], [], []>} : vector<256x128xbf16>, vector<128x128xbf16>, vector<256x128xf32> -> vector<256x128xf32>
    %113 = arith.addf %107, %112 : vector<256x128xf32>
    %c0_96 = arith.constant 0 : index
    %c2_97 = arith.constant 2 : index
    %c0_98 = arith.constant 0 : index
    %114 = vector.load %arg10[%c0_96, %c2_97, %c0_98] : memref<18x18x128xbf16, #tpu.memory_space<vmem>>, vector<16x16x128xbf16>
    %115 = vector.shape_cast %114 : vector<16x16x128xbf16> to vector<256x128xbf16>
    %c2_99 = arith.constant 2 : index
    %c0_100 = arith.constant 0 : index
    %c0_101 = arith.constant 0 : index
    %116 = vector.load %arg6[%c2_99, %c0_100, %c0_101] : memref<9x128x128xbf16, #tpu.memory_space<vmem>>, vector<1x128x128xbf16>
    %117 = vector.shape_cast %116 : vector<1x128x128xbf16> to vector<128x128xbf16>
    %cst_102 = arith.constant dense<0.000000e+00> : vector<256x128xf32>
    %118 = tpu.matmul %115, %117, %cst_102 {dimension_numbers = #tpu.dot_dimension_numbers<[1], [0], [0], [1], [0, 0, 1, 1], [], []>} : vector<256x128xbf16>, vector<128x128xbf16>, vector<256x128xf32> -> vector<256x128xf32>
    %119 = arith.addf %113, %118 : vector<256x128xf32>
    %c1_103 = arith.constant 1 : index
    %c0_104 = arith.constant 0 : index
    %c0_105 = arith.constant 0 : index
    %120 = vector.load %arg10[%c1_103, %c0_104, %c0_105] : memref<18x18x128xbf16, #tpu.memory_space<vmem>>, vector<16x16x128xbf16>
    %121 = vector.shape_cast %120 : vector<16x16x128xbf16> to vector<256x128xbf16>
    %c3_106 = arith.constant 3 : index
    %c0_107 = arith.constant 0 : index
    %c0_108 = arith.constant 0 : index
    %122 = vector.load %arg6[%c3_106, %c0_107, %c0_108] : memref<9x128x128xbf16, #tpu.memory_space<vmem>>, vector<1x128x128xbf16>
    %123 = vector.shape_cast %122 : vector<1x128x128xbf16> to vector<128x128xbf16>
    %cst_109 = arith.constant dense<0.000000e+00> : vector<256x128xf32>
    %124 = tpu.matmul %121, %123, %cst_109 {dimension_numbers = #tpu.dot_dimension_numbers<[1], [0], [0], [1], [0, 0, 1, 1], [], []>} : vector<256x128xbf16>, vector<128x128xbf16>, vector<256x128xf32> -> vector<256x128xf32>
    %125 = arith.addf %119, %124 : vector<256x128xf32>
    %c1_110 = arith.constant 1 : index
    %c1_111 = arith.constant 1 : index
    %c0_112 = arith.constant 0 : index
    %126 = vector.load %arg10[%c1_110, %c1_111, %c0_112] : memref<18x18x128xbf16, #tpu.memory_space<vmem>>, vector<16x16x128xbf16>
    %127 = vector.shape_cast %126 : vector<16x16x128xbf16> to vector<256x128xbf16>
    %c4_113 = arith.constant 4 : index
    %c0_114 = arith.constant 0 : index
    %c0_115 = arith.constant 0 : index
    %128 = vector.load %arg6[%c4_113, %c0_114, %c0_115] : memref<9x128x128xbf16, #tpu.memory_space<vmem>>, vector<1x128x128xbf16>
    %129 = vector.shape_cast %128 : vector<1x128x128xbf16> to vector<128x128xbf16>
    %cst_116 = arith.constant dense<0.000000e+00> : vector<256x128xf32>
    %130 = tpu.matmul %127, %129, %cst_116 {dimension_numbers = #tpu.dot_dimension_numbers<[1], [0], [0], [1], [0, 0, 1, 1], [], []>} : vector<256x128xbf16>, vector<128x128xbf16>, vector<256x128xf32> -> vector<256x128xf32>
    %131 = arith.addf %125, %130 : vector<256x128xf32>
    %c1_117 = arith.constant 1 : index
    %c2_118 = arith.constant 2 : index
    %c0_119 = arith.constant 0 : index
    %132 = vector.load %arg10[%c1_117, %c2_118, %c0_119] : memref<18x18x128xbf16, #tpu.memory_space<vmem>>, vector<16x16x128xbf16>
    %133 = vector.shape_cast %132 : vector<16x16x128xbf16> to vector<256x128xbf16>
    %c5_120 = arith.constant 5 : index
    %c0_121 = arith.constant 0 : index
    %c0_122 = arith.constant 0 : index
    %134 = vector.load %arg6[%c5_120, %c0_121, %c0_122] : memref<9x128x128xbf16, #tpu.memory_space<vmem>>, vector<1x128x128xbf16>
    %135 = vector.shape_cast %134 : vector<1x128x128xbf16> to vector<128x128xbf16>
    %cst_123 = arith.constant dense<0.000000e+00> : vector<256x128xf32>
    %136 = tpu.matmul %133, %135, %cst_123 {dimension_numbers = #tpu.dot_dimension_numbers<[1], [0], [0], [1], [0, 0, 1, 1], [], []>} : vector<256x128xbf16>, vector<128x128xbf16>, vector<256x128xf32> -> vector<256x128xf32>
    %137 = arith.addf %131, %136 : vector<256x128xf32>
    %c2_124 = arith.constant 2 : index
    %c0_125 = arith.constant 0 : index
    %c0_126 = arith.constant 0 : index
    %138 = vector.load %arg10[%c2_124, %c0_125, %c0_126] : memref<18x18x128xbf16, #tpu.memory_space<vmem>>, vector<16x16x128xbf16>
    %139 = vector.shape_cast %138 : vector<16x16x128xbf16> to vector<256x128xbf16>
    %c6_127 = arith.constant 6 : index
    %c0_128 = arith.constant 0 : index
    %c0_129 = arith.constant 0 : index
    %140 = vector.load %arg6[%c6_127, %c0_128, %c0_129] : memref<9x128x128xbf16, #tpu.memory_space<vmem>>, vector<1x128x128xbf16>
    %141 = vector.shape_cast %140 : vector<1x128x128xbf16> to vector<128x128xbf16>
    %cst_130 = arith.constant dense<0.000000e+00> : vector<256x128xf32>
    %142 = tpu.matmul %139, %141, %cst_130 {dimension_numbers = #tpu.dot_dimension_numbers<[1], [0], [0], [1], [0, 0, 1, 1], [], []>} : vector<256x128xbf16>, vector<128x128xbf16>, vector<256x128xf32> -> vector<256x128xf32>
    %143 = arith.addf %137, %142 : vector<256x128xf32>
    %c2_131 = arith.constant 2 : index
    %c1_132 = arith.constant 1 : index
    %c0_133 = arith.constant 0 : index
    %144 = vector.load %arg10[%c2_131, %c1_132, %c0_133] : memref<18x18x128xbf16, #tpu.memory_space<vmem>>, vector<16x16x128xbf16>
    %145 = vector.shape_cast %144 : vector<16x16x128xbf16> to vector<256x128xbf16>
    %c7_134 = arith.constant 7 : index
    %c0_135 = arith.constant 0 : index
    %c0_136 = arith.constant 0 : index
    %146 = vector.load %arg6[%c7_134, %c0_135, %c0_136] : memref<9x128x128xbf16, #tpu.memory_space<vmem>>, vector<1x128x128xbf16>
    %147 = vector.shape_cast %146 : vector<1x128x128xbf16> to vector<128x128xbf16>
    %cst_137 = arith.constant dense<0.000000e+00> : vector<256x128xf32>
    %148 = tpu.matmul %145, %147, %cst_137 {dimension_numbers = #tpu.dot_dimension_numbers<[1], [0], [0], [1], [0, 0, 1, 1], [], []>} : vector<256x128xbf16>, vector<128x128xbf16>, vector<256x128xf32> -> vector<256x128xf32>
    %149 = arith.addf %143, %148 : vector<256x128xf32>
    %c2_138 = arith.constant 2 : index
    %c2_139 = arith.constant 2 : index
    %c0_140 = arith.constant 0 : index
    %150 = vector.load %arg10[%c2_138, %c2_139, %c0_140] : memref<18x18x128xbf16, #tpu.memory_space<vmem>>, vector<16x16x128xbf16>
    %151 = vector.shape_cast %150 : vector<16x16x128xbf16> to vector<256x128xbf16>
    %c8_141 = arith.constant 8 : index
    %c0_142 = arith.constant 0 : index
    %c0_143 = arith.constant 0 : index
    %152 = vector.load %arg6[%c8_141, %c0_142, %c0_143] : memref<9x128x128xbf16, #tpu.memory_space<vmem>>, vector<1x128x128xbf16>
    %153 = vector.shape_cast %152 : vector<1x128x128xbf16> to vector<128x128xbf16>
    %cst_144 = arith.constant dense<0.000000e+00> : vector<256x128xf32>
    %154 = tpu.matmul %151, %153, %cst_144 {dimension_numbers = #tpu.dot_dimension_numbers<[1], [0], [0], [1], [0, 0, 1, 1], [], []>} : vector<256x128xbf16>, vector<128x128xbf16>, vector<256x128xf32> -> vector<256x128xf32>
    %155 = arith.addf %149, %154 : vector<256x128xf32>
    %c0_145 = arith.constant 0 : index
    %c0_146 = arith.constant 0 : index
    %156 = vector.load %arg7[%c0_145, %c0_146] : memref<1x128xf32, #tpu.memory_space<vmem>>, vector<1x128xf32>
    %157 = vector.broadcast %156 : vector<1x128xf32> to vector<256x128xf32>
    %158 = arith.mulf %155, %157 : vector<256x128xf32>
    %c0_147 = arith.constant 0 : index
    %c0_148 = arith.constant 0 : index
    %159 = vector.load %arg8[%c0_147, %c0_148] : memref<1x128xf32, #tpu.memory_space<vmem>>, vector<1x128xf32>
    %160 = vector.broadcast %159 : vector<1x128xf32> to vector<256x128xf32>
    %161 = arith.addf %158, %160 : vector<256x128xf32>
    %162 = arith.extf %2 : vector<16x16x128xbf16> to vector<16x16x128xf32>
    %163 = vector.shape_cast %162 : vector<16x16x128xf32> to vector<256x128xf32>
    %164 = arith.addf %161, %163 : vector<256x128xf32>
    %cst_149 = arith.constant 0.000000e+00 : f32
    %165 = vector.broadcast %cst_149 : f32 to vector<256x128xf32>
    %166 = arith.maximumf %164, %165 : vector<256x128xf32>
    %167 = vector.shape_cast %166 : vector<256x128xf32> to vector<16x16x128xf32>
    %168 = arith.truncf %167 : vector<16x16x128xf32> to vector<16x16x128xbf16>
    %c0_150 = arith.constant 0 : index
    %c0_151 = arith.constant 0 : index
    %c0_152 = arith.constant 0 : index
    %c0_153 = arith.constant 0 : index
    %169 = vector.load %arg9[%c0_150, %c0_151, %c0_152, %c0_153] : memref<1x16x16x128xbf16, #tpu.memory_space<vmem>>, vector<1x16x16x128xbf16>
    %170 = vector.shape_cast %169 : vector<1x16x16x128xbf16> to vector<16x16x128xbf16>
    %171 = vector.shape_cast %168 : vector<16x16x128xbf16> to vector<1x16x16x128xbf16>
    tpu.vector_store %arg9[%c0_150, %c0_151, %c0_152, %c0_153], %171 {strides = array<i32>} : memref<1x16x16x128xbf16, #tpu.memory_space<vmem>>, vector<1x16x16x128xbf16>,
    return
  }
  func.func @transform_0(%arg0: i32, %arg1: i32) -> (i32, i32, i32, i32) {
    %c0_i32 = arith.constant 0 : i32
    %c0_i32_0 = arith.constant 0 : i32
    %c0_i32_1 = arith.constant 0 : i32
    %c0_i32_2 = arith.constant 0 : i32
    return %arg0, %c0_i32, %c0_i32_0, %c0_i32_1 : i32, i32, i32, i32
  }
  func.func @transform_1(%arg0: i32, %arg1: i32) -> (i32, i32, i32) {
    %c0_i32 = arith.constant 0 : i32
    %c0_i32_0 = arith.constant 0 : i32
    %c0_i32_1 = arith.constant 0 : i32
    %c0_i32_2 = arith.constant 0 : i32
    return %c0_i32, %c0_i32_0, %c0_i32_1 : i32, i32, i32
  }
  func.func @transform_2(%arg0: i32, %arg1: i32) -> (i32, i32) {
    %c0_i32 = arith.constant 0 : i32
    %c0_i32_0 = arith.constant 0 : i32
    %c0_i32_1 = arith.constant 0 : i32
    return %c0_i32, %c0_i32_0 : i32, i32
  }
  func.func @transform_3(%arg0: i32, %arg1: i32) -> (i32, i32) {
    %c0_i32 = arith.constant 0 : i32
    %c0_i32_0 = arith.constant 0 : i32
    %c0_i32_1 = arith.constant 0 : i32
    return %c0_i32, %c0_i32_0 : i32, i32
  }
  func.func @transform_4(%arg0: i32, %arg1: i32) -> (i32, i32, i32) {
    %c0_i32 = arith.constant 0 : i32
    %c0_i32_0 = arith.constant 0 : i32
    %c0_i32_1 = arith.constant 0 : i32
    %c0_i32_2 = arith.constant 0 : i32
    return %c0_i32, %c0_i32_0, %c0_i32_1 : i32, i32, i32
  }
  func.func @transform_5(%arg0: i32, %arg1: i32) -> (i32, i32) {
    %c0_i32 = arith.constant 0 : i32
    %c0_i32_0 = arith.constant 0 : i32
    %c0_i32_1 = arith.constant 0 : i32
    return %c0_i32, %c0_i32_0 : i32, i32
  }
  func.func @transform_6(%arg0: i32, %arg1: i32) -> (i32, i32) {
    %c0_i32 = arith.constant 0 : i32
    %c0_i32_0 = arith.constant 0 : i32
    %c0_i32_1 = arith.constant 0 : i32
    return %c0_i32, %c0_i32_0 : i32, i32
  }
  func.func @transform_7(%arg0: i32, %arg1: i32) -> (i32, i32, i32, i32) {
    %c4_i32 = arith.constant 4 : i32
    %0 = arith.muli %arg0, %c4_i32 : i32
    %1 = arith.addi %0, %arg1 : i32
    %c0_i32 = arith.constant 0 : i32
    %c0_i32_0 = arith.constant 0 : i32
    %c0_i32_1 = arith.constant 0 : i32
    %c0_i32_2 = arith.constant 0 : i32
    return %1, %c0_i32, %c0_i32_0, %c0_i32_1 : i32, i32, i32, i32
  }
}

</mosaic_0001>

<bundles_post_ra>
// kernel: basic_block_forward.1
= control target key start
LH: loop header
LB: loop body
LE: loop exit
PB: predicated region body
PF: predicated region fallthrough
CT: control target
= control target key end

     0   :  { %s18729_s0 = inlined_call_operand.hbm [shape: bf16[8,16,16,128], index: 0, kind: input, shape index: {}]   ;;  %s18730_s1 = inlined_call_operand.hbm [shape: bf16[9,128,128], index: 1, kind: input, shape index: {}]   ;;  %s18731_s2 = inlined_call_operand.vmem [shape: f32[1,128], index: 2, kind: input, shape index: {}]   ;;  %s18732_s3 = inlined_call_operand.vmem [shape: f32[1,128], index: 3, kind: input, shape index: {}]   ;;  %s18733_s4 = inlined_call_operand.hbm [shape: bf16[9,128,128], index: 4, kind: input, shape index: {}]   ;;  %s18734_s5 = inlined_call_operand.vmem [shape: f32[1,128], index: 5, kind: input, shape index: {}]   ;;  %s18735_s6 = inlined_call_operand.vmem [shape: f32[1,128], index: 6, kind: input, shape index: {}]   ;;  %s18736_s7 = inlined_call_operand.hbm [shape: bf16[8,16,16,128], index: 7, kind: output, shape index: {}]  }
   0x1   :  { %18830 = sst [smem:[#allocation75_spill]] %s18730_s1 }
   0x2   :  { %18831 = sst [smem:[#allocation76_spill]] %s18733_s4 }
   0x3   :  { %18832 = sst [smem:[#allocation77_spill]] %s18734_s5 }
   0x4   :  { %18833 = sst [smem:[#allocation78_spill]] %s18735_s6 }
   0x5   :  { %18834 = sst [smem:[#allocation79_spill]] %s18736_s7 }
   0x6   :  { %12 = vsyncpa [#allocation4], 0 }
   0x7   :  { %14 = vsyncpa [#allocation4 + $0x1], 0 }
   0x8   :  { %15 = vsyncpa [#allocation7], 0 }
   0x9   :  { %16 = vsyncpa [#allocation5], 0 }
   0xa   :  { %18 = vsyncpa [#allocation5 + $0x1], 0  ;;  %s15171_s24 = smov 0   ;;  %s15173_s25 = smov 0  }
   0xb   :  { %s15175_s26 = smov 0   ;;  %s15177_s27 = smov 0  }
   0xc   :  { %s15179_s28 = smov 0   ;;  %s15181_s29 = smov 0  }
   0xd   :  { %s15183_s30 = smov 0   ;;  %s15185_s8 = smov 0  }
   0xe   :  { %s15187_s9 = smov 0   ;;  %s15189_s10 = smov 0  }
   0xf   :  { %s15191_s11 = smov 0  }
  0x10 LB: > { %18835 = sst [smem:[#allocation13_spill]] %s15080_s24  ;;  %s11828_s12 = sadd.s32 4294967295, %s15120_s11   ;;  %s15120_s11 = sphi %s15191_s11, %s24_s11   ;;  %s15116_s10 = sphi %s15189_s10, %s19076_s10   ;;  %s15112_s9 = sphi %s15187_s9, %s19075_s9   ;;  %s15108_s8 = sphi %s15185_s8, %s19074_s8   ;;  %s15104_s30 = sphi %s15183_s30, %s19067_s30   ;;  %s15100_s29 = sphi %s15181_s29, %s19073_s29   ;;  %s15096_s28 = sphi %s15179_s28, %s19072_s28   ;;  %s15092_s27 = sphi %s15177_s27, %s19071_s27   ;;  %s15088_s26 = sphi %s15175_s26, %s19070_s26   ;;  %s15084_s25 = sphi %s15173_s25, %s19069_s25   ;;  %s15080_s24 = sphi %s15171_s24, %s19066_s24  }
  0x11   : > { %18836 = sst [smem:[#allocation14_spill]] %s15084_s25  ;;  %s11829_s13 = sadd.s32 4294967294, %s15120_s11  }
  0x12   : > { %18837 = sst [smem:[#allocation15_spill]] %s15108_s8  ;;  %p56_p0 = scmp.ne.s32.totalorder %s15096_s28, %s15092_s27 }
  0x13   : > { %18838 = sst [smem:[#allocation16_spill]] %s15112_s9  ;;  %p15227_p1 = scmp.eq.s32.totalorder %s11828_s12, 0 }
  0x14   : > { %p209_p2 = scmp.ne.s32.totalorder %s15088_s26, %s15084_s25  ;;  %p210_p4 = scmp.eq.s32.totalorder %s11828_s12, 7 }
  0x15   : > { %s18839_s14 = scalar_select %p15227_p1, 1, 0 }
  0x16   : > { %p15236_p3 = por %p15227_p1, %p56_p0  ;;  %p215_p5 = scmp.ne.s32.totalorder %s15084_s25, %s15080_s24 }
  0x17   : > { %p216_p6 = scmp.eq.s32.totalorder %s11829_s13, 7  ;;  %p15242_p7 = por %p210_p4, %p209_p2 }
  0x18   : > { %s18840_s16 = scalar_select %p15236_p3, 1, 0 }
  0x19   : > { %s18841_s17 = scalar_select %p15242_p7, 1, 0 }
  0x1a   : > { %p11832_p8 = scmp.ge.s32.totalorder %s15120_s11, 1  ;;  %p15247_p9 = por %p216_p6, %p215_p5 }
  0x1b   : > { %18842 = sst [smem:[#allocation17_spill]] %s18841_s17  ;;  %p223_p10 = scmp.lt.s32.totalorder %s15120_s11, 9 }
  0x1c   : > { %s18843_s18 = scalar_select %p15247_p9, 1, 0 }
  0x1d   : > { %p15252_p11 = pnand %p11832_p8, %p223_p10  ;;  %s15122_s20 = smov [#allocation6]  }
  0x1e   : > { %18844 = sst [smem:[#allocation18_spill]] %s18843_s18  ;;  %s235_s21 = sshll.u32 %s15122_s20, 4  ;;  %s236_s21 = int_to_ptr.vmem [resolvable:$true] %s235_s21 }
  0x1f   : > { %s18845_s19 = scalar_select %p15252_p11, 1, 0 }
  0x20   : > { %p14439_p12 = pneg %p15252_p11  ;;  %s15123_s23 = smov [#allocation8]  }
  0x21   : > { %s254_s27 = sshll.u32 %s15123_s23, 4  ;;  %s18847_s1 = sld [smem:[#allocation75_spill]]  ;;  %s15264_s27 = int_to_ptr.vmem [resolvable:$true] %s254_s27 }
  0x22   : > { %p15260_p13 = pnand %p14439_p12, %p15227_p1 }
  0x24   : > { %p14910_p2 = pneg %p15260_p13 }
  0x27   : > { %s14908_s15 = scalar_lea.hbm %s18847_s1, 9216 }
  0x28   : > { %p14909_p0 = scmp.ne.s32.totalorder %s18847_s1, %s14908_s15  ;;  %p14915_p6 = scmp.lt.u32.totalorder %s14908_s15, %s18847_s1 }
  0x2a   : > { %p14911_p4 = pnand %p14910_p2, %p14909_p0 }
  0x2c   : > { %p14912_p5 = pneg %p14911_p4 }
  0x2e   : > { %p14917_p8 = pnand %p14915_p6, %p14912_p5 }
  0x30   : > { %14920 = shalt.err (!%p14917_p8)
}
  0x31   : > { %s14921_s23 = scalar_lea.vmem %s236_s21, 9216  ;;  %p14929_p7 = scmp.lt.s32.totalorder %s236_s21, %s236_s21 }
  0x32   : > { %p14922_p10 = scmp.ne.s32.totalorder %s236_s21, %s14921_s23  ;;  %p14930_p1 = scmp.lt.s32.totalorder %s14921_s23, %s14921_s23 }
  0x34   : > { %p14924_p12 = pnand %p14922_p10, %p14910_p2  ;;  %p14931_p3 = por %p14930_p1, %p14929_p7 }
  0x36   : > { %p14925_p9 = pneg %p14924_p12 }
  0x38   : > { %p14932_p11 = pnand %p14931_p3, %p14925_p9 }
  0x3a   : > { %14935 = shalt.err (!%p14932_p11)
}
  0x3b   : > { %s18749_s18 = smov 64   ;;  %s18750_s12 = smov 4  }
  0x3c   : > { %14442 = dma.hbm_to_vmem [thread:$0]  (!%p15260_p13), %s18847_s1, 9216, %s236_s21, [#allocation7], %s18749_s18, %s18749_s18, %s18750_s12  }
  0x3d   : > { %s18848_s4 = sld [smem:[#allocation76_spill]] }
  0x43   : > { %s14936_s20 = scalar_lea.hbm %s18848_s4, 9216 }
  0x44   : > { %p14937_p1 = scmp.ne.s32.totalorder %s18848_s4, %s14936_s20  ;;  %p14943_p9 = scmp.lt.u32.totalorder %s14936_s20, %s18848_s4 }
  0x46   : > { %p14939_p3 = pnand %p14937_p1, %p14910_p2 }
  0x48   : > { %p14940_p7 = pneg %p14939_p3 }
  0x4a   : > { %p14945_p11 = pnand %p14943_p9, %p14940_p7 }
  0x4c   : > { %14948 = shalt.err (!%p14945_p11)
}
  0x4d   : > { %s14949_s21 = scalar_lea.vmem %s15264_s27, 9216  ;;  %p14957_p6 = scmp.lt.s32.totalorder %s15264_s27, %s15264_s27 }
  0x4e   : > { %p14950_p0 = scmp.ne.s32.totalorder %s15264_s27, %s14949_s21  ;;  %p14958_p8 = scmp.lt.s32.totalorder %s14949_s21, %s14949_s21 }
  0x50   : > { %p14952_p4 = pnand %p14950_p0, %p14910_p2  ;;  %p14959_p10 = por %p14958_p8, %p14957_p6 }
  0x52   : > { %p14953_p5 = pneg %p14952_p4 }
  0x54   : > { %p14960_p12 = pnand %p14959_p10, %p14953_p5 }
  0x56   : > { %14963 = shalt.err (!%p14960_p12)
}
  0x57   : > { %14445 = dma.hbm_to_vmem [thread:$0]  (!%p15260_p13), %s18848_s4, 9216, %s15264_s27, [#allocation7], %s18749_s18, %s18749_s18, %s18750_s12  }
  0x58   : > { %s33_s17 = sadd.s32 1, %s15112_s9  ;;  %s36_s22 = sadd.s32 1, %s15116_s10 }
  0x59   : > { %p34_p2 = scmp.ge.s32.totalorder %s33_s17, 4  ;;  %s43_s7 = sadd.s32 1, %s15100_s29 }
  0x5a   : > { %p50_p1 = scmp.ne.s32.totalorder %s15100_s29, %s15096_s28  ;;  %p51_p3 = scmp.eq.s32.totalorder %s15120_s11, 0 }
  0x5b   : > { %s19078_s17 = smov (%p34_p2, %s33_s17), 0  ;;  %s19080_s22 = smov (!%p34_p2, %s36_s22), %s15116_s10 }
  0x5c   : > { %p15328_p7 = por %p51_p3, %p50_p1  ;;  %s11830_s15 = sshll.u32 %s15116_s10, 2 }
  0x5d   : > { %p38_p9 = scmp.ge.s32.totalorder %s19080_s22, 2  ;;  %s193_s27 = sadd.s32 %s15112_s9, %s11830_s15 }
  0x5e   : > { %p14456_p13 = scmp.lt.s32.totalorder %s15120_s11, 8  ;;  %s274_s13 = sand.u32 1, %s15100_s29  }
  0x5f   : > { %s19082_s22 = smov (%p38_p9, %s19080_s22), 0  ;;  %s11836_s20 = sshll.u32 %s274_s13, 9 }
  0x60   : > { %18850 = sst [smem:[#allocation19_spill]] %s19082_s22  ;;  %s40_s23 = ssub.s32 %s15116_s10, %s19082_s22 }
  0x61   : > { %s11831_s21 = sshll.u32 %s19082_s22, 2  ;;  %p41_p11 = scmp.eq.s32.totalorder %s40_s23, 0 }
  0x62   : > { %s195_s25 = sadd.s32 %s11831_s21, %s19078_s17  ;;  %s12455_s15 = sshll.u32 %s15116_s10, 13 }
  0x63   : > { %s196_s8 = ssub.s32 %s193_s27, %s195_s25  ;;  %s15349_s4 = scalar_lea.hbm %s18729_s0, %s12455_s15 }
  0x64   : > { %s15343_s18 = scalar_select %p41_p11, %s15100_s29, %s43_s7  }
  0x65   : > { %p197_p0 = scmp.eq.s32.totalorder %s196_s8, 0  ;;  %s278_s9 = scalar_lea.vmem [#allocation3], %s11836_s20 }
  0x66   : > { %s286_s6 = sshll.u32 %s278_s9, 4  ;;  %s18851_s5 = sadd.s32 1, %s15088_s26  ;;  %s15356_s6 = int_to_ptr.vmem [resolvable:$true] %s286_s6 }
  0x67   : > { %s15354_s22 = scalar_select %p197_p0, %s15088_s26, %s18851_s5  }
  0x68   : > { %p15362_p4 = pnand %p14456_p13, %p15328_p7  ;;  %s15366_s1 = scalar_lea.sflag [#allocation4], %s274_s13 }
  0x69   : > { %s14964_s12 = scalar_lea.hbm %s15349_s4, 8192  ;;  %s14969_s24 = scalar_lea.hbm %s18729_s0, 16384 }
  0x6a   : > { %p14965_p5 = scmp.ne.s32.totalorder %s15349_s4, %s14964_s12  ;;  %p14966_p6 = pneg %p15362_p4 }
  0x6b   : > { %p14970_p12 = scmp.lt.u32.totalorder %s15349_s4, %s18729_s0  ;;  %p14971_p2 = scmp.lt.u32.totalorder %s14969_s24, %s14964_s12 }
  0x6c   : > { %p14967_p8 = pnand %p14966_p6, %p14965_p5  ;;  %p14973_p3 = scmp.lt.u32.totalorder %s14964_s12, %s15349_s4 }
  0x6d   : > { %p14972_p1 = por %p14971_p2, %p14970_p12 }
  0x6e   : > { %p14968_p10 = pneg %p14967_p8 }
  0x6f   : > { %p14974_p7 = por %p14973_p3, %p14972_p1 }
  0x71   : > { %p14975_p9 = pnand %p14974_p7, %p14968_p10 }
  0x73   : > { %14978 = shalt.err (!%p14975_p9)
}
  0x74   : > { %s14979_s13 = scalar_lea.vmem %s15356_s6, 8192  ;;  %s15126_s23 = smov [#allocation3]  }
  0x75   : > { %p14980_p13 = scmp.ne.s32.totalorder %s15356_s6, %s14979_s13  ;;  %s14984_s21 = sshll.u32 %s15126_s23, 4  ;;  %s14985_s21 = int_to_ptr.vmem [resolvable:$false] %s14984_s21 }
  0x76   : > { %s14986_s25 = scalar_lea.vmem %s14985_s21, 16384  ;;  %p14987_p5 = scmp.lt.s32.totalorder %s15356_s6, %s14985_s21 }
  0x77   : > { %p14982_p11 = pnand %p14980_p13, %p14966_p6  ;;  %p14988_p8 = scmp.lt.s32.totalorder %s14986_s25, %s14979_s13 }
  0x79   : > { %p14983_p0 = pneg %p14982_p11  ;;  %p14989_p12 = por %p14988_p8, %p14987_p5 }
  0x7b   : > { %p14990_p2 = pnand %p14989_p12, %p14983_p0 }
  0x7d   : > { %14993 = shalt.err (!%p14990_p2)
}
  0x7e   : > { %s18853_s8 = smov 4   ;;  %s18854_s15 = smov 64  }
  0x7f   : > { %14449 = dma.hbm_to_vmem [thread:$0]  (!%p15362_p4), %s15349_s4, 8192, %s15356_s6, %s15366_s1, %s18854_s15, %s18854_s15, %s18853_s8  }
  0x80   : > { %p18855_p6 = scmp.ne.s32.totalorder %s18845_s19, 0 }
  0x82   : > { %298 = sbr.rel (%p18855_p6) target bundleno = 1915 (0x77b), region = 48 }
  0x89   : > { %s300_s12 = sand.u32 1, %s15096_s28   ;;  %p18856_p10 = scmp.ne.s32.totalorder %s18840_s16, 0 }
  0x8a   : > { %s11841_s5 = sshll.u32 %s300_s12, 9  ;;  %s301_s9 = scalar_lea.sflag [#allocation4], %s300_s12 }
  0x8b   : > { %s15400_s24 = scalar_lea.vmem [#allocation3], %s11841_s5 }
  0x8c   : > { %15067 = dma.done.wait (%p18856_p10), %s301_s9, 8192  }
  0x8d   : > { %15069 = vsyncadd (%p18856_p10), %s301_s9, 4294959104  ;;  %p18857_p1 = scmp.ne.s32.totalorder %s18839_s14, 0 }
  0x8f   : > { %15071 = dma.done.wait (%p18857_p1), [#allocation7], 18432  }
  0x90   : > { %15073 = vsyncadd (%p18857_p1), [#allocation7], 4294948864  ;;  %v15127_v0 = vmov 0   ;;  %p382_p4 = scmp.gt.s32.totalorder %s15104_s30, 0  ;;  %p395_p3 = scmp.lt.s32.totalorder %s15104_s30, 3  ;;  %v14555_v1 = vld [vmem:[#allocation6 + $0x40] sm:$0xff]   ;;  %v556_v5 = vlaneseq }
  0x91   : > { %626 = vst [vmem:[#allocation2] sm:$0xf] %v15127_v0  ;;  %627 = vst [vmem:[#allocation2 + $0x4] sm:$0xf] %v15127_v0  ;;  %v14556_v2 = vld [vmem:[#allocation6 + $0x48] sm:$0xff]   ;;  %13051 = vmatprep.subr.bf16.mxu0 %v14555_v1  ;;  %v14557_v3 = vld [vmem:[#allocation6 + $0x50] sm:$0xff]  }
  0x92   : > { %628 = vst [vmem:[#allocation2 + $0x8] sm:$0x1] %v15127_v0  ;;  %629 = vst [vmem:[#allocation2 + $0xc] sm:$0xf] %v15127_v0  ;;  %s383_s4 = scalar_select %p382_p4, 1, 0  ;;  %13052 = vmatpush3.bf16.msra.mxu0 %v14555_v1 }
  0x93   : > { %630 = vst [vmem:[#allocation2 + $0x10] sm:$0xf] %v15127_v0  ;;  %631 = vst [vmem:[#allocation2 + $0x14] sm:$0x1] %v15127_v0  ;;  %s396_s6 = scalar_select %p395_p3, 1, 0  ;;  %13053 = vmatprep.subr.bf16.mxu0 %v14556_v2 }
  0x94   : > { %632 = vst [vmem:[#allocation2 + $0x18] sm:$0xf] %v15127_v0  ;;  %633 = vst [vmem:[#allocation2 + $0x1c] sm:$0xf] %v15127_v0  ;;  %s384_s14 = scvt.s32.f32 %s383_s4  ;;  %vm1185_vm0 = vsmask.f32 3328 }
  0x95   : > { %634 = vst [vmem:[#allocation2 + $0x20] sm:$0x1] %v15127_v0  ;;  %635 = vst [vmem:[#allocation2 + $0x24] sm:$0xf] %v15127_v0  ;;  %s15412_s19 = scvt.s32.f32 %s396_s6  ;;  %vm1186_vm1 = vsmask.f32 7440 }
  0x96   : > { %636 = vst [vmem:[#allocation2 + $0x28] sm:$0xf] %v15127_v0  ;;  %637 = vst [vmem:[#allocation2 + $0x2c] sm:$0x1] %v15127_v0  ;;  %s387_s16 = sshrl.u32 %s384_s14, 16  ;;  %p386_p7 = scmp.ne.f32.partialorder %s384_s14, %s384_s14  ;;  %v14558_v4 = vld [vmem:[#allocation6 + $0x58] sm:$0xff]   ;;  %13054 = vmatpush3.bf16.msra.mxu0 %v14556_v2 }
  0x97   : > { %638 = vst [vmem:[#allocation2 + $0x30] sm:$0xf] %v15127_v0  ;;  %639 = vst [vmem:[#allocation2 + $0x34] sm:$0xf] %v15127_v0  ;;  %s388_s7 = sand.u32 1, %s387_s16  ;;  %s12456_s27 = sshll.u32 %s15104_s30, 7  ;;  %13055 = vmatprep.subr.bf16.mxu0 %v14557_v3 }
  0x98   : > { %640 = vst [vmem:[#allocation2 + $0x38] sm:$0x1] %v15127_v0  ;;  %641 = vst [vmem:[#allocation2 + $0x3c] sm:$0xf] %v15127_v0  ;;  %s389_s1 = sadd.s32 32767, %s388_s7  ;;  %s400_s23 = sshrl.u32 %s15412_s19, 16 }
  0x99   : > { %642 = vst [vmem:[#allocation2 + $0x40] sm:$0xf] %v15127_v0  ;;  %643 = vst [vmem:[#allocation2 + $0x44] sm:$0x1] %v15127_v0  ;;  %s390_s20 = sadd.s32 %s389_s1, %s384_s14  ;;  %s11847_s21 = sadd.s32 4294967295, %s15104_s30  ;;  %v557_v14 = vand.u32 127, %v556_v5 }
  0x9a   : > { %644 = vst [vmem:[#allocation2 + $0x48] sm:$0xf] %v15127_v0  ;;  %645 = vst [vmem:[#allocation2 + $0x4c] sm:$0xf] %v15127_v0  ;;  %s391_s13 = sand.u32 4294901760, %s390_s20  ;;  %s401_s8 = sand.u32 1, %s400_s23  ;;  %13056 = vmatpush3.bf16.msra.mxu0 %v14557_v3 }
  0x9b   : > { %646 = vst [vmem:[#allocation2 + $0x50] sm:$0x1] %v15127_v0  ;;  %647 = vst [vmem:[#allocation2 + $0x54] sm:$0xf] %v15127_v0  ;;  %s19084_s13 = smov (%p386_p7, %s391_s13), 2143289344  ;;  %s15421_s15 = scalar_lea.vmem %s15400_s24, %s12456_s27 [#allocation3]  ;;  %13057 = vmatprep.subr.bf16.mxu0 %v14558_v4  ;;  %v14559_v19 = vld [vmem:[#allocation6 + $0x60] sm:$0xff]  }
  0x9c   : > { %648 = vst [vmem:[#allocation2 + $0x58] sm:$0xf] %v15127_v0  ;;  %649 = vst [vmem:[#allocation2 + $0x5c] sm:$0x1] %v15127_v0  ;;  %s394_s25 = sshrl.u32 %s19084_s13, 16  ;;  %p399_p9 = scmp.ne.f32.partialorder %s15412_s19, %s15412_s19  ;;  %vm559_vm3 = vcmp.lt.s32.totalorder %v557_v14, 64 }
  0x9d   : > { %650 = vst [vmem:[#allocation2 + $0x60] sm:$0xf] %v15127_v0  ;;  %651 = vst [vmem:[#allocation2 + $0x64] sm:$0xf] %v15127_v0  ;;  %v1121_v6 = vld [vmem:[#allocation2] sm:$0xf] }
  0x9e   : > { %652 = vst [vmem:[#allocation2 + $0x68] sm:$0x1] %v15127_v0  ;;  %653 = vst [vmem:[#allocation2 + $0x6c] sm:$0xf] %v15127_v0  ;;  %v1122_v7 = vld [vmem:[#allocation2 + $0x4] sm:$0xf]  ;;  %13058 = vmatpush3.bf16.msra.mxu0 %v14558_v4 }
  0x9f   : > { %654 = vst [vmem:[#allocation2 + $0x70] sm:$0xf] %v15127_v0  ;;  %655 = vst [vmem:[#allocation2 + $0x74] sm:$0x1] %v15127_v0  ;;  %v1169_v8 = vld [vmem:[#allocation2 + $0x8] sm:$0x1]  ;;  %13059 = vmatprep.subr.bf16.mxu0 %v14559_v19 }
  0xa0   : > { %656 = vst [vmem:[#allocation2 + $0x78] sm:$0xf] %v15127_v0  ;;  %657 = vst [vmem:[#allocation2 + $0x7c] sm:$0xf] %v15127_v0  ;;  %v1189_v9 = vshrl.u32 %v1121_v6, 16  ;;  %v1192_v10 = vshll.u32 %v1121_v6, 16 }
  0xa1   : > { %658 = vst [vmem:[#allocation2 + $0x80] sm:$0x1] %v15127_v0  ;;  %659 = vst [vmem:[#allocation2 + $0x84] sm:$0xf] %v15127_v0  ;;  %v1198_v11 = vshll.u32 %v1122_v7, 16  ;;  %v1202_v12 = vshrl.u32 %v1122_v7, 16 }
  0xa2   : > { %660 = vst [vmem:[#allocation2 + $0x88] sm:$0xf] %v15127_v0  ;;  %661 = vst [vmem:[#allocation2 + $0x8c] sm:$0x1] %v15127_v0  ;;  %v1208_v13 = vshll.u32 %v1169_v8, 16  ;;  %s402_s12 = sadd.s32 32767, %s401_s8  ;;  %13060 = vmatpush3.bf16.msra.mxu0 %v14559_v19 }
  0xa3   : > { %662 = vst [vmem:[#allocation2 + $0x90] sm:$0xf] %v15127_v0  ;;  %663 = vst [vmem:[#allocation2 + $0x94] sm:$0xf] %v15127_v0  ;;  %p15427_p13 = scmp.gt.s32.totalorder %s11847_s21, 0  ;;  %v1191_v15 = vrot.slane %v1189_v9, 4  ;;  %s403_s9 = sadd.s32 %s402_s12, %s15412_s19 }
  0xa4   : > { %664 = vst [vmem:[#allocation2 + $0x98] sm:$0x1] %v15127_v0  ;;  %665 = vst [vmem:[#allocation2 + $0x9c] sm:$0xf] %v15127_v0  ;;  %v1194_v16 = vrot.slane %v1192_v10, 5  ;;  %v1200_v17 = vrot.slane %v1198_v11, 5 }
  0xa5   : > { %666 = vst [vmem:[#allocation2 + $0xa0] sm:$0xf] %v15127_v0  ;;  %667 = vst [vmem:[#allocation2 + $0xa4] sm:$0x1] %v15127_v0  ;;  %v1204_v18 = vrot.slane %v1202_v12, 4  ;;  %s482_s4 = sadd.s32 1, %s15104_s30 }
  0xa6   : > { %668 = vst [vmem:[#allocation2 + $0xa8] sm:$0xf] %v15127_v0  ;;  %669 = vst [vmem:[#allocation2 + $0xac] sm:$0xf] %v15127_v0  ;;  %s404_s6 = sand.u32 4294901760, %s403_s9  ;;  %s446_s14 = sshll.u32 %s394_s25, 16  ;;  %v1195_v20 = vor.u32 %v1194_v16, %v1191_v15 }
  0xa7   : > { %670 = vst [vmem:[#allocation2 + $0xb0] sm:$0x1] %v15127_v0  ;;  %671 = vst [vmem:[#allocation2 + $0xb4] sm:$0xf] %v15127_v0  ;;  %v1205_v21 = vor.u32 %v1204_v18, %v1200_v17  ;;  %v1210_v22 = vrot.slane %v1208_v13, 5  ;;  %s19086_s6 = smov (%p399_p9, %s404_s6), 2143289344  ;;  %s447_s19 = sor.u32 %s446_s14, %s394_s25 }
  0xa8   : > { %672 = vst [vmem:[#allocation2 + $0xb8] sm:$0xf] %v15127_v0  ;;  %673 = vst [vmem:[#allocation2 + $0xbc] sm:$0x1] %v15127_v0  ;;  %s19088_s21 = smov (!%p15427_p13, %s11847_s21), 0  ;;  %v1196_v24 = vrot.slane %v1195_v20, 4  ;;  %v15474_v34 = vstv %s447_s19 }
  0xa9   : > { %674 = vst [vmem:[#allocation2 + $0xc0] sm:$0xf] %v15127_v0  ;;  %675 = vst [vmem:[#allocation2 + $0xc4] sm:$0xf] %v15127_v0  ;;  %v1206_v25 = vrot.slane %v1205_v21, 4  ;;  %s407_s16 = sshrl.u32 %s19086_s6, 16 }
  0xaa   : > { %676 = vst [vmem:[#allocation2 + $0xc8] sm:$0x1] %v15127_v0  ;;  %677 = vst [vmem:[#allocation2 + $0xcc] sm:$0xf] %v15127_v0  ;;  %vm558_vm4 = vcmp.lt.s32.totalorder %v557_v14, 32  ;;  %v14560_v26 = vld [vmem:[#allocation6 + $0x68] sm:$0xff]  }
  0xab   : > { %678 = vst [vmem:[#allocation2 + $0xd0] sm:$0xf] %v15127_v0  ;;  %679 = vst [vmem:[#allocation2 + $0xd4] sm:$0x1] %v15127_v0  ;;  %s12457_s7 = sshll.u32 %s19088_s21, 7  ;;  %p483_p11 = scmp.lt.s32.totalorder %s482_s4, 3  ;;  %13061 = vmatprep.subr.bf16.mxu0 %v14560_v26 }
  0xac   : > { %vm15442_vm2 = vmor %vm1185_vm0, %vm1186_vm1  ;;  %s15460_s1 = scalar_lea.vmem %s15400_s24, %s12457_s7 [#allocation3]  ;;  %s520_s27 = sshll.u32 %s407_s16, 16  ;;  %vm680_vm6 = vsmask.f32 256  ;;  %vm681_vm7 = vsmask.f32 4368  ;;  %vm1004_vm9 = vcmask 1043456   ;;  %13062 = vmatpush3.bf16.msra.mxu0 %v14560_v26 }
  0xad   : > { %v1201_v27 = vsel %vm15442_vm2, %v1196_v24, %v1200_v17  ;;  %v1211_v28 = vsel %vm15442_vm2, %v1206_v25, %v1210_v22  ;;  %vm15462_vm5 = vmpackc.low %vm559_vm3, %vm559_vm3  ;;  %v414_v31 = vld [vmem:[%s15460_s1] sm:$0xf]  ;;  %s19090_s4 = smov (!%p483_p11, %s482_s4), 3  ;;  %vm1005_vm10 = vsmask.f32 7938  ;;  %s521_s20 = sor.u32 %s520_s27, %s407_s16  ;;  %vm1011_vm11 = vcmask 1040384  }
  0xae   : > { %v11852_v30 = vcombine.low %v1201_v27, %v1211_v28  ;;  %vm15469_vm8 = vmpackc.low %vm558_vm4, %vm558_vm4  ;;  %v415_v33 = vld [vmem:[%s15460_s1 + $0x4] sm:$0xf]  ;;  %v416_v35 = vld [vmem:[%s15460_s1 + $0x8] sm:$0xf]  ;;  %s12458_s13 = sshll.u32 %s19090_s4, 7  ;;  %v15480_v40 = vstv %s521_s20  ;;  %v450_v45 = vmul.bf16 %v15474_v34, %v414_v31  ;;  %v18865_v17 = vmov 0 }
  0xaf   : > { %v417_v36 = vld [vmem:[%s15460_s1 + $0xc] sm:$0xf]  ;;  %v350_v38 = vld [vmem:[%s15421_s15] sm:$0xf]  ;;  %v351_v39 = vld [vmem:[%s15421_s15 + $0x4] sm:$0xf]  ;;  %s15484_s23 = scalar_lea.vmem %s15400_s24, %s12458_s13 [#allocation3]  ;;  %v451_v46 = vmul.bf16 %v15474_v34, %v415_v33  ;;  %v452_v49 = vmul.bf16 %v15474_v34, %v416_v35 }
  0xb0   : > { %v14561_v37 = vld [vmem:[#allocation6 + $0x70] sm:$0xff]   ;;  %13067 = vmatprep.mubr.bf16.mxu0 %v11852_v30  ;;  %v418_v41 = vld [vmem:[%s15460_s1 + $0x10] sm:$0xf]  ;;  %v15489_v44 = vld [vmem:[%s15460_s1 + $0x14] sm:$0xf]  ;;  %v453_v50 = vmul.bf16 %v15474_v34, %v417_v36  ;;  %v18868_v25 = vmov 0 }
  0xb1   : > { %v352_v42 = vld [vmem:[%s15421_s15 + $0x8] sm:$0xf]  ;;  %v353_v43 = vld [vmem:[%s15421_s15 + $0xc] sm:$0xf]  ;;  %v488_v47 = vld [vmem:[%s15484_s23] sm:$0xf]  ;;  %v454_v56 = vmul.bf16 %v15474_v34, %v418_v41  ;;  %13063 = vmatprep.subr.bf16.mxu0 %v14561_v37  ;;  %v455_v61 = vmul.bf16 %v15474_v34, %v15489_v44 }
  0xb2   : > { %v489_v48 = vld [vmem:[%s15484_s23 + $0x4] sm:$0xf]  ;;  %v490_v51 = vld [vmem:[%s15484_s23 + $0x8] sm:$0xf]  ;;  %v524_v52 = vmul.bf16 %v15480_v40, %v488_v47  ;;  %v491_v54 = vld [vmem:[%s15484_s23 + $0xc] sm:$0xf]  ;;  %13064 = vmatpush3.bf16.msra.mxu0 %v14561_v37 }
  0xb3   : > { %v525_v53 = vmul.bf16 %v15480_v40, %v489_v48  ;;  %v526_v55 = vmul.bf16 %v15480_v40, %v490_v51  ;;  %v492_v57 = vld [vmem:[%s15484_s23 + $0x10] sm:$0xf]  ;;  %v493_v58 = vld [vmem:[%s15484_s23 + $0x14] sm:$0xf]  ;;  %v527_v60 = vmul.bf16 %v15480_v40, %v491_v54  ;;  %v15511_v0 = vld [vmem:[%s15460_s1 + $0x18] sm:$0xf] }
  0xb4   : > { %v14562_v59 = vld [vmem:[#allocation6 + $0x78] sm:$0xff]   ;;  %v528_v62 = vmul.bf16 %v15480_v40, %v492_v57  ;;  %v529_v63 = vmul.bf16 %v15480_v40, %v493_v58  ;;  %v561_v1 = vsel %vm15462_vm5, %v524_v52, %v350_v38  ;;  %v456_v5 = vmul.bf16 %v15474_v34, %v15511_v0  ;;  %v15532_v15 = vld [vmem:[%s15460_s1 + $0x1c] sm:$0xf]  ;;  %vm15538_vm12 = vmor %vm680_vm6, %vm681_vm7  ;;  %s19056_s16 = sld [smem:[#allocation77_spill]]  ;;  %s19058_s27 = sld [smem:[#allocation14_spill]] }
  0xb5   : > { %v562_v2 = vsel %vm15462_vm5, %v525_v53, %v351_v39  ;;  %v563_v3 = vsel %vm15462_vm5, %v526_v55, %v352_v42  ;;  %v354_v4 = vld [vmem:[%s15421_s15 + $0x10] sm:$0xf]  ;;  %v594_v6 = vsel %vm15469_vm8, %v450_v45, %v561_v1  ;;  %v564_v8 = vsel %vm15462_vm5, %v527_v60, %v353_v43  ;;  %v355_v10 = vld [vmem:[%s15421_s15 + $0x14] sm:$0xf]  ;;  %13065 = vmatprep.subr.bf16.mxu0 %v14562_v59  ;;  %v15534_v16 = vld [vmem:[#allocation6] sm:$0xff]   ;;  %s19059_s24 = sld [smem:[#allocation15_spill]] }
  0xb6   : > { %v595_v7 = vsel %vm15469_vm8, %v451_v46, %v562_v2  ;;  %v596_v9 = vsel %vm15469_vm8, %v452_v49, %v563_v3  ;;  %v684_v11 = vshrl.u32 %v594_v6, 16  ;;  %v687_v12 = vshll.u32 %v594_v6, 16  ;;  %vm15548_vm13 = vmand %vm1004_vm9, %vm1005_vm10  ;;  %v1007_v28 = vld [vmem:[#allocation2 + $0xc] sm:$0xf]  ;;  %v1013_v31 = vld [vmem:[#allocation2 + $0x14] sm:$0x1]  ;;  %13066 = vmatpush3.bf16.msra.mxu0 %v14562_v59 }
  0xb7   : > { %v692_v13 = vshrl.u32 %v595_v7, 16  ;;  %v695_v14 = vshll.u32 %v595_v7, 16  ;;  %v18866_v17 = vsel %vm15538_vm12, 4294967295, %v18865_v17  ;;  %v597_v18 = vsel %vm15469_vm8, %v453_v50, %v564_v8  ;;  %vm15554_vm14 = vmand %vm1011_vm11, %vm680_vm6  ;;  %v1016_v43 = vld [vmem:[#allocation2 + $0x18] sm:$0xf]  ;;  %13099 = vmatprep.subr.bf16.mxu0 %v15534_v16  ;;  %s19060_s8 = sld [smem:[#allocation17_spill]] }
  0xb8   : > { %18867 = vst [vmem:[#allocation20_spill] sm:$0xff] %v18866_v17  ;;  %v701_v19 = vshrl.u32 %v596_v9, 16  ;;  %v704_v20 = vshll.u32 %v596_v9, 16  ;;  %v565_v21 = vsel %vm15462_vm5, %v528_v62, %v354_v4  ;;  %v686_v22 = vrot.slane %v684_v11, 7  ;;  %v1020_v47 = vld [vmem:[#allocation2 + $0x20] sm:$0x1] }
  0xb9   : > { %v694_v24 = vrot.slane %v692_v13, 7  ;;  %v18869_v25 = vsel %vm15548_vm13, 4294967295, %v18868_v25  ;;  %v709_v26 = vshrl.u32 %v597_v18, 16  ;;  %v712_v27 = vshll.u32 %v597_v18, 16  ;;  %v494_v49 = vld [vmem:[%s15484_s23 + $0x18] sm:$0xf] }
  0xba   : > { %18870 = vst [vmem:[#allocation21_spill] sm:$0xff] %v18869_v25  ;;  %v18871_v30 = vmov 0  ;;  %v703_v33 = vrot.slane %v701_v19, 7  ;;  %v566_v35 = vsel %vm15462_vm5, %v529_v63, %v355_v10  ;;  %v598_v36 = vsel %vm15469_vm8, %v454_v56, %v565_v21  ;;  %v356_v54 = vld [vmem:[%s15421_s15 + $0x18] sm:$0xf]  ;;  %s340_s20 = sand.u32 1, %s19058_s27  }
  0xbb   : > { %v18872_v30 = vsel %vm15554_vm14, 4294967295, %v18871_v30  ;;  %v457_v37 = vmul.bf16 %v15474_v34, %v15532_v15  ;;  %v689_v38 = vor.u32 %v687_v12, %v686_v22  ;;  %v690_v39 = vrot.slane %v686_v22, 4  ;;  %v495_v55 = vld [vmem:[%s15484_s23 + $0x1c] sm:$0xf]  ;;  %v496_v3 = vld [vmem:[%s15484_s23 + $0x20] sm:$0xf] }
  0xbc   : > { %18873 = vst [vmem:[#allocation22_spill] sm:$0xff] %v18872_v30  ;;  %v697_v41 = vor.u32 %v695_v14, %v694_v24  ;;  %v699_v42 = vrot.slane %v694_v24, 4  ;;  %v706_v44 = vor.u32 %v704_v20, %v703_v33  ;;  %v707_v45 = vrot.slane %v703_v33, 4  ;;  %v357_v60 = vld [vmem:[%s15421_s15 + $0x1c] sm:$0xf]  ;;  %s11844_s13 = sshll.u32 %s340_s20, 7 }
  0xbd   : > { %v711_v46 = vrot.slane %v709_v26, 7  ;;  %v599_v48 = vsel %vm15469_vm8, %v455_v61, %v566_v35  ;;  %v1008_v51 = vsel %vm15548_vm13, %v689_v38, %v1007_v28  ;;  %v718_v53 = vshrl.u32 %v598_v36, 16  ;;  %v15580_v61 = vld [vmem:[%s15460_s1 + $0x20] sm:$0xf]  ;;  %v1023_v7 = vld [vmem:[#allocation2 + $0x24] sm:$0xf] }
  0xbe   : > { %v698_v50 = vsel %vm15538_vm12, %v690_v39, %v697_v41  ;;  %v1014_v52 = vsel %vm15554_vm14, %v699_v42, %v1013_v31  ;;  %1009 = vst [vmem:[#allocation2 + $0xc] sm:$0xf] %v1008_v51  ;;  %v1017_v58 = vsel %vm15548_vm13, %v706_v44, %v1016_v43  ;;  %v721_v59 = vshll.u32 %v598_v36, 16  ;;  %v1027_v13 = vld [vmem:[#allocation2 + $0x2c] sm:$0x1]  ;;  %s12449_s21 = sshll.u32 %s19059_s24, 2 }
  0xbf   : > { %1010 = vst [vmem:[#allocation2 + $0x10] sm:$0xf] %v698_v50  ;;  %1015 = vst [vmem:[#allocation2 + $0x14] sm:$0x1] %v1014_v52  ;;  %v714_v56 = vor.u32 %v712_v27, %v711_v46  ;;  %v716_v57 = vrot.slane %v711_v46, 4  ;;  %v720_v62 = vrot.slane %v718_v53, 7  ;;  %v530_v2 = vmul.bf16 %v15480_v40, %v494_v49  ;;  %s11710_s25 = sadd.s32 %s15104_s30, %s12449_s21 }
  0xc0   : > { %1018 = vst [vmem:[#allocation2 + $0x18] sm:$0xf] %v1017_v58  ;;  %v726_v63 = vshrl.u32 %v599_v48, 16  ;;  %v729_v1 = vshll.u32 %v599_v48, 16  ;;  %v531_v8 = vmul.bf16 %v15480_v40, %v495_v55  ;;  %v15599_v18 = vld [vmem:[%s15460_s1 + $0x24] sm:$0xf]  ;;  %v458_v19 = vmul.bf16 %v15474_v34, %v15580_v61 }
  0xc1   : > { %v715_v4 = vsel %vm15538_vm12, %v707_v45, %v714_v56  ;;  %v1021_v6 = vsel %vm15554_vm14, %v716_v57, %v1020_v47  ;;  %v723_v9 = vor.u32 %v721_v59, %v720_v62  ;;  %v724_v10 = vrot.slane %v720_v62, 4  ;;  %v15604_v20 = vld [vmem:[%s15484_s23 + $0x24] sm:$0xf]  ;;  %v358_v33 = vld [vmem:[%s15421_s15 + $0x20] sm:$0xf]  ;;  %s19061_s4 = sld [smem:[#allocation79_spill]] }
  0xc2   : > { %1019 = vst [vmem:[#allocation2 + $0x1c] sm:$0xf] %v715_v4  ;;  %1022 = vst [vmem:[#allocation2 + $0x20] sm:$0x1] %v1021_v6  ;;  %v728_v11 = vrot.slane %v726_v63, 7  ;;  %v567_v12 = vsel %vm15462_vm5, %v530_v2, %v356_v54  ;;  %v568_v14 = vsel %vm15462_vm5, %v531_v8, %v357_v60  ;;  %v532_v21 = vmul.bf16 %v15480_v40, %v496_v3  ;;  %s18668_s6 = scalar_lea.sflag [#allocation5], %s340_s20 }
  0xc3   : > { %v600_v15 = vsel %vm15469_vm8, %v456_v5, %v567_v12  ;;  %v1024_v26 = vsel %vm15548_vm13, %v723_v9, %v1023_v7  ;;  %v601_v0 = vsel %vm15469_vm8, %v457_v37, %v568_v14  ;;  %v459_v42 = vmul.bf16 %v15474_v34, %v15599_v18  ;;  %p19062_p5 = scmp.ne.s32.totalorder %s19060_s8, 0 }
  0xc4   : > { %v731_v22 = vor.u32 %v729_v1, %v728_v11  ;;  %v733_v24 = vrot.slane %v728_v11, 4  ;;  %1025 = vst [vmem:[#allocation2 + $0x24] sm:$0xf] %v1024_v26  ;;  %v735_v27 = vshrl.u32 %v600_v15, 16  ;;  %v738_v5 = vshll.u32 %v600_v15, 16 }
  0xc5   : > { %v743_v28 = vshrl.u32 %v601_v0, 16  ;;  %v746_v31 = vshll.u32 %v601_v0, 16  ;;  %v1123_v35 = vld [vmem:[#allocation2 + $0xc] sm:$0xf]  ;;  %v533_v37 = vmul.bf16 %v15480_v40, %v15604_v20  ;;  %v15622_v51 = vsel %vm15462_vm5, %v532_v21, %v358_v33 }
  0xc6   : > { %v1124_v36 = vld [vmem:[#allocation2 + $0x10] sm:$0xf]  ;;  %v1170_v38 = vld [vmem:[#allocation2 + $0x14] sm:$0x1]  ;;  %v732_v39 = vsel %vm15538_vm12, %v724_v10, %v731_v22  ;;  %v1028_v41 = vsel %vm15554_vm14, %v733_v24, %v1027_v13  ;;  %v1213_v43 = vshrl.u32 %v1123_v35, 16  ;;  %v1216_v44 = vshll.u32 %v1123_v35, 16 }
  0xc7   : > { %v1222_v45 = vshll.u32 %v1124_v36, 16  ;;  %v1226_v46 = vshrl.u32 %v1124_v36, 16  ;;  %v1125_v47 = vld [vmem:[#allocation2 + $0x18] sm:$0xf]  ;;  %1026 = vst [vmem:[#allocation2 + $0x28] sm:$0xf] %v732_v39 }
  0xc8   : > { %1029 = vst [vmem:[#allocation2 + $0x2c] sm:$0x1] %v1028_v41  ;;  %v1232_v48 = vshll.u32 %v1170_v38, 16  ;;  %v1237_v49 = vshrl.u32 %v1125_v47, 16  ;;  %v1240_v50 = vshll.u32 %v1125_v47, 16  ;;  %v1215_v52 = vrot.slane %v1213_v43, 4 }
  0xc9   : > { %v1218_v53 = vrot.slane %v1216_v44, 5  ;;  %v1224_v54 = vrot.slane %v1222_v45, 5  ;;  %v1228_v55 = vrot.slane %v1226_v46, 4  ;;  %v1126_v56 = vld [vmem:[#allocation2 + $0x1c] sm:$0xf]  ;;  %v737_v8 = vrot.slane %v735_v27, 7 }
  0xca   : > { %v1234_v57 = vrot.slane %v1232_v48, 5  ;;  %v1171_v58 = vld [vmem:[#allocation2 + $0x20] sm:$0x1]  ;;  %v1239_v59 = vrot.slane %v1237_v49, 4  ;;  %v1242_v60 = vrot.slane %v1240_v50, 5  ;;  %v1246_v62 = vshll.u32 %v1126_v56, 16 }
  0xcb   : > { %v1219_v63 = vor.u32 %v1218_v53, %v1215_v52  ;;  %v1229_v1 = vor.u32 %v1228_v55, %v1224_v54  ;;  %v1250_v2 = vshrl.u32 %v1126_v56, 16  ;;  %v1256_v3 = vshll.u32 %v1171_v58, 16  ;;  %v1127_v7 = vld [vmem:[#allocation2 + $0x24] sm:$0xf]  ;;  %v1030_v36 = vld [vmem:[#allocation2 + $0x30] sm:$0xf] }
  0xcc   : > { %v1243_v4 = vor.u32 %v1242_v60, %v1239_v59  ;;  %v1248_v6 = vrot.slane %v1246_v62, 5  ;;  %v745_v9 = vrot.slane %v743_v28, 7  ;;  %v1261_v22 = vshrl.u32 %v1127_v7, 16  ;;  %v14564_v27 = vld [vmem:[#allocation6 + $0x8] sm:$0xff]   ;;  %v1034_v44 = vld [vmem:[#allocation2 + $0x38] sm:$0x1] }
  0xcd   : > { %v1220_v10 = vrot.slane %v1219_v63, 4  ;;  %v1230_v11 = vrot.slane %v1229_v1, 4  ;;  %v1252_v12 = vrot.slane %v1250_v2, 4  ;;  %v1258_v13 = vrot.slane %v1256_v3, 5  ;;  %v359_v45 = vld [vmem:[%s15421_s15 + $0x24] sm:$0xf] }
  0xce   : > { %v1244_v14 = vrot.slane %v1243_v4, 4  ;;  %v1128_v15 = vld [vmem:[#allocation2 + $0x28] sm:$0xf]  ;;  %v740_v24 = vor.u32 %v738_v5, %v737_v8  ;;  %v748_v26 = vor.u32 %v746_v31, %v745_v9  ;;  %v1264_v28 = vshll.u32 %v1127_v7, 16  ;;  %v15647_v63 = vld [vmem:[%s15460_s1 + $0x2c] sm:$0xf] }
  0xcf   : > { %v1172_v21 = vld [vmem:[#allocation2 + $0x2c] sm:$0x1]  ;;  %v1225_v0 = vsel %vm15442_vm2, %v1220_v10, %v1224_v54  ;;  %v1235_v33 = vsel %vm15442_vm2, %v1230_v11, %v1234_v57  ;;  %v1253_v35 = vor.u32 %v1252_v12, %v1248_v6  ;;  %v1263_v41 = vrot.slane %v1261_v22, 4  ;;  %v424_v58 = vld [vmem:[%s15460_s1 + $0x28] sm:$0xf] }
  0xd0   : > { %v11853_v38 = vcombine.low %v1225_v0, %v1235_v33  ;;  %v1249_v39 = vsel %vm15442_vm2, %v1244_v14, %v1248_v6  ;;  %v1270_v43 = vshll.u32 %v1128_v15, 16  ;;  %v1266_v31 = vrot.slane %v1264_v28, 5  ;;  %v14565_v57 = vld [vmem:[#allocation6 + $0x10] sm:$0xff]   ;;  %v15666_v7 = vld [vmem:[%s15460_s1 + $0x34] sm:$0xf] }
  0xd1   : > { %v1254_v5 = vrot.slane %v1253_v35, 4  ;;  %v1274_v46 = vshrl.u32 %v1128_v15, 16  ;;  %v1280_v47 = vshll.u32 %v1172_v21, 16  ;;  %v741_v49 = vrot.slane %v737_v8, 4  ;;  %v498_v1 = vld [vmem:[%s15484_s23 + $0x28] sm:$0xf] }
  0xd2   : > { %13068 = vmatmul.mubr.bf16.vlgmr.msra.gmra.mrb[0].mxu0 %v11853_v38  ;;  %v1272_v48 = vrot.slane %v1270_v43, 5  ;;  %v750_v50 = vrot.slane %v745_v9, 4  ;;  %v1031_v52 = vsel %vm15548_vm13, %v740_v24, %v1030_v36  ;;  %v1267_v54 = vor.u32 %v1266_v31, %v1263_v41  ;;  %v499_v2 = vld [vmem:[%s15484_s23 + $0x2c] sm:$0xf]  ;;  %v15669_v11 = vld [vmem:[%s15484_s23 + $0x30] sm:$0xf] }
  0xd3   : > { %13100 = vmatpush3.bf16.msra.mxu0 %v15534_v16  ;;  %v1259_v53 = vsel %vm15442_vm2, %v1254_v5, %v1258_v13  ;;  %v1276_v55 = vrot.slane %v1274_v46, 4  ;;  %v1282_v56 = vrot.slane %v1280_v47, 5  ;;  %1032 = vst [vmem:[#allocation2 + $0x30] sm:$0xf] %v1031_v52  ;;  %v749_v60 = vsel %vm15538_vm12, %v741_v49, %v748_v26  ;;  %v360_v14 = vld [vmem:[%s15421_s15 + $0x28] sm:$0xf] }
  0xd4   : > { %v11854_v59 = vcombine.low %v1249_v39, %v1259_v53  ;;  %13101 = vmatprep.subr.bf16.mxu0 %v14564_v27  ;;  %v1035_v62 = vsel %vm15554_vm14, %v750_v50, %v1034_v44  ;;  %v570_v16 = vsel %vm15462_vm5, %v533_v37, %v359_v45  ;;  %v1268_v3 = vrot.slane %v1267_v54, 4  ;;  %1033 = vst [vmem:[#allocation2 + $0x34] sm:$0xf] %v749_v60  ;;  %v15663_v37 = vld [vmem:[%s15460_s1 + $0x30] sm:$0xf]  ;;  %v14567_v46 = vld [vmem:[#allocation6 + $0x20] sm:$0xff]  }
  0xd5   : > { %v1277_v4 = vor.u32 %v1276_v55, %v1272_v48  ;;  %1036 = vst [vmem:[#allocation2 + $0x38] sm:$0x1] %v1035_v62  ;;  %v602_v6 = vsel %vm15469_vm8, %v458_v19, %v15622_v51  ;;  %v603_v20 = vsel %vm15469_vm8, %v459_v42, %v570_v16  ;;  %v460_v42 = vmul.bf16 %v15474_v34, %v424_v58  ;;  %v1037_v24 = vld [vmem:[#allocation2 + $0x3c] sm:$0xf]  ;;  %v361_v26 = vld [vmem:[%s15421_s15 + $0x2c] sm:$0xf] }
  0xd6   : > { %13071 = vmatprep.mubr.bf16.mxu0 %v11854_v59  ;;  %v752_v8 = vshrl.u32 %v602_v6, 16  ;;  %v755_v9 = vshll.u32 %v602_v6, 16  ;;  %v760_v10 = vshrl.u32 %v603_v20, 16  ;;  %v763_v61 = vshll.u32 %v603_v20, 16  ;;  %v14566_v0 = vld [vmem:[#allocation6 + $0x18] sm:$0xff]   ;;  %v14568_v6 = vld [vmem:[#allocation6 + $0x28] sm:$0xff]  }
  0xd7   : > { %v1273_v19 = vsel %vm15442_vm2, %v1268_v3, %v1272_v48  ;;  %v1278_v18 = vrot.slane %v1277_v4, 4  ;;  %13102 = vmatpush3.bf16.msra.mxu0 %v14564_v27  ;;  %v461_v51 = vmul.bf16 %v15474_v34, %v15647_v63  ;;  %v534_v15 = vmul.bf16 %v15480_v40, %v498_v1  ;;  %v1041_v43 = vld [vmem:[#allocation2 + $0x44] sm:$0x1]  ;;  %v362_v16 = vld [vmem:[%s15421_s15 + $0x30] sm:$0xf] }
  0xd8   : > { %13103 = vmatprep.subr.bf16.mxu0 %v14565_v57  ;;  %v754_v12 = vrot.slane %v752_v8, 7  ;;  %v762_v13 = vrot.slane %v760_v10, 7  ;;  %v535_v21 = vmul.bf16 %v15480_v40, %v499_v2  ;;  %v462_v33 = vmul.bf16 %v15474_v34, %v15663_v37  ;;  %v501_v63 = vld [vmem:[%s15484_s23 + $0x34] sm:$0xf] }
  0xd9   : > { %v1283_v22 = vsel %vm15442_vm2, %v1278_v18, %v1282_v56  ;;  %v463_v35 = vmul.bf16 %v15474_v34, %v15666_v7  ;;  %v536_v27 = vmul.bf16 %v15480_v40, %v15669_v11  ;;  %v571_v31 = vsel %vm15462_vm5, %v534_v15, %v360_v14  ;;  %v363_v10 = vld [vmem:[%s15421_s15 + $0x34] sm:$0xf] }
  0xda   : > { %v11855_v28 = vcombine.low %v1273_v19, %v1283_v22  ;;  %v1129_v36 = vld [vmem:[#allocation2 + $0x30] sm:$0xf]  ;;  %v757_v38 = vor.u32 %v755_v9, %v754_v12  ;;  %v758_v39 = vrot.slane %v754_v12, 4  ;;  %v765_v41 = vor.u32 %v763_v61, %v762_v13  ;;  %v1044_v19 = vld [vmem:[#allocation2 + $0x48] sm:$0xf] }
  0xdb   : > { %v1285_v44 = vshrl.u32 %v1129_v36, 16  ;;  %v1288_v45 = vshll.u32 %v1129_v36, 16  ;;  %v767_v5 = vrot.slane %v762_v13, 4  ;;  %13104 = vmatpush3.bf16.msra.mxu0 %v14565_v57  ;;  %v1130_v47 = vld [vmem:[#allocation2 + $0x34] sm:$0xf]  ;;  %v572_v52 = vsel %vm15462_vm5, %v535_v21, %v361_v26 }
  0xdc   : > { %13072 = vmatmul.mubr.bf16.gmra.mrb[4].mxu0 %v11855_v28  ;;  %v1173_v48 = vld [vmem:[#allocation2 + $0x38] sm:$0x1]  ;;  %v766_v49 = vsel %vm15538_vm12, %v758_v39, %v765_v41  ;;  %v1038_v50 = vsel %vm15548_vm13, %v757_v38, %v1037_v24  ;;  %v604_v53 = vsel %vm15469_vm8, %v460_v42, %v571_v31  ;;  %v1294_v56 = vshll.u32 %v1130_v47, 16  ;;  %13105 = vmatprep.subr.bf16.mxu0 %v14566_v0  ;;  %v1048_v22 = vld [vmem:[#allocation2 + $0x50] sm:$0x1]  ;;  %v14569_v39 = vld [vmem:[#allocation6 + $0x30] sm:$0xff]  }
  0xdd   : > { %v1287_v54 = vrot.slane %v1285_v44, 4  ;;  %v1290_v55 = vrot.slane %v1288_v45, 5  ;;  %v1298_v57 = vshrl.u32 %v1130_v47, 16  ;;  %1039 = vst [vmem:[#allocation2 + $0x3c] sm:$0xf] %v1038_v50  ;;  %v1304_v58 = vshll.u32 %v1173_v48, 16 }
  0xde   : > { %1040 = vst [vmem:[#allocation2 + $0x40] sm:$0xf] %v766_v49  ;;  %v1042_v59 = vsel %vm15554_vm14, %v767_v5, %v1041_v43  ;;  %v605_v60 = vsel %vm15469_vm8, %v461_v51, %v572_v52  ;;  %v769_v62 = vshrl.u32 %v604_v53, 16  ;;  %v1296_v2 = vrot.slane %v1294_v56, 5  ;;  %v15724_v5 = vld [vmem:[%s15460_s1 + $0x38] sm:$0xf] }
  0xdf   : > { %v1291_v1 = vor.u32 %v1290_v55, %v1287_v54  ;;  %v1300_v3 = vrot.slane %v1298_v57, 4  ;;  %1043 = vst [vmem:[#allocation2 + $0x44] sm:$0x1] %v1042_v59  ;;  %v772_v4 = vshll.u32 %v604_v53, 16  ;;  %13106 = vmatpush3.bf16.msra.mxu0 %v14566_v0  ;;  %v1306_v20 = vrot.slane %v1304_v58, 5  ;;  %v14570_v49 = vld [vmem:[#allocation6 + $0x38] sm:$0xff]  }
  0xe0   : > { %v771_v37 = vrot.slane %v769_v62, 7  ;;  %v777_v8 = vshrl.u32 %v605_v60, 16  ;;  %v780_v9 = vshll.u32 %v605_v60, 16  ;;  %13107 = vmatprep.subr.bf16.mxu0 %v14567_v46  ;;  %v537_v18 = vmul.bf16 %v15480_v40, %v501_v63  ;;  %v15731_v48 = vld [vmem:[%s15460_s1 + $0x3c] sm:$0xf] }
  0xe1   : > { %v1292_v61 = vrot.slane %v1291_v1, 4  ;;  %v1301_v11 = vor.u32 %v1300_v3, %v1296_v2  ;;  %v573_v42 = vsel %vm15462_vm5, %v536_v27, %v362_v16  ;;  %v502_v55 = vld [vmem:[%s15484_s23 + $0x38] sm:$0xf]  ;;  %v503_v60 = vld [vmem:[%s15484_s23 + $0x3c] sm:$0xf]  ;;  %vm2215_vm15 = vcmask 1042432  }
  0xe2   : > { %v774_v51 = vor.u32 %v772_v4, %v771_v37  ;;  %v775_v12 = vrot.slane %v771_v37, 4  ;;  %v779_v13 = vrot.slane %v777_v8, 7  ;;  %v606_v14 = vsel %vm15469_vm8, %v462_v33, %v573_v42  ;;  %v1051_v1 = vld [vmem:[#allocation2 + $0x54] sm:$0xf]  ;;  %v364_v37 = vld [vmem:[%s15421_s15 + $0x38] sm:$0xf] }
  0xe3   : > { %v1297_v15 = vsel %vm15442_vm2, %v1292_v61, %v1296_v2  ;;  %v1302_v21 = vrot.slane %v1301_v11, 4  ;;  %v574_v24 = vsel %vm15462_vm5, %v537_v18, %v363_v10  ;;  %v786_v26 = vshrl.u32 %v606_v14, 16  ;;  %13108 = vmatpush3.bf16.msra.mxu0 %v14567_v46  ;;  %v365_v10 = vld [vmem:[%s15421_s15 + $0x3c] sm:$0xf] }
  0xe4   : > { %v1131_v0 = vld [vmem:[#allocation2 + $0x3c] sm:$0xf]  ;;  %v782_v27 = vor.u32 %v780_v9, %v779_v13  ;;  %v784_v36 = vrot.slane %v779_v13, 4  ;;  %v1045_v38 = vsel %vm15548_vm13, %v774_v51, %v1044_v19  ;;  %v607_v33 = vsel %vm15469_vm8, %v463_v35, %v574_v24  ;;  %13109 = vmatprep.subr.bf16.mxu0 %v14568_v6 }
  0xe5   : > { %v1132_v28 = vld [vmem:[#allocation2 + $0x40] sm:$0xf]  ;;  %v1307_v41 = vsel %vm15442_vm2, %v1302_v21, %v1306_v20  ;;  %v1309_v43 = vshrl.u32 %v1131_v0, 16  ;;  %v1312_v44 = vshll.u32 %v1131_v0, 16  ;;  %1046 = vst [vmem:[#allocation2 + $0x48] sm:$0xf] %v1045_v38  ;;  %v464_v2 = vmul.bf16 %v15474_v34, %v15724_v5 }
  0xe6   : > { %v1318_v45 = vshll.u32 %v1132_v28, 16  ;;  %v11856_v31 = vcombine.low %v1297_v15, %v1307_v41  ;;  %v1174_v46 = vld [vmem:[#allocation2 + $0x44] sm:$0x1]  ;;  %v1322_v47 = vshrl.u32 %v1132_v28, 16  ;;  %v783_v7 = vsel %vm15538_vm12, %v775_v12, %v782_v27  ;;  %v1055_v9 = vld [vmem:[#allocation2 + $0x5c] sm:$0x1] }
  0xe7   : > { %v1049_v35 = vsel %vm15554_vm14, %v784_v36, %v1048_v22  ;;  %v1311_v50 = vrot.slane %v1309_v43, 4  ;;  %v1314_v52 = vrot.slane %v1312_v44, 5  ;;  %v1328_v54 = vshll.u32 %v1174_v46, 16  ;;  %1047 = vst [vmem:[#allocation2 + $0x4c] sm:$0xf] %v783_v7  ;;  %13110 = vmatpush3.bf16.msra.mxu0 %v14568_v6 }
  0xe8   : > { %v1320_v53 = vrot.slane %v1318_v45, 5  ;;  %1050 = vst [vmem:[#allocation2 + $0x50] sm:$0x1] %v1049_v35  ;;  %13075 = vmatprep.mubr.bf16.mxu0 %v11856_v31  ;;  %v1324_v56 = vrot.slane %v1322_v47, 4  ;;  %v788_v57 = vrot.slane %v786_v26, 7  ;;  %v789_v58 = vshll.u32 %v606_v14, 16  ;;  %13111 = vmatprep.subr.bf16.mxu0 %v14569_v39 }
  0xe9   : > { %v794_v59 = vshrl.u32 %v607_v33, 16  ;;  %v1315_v62 = vor.u32 %v1314_v52, %v1311_v50  ;;  %v1330_v16 = vrot.slane %v1328_v54, 5  ;;  %v797_v63 = vshll.u32 %v607_v33, 16  ;;  %v14572_v14 = vld [vmem:[#allocation6 + $0x80] sm:$0xff]   ;;  %v15758_v44 = vld [vmem:[%s15460_s1 + $0x40] sm:$0xf] }
  0xea   : > { %v1325_v3 = vor.u32 %v1324_v56, %v1320_v53  ;;  %v791_v4 = vor.u32 %v789_v58, %v788_v57  ;;  %v792_v20 = vrot.slane %v788_v57, 4  ;;  %v465_v61 = vmul.bf16 %v15474_v34, %v15731_v48  ;;  %v15765_v47 = vld [vmem:[%s15460_s1 + $0x44] sm:$0xf]  ;;  %v504_v7 = vld [vmem:[%s15484_s23 + $0x40] sm:$0xf] }
  0xeb   : > { %v796_v6 = vrot.slane %v794_v59, 7  ;;  %v1316_v8 = vrot.slane %v1315_v62, 4  ;;  %v538_v11 = vmul.bf16 %v15480_v40, %v502_v55  ;;  %v539_v19 = vmul.bf16 %v15480_v40, %v503_v60  ;;  %13112 = vmatpush3.bf16.msra.mxu0 %v14569_v39  ;;  %v366_v59 = vld [vmem:[%s15421_s15 + $0x40] sm:$0xf] }
  0xec   : > { %v1326_v18 = vrot.slane %v1325_v3, 4  ;;  %v1133_v42 = vld [vmem:[#allocation2 + $0x48] sm:$0xf]  ;;  %v1052_v13 = vsel %vm15548_vm13, %v791_v4, %v1051_v1  ;;  %13113 = vmatprep.subr.bf16.mxu0 %v14570_v49  ;;  %v466_v60 = vmul.bf16 %v15474_v34, %v15758_v44  ;;  %v467_v62 = vmul.bf16 %v15474_v34, %v15765_v47 }
  0xed   : > { %v799_v51 = vor.u32 %v797_v63, %v796_v6  ;;  %v801_v12 = vrot.slane %v796_v6, 4  ;;  %v1321_v15 = vsel %vm15442_vm2, %v1316_v8, %v1320_v53  ;;  %v1333_v21 = vshrl.u32 %v1133_v42, 16  ;;  %1053 = vst [vmem:[#allocation2 + $0x54] sm:$0xf] %v1052_v13  ;;  %v505_v53 = vld [vmem:[%s15484_s23 + $0x44] sm:$0xf] }
  0xee   : > { %v1336_v22 = vshll.u32 %v1133_v42, 16  ;;  %v575_v24 = vsel %vm15462_vm5, %v538_v11, %v364_v37  ;;  %v1331_v26 = vsel %vm15442_vm2, %v1326_v18, %v1330_v16  ;;  %v1134_v0 = vld [vmem:[#allocation2 + $0x4c] sm:$0xf]  ;;  %v576_v38 = vsel %vm15462_vm5, %v539_v19, %v365_v10  ;;  %v1058_v8 = vld [vmem:[#allocation2 + $0x60] sm:$0xf] }
  0xef   : > { %v1175_v28 = vld [vmem:[#allocation2 + $0x50] sm:$0x1]  ;;  %v800_v27 = vsel %vm15538_vm12, %v792_v20, %v799_v51  ;;  %v1056_v36 = vsel %vm15554_vm14, %v801_v12, %v1055_v9  ;;  %v11857_v33 = vcombine.low %v1321_v15, %v1331_v26  ;;  %v1335_v39 = vrot.slane %v1333_v21, 4  ;;  %13114 = vmatpush3.bf16.msra.mxu0 %v14570_v49  ;;  %v1062_v9 = vld [vmem:[#allocation2 + $0x68] sm:$0x1] }
  0xf0   : > { %v1338_v41 = vrot.slane %v1336_v22, 5  ;;  %v1342_v43 = vshll.u32 %v1134_v0, 16  ;;  %1054 = vst [vmem:[#allocation2 + $0x58] sm:$0xf] %v800_v27  ;;  %1057 = vst [vmem:[#allocation2 + $0x5c] sm:$0x1] %v1056_v36  ;;  %v608_v31 = vsel %vm15469_vm8, %v464_v2, %v575_v24  ;;  %v609_v46 = vsel %vm15469_vm8, %v465_v61, %v576_v38  ;;  %13147 = vmatprep.subr.bf16.mxu0 %v14572_v14 }
  0xf1   : > { %v1346_v45 = vshrl.u32 %v1134_v0, 16  ;;  %v1352_v5 = vshll.u32 %v1175_v28, 16  ;;  %13076 = vmatmul.mubr.bf16.gmra.mrb[8].mxu0 %v11857_v33  ;;  %v803_v50 = vshrl.u32 %v608_v31, 16  ;;  %v806_v52 = vshll.u32 %v608_v31, 16  ;;  %v367_v10 = vld [vmem:[%s15421_s15 + $0x44] sm:$0xf] }
  0xf2   : > { %v1339_v35 = vor.u32 %v1338_v41, %v1335_v39  ;;  %v1344_v48 = vrot.slane %v1342_v43, 5  ;;  %v811_v55 = vshrl.u32 %v609_v46, 16  ;;  %v814_v56 = vshll.u32 %v609_v46, 16  ;;  %v432_v0 = vld [vmem:[%s15460_s1 + $0x48] sm:$0xf] }
  0xf3   : > { %v1348_v49 = vrot.slane %v1346_v45, 4  ;;  %v1354_v54 = vrot.slane %v1352_v5, 5  ;;  %v805_v58 = vrot.slane %v803_v50, 7  ;;  %v540_v2 = vmul.bf16 %v15480_v40, %v504_v7  ;;  %v15787_v33 = vld [vmem:[%s15460_s1 + $0x4c] sm:$0xf] }
  0xf4   : > { %v1340_v57 = vrot.slane %v1339_v35, 4  ;;  %v1135_v63 = vld [vmem:[#allocation2 + $0x54] sm:$0xf]  ;;  %v813_v1 = vrot.slane %v811_v55, 7  ;;  %v541_v3 = vmul.bf16 %v15480_v40, %v505_v53  ;;  %v506_v39 = vld [vmem:[%s15484_s23 + $0x48] sm:$0xf] }
  0xf5   : > { %v1349_v16 = vor.u32 %v1348_v49, %v1344_v48  ;;  %v1357_v20 = vshrl.u32 %v1135_v63, 16  ;;  %v1360_v6 = vshll.u32 %v1135_v63, 16  ;;  %v808_v37 = vor.u32 %v806_v52, %v805_v58  ;;  %v507_v5 = vld [vmem:[%s15484_s23 + $0x4c] sm:$0xf]  ;;  %v15798_v31 = vld [vmem:[%s15460_s1 + $0x50] sm:$0xf] }
  0xf6   : > { %v1345_v4 = vsel %vm15442_vm2, %v1340_v57, %v1344_v48  ;;  %v809_v18 = vrot.slane %v805_v58, 4  ;;  %v816_v42 = vor.u32 %v814_v56, %v813_v1  ;;  %v577_v51 = vsel %vm15462_vm5, %v540_v2, %v366_v59  ;;  %v15805_v48 = vld [vmem:[%s15460_s1 + $0x54] sm:$0xf]  ;;  %v15808_v50 = vld [vmem:[%s15484_s23 + $0x50] sm:$0xf] }
  0xf7   : > { %v1350_v61 = vrot.slane %v1349_v16, 4  ;;  %v1136_v11 = vld [vmem:[#allocation2 + $0x58] sm:$0xf]  ;;  %v1176_v19 = vld [vmem:[#allocation2 + $0x5c] sm:$0x1]  ;;  %v1359_v12 = vrot.slane %v1357_v20, 4  ;;  %v1059_v43 = vsel %vm15548_vm13, %v808_v37, %v1058_v8  ;;  %v578_v45 = vsel %vm15462_vm5, %v541_v3, %v367_v10 }
  0xf8   : > { %v1362_v13 = vrot.slane %v1360_v6, 5  ;;  %v1366_v14 = vshll.u32 %v1136_v11, 16  ;;  %v1370_v15 = vshrl.u32 %v1136_v11, 16  ;;  %v1376_v22 = vshll.u32 %v1176_v19, 16  ;;  %1060 = vst [vmem:[#allocation2 + $0x60] sm:$0xf] %v1059_v43 }
  0xf9   : > { %v1355_v21 = vsel %vm15442_vm2, %v1350_v61, %v1354_v54  ;;  %v817_v24 = vsel %vm15538_vm12, %v809_v18, %v816_v42  ;;  %v818_v26 = vrot.slane %v813_v1, 4  ;;  %v610_v7 = vsel %vm15469_vm8, %v466_v60, %v577_v51  ;;  %v368_v55 = vld [vmem:[%s15421_s15 + $0x48] sm:$0xf]  ;;  %v1065_v58 = vld [vmem:[#allocation2 + $0x6c] sm:$0xf] }
  0xfa   : > { %v11858_v28 = vcombine.low %v1345_v4, %v1355_v21  ;;  %v1363_v27 = vor.u32 %v1362_v13, %v1359_v12  ;;  %v1368_v36 = vrot.slane %v1366_v14, 5  ;;  %v1372_v38 = vrot.slane %v1370_v15, 4  ;;  %1061 = vst [vmem:[#allocation2 + $0x64] sm:$0xf] %v817_v24  ;;  %v369_v59 = vld [vmem:[%s15421_s15 + $0x4c] sm:$0xf] }
  0xfb   : > { %v1378_v41 = vrot.slane %v1376_v22, 5  ;;  %v1063_v44 = vsel %vm15554_vm14, %v818_v26, %v1062_v9  ;;  %v611_v35 = vsel %vm15469_vm8, %v467_v62, %v578_v45  ;;  %v820_v52 = vshrl.u32 %v610_v7, 16  ;;  %v1069_v4 = vld [vmem:[#allocation2 + $0x74] sm:$0x1]  ;;  %v370_v24 = vld [vmem:[%s15421_s15 + $0x50] sm:$0xf] }
  0xfc   : > { %13079 = vmatprep.mubr.bf16.mxu0 %v11858_v28  ;;  %v1364_v46 = vrot.slane %v1363_v27, 4  ;;  %v1373_v47 = vor.u32 %v1372_v38, %v1368_v36  ;;  %1064 = vst [vmem:[#allocation2 + $0x68] sm:$0x1] %v1063_v44  ;;  %v823_v53 = vshll.u32 %v610_v7, 16  ;;  %v828_v49 = vshrl.u32 %v611_v35, 16 }
  0xfd   : > { %v831_v54 = vshll.u32 %v611_v35, 16  ;;  %v468_v60 = vmul.bf16 %v15474_v34, %v432_v0  ;;  %v469_v62 = vmul.bf16 %v15474_v34, %v15787_v33  ;;  %v822_v16 = vrot.slane %v820_v52, 7  ;;  %v509_v26 = vld [vmem:[%s15484_s23 + $0x54] sm:$0xf] }
  0xfe   : > { %v1369_v56 = vsel %vm15442_vm2, %v1364_v46, %v1368_v36  ;;  %v1374_v57 = vrot.slane %v1373_v47, 4  ;;  %v830_v63 = vrot.slane %v828_v49, 7  ;;  %v542_v1 = vmul.bf16 %v15480_v40, %v506_v39  ;;  %v371_v43 = vld [vmem:[%s15421_s15 + $0x54] sm:$0xf]  ;;  %v1072_v46 = vld [vmem:[#allocation2 + $0x78] sm:$0xf] }
  0xff   : > { %v543_v2 = vmul.bf16 %v15480_v40, %v507_v5  ;;  %v470_v20 = vmul.bf16 %v15474_v34, %v15798_v31  ;;  %v471_v6 = vmul.bf16 %v15474_v34, %v15805_v48  ;;  %v544_v37 = vmul.bf16 %v15480_v40, %v15808_v50  ;;  %v1137_v12 = vld [vmem:[#allocation2 + $0x60] sm:$0xf] }
 0x100   : > { %v1379_v3 = vsel %vm15442_vm2, %v1374_v57, %v1378_v41  ;;  %v825_v10 = vor.u32 %v823_v53, %v822_v16  ;;  %v826_v61 = vrot.slane %v822_v16, 4  ;;  %v833_v11 = vor.u32 %v831_v54, %v830_v63  ;;  %v1076_v53 = vld [vmem:[#allocation2 + $0x80] sm:$0x1] }
 0x101   : > { %v11859_v8 = vcombine.low %v1369_v56, %v1379_v3  ;;  %v1138_v9 = vld [vmem:[#allocation2 + $0x64] sm:$0xf]  ;;  %v835_v42 = vrot.slane %v830_v63, 4  ;;  %v579_v51 = vsel %vm15462_vm5, %v542_v1, %v368_v55  ;;  %v580_v21 = vsel %vm15462_vm5, %v543_v2, %v369_v59 }
 0x102   : > { %v1390_v19 = vshll.u32 %v1138_v9, 16  ;;  %v1394_v18 = vshrl.u32 %v1138_v9, 16  ;;  %v834_v14 = vsel %vm15538_vm12, %v826_v61, %v833_v11  ;;  %v1066_v15 = vsel %vm15548_vm13, %v825_v10, %v1065_v58 }
 0x103   : > { %13080 = vmatmul.mubr.bf16.gmra.mrb[12].mxu0 %v11859_v8  ;;  %v1177_v13 = vld [vmem:[#allocation2 + $0x68] sm:$0x1]  ;;  %v612_v22 = vsel %vm15469_vm8, %v468_v60, %v579_v51  ;;  %v1381_v0 = vshrl.u32 %v1137_v12, 16  ;;  %v1384_v28 = vshll.u32 %v1137_v12, 16  ;;  %1067 = vst [vmem:[#allocation2 + $0x6c] sm:$0xf] %v1066_v15  ;;  %v1070_v33 = vsel %vm15554_vm14, %v835_v42, %v1069_v4 }
 0x104   : > { %v1392_v27 = vrot.slane %v1390_v19, 5  ;;  %v1396_v36 = vrot.slane %v1394_v18, 4  ;;  %1068 = vst [vmem:[#allocation2 + $0x70] sm:$0xf] %v834_v14  ;;  %v1400_v38 = vshll.u32 %v1177_v13, 16  ;;  %v613_v39 = vsel %vm15469_vm8, %v469_v62, %v580_v21 }
 0x105   : > { %v837_v41 = vshrl.u32 %v612_v22, 16  ;;  %v1383_v44 = vrot.slane %v1381_v0, 4  ;;  %v1386_v45 = vrot.slane %v1384_v28, 5  ;;  %1071 = vst [vmem:[#allocation2 + $0x74] sm:$0x1] %v1070_v33  ;;  %v840_v31 = vshll.u32 %v612_v22, 16 }
 0x106   : > { %v1397_v5 = vor.u32 %v1396_v36, %v1392_v27  ;;  %v1402_v47 = vrot.slane %v1400_v38, 5  ;;  %v845_v35 = vshrl.u32 %v613_v39, 16  ;;  %v848_v48 = vshll.u32 %v613_v39, 16  ;;  %v437_v51 = vld [vmem:[%s15460_s1 + $0x5c] sm:$0xf] }
 0x107   : > { %v839_v7 = vrot.slane %v837_v41, 7  ;;  %v1387_v50 = vor.u32 %v1386_v45, %v1383_v44  ;;  %v545_v49 = vmul.bf16 %v15480_v40, %v509_v26  ;;  %v581_v54 = vsel %vm15462_vm5, %v544_v37, %v370_v24  ;;  %v15862_v37 = vld [vmem:[%s15460_s1 + $0x58] sm:$0xf]  ;;  %v1079_v22 = vld [vmem:[#allocation2 + $0x84] sm:$0xf] }
 0x108   : > { %v1398_v52 = vrot.slane %v1397_v5, 4  ;;  %v847_v57 = vrot.slane %v845_v35, 7  ;;  %v614_v58 = vsel %vm15469_vm8, %v470_v20, %v581_v54  ;;  %v510_v12 = vld [vmem:[%s15484_s23 + $0x58] sm:$0xf]  ;;  %v1083_v39 = vld [vmem:[#allocation2 + $0x8c] sm:$0x1]  ;;  %v472_v44 = vmul.bf16 %v15474_v34, %v15862_v37 }
 0x109   : > { %v842_v55 = vor.u32 %v840_v31, %v839_v7  ;;  %v843_v56 = vrot.slane %v839_v7, 4  ;;  %v1388_v59 = vrot.slane %v1387_v50, 4  ;;  %v582_v62 = vsel %vm15462_vm5, %v545_v49, %v371_v43  ;;  %v372_v41 = vld [vmem:[%s15421_s15 + $0x58] sm:$0xf]  ;;  %v373_v43 = vld [vmem:[%s15421_s15 + $0x5c] sm:$0xf] }
 0x10a   : > { %v1403_v60 = vsel %vm15442_vm2, %v1398_v52, %v1402_v47  ;;  %v854_v16 = vshrl.u32 %v614_v58, 16  ;;  %v15853_v63 = vld [vmem:[#allocation2 + $0x6c] sm:$0xf]  ;;  %v850_v2 = vor.u32 %v848_v48, %v847_v57  ;;  %v852_v3 = vrot.slane %v847_v57, 4 }
 0x10b   : > { %v15855_v1 = vld [vmem:[#allocation2 + $0x70] sm:$0xf]  ;;  %v1073_v4 = vsel %vm15548_vm13, %v842_v55, %v1072_v46  ;;  %v615_v20 = vsel %vm15469_vm8, %v471_v6, %v582_v62  ;;  %v1393_v8 = vsel %vm15442_vm2, %v1388_v59, %v1392_v27  ;;  %v1405_v9 = vshrl.u32 %v15853_v63, 16  ;;  %v511_v27 = vld [vmem:[%s15484_s23 + $0x5c] sm:$0xf] }
 0x10c   : > { %v1408_v10 = vshll.u32 %v15853_v63, 16  ;;  %v1414_v61 = vshll.u32 %v15855_v1, 16  ;;  %1074 = vst [vmem:[#allocation2 + $0x78] sm:$0xf] %v1073_v4  ;;  %v11860_v11 = vcombine.low %v1393_v8, %v1403_v60  ;;  %v1178_v19 = vld [vmem:[#allocation2 + $0x74] sm:$0x1]  ;;  %v851_v42 = vsel %vm15538_vm12, %v843_v56, %v850_v2 }
 0x10d   : > { %v1418_v18 = vshrl.u32 %v15855_v1, 16  ;;  %v1077_v6 = vsel %vm15554_vm14, %v852_v3, %v1076_v53  ;;  %v1407_v13 = vrot.slane %v1405_v9, 4  ;;  %v1424_v21 = vshll.u32 %v1178_v19, 16  ;;  %1075 = vst [vmem:[#allocation2 + $0x7c] sm:$0xf] %v851_v42 }
 0x10e   : > { %v1410_v14 = vrot.slane %v1408_v10, 5  ;;  %v1416_v15 = vrot.slane %v1414_v61, 5  ;;  %1078 = vst [vmem:[#allocation2 + $0x80] sm:$0x1] %v1077_v6  ;;  %13083 = vmatprep.mubr.bf16.mxu0 %v11860_v11  ;;  %v856_v26 = vrot.slane %v854_v16, 7  ;;  %v857_v0 = vshll.u32 %v614_v58, 16 }
 0x10f   : > { %v1420_v24 = vrot.slane %v1418_v18, 4  ;;  %v862_v28 = vshrl.u32 %v615_v20, 16  ;;  %v1426_v38 = vrot.slane %v1424_v21, 5  ;;  %v865_v33 = vshll.u32 %v615_v20, 16  ;;  %v15905_v4 = vld [vmem:[%s15460_s1 + $0x60] sm:$0xf] }
 0x110   : > { %v1411_v36 = vor.u32 %v1410_v14, %v1407_v13  ;;  %v859_v5 = vor.u32 %v857_v0, %v856_v26  ;;  %v860_v31 = vrot.slane %v856_v26, 4  ;;  %v473_v7 = vmul.bf16 %v15474_v34, %v437_v51  ;;  %v15908_v20 = vld [vmem:[%s15460_s1 + $0x64] sm:$0xf]  ;;  %v512_v61 = vld [vmem:[%s15484_s23 + $0x60] sm:$0xf] }
 0x111   : > { %v1421_v45 = vor.u32 %v1420_v24, %v1416_v15  ;;  %v864_v46 = vrot.slane %v862_v28, 7  ;;  %v546_v35 = vmul.bf16 %v15480_v40, %v510_v12  ;;  %v547_v48 = vmul.bf16 %v15480_v40, %v511_v27  ;;  %v513_v14 = vld [vmem:[%s15484_s23 + $0x64] sm:$0xf]  ;;  %v374_v26 = vld [vmem:[%s15421_s15 + $0x60] sm:$0xf] }
 0x112   : > { %v1412_v47 = vrot.slane %v1411_v36, 4  ;;  %v1080_v54 = vsel %vm15548_vm13, %v859_v5, %v1079_v22  ;;  %v474_v27 = vmul.bf16 %v15474_v34, %v15905_v4  ;;  %v475_v36 = vmul.bf16 %v15474_v34, %v15908_v20  ;;  %v15944_v4 = vld [vmem:[%s15460_s1 + $0x6c] sm:$0xf] }
 0x113   : > { %v1422_v50 = vrot.slane %v1421_v45, 4  ;;  %v15884_v52 = vld [vmem:[#allocation2 + $0x78] sm:$0xf]  ;;  %v867_v53 = vor.u32 %v865_v33, %v864_v46  ;;  %v869_v49 = vrot.slane %v864_v46, 4  ;;  %1081 = vst [vmem:[#allocation2 + $0x84] sm:$0xf] %v1080_v54  ;;  %v583_v58 = vsel %vm15462_vm5, %v546_v35, %v372_v41 }
 0x114   : > { %v1417_v55 = vsel %vm15442_vm2, %v1412_v47, %v1416_v15  ;;  %v1429_v56 = vshrl.u32 %v15884_v52, 16  ;;  %v1432_v57 = vshll.u32 %v15884_v52, 16  ;;  %v15896_v60 = vld [vmem:[#allocation2 + $0x7c] sm:$0xf]  ;;  %v584_v3 = vsel %vm15462_vm5, %v547_v48, %v373_v43  ;;  %v1086_v46 = vld [vmem:[#allocation2 + $0x90] sm:$0xf] }
 0x115   : > { %v1427_v59 = vsel %vm15442_vm2, %v1422_v50, %v1426_v38  ;;  %v1179_v62 = vld [vmem:[#allocation2 + $0x80] sm:$0x1]  ;;  %v868_v16 = vsel %vm15538_vm12, %v860_v31, %v867_v53  ;;  %v1084_v2 = vsel %vm15554_vm14, %v869_v49, %v1083_v39  ;;  %v1438_v10 = vshll.u32 %v15896_v60, 16  ;;  %v1090_v47 = vld [vmem:[#allocation2 + $0x98] sm:$0x1] }
 0x116   : > { %v11861_v37 = vcombine.low %v1417_v55, %v1427_v59  ;;  %v1431_v8 = vrot.slane %v1429_v56, 4  ;;  %v1434_v9 = vrot.slane %v1432_v57, 5  ;;  %1082 = vst [vmem:[#allocation2 + $0x88] sm:$0xf] %v868_v16  ;;  %1085 = vst [vmem:[#allocation2 + $0x8c] sm:$0x1] %v1084_v2  ;;  %v616_v18 = vsel %vm15469_vm8, %v472_v44, %v583_v58 }
 0x117   : > { %v1442_v11 = vshrl.u32 %v15896_v60, 16  ;;  %v1448_v19 = vshll.u32 %v1179_v62, 16  ;;  %v617_v42 = vsel %vm15469_vm8, %v473_v7, %v584_v3  ;;  %v1440_v51 = vrot.slane %v1438_v10, 5  ;;  %v375_v7 = vld [vmem:[%s15421_s15 + $0x64] sm:$0xf] }
 0x118   : > { %13084 = vmatmul.mubr.bf16.gmra.mrb[16].mxu0 %v11861_v37  ;;  %v1435_v6 = vor.u32 %v1434_v9, %v1431_v8  ;;  %v871_v12 = vshrl.u32 %v616_v18, 16  ;;  %v874_v13 = vshll.u32 %v616_v18, 16  ;;  %v879_v22 = vshrl.u32 %v617_v42, 16  ;;  %v440_v3 = vld [vmem:[%s15460_s1 + $0x68] sm:$0xf] }
 0x119   : > { %v1444_v15 = vrot.slane %v1442_v11, 4  ;;  %v1450_v21 = vrot.slane %v1448_v19, 5  ;;  %v882_v24 = vshll.u32 %v617_v42, 16  ;;  %v548_v41 = vmul.bf16 %v15480_v40, %v512_v61  ;;  %v514_v10 = vld [vmem:[%s15484_s23 + $0x68] sm:$0xf] }
 0x11a   : > { %v1436_v0 = vrot.slane %v1435_v6, 4  ;;  %v873_v28 = vrot.slane %v871_v12, 7  ;;  %v15923_v33 = vld [vmem:[#allocation2 + $0x84] sm:$0xf]  ;;  %v881_v39 = vrot.slane %v879_v22, 7  ;;  %v549_v43 = vmul.bf16 %v15480_v40, %v513_v14 }
 0x11b   : > { %v1445_v38 = vor.u32 %v1444_v15, %v1440_v51  ;;  %v1453_v45 = vshrl.u32 %v15923_v33, 16  ;;  %v1456_v5 = vshll.u32 %v15923_v33, 16  ;;  %v585_v54 = vsel %vm15462_vm5, %v548_v41, %v374_v26  ;;  %v515_v61 = vld [vmem:[%s15484_s23 + $0x6c] sm:$0xf]  ;;  %v15955_v6 = vld [vmem:[%s15460_s1 + $0x70] sm:$0xf] }
 0x11c   : > { %v1441_v44 = vsel %vm15442_vm2, %v1436_v0, %v1440_v51  ;;  %v876_v31 = vor.u32 %v874_v13, %v873_v28  ;;  %v877_v53 = vrot.slane %v873_v28, 4  ;;  %v884_v49 = vor.u32 %v882_v24, %v881_v39  ;;  %v15958_v51 = vld [vmem:[%s15460_s1 + $0x74] sm:$0xf]  ;;  %v15961_v12 = vld [vmem:[%s15484_s23 + $0x70] sm:$0xf] }
 0x11d   : > { %v1446_v35 = vrot.slane %v1445_v38, 4  ;;  %v15932_v48 = vld [vmem:[#allocation2 + $0x88] sm:$0xf]  ;;  %v1180_v50 = vld [vmem:[#allocation2 + $0x8c] sm:$0x1]  ;;  %v1455_v55 = vrot.slane %v1453_v45, 4  ;;  %v586_v42 = vsel %vm15462_vm5, %v549_v43, %v375_v7  ;;  %v618_v15 = vsel %vm15469_vm8, %v474_v27, %v585_v54 }
 0x11e   : > { %v1458_v56 = vrot.slane %v1456_v5, 5  ;;  %v1462_v57 = vshll.u32 %v15932_v48, 16  ;;  %v1466_v58 = vshrl.u32 %v15932_v48, 16  ;;  %v1472_v62 = vshll.u32 %v1180_v50, 16  ;;  %v376_v28 = vld [vmem:[%s15421_s15 + $0x68] sm:$0xf] }
 0x11f   : > { %v1451_v59 = vsel %vm15442_vm2, %v1446_v35, %v1450_v21  ;;  %v885_v16 = vsel %vm15538_vm12, %v877_v53, %v884_v49  ;;  %v886_v2 = vrot.slane %v881_v39, 4  ;;  %v1087_v19 = vsel %vm15548_vm13, %v876_v31, %v1086_v46  ;;  %v1093_v41 = vld [vmem:[#allocation2 + $0x9c] sm:$0xf]  ;;  %v377_v43 = vld [vmem:[%s15421_s15 + $0x6c] sm:$0xf] }
 0x120   : > { %v11862_v20 = vcombine.low %v1441_v44, %v1451_v59  ;;  %v1459_v37 = vor.u32 %v1458_v56, %v1455_v55  ;;  %v1464_v8 = vrot.slane %v1462_v57, 5  ;;  %v1468_v9 = vrot.slane %v1466_v58, 4  ;;  %1089 = vst [vmem:[#allocation2 + $0x94] sm:$0xf] %v885_v16  ;;  %1088 = vst [vmem:[#allocation2 + $0x90] sm:$0xf] %v1087_v19 }
 0x121   : > { %v1474_v11 = vrot.slane %v1472_v62, 5  ;;  %v1091_v18 = vsel %vm15554_vm14, %v886_v2, %v1090_v47  ;;  %v619_v21 = vsel %vm15469_vm8, %v475_v36, %v586_v42  ;;  %v888_v22 = vshrl.u32 %v618_v15, 16  ;;  %v1097_v59 = vld [vmem:[#allocation2 + $0xa4] sm:$0x1] }
 0x122   : > { %13087 = vmatprep.mubr.bf16.mxu0 %v11862_v20  ;;  %v1460_v13 = vrot.slane %v1459_v37, 4  ;;  %v1469_v14 = vor.u32 %v1468_v9, %v1464_v8  ;;  %1092 = vst [vmem:[#allocation2 + $0x98] sm:$0x1] %v1091_v18  ;;  %v891_v24 = vshll.u32 %v618_v15, 16  ;;  %v896_v26 = vshrl.u32 %v619_v21, 16 }
 0x123   : > { %v899_v0 = vshll.u32 %v619_v21, 16  ;;  %v476_v44 = vmul.bf16 %v15474_v34, %v440_v3  ;;  %v477_v45 = vmul.bf16 %v15474_v34, %v15944_v4  ;;  %v890_v27 = vrot.slane %v888_v22, 7  ;;  %v517_v9 = vld [vmem:[%s15484_s23 + $0x74] sm:$0xf]  ;;  %v1100_v22 = vld [vmem:[#allocation2 + $0xa8] sm:$0xf] }
 0x124   : > { %v1465_v38 = vsel %vm15442_vm2, %v1460_v13, %v1464_v8  ;;  %v1470_v39 = vrot.slane %v1469_v14, 4  ;;  %v898_v5 = vrot.slane %v896_v26, 7  ;;  %v550_v36 = vmul.bf16 %v15480_v40, %v514_v10  ;;  %v378_v8 = vld [vmem:[%s15421_s15 + $0x70] sm:$0xf] }
 0x125   : > { %v551_v31 = vmul.bf16 %v15480_v40, %v515_v61  ;;  %v478_v47 = vmul.bf16 %v15474_v34, %v15955_v6  ;;  %v479_v7 = vmul.bf16 %v15474_v34, %v15958_v51  ;;  %v552_v35 = vmul.bf16 %v15480_v40, %v15961_v12  ;;  %v379_v12 = vld [vmem:[%s15421_s15 + $0x74] sm:$0xf] }
 0x126   : > { %v1475_v46 = vsel %vm15442_vm2, %v1470_v39, %v1474_v11  ;;  %v893_v49 = vor.u32 %v891_v24, %v890_v27  ;;  %v894_v54 = vrot.slane %v890_v27, 4  ;;  %v901_v55 = vor.u32 %v899_v0, %v898_v5 }
 0x127   : > { %v11863_v50 = vcombine.low %v1465_v38, %v1475_v46  ;;  %v15984_v53 = vld [vmem:[#allocation2 + $0x94] sm:$0xf]  ;;  %v903_v58 = vrot.slane %v898_v5, 4  ;;  %v587_v62 = vsel %vm15462_vm5, %v550_v36, %v376_v28  ;;  %v15990_v16 = vld [vmem:[#allocation2 + $0x90] sm:$0xf]  ;;  %v588_v20 = vsel %vm15462_vm5, %v551_v31, %v377_v43 }
 0x128   : > { %v1486_v56 = vshll.u32 %v15984_v53, 16  ;;  %v1490_v57 = vshrl.u32 %v15984_v53, 16  ;;  %v902_v3 = vsel %vm15538_vm12, %v894_v54, %v901_v55  ;;  %v1094_v4 = vsel %vm15548_vm13, %v893_v49, %v1093_v41  ;;  %v1104_v46 = vld [vmem:[#allocation2 + $0xb0] sm:$0x1] }
 0x129   : > { %13088 = vmatmul.mubr.bf16.gmra.mrb[20].mxu0 %v11863_v50  ;;  %v1181_v2 = vld [vmem:[#allocation2 + $0x98] sm:$0x1]  ;;  %v620_v37 = vsel %vm15469_vm8, %v476_v44, %v587_v62  ;;  %v1477_v10 = vshrl.u32 %v15990_v16, 16  ;;  %v1480_v61 = vshll.u32 %v15990_v16, 16  ;;  %1095 = vst [vmem:[#allocation2 + $0x9c] sm:$0xf] %v1094_v4  ;;  %v1098_v42 = vsel %vm15554_vm14, %v903_v58, %v1097_v59 }
 0x12a   : > { %v1488_v11 = vrot.slane %v1486_v56, 5  ;;  %v1492_v19 = vrot.slane %v1490_v57, 4  ;;  %1096 = vst [vmem:[#allocation2 + $0xa0] sm:$0xf] %v902_v3  ;;  %v1496_v18 = vshll.u32 %v1181_v2, 16  ;;  %v621_v6 = vsel %vm15469_vm8, %v477_v45, %v588_v20 }
 0x12b   : > { %v905_v51 = vshrl.u32 %v620_v37, 16  ;;  %v1479_v13 = vrot.slane %v1477_v10, 4  ;;  %v1482_v14 = vrot.slane %v1480_v61, 5  ;;  %1099 = vst [vmem:[#allocation2 + $0xa4] sm:$0x1] %v1098_v42  ;;  %v908_v21 = vshll.u32 %v620_v37, 16 }
 0x12c   : > { %v1493_v15 = vor.u32 %v1492_v19, %v1488_v11  ;;  %v1498_v24 = vrot.slane %v1496_v18, 5  ;;  %v913_v0 = vshrl.u32 %v621_v6, 16  ;;  %v916_v28 = vshll.u32 %v621_v6, 16 }
 0x12d   : > { %v907_v26 = vrot.slane %v905_v51, 7  ;;  %v1483_v38 = vor.u32 %v1482_v14, %v1479_v13  ;;  %v553_v41 = vmul.bf16 %v15480_v40, %v517_v9  ;;  %v589_v43 = vsel %vm15462_vm5, %v552_v35, %v378_v8 }
 0x12e   : > { %v1494_v39 = vrot.slane %v1493_v15, 4  ;;  %v915_v27 = vrot.slane %v913_v0, 7  ;;  %v622_v5 = vsel %vm15469_vm8, %v478_v47, %v589_v43  ;;  %vm2216_vm0 = vcmask 1046532  }
 0x12f   : > { %v910_v44 = vor.u32 %v908_v21, %v907_v26  ;;  %v911_v45 = vrot.slane %v907_v26, 4  ;;  %v1484_v36 = vrot.slane %v1483_v38, 4  ;;  %v590_v50 = vsel %vm15462_vm5, %v553_v41, %v379_v12  ;;  %v1111_v26 = vld [vmem:[#allocation2 + $0xbc] sm:$0x1]  ;;  %vm16140_vm1 = vmor %vm2215_vm15, %vm2216_vm0 }
 0x130   : > { %v1499_v31 = vsel %vm15442_vm2, %v1494_v39, %v1498_v24  ;;  %v922_v49 = vshrl.u32 %v622_v5, 16  ;;  %v16018_v54 = vld [vmem:[#allocation2 + $0x9c] sm:$0xf]  ;;  %v918_v35 = vor.u32 %v916_v28, %v915_v27  ;;  %v920_v56 = vrot.slane %v915_v27, 4 }
 0x131   : > { %v16020_v55 = vld [vmem:[#allocation2 + $0xa0] sm:$0xf]  ;;  %v1101_v57 = vsel %vm15548_vm13, %v910_v44, %v1100_v22  ;;  %v623_v47 = vsel %vm15469_vm8, %v479_v7, %v590_v50  ;;  %v1489_v58 = vsel %vm15442_vm2, %v1484_v36, %v1488_v11  ;;  %v1501_v59 = vshrl.u32 %v16018_v54, 16  ;;  %v1107_v11 = vld [vmem:[#allocation2 + $0xb4] sm:$0xf] }
 0x132   : > { %v1504_v62 = vshll.u32 %v16018_v54, 16  ;;  %v1510_v2 = vshll.u32 %v16020_v55, 16  ;;  %1102 = vst [vmem:[#allocation2 + $0xa8] sm:$0xf] %v1101_v57  ;;  %v11864_v3 = vcombine.low %v1489_v58, %v1499_v31  ;;  %v16031_v4 = vld [vmem:[#allocation2 + $0xa4] sm:$0x1]  ;;  %v919_v37 = vsel %vm15538_vm12, %v911_v45, %v918_v35 }
 0x133   : > { %v1514_v20 = vshrl.u32 %v16020_v55, 16  ;;  %v1105_v7 = vsel %vm15554_vm14, %v920_v56, %v1104_v46  ;;  %v1503_v8 = vrot.slane %v1501_v59, 4  ;;  %v1520_v61 = vshll.u32 %v16031_v4, 16  ;;  %1103 = vst [vmem:[#allocation2 + $0xac] sm:$0xf] %v919_v37 }
 0x134   : > { %v1506_v9 = vrot.slane %v1504_v62, 5  ;;  %v1512_v10 = vrot.slane %v1510_v2, 5  ;;  %1106 = vst [vmem:[#allocation2 + $0xb0] sm:$0x1] %v1105_v7  ;;  %13091 = vmatprep.mubr.bf16.mxu0 %v11864_v3  ;;  %v924_v18 = vrot.slane %v922_v49, 7  ;;  %v925_v42 = vshll.u32 %v622_v5, 16 }
 0x135   : > { %v1516_v19 = vrot.slane %v1514_v20, 4  ;;  %v930_v6 = vshrl.u32 %v623_v47, 16  ;;  %v1522_v12 = vrot.slane %v1520_v61, 5  ;;  %v933_v13 = vshll.u32 %v623_v47, 16 }
 0x136   : > { %v1507_v51 = vor.u32 %v1506_v9, %v1503_v8  ;;  %v927_v15 = vor.u32 %v925_v42, %v924_v18  ;;  %v928_v21 = vrot.slane %v924_v18, 4  ;;  %v11889_v32 = vcombine.low %v16018_v54, %v16020_v55  ;;  %v2168_v54 = vld [vmem:[#allocation2 + $0xc] sm:$0xe] }
 0x137   : > { %v1517_v14 = vor.u32 %v1516_v19, %v1512_v10  ;;  %v932_v22 = vrot.slane %v930_v6, 7 }
 0x138   : > { %v1508_v24 = vrot.slane %v1507_v51, 4  ;;  %v1108_v41 = vsel %vm15548_vm13, %v927_v15, %v1107_v11 }
 0x139   : > { %v1518_v0 = vrot.slane %v1517_v14, 4  ;;  %v16039_v28 = vld [vmem:[#allocation2 + $0xa8] sm:$0xf]  ;;  %v935_v38 = vor.u32 %v933_v13, %v932_v22  ;;  %v937_v39 = vrot.slane %v932_v22, 4  ;;  %1109 = vst [vmem:[#allocation2 + $0xb4] sm:$0xf] %v1108_v41 }
 0x13a   : > { %v1513_v43 = vsel %vm15442_vm2, %v1508_v24, %v1512_v10  ;;  %v1525_v44 = vshrl.u32 %v16039_v28, 16  ;;  %v1528_v45 = vshll.u32 %v16039_v28, 16  ;;  %v16049_v5 = vld [vmem:[#allocation2 + $0xac] sm:$0xf]  ;;  %v14795_v41 = vld [vmem:[#allocation2] sm:$0xf] }
 0x13b   : > { %v1523_v27 = vsel %vm15442_vm2, %v1518_v0, %v1522_v12  ;;  %v16051_v36 = vld [vmem:[#allocation2 + $0xb0] sm:$0x1]  ;;  %v936_v31 = vsel %vm15538_vm12, %v928_v21, %v935_v38  ;;  %v1112_v46 = vsel %vm15554_vm14, %v937_v39, %v1111_v26  ;;  %v1534_v56 = vshll.u32 %v16049_v5, 16 }
 0x13c   : > { %v11865_v50 = vcombine.low %v1513_v43, %v1523_v27  ;;  %v1527_v49 = vrot.slane %v1525_v44, 4  ;;  %v1530_v35 = vrot.slane %v1528_v45, 5  ;;  %1110 = vst [vmem:[#allocation2 + $0xb8] sm:$0xf] %v936_v31  ;;  %1113 = vst [vmem:[#allocation2 + $0xbc] sm:$0x1] %v1112_v46 }
 0x13d   : > { %v1538_v57 = vshrl.u32 %v16049_v5, 16  ;;  %v1544_v47 = vshll.u32 %v16051_v36, 16  ;;  %v1536_v59 = vrot.slane %v1534_v56, 5  ;;  %v16079_v43 = vld [vmem:[#allocation2 + $0x4] sm:$0xf] }
 0x13e   : > { %13092 = vmatmul.mubr.bf16.gmra.mrb[24].mxu0 %v11865_v50  ;;  %v1531_v58 = vor.u32 %v1530_v35, %v1527_v49  ;;  %v11876_v44 = vcombine.low %v14795_v41, %v16079_v43  ;;  %v14797_v27 = vld [vmem:[#allocation2 + $0xc] sm:$0xf]  ;;  %v16082_v31 = vld [vmem:[#allocation2 + $0x10] sm:$0xf]  ;;  %v14799_v50 = vld [vmem:[#allocation2 + $0x18] sm:$0xf] }
 0x13f   : > { %v1540_v62 = vrot.slane %v1538_v57, 4  ;;  %v1546_v20 = vrot.slane %v1544_v47, 5  ;;  %v11877_v46 = vcombine.low %v14797_v27, %v16082_v31  ;;  %v16085_v49 = vld [vmem:[#allocation2 + $0x1c] sm:$0xf]  ;;  %v14575_v56 = vld [vmem:[#allocation6 + $0x88] sm:$0xff]   ;;  %v14578_v47 = vld [vmem:[#allocation6 + $0x90] sm:$0xff]  }
 0x140   : > { %v1532_v2 = vrot.slane %v1531_v58, 4  ;;  %v16060_v37 = vld [vmem:[#allocation2 + $0xb4] sm:$0xf]  ;;  %v11878_v35 = vcombine.low %v14799_v50, %v16085_v49  ;;  %v14801_v57 = vld [vmem:[#allocation6 + $0x80] sm:$0xff]   ;;  %v14802_v58 = vld [vmem:[#allocation2 + $0x24] sm:$0xf] }
 0x141   : > { %v1541_v3 = vor.u32 %v1540_v62, %v1536_v59  ;;  %v1549_v7 = vshrl.u32 %v16060_v37, 16  ;;  %v1552_v8 = vshll.u32 %v16060_v37, 16  ;;  %v518_v41 = vld [vmem:[%s15484_s23 + $0x78] sm:$0xf]  ;;  %v2167_v27 = vld [vmem:[#allocation2] sm:$0xe] }
 0x142   : > { %v1537_v9 = vsel %vm15442_vm2, %v1532_v2, %v1536_v59  ;;  %v16088_v59 = vld [vmem:[#allocation2 + $0x28] sm:$0xf]  ;;  %v14804_v2 = vld [vmem:[#allocation2 + $0x30] sm:$0xf]  ;;  %v445_v50 = vld [vmem:[%s15460_s1 + $0x7c] sm:$0xf] }
 0x143   : > { %v1542_v10 = vrot.slane %v1541_v3, 4  ;;  %v16066_v61 = vld [vmem:[#allocation2 + $0xb8] sm:$0xf]  ;;  %v16068_v11 = vld [vmem:[#allocation2 + $0xbc] sm:$0x1]  ;;  %v1551_v19 = vrot.slane %v1549_v7, 4  ;;  %v11879_v62 = vcombine.low %v14802_v58, %v16088_v59 }
 0x144   : > { %v1554_v18 = vrot.slane %v1552_v8, 5  ;;  %v1558_v42 = vshll.u32 %v16066_v61, 16  ;;  %v1562_v6 = vshrl.u32 %v16066_v61, 16  ;;  %v1568_v12 = vshll.u32 %v16068_v11, 16  ;;  %v16091_v3 = vld [vmem:[#allocation2 + $0x34] sm:$0xf] }
 0x145   : > { %v1547_v51 = vsel %vm15442_vm2, %v1542_v10, %v1546_v20  ;;  %v11880_v20 = vcombine.low %v14804_v2, %v16091_v3  ;;  %v14581_v7 = vld [vmem:[#allocation6 + $0x98] sm:$0xff]   ;;  %v14584_v8 = vld [vmem:[#allocation6 + $0xa0] sm:$0xff]   ;;  %v16094_v10 = vld [vmem:[#allocation2 + $0x40] sm:$0xf] }
 0x146   : > { %v11866_v13 = vcombine.low %v1537_v9, %v1547_v51  ;;  %v1555_v14 = vor.u32 %v1554_v18, %v1551_v19  ;;  %v1560_v15 = vrot.slane %v1558_v42, 5  ;;  %v1564_v21 = vrot.slane %v1562_v6, 4  ;;  %v14806_v9 = vld [vmem:[#allocation2 + $0x3c] sm:$0xf]  ;;  %v14587_v18 = vld [vmem:[#allocation6 + $0xa8] sm:$0xff]  }
 0x147   : > { %v1570_v26 = vrot.slane %v1568_v12, 5  ;;  %v11881_v19 = vcombine.low %v14806_v9, %v16094_v10  ;;  %v14808_v42 = vld [vmem:[#allocation2 + $0x48] sm:$0xf]  ;;  %v16097_v6 = vld [vmem:[#allocation2 + $0x4c] sm:$0xf] }
 0x148   : > { %13095 = vmatprep.mubr.bf16.mxu0 %v11866_v13  ;;  %v1556_v22 = vrot.slane %v1555_v14, 4  ;;  %v1565_v24 = vor.u32 %v1564_v21, %v1560_v15  ;;  %v11882_v51 = vcombine.low %v14808_v42, %v16097_v6  ;;  %v14590_v12 = vld [vmem:[#allocation6 + $0xb0] sm:$0xff]   ;;  %v14810_v13 = vld [vmem:[#allocation2 + $0x54] sm:$0xf]  ;;  %v16100_v14 = vld [vmem:[#allocation2 + $0x58] sm:$0xf] }
 0x149   : > { %v14593_v21 = vld [vmem:[#allocation6 + $0xb8] sm:$0xff]  }
 0x14a   : > { %v1561_v0 = vsel %vm15442_vm2, %v1556_v22, %v1560_v15  ;;  %v1566_v38 = vrot.slane %v1565_v24, 4  ;;  %v11883_v15 = vcombine.low %v14810_v13, %v16100_v14  ;;  %v16103_v22 = vld [vmem:[#allocation2 + $0x64] sm:$0xf]  ;;  %v14813_v24 = vld [vmem:[#allocation2 + $0x60] sm:$0xf] }
 0x14c   : > { %v1571_v39 = vsel %vm15442_vm2, %v1566_v38, %v1570_v26  ;;  %v11884_v26 = vcombine.low %v14813_v24, %v16103_v22  ;;  %v11885_v38 = vcombine.low %v15853_v63, %v15855_v1  ;;  %v11888_v1 = vcombine.low %v15990_v16, %v15984_v53 }
 0x14d   : > { %v11867_v45 = vcombine.low %v1561_v0, %v1571_v39  ;;  %v16106_v0 = vld [vmem:[#allocation6 + $0xc0] sm:$0xff]   ;;  %v11886_v39 = vcombine.low %v15884_v52, %v15896_v60  ;;  %v2220_v53 = vrot.slane %v16079_v43, 5  ;;  %v2227_v24 = vrot.slane %v16082_v31, 5 }
 0x14e   : > { %v380_v52 = vld [vmem:[%s15421_s15 + $0x78] sm:$0xf]  ;;  %v381_v60 = vld [vmem:[%s15421_s15 + $0x7c] sm:$0xf] }
 0x14f   : > { %13096 = vmatmul.mubr.bf16.gmra.mrb[28].mxu0 %v11867_v45  ;;  %v11887_v45 = vcombine.low %v15923_v33, %v15932_v48  ;;  %v2222_v43 = vrot.slane %v2220_v53, 4 }
 0x150   : > { %13115 = vmatprep.mubr.bf16.mxu0 %v11876_v44  ;;  %v519_v44 = vld [vmem:[%s15484_s23 + $0x7c] sm:$0xf]  ;;  %s18564_s23 = scalar_lea.vmem [#allocation9], %s11844_s13 }
 0x151   : > { %v555_v63 = vmul.bf16 %v15480_v40, %v519_v44  ;;  %v11891_v44 = vcombine.low %v16060_v37, %v16066_v61  ;;  %s11717_s12 = sshll.u32 %s18564_s23, 4  ;;  %s18657_s12 = int_to_ptr.vmem [resolvable:$true] %s11717_s12 }
 0x152   : > { %s14994_s14 = scalar_lea.vmem %s18657_s12, 2048 }
 0x153   : > { %v592_v33 = vsel %vm15462_vm5, %v555_v63, %v381_v60  ;;  %v14816_v63 = vld [vmem:[#allocation2 + $0x20] sm:$0x1]  ;;  %v2241_v60 = vrot.slane %v16088_v59, 5  ;;  %p14995_p0 = scmp.ne.s32.totalorder %s18657_s12, %s14994_s14 }
 0x154   : > { %v2237_v31 = vrot.slane %v14816_v63, 5 }
 0x155   : > { %p14996_p8 = pnand %p14995_p0, %p19062_p5 }
 0x157   : > { %13116 = vmatmul.mubr.bf16.vlgmr.msra.gmra.mrb[0].mxu0 %v11877_v46  ;;  %v444_v46 = vld [vmem:[%s15460_s1 + $0x78] sm:$0xf]  ;;  %s19057_s1 = sld [smem:[#allocation78_spill]]  ;;  %p14997_p12 = pneg %p14996_p8 }
 0x158   : > { %13148 = vmatpush3.bf16.msra.mxu0 %v14801_v57  ;;  %13119 = vmatprep.mubr.bf16.mxu0 %v11878_v35  ;;  %v554_v35 = vmul.bf16 %v15480_v40, %v518_v41  ;;  %v481_v57 = vmul.bf16 %v15474_v34, %v445_v50 }
 0x159   : > { %13149 = vmatprep.subr.bf16.mxu0 %v14575_v56 }
 0x15a   : > { %v625_v40 = vsel %vm15469_vm8, %v481_v57, %v592_v33  ;;  %v2171_v57 = vld [vmem:[#allocation2 + $0x30] sm:$0xe] }
 0x15b   : > { %v947_v58 = vshrl.u32 %v625_v40, 16 }
 0x15c   : > { %13150 = vmatpush3.bf16.msra.mxu0 %v14575_v56  ;;  %v480_v56 = vmul.bf16 %v15474_v34, %v444_v46  ;;  %v11900_v34 = vrot.slane %v2167_v27, 9  ;;  %v11901_v27 = vrot.slane %v2168_v54, 9  ;;  %v2229_v46 = vrot.slane %v2227_v24, 4  ;;  %v14819_v54 = vld [vmem:[#allocation2 + $0x44] sm:$0x1] }
 0x15d   : > { %13151 = vmatprep.subr.bf16.mxu0 %v14578_v47 }
 0x15f   : > { %13120 = vmatmul.mubr.bf16.gmra.mrb[4].mxu0 %v11879_v62  ;;  %v14814_v62 = vld [vmem:[#allocation2 + $0x8] sm:$0x1] }
 0x160   : > { %13123 = vmatprep.mubr.bf16.mxu0 %v11880_v20  ;;  %13152 = vmatpush3.bf16.msra.mxu0 %v14578_v47  ;;  %v591_v47 = vsel %vm15462_vm5, %v554_v35, %v380_v52  ;;  %v2223_v2 = vrot.slane %v14814_v62, 5 }
 0x161   : > { %13153 = vmatprep.subr.bf16.mxu0 %v14581_v7  ;;  %v624_v48 = vsel %vm15469_vm8, %v480_v56, %v591_v47  ;;  %v2248_v47 = vrot.slane %v16091_v3, 5 }
 0x162   : > { %v939_v16 = vshrl.u32 %v624_v48, 16  ;;  %v942_v29 = vshll.u32 %v624_v48, 16 }
 0x164   : > { %13154 = vmatpush3.bf16.msra.mxu0 %v14581_v7  ;;  %v941_v20 = vrot.slane %v939_v16, 7  ;;  %v16136_v7 = vrot.slane %v947_v58, 7  ;;  %v2243_v16 = vrot.slane %v2241_v60, 4  ;;  %v14817_v58 = vld [vmem:[#allocation2 + $0x2c] sm:$0x1] }
 0x165   : > { %13155 = vmatprep.subr.bf16.mxu0 %v14584_v8  ;;  %v2244_v62 = vrot.slane %v14817_v58, 5 }
 0x167   : > { %13124 = vmatmul.mubr.bf16.gmra.mrb[8].mxu0 %v11881_v19  ;;  %v944_v19 = vor.u32 %v942_v29, %v941_v20  ;;  %v2172_v29 = vld [vmem:[#allocation2 + $0x3c] sm:$0xe]  ;;  %v2245_v3 = vsel %vm16140_vm1, %v2243_v16, %v2244_v62  ;;  %v2177_v62 = vld [vmem:[#allocation2 + $0x78] sm:$0xe] }
 0x168   : > { %13127 = vmatprep.mubr.bf16.mxu0 %v11882_v51  ;;  %13156 = vmatpush3.bf16.msra.mxu0 %v14584_v8  ;;  %v950_v8 = vshll.u32 %v625_v40, 16  ;;  %v11890_v51 = vcombine.low %v16039_v28, %v16049_v5  ;;  %v2221_v28 = vsel %vm16140_vm1, %v11900_v34, %v2220_v53  ;;  %v14596_v53 = vld [vmem:[#allocation6 + $0xc8] sm:$0xff]   ;;  %v2250_v34 = vrot.slane %v2248_v47, 4 }
 0x169   : > { %13157 = vmatprep.subr.bf16.mxu0 %v14587_v18 }
 0x16a   : > { %v952_v42 = vor.u32 %v950_v8, %v16136_v7 }
 0x16c   : > { %13158 = vmatpush3.bf16.msra.mxu0 %v14587_v18  ;;  %v945_v18 = vrot.slane %v941_v20, 4  ;;  %v14818_v20 = vld [vmem:[#allocation2 + $0x38] sm:$0x1] }
 0x16d   : > { %13159 = vmatprep.subr.bf16.mxu0 %v14590_v12  ;;  %v2251_v59 = vrot.slane %v14818_v20, 5  ;;  %v14601_v20 = vld [vmem:[#allocation6 + $0xf0] sm:$0xff]  }
 0x16e   : > { %v953_v13 = vsel %vm15538_vm12, %v945_v18, %v952_v42  ;;  %v14597_v18 = vld [vmem:[#allocation6 + $0xd0] sm:$0xff]  }
 0x16f   : > { %13128 = vmatmul.mubr.bf16.gmra.mrb[12].mxu0 %v11883_v15  ;;  %1117 = vst [vmem:[#allocation2 + $0xc4] sm:$0xf] %v953_v13  ;;  %v2173_v42 = vld [vmem:[#allocation2 + $0x48] sm:$0xe] }
 0x170   : > { %13131 = vmatprep.mubr.bf16.mxu0 %v11884_v26  ;;  %13160 = vmatpush3.bf16.msra.mxu0 %v14590_v12  ;;  %v1114_v12 = vld [vmem:[#allocation2 + $0xc0] sm:$0xf]  ;;  %v2234_v26 = vrot.slane %v16085_v49, 5  ;;  %v2170_v49 = vld [vmem:[#allocation2 + $0x24] sm:$0xe] }
 0x171   : > { %13161 = vmatprep.subr.bf16.mxu0 %v14593_v21  ;;  %v1115_v15 = vsel %vm15548_vm13, %v944_v19, %v1114_v12  ;;  %v11903_v48 = vrot.slane %v2170_v49, 9  ;;  %v2252_v19 = vsel %vm16140_vm1, %v2250_v34, %v2251_v59  ;;  %v11905_v12 = vrot.slane %v2172_v29, 9 }
 0x172   : > { %1116 = vst [vmem:[#allocation2 + $0xc0] sm:$0xf] %v1115_v15  ;;  %v2236_v35 = vrot.slane %v2234_v26, 4 }
 0x173   : > { %v2242_v8 = vsel %vm16140_vm1, %v11903_v48, %v2241_v60  ;;  %v2176_v48 = vld [vmem:[#allocation2 + $0x6c] sm:$0xe] }
 0x174   : > { %13162 = vmatpush3.bf16.msra.mxu0 %v14593_v21  ;;  %v2169_v21 = vld [vmem:[#allocation2 + $0x18] sm:$0xe]  ;;  %v2238_v56 = vsel %vm16140_vm1, %v2236_v35, %v2237_v31  ;;  %v2175_v35 = vld [vmem:[#allocation2 + $0x60] sm:$0xe]  ;;  %v11909_v29 = vrot.slane %v2176_v48, 9 }
 0x175   : > { %13195 = vmatprep.subr.bf16.mxu0 %v16106_v0  ;;  %v11902_v50 = vrot.slane %v2169_v21, 9  ;;  %v2258_v21 = vrot.slane %v14819_v54, 5  ;;  %v14827_v54 = vld [vmem:[#allocation2 + $0x88] sm:$0xf] }
 0x177   : > { %13132 = vmatmul.mubr.bf16.gmra.mrb[16].mxu0 %v11885_v38  ;;  %v2224_v38 = vsel %vm16140_vm1, %v2222_v43, %v2223_v2  ;;  %v2235_v37 = vsel %vm16140_vm1, %v11902_v50, %v2234_v26  ;;  %v11904_v2 = vrot.slane %v2171_v57, 9  ;;  %v14599_v50 = vld [vmem:[#allocation6 + $0xe0] sm:$0xff]  }
 0x178   : > { %13135 = vmatprep.mubr.bf16.mxu0 %v11886_v39  ;;  %v14815_v39 = vld [vmem:[#allocation2 + $0x14] sm:$0x1]  ;;  %v11918_v40 = vcombine.low %v2235_v37, %v2238_v56  ;;  %v14822_v56 = vld [vmem:[#allocation2 + $0x68] sm:$0x1] }
 0x179   : > { %v2230_v41 = vrot.slane %v14815_v39, 5  ;;  %v2249_v43 = vsel %vm16140_vm1, %v11904_v2, %v2248_v47  ;;  %v2279_v57 = vrot.slane %v14822_v56, 5  ;;  %v14600_v47 = vld [vmem:[#allocation6 + $0xe8] sm:$0xff]   ;;  %v14824_v2 = vld [vmem:[#allocation2 + $0x7c] sm:$0xf]  ;;  %v2318_v56 = vrot.slane %v16049_v5, 5 }
 0x17a   : > { %v11920_v13 = vcombine.low %v2249_v43, %v2252_v19  ;;  %v2290_v34 = vrot.slane %v14824_v2, 5  ;;  %v11910_v19 = vrot.slane %v2177_v62, 9  ;;  %v2325_v5 = vrot.slane %v16066_v61, 5 }
 0x17b   : > { %v2231_v52 = vsel %vm16140_vm1, %v2229_v46, %v2230_v41  ;;  %v2269_v41 = vrot.slane %v16100_v14, 5  ;;  %v2276_v46 = vrot.slane %v16103_v22, 5  ;;  %v11908_v14 = vrot.slane %v2175_v35, 9 }
 0x17d   : > { %v2278_v37 = vrot.slane %v2276_v46, 4  ;;  %v2277_v16 = vsel %vm16140_vm1, %v11908_v14, %v2276_v46 }
 0x17f   : > { %13136 = vmatmul.mubr.bf16.gmra.mrb[20].mxu0 %v11887_v45  ;;  %v11916_v45 = vcombine.low %v2221_v28, %v2224_v38  ;;  %v14820_v28 = vld [vmem:[#allocation2 + $0x50] sm:$0x1]  ;;  %v2280_v58 = vsel %vm16140_vm1, %v2278_v37, %v2279_v57  ;;  %v2181_v57 = vld [vmem:[#allocation2 + $0xa8] sm:$0xe] }
 0x180   : > { %13139 = vmatprep.mubr.bf16.mxu0 %v11888_v1  ;;  %v2228_v1 = vsel %vm16140_vm1, %v11901_v27, %v2227_v24  ;;  %v11906_v24 = vrot.slane %v2173_v42, 9  ;;  %v2265_v38 = vrot.slane %v14820_v28, 5  ;;  %v2174_v27 = vld [vmem:[#allocation2 + $0x54] sm:$0xe]  ;;  %v2292_v42 = vrot.slane %v2290_v34, 4 }
 0x181   : > { %v11917_v33 = vcombine.low %v2228_v1, %v2231_v52  ;;  %v11907_v49 = vrot.slane %v2174_v27, 9  ;;  %v2271_v1 = vrot.slane %v2269_v41, 4  ;;  %v14821_v52 = vld [vmem:[#allocation2 + $0x5c] sm:$0x1]  ;;  %v14829_v27 = vld [vmem:[#allocation2 + $0x8c] sm:$0x1] }
 0x182   : > { %v2272_v60 = vrot.slane %v14821_v52, 5  ;;  %v2300_v46 = vrot.slane %v14829_v27, 5  ;;  %v2180_v52 = vld [vmem:[#allocation2 + $0x9c] sm:$0xe]  ;;  %v14618_v27 = vld [vmem:[#allocation2 + $0x84] sm:$0xff]  }
 0x183   : > { %v2270_v22 = vsel %vm16140_vm1, %v11907_v49, %v2269_v41 }
 0x187   : > { %13140 = vmatmul.mubr.bf16.gmra.mrb[24].mxu0 %v11889_v32  ;;  %v2255_v32 = vrot.slane %v16094_v10, 5  ;;  %v14598_v10 = vld [vmem:[#allocation6 + $0xd8] sm:$0xff]  }
 0x188   : > { %13143 = vmatprep.mubr.bf16.mxu0 %v11890_v51  ;;  %v11919_v51 = vcombine.low %v2242_v8, %v2245_v3  ;;  %v11924_v8 = vcombine.low %v2277_v16, %v2280_v58  ;;  %v2320_v16 = vrot.slane %v2318_v56, 4  ;;  %v2321_v58 = vrot.slane %v16051_v36, 5 }
 0x189   : > { %v2257_v15 = vrot.slane %v2255_v32, 4  ;;  %v2256_v39 = vsel %vm16140_vm1, %v11905_v12, %v2255_v32  ;;  %v14825_v32 = vld [vmem:[#allocation2 + $0x74] sm:$0x1] }
 0x18a   : > { %v2286_v43 = vrot.slane %v14825_v32, 5  ;;  %v1118_v32 = vld [vmem:[#allocation2 + $0xc8] sm:$0x1] }
 0x18f   : > { %13144 = vmatmul.mubr.bf16.gmra.mrb[28].mxu0 %v11891_v44 }
 0x190   : > { %13163 = vmatprep.mubr.bf16.mxu0 %v11916_v45 }
 0x197   : > { %13164 = vmatmul.mubr.bf16.vlgmr.msra.gmra.mrb[0].mxu0 %v11917_v33  ;;  %v2273_v33 = vsel %vm16140_vm1, %v2271_v1, %v2272_v60  ;;  %v2311_v60 = vrot.slane %v16020_v55, 5 }
 0x198   : > { %13196 = vmatpush3.bf16.msra.mxu0 %v16106_v0  ;;  %13167 = vmatprep.mubr.bf16.mxu0 %v11918_v40  ;;  %v2262_v0 = vrot.slane %v16097_v6, 5  ;;  %v2259_v6 = vsel %vm16140_vm1, %v2257_v15, %v2258_v21  ;;  %v14823_v40 = vld [vmem:[#allocation2 + $0x70] sm:$0xf]  ;;  %v11923_v59 = vcombine.low %v2270_v22, %v2273_v33  ;;  %v2178_v15 = vld [vmem:[#allocation2 + $0x84] sm:$0xe]  ;;  %v2297_v21 = vrot.slane %v14827_v54, 5 }
 0x199   : > { %13197 = vmatprep.subr.bf16.mxu0 %v14596_v53  ;;  %v11921_v63 = vcombine.low %v2256_v39, %v2259_v6  ;;  %v2179_v39 = vld [vmem:[#allocation2 + $0x90] sm:$0xe]  ;;  %v11913_v33 = vrot.slane %v2180_v52, 9  ;;  %v2313_v48 = vrot.slane %v2311_v60, 4  ;;  %v14611_v54 = vld [vmem:[#allocation2 + $0x48] sm:$0xff]  }
 0x19a   : > { %v2264_v26 = vrot.slane %v2262_v0, 4  ;;  %v2263_v44 = vsel %vm16140_vm1, %v11906_v24, %v2262_v0  ;;  %v14826_v0 = vld [vmem:[#allocation2 + $0x80] sm:$0x1]  ;;  %v2291_v24 = vsel %vm16140_vm1, %v11910_v19, %v2290_v34  ;;  %v2182_v34 = vld [vmem:[#allocation2 + $0xb4] sm:$0xe] }
 0x19b   : > { %v2312_v55 = vsel %vm16140_vm1, %v11913_v33, %v2311_v60  ;;  %v11915_v36 = vrot.slane %v2182_v34, 9 }
 0x19c   : > { %13198 = vmatpush3.bf16.msra.mxu0 %v14596_v53  ;;  %v2266_v45 = vsel %vm16140_vm1, %v2264_v26, %v2265_v38  ;;  %v2283_v53 = vrot.slane %v14823_v40, 5  ;;  %v14828_v26 = vld [vmem:[#allocation2 + $0x94] sm:$0xf]  ;;  %v14604_v38 = vld [vmem:[#allocation6 + $0x100] sm:$0xff]   ;;  %v2314_v40 = vrot.slane %v16031_v4, 5  ;;  %v2322_v4 = vsel %vm16140_vm1, %v2320_v16, %v2321_v58 }
 0x19d   : > { %13199 = vmatprep.subr.bf16.mxu0 %v14597_v18  ;;  %v11922_v31 = vcombine.low %v2263_v44, %v2266_v45  ;;  %v2304_v28 = vrot.slane %v14828_v26, 5  ;;  %v11911_v44 = vrot.slane %v2178_v15, 9  ;;  %v2299_v45 = vrot.slane %v2297_v21, 4  ;;  %v14613_v15 = vld [vmem:[#allocation6 + $0x118] sm:$0xff]   ;;  %v14614_v26 = vld [vmem:[#allocation2 + $0x60] sm:$0xff]  }
 0x19e   : > { %v2285_v3 = vrot.slane %v2283_v53, 4  ;;  %v2284_v12 = vsel %vm16140_vm1, %v11909_v29, %v2283_v53  ;;  %v11914_v53 = vrot.slane %v2181_v57, 9  ;;  %v2315_v62 = vsel %vm16140_vm1, %v2313_v48, %v2314_v40  ;;  %v14620_v16 = vld [vmem:[#allocation2 + $0x90] sm:$0xff]  }
 0x19f   : > { %13168 = vmatmul.mubr.bf16.gmra.mrb[4].mxu0 %v11919_v51  ;;  %v2293_v51 = vrot.slane %v14826_v0, 5  ;;  %v2306_v35 = vrot.slane %v2304_v28, 4  ;;  %v2298_v49 = vsel %vm16140_vm1, %v11911_v44, %v2297_v21  ;;  %v2301_v1 = vsel %vm16140_vm1, %v2299_v45, %v2300_v46  ;;  %v14606_v0 = vld [vmem:[#allocation2 + $0x24] sm:$0xff]   ;;  %v14616_v21 = vld [vmem:[#allocation6 + $0x120] sm:$0xff]   ;;  %v16237_v44 = vld [vmem:[#allocation2 + $0x10] sm:$0xf] }
 0x1a0   : > { %13171 = vmatprep.mubr.bf16.mxu0 %v11920_v13  ;;  %13200 = vmatpush3.bf16.msra.mxu0 %v14597_v18  ;;  %v14602_v18 = vld [vmem:[#allocation6 + $0xf8] sm:$0xff]   ;;  %v2287_v13 = vsel %vm16140_vm1, %v2285_v3, %v2286_v43  ;;  %v2319_v2 = vsel %vm16140_vm1, %v11914_v53, %v2318_v56  ;;  %v2327_v29 = vrot.slane %v2325_v5, 4  ;;  %v954_v3 = vrot.slane %v16136_v7, 4  ;;  %v14607_v7 = vld [vmem:[#allocation6 + $0x108] sm:$0xff]   ;;  %v14617_v45 = vld [vmem:[#allocation2 + $0x78] sm:$0xff]  }
 0x1a1   : > { %13201 = vmatprep.subr.bf16.mxu0 %v14598_v10  ;;  %v11925_v6 = vcombine.low %v2284_v12, %v2287_v13  ;;  %v2326_v61 = vsel %vm16140_vm1, %v11915_v36, %v2325_v5  ;;  %v14610_v12 = vld [vmem:[#allocation6 + $0x110] sm:$0xff]   ;;  %v14609_v13 = vld [vmem:[#allocation2 + $0x3c] sm:$0xff]   ;;  %v16256_v36 = vld [vmem:[#allocation2 + $0x34] sm:$0xf] }
 0x1a2   : > { %v1119_v19 = vsel %vm15554_vm14, %v954_v3, %v1118_v32 }
 0x1a3   : > { %1120 = vst [vmem:[#allocation2 + $0xc8] sm:$0x1] %v1119_v19 }
 0x1a4   : > { %13202 = vmatpush3.bf16.msra.mxu0 %v14598_v10  ;;  %v2294_v10 = vsel %vm16140_vm1, %v2292_v42, %v2293_v51  ;;  %v14603_v42 = vld [vmem:[#allocation2 + $0xc] sm:$0xff]  }
 0x1a5   : > { %13203 = vmatprep.subr.bf16.mxu0 %v14599_v50  ;;  %v11926_v41 = vcombine.low %v2291_v24, %v2294_v10  ;;  %v14608_v51 = vld [vmem:[#allocation2 + $0x30] sm:$0xff]   ;;  %v14619_v10 = vld [vmem:[#allocation6 + $0x128] sm:$0xff]  }
 0x1a6   : > { %v14612_v24 = vld [vmem:[#allocation2 + $0x54] sm:$0xff]  }
 0x1a7   : > { %13172 = vmatmul.mubr.bf16.gmra.mrb[8].mxu0 %v11921_v63  ;;  %v14830_v63 = vld [vmem:[#allocation2 + $0x98] sm:$0x1] }
 0x1a8   : > { %13175 = vmatprep.mubr.bf16.mxu0 %v11922_v31  ;;  %13204 = vmatpush3.bf16.msra.mxu0 %v14599_v50  ;;  %v11912_v50 = vrot.slane %v2179_v39, 9  ;;  %v2307_v31 = vrot.slane %v14830_v63, 5  ;;  %v14625_v39 = vld [vmem:[#allocation6 + $0x138] sm:$0xff]   ;;  %v3100_v63 = vshrl.u32 %v16237_v44, 16 }
 0x1a9   : > { %13205 = vmatprep.subr.bf16.mxu0 %v14600_v47 }
 0x1aa   : > { %v2305_v14 = vsel %vm16140_vm1, %v11912_v50, %v2304_v28  ;;  %v2308_v37 = vsel %vm16140_vm1, %v2306_v35, %v2307_v31  ;;  %v14622_v28 = vld [vmem:[#allocation6 + $0x130] sm:$0xff]   ;;  %v3096_v35 = vshll.u32 %v16237_v44, 16  ;;  %v3041_v31 = vld [vmem:[#allocation2 + $0x18] sm:$0xf] }
 0x1ab   : > { %v11928_v22 = vcombine.low %v2305_v14, %v2308_v37  ;;  %v3111_v52 = vshrl.u32 %v3041_v31, 16  ;;  %v3114_v60 = vshll.u32 %v3041_v31, 16  ;;  %v16244_v14 = vld [vmem:[#allocation2 + $0x28] sm:$0xf] }
 0x1ac   : > { %13206 = vmatpush3.bf16.msra.mxu0 %v14600_v47  ;;  %v11927_v47 = vcombine.low %v2298_v49, %v2301_v1  ;;  %v16242_v49 = vld [vmem:[#allocation2 + $0x1c] sm:$0xf]  ;;  %v3044_v1 = vld [vmem:[#allocation2 + $0x24] sm:$0xf]  ;;  %v16246_v57 = vrot.slane %v3096_v35, 5  ;;  %v3144_v58 = vshll.u32 %v16244_v14, 16 }
 0x1ad   : > { %13207 = vmatprep.subr.bf16.mxu0 %v14601_v20  ;;  %v3120_v33 = vshll.u32 %v16242_v49, 16  ;;  %v3124_v48 = vshrl.u32 %v16242_v49, 16  ;;  %v3135_v40 = vshrl.u32 %v3044_v1, 16  ;;  %v3138_v53 = vshll.u32 %v3044_v1, 16 }
 0x1ae   : > { %v3113_v5 = vrot.slane %v3111_v52, 4  ;;  %v16264_v19 = vrot.slane %v3144_v58, 5 }
 0x1af   : > { %13176 = vmatmul.mubr.bf16.gmra.mrb[12].mxu0 %v11923_v59  ;;  %v11930_v59 = vcombine.low %v2319_v2, %v2322_v4  ;;  %v3047_v2 = vld [vmem:[#allocation2 + $0x30] sm:$0xf]  ;;  %v3126_v3 = vrot.slane %v3124_v48, 4  ;;  %v3137_v32 = vrot.slane %v3135_v40, 4  ;;  %v3053_v48 = vld [vmem:[#allocation2 + $0x48] sm:$0xf] }
 0x1b0   : > { %13179 = vmatprep.mubr.bf16.mxu0 %v11924_v8  ;;  %13208 = vmatpush3.bf16.msra.mxu0 %v14601_v20  ;;  %v11929_v20 = vcombine.low %v2312_v55, %v2315_v62  ;;  %v2328_v8 = vrot.slane %v16068_v11, 5  ;;  %v14605_v11 = vld [vmem:[#allocation2 + $0x18] sm:$0xff]   ;;  %v3148_v55 = vshrl.u32 %v16244_v14, 16 }
 0x1b1   : > { %13209 = vmatprep.subr.bf16.mxu0 %v14602_v18  ;;  %v14621_v62 = vld [vmem:[#allocation2 + $0x9c] sm:$0xff]  }
 0x1b2   : > { %v2329_v43 = vsel %vm16140_vm1, %v2327_v29, %v2328_v8  ;;  %v16258_v29 = vld [vmem:[#allocation2 + $0x20] sm:$0x1]  ;;  %v16260_v8 = vrot.slane %v3120_v33, 5 }
 0x1b4   : > { %13210 = vmatpush3.bf16.msra.mxu0 %v14602_v18  ;;  %v11931_v18 = vcombine.low %v2326_v61, %v2329_v43  ;;  %v3140_v61 = vrot.slane %v3138_v53, 5  ;;  %v16262_v43 = vld [vmem:[#allocation2 + $0x2c] sm:$0x1] }
 0x1b5   : > { %13243 = vmatprep.subr.bf16.mxu0 %v14604_v38 }
 0x1b7   : > { %13180 = vmatmul.mubr.bf16.gmra.mrb[16].mxu0 %v11925_v6  ;;  %v16235_v6 = vld [vmem:[#allocation6 + $0x140] sm:$0xff]  }
 0x1b8   : > { %13183 = vmatprep.mubr.bf16.mxu0 %v11926_v41  ;;  %v3038_v41 = vld [vmem:[#allocation2 + $0xc] sm:$0xf] }
 0x1b9   : > { %v3087_v46 = vshrl.u32 %v3038_v41, 16  ;;  %v3090_v50 = vshll.u32 %v3038_v41, 16 }
 0x1bb   : > { %v3089_v37 = vrot.slane %v3087_v46, 4  ;;  %v3092_v56 = vrot.slane %v3090_v50, 5  ;;  %v16274_v46 = vld [vmem:[#allocation2 + $0x38] sm:$0x1] }
 0x1bc   : > { %v3178_v58 = vshll.u32 %v16274_v46, 16 }
 0x1bd   : > { %v3093_v4 = vor.u32 %v3092_v56, %v3089_v37 }
 0x1bf   : > { %13184 = vmatmul.mubr.bf16.gmra.mrb[20].mxu0 %v11927_v47  ;;  %v3102_v47 = vrot.slane %v3100_v63, 4 }
 0x1c0   : > { %13187 = vmatprep.mubr.bf16.mxu0 %v11928_v22  ;;  %v16248_v22 = vld [vmem:[#allocation2 + $0x14] sm:$0x1] }
 0x1c1   : > { %v3103_v34 = vor.u32 %v3102_v47, %v16246_v57 }
 0x1c7   : > { %13188 = vmatmul.mubr.bf16.gmra.mrb[24].mxu0 %v11929_v20  ;;  %v3106_v20 = vshll.u32 %v16248_v22, 16 }
 0x1c8   : > { %13191 = vmatprep.mubr.bf16.mxu0 %v11930_v59  ;;  %v3116_v59 = vrot.slane %v3114_v60, 5 }
 0x1cf   : > { %13192 = vmatmul.mubr.bf16.gmra.mrb[28].mxu0 %v11931_v18  ;;  %v3150_v18 = vrot.slane %v3148_v55, 4 }
 0x1d0   : > { %13211 = vmatprep.mubr.bf16.mxu0 %v14603_v42  ;;  %v3159_v42 = vshrl.u32 %v3047_v2, 16 }
 0x1d1   : > { %v3151_v41 = vor.u32 %v3150_v18, %v16264_v19 }
 0x1d3   : > { %v3152_v53 = vrot.slane %v3151_v41, 4 }
 0x1d7   : > { %13212 = vmatmul.mubr.bf16.vlgmr.msra.gmra.mrb[0].mxu0 %v14605_v11  ;;  %v3162_v11 = vshll.u32 %v3047_v2, 16 }
 0x1d8   : > { %13244 = vmatpush3.bf16.msra.mxu0 %v14604_v38  ;;  %13215 = vmatprep.mubr.bf16.mxu0 %v14606_v0  ;;  %v14615_v38 = vld [vmem:[#allocation2 + $0x6c] sm:$0xff]   ;;  %v3168_v0 = vshll.u32 %v16256_v36, 16 }
 0x1d9   : > { %13245 = vmatprep.subr.bf16.mxu0 %v14607_v7 }
 0x1da   : > { %v16276_v50 = vrot.slane %v3168_v0, 5 }
 0x1dc   : > { %13246 = vmatpush3.bf16.msra.mxu0 %v14607_v7  ;;  %v3172_v7 = vshrl.u32 %v16256_v36, 16 }
 0x1dd   : > { %13247 = vmatprep.subr.bf16.mxu0 %v14610_v12 }
 0x1de   : > { %v3174_v35 = vrot.slane %v3172_v7, 4 }
 0x1df   : > { %13216 = vmatmul.mubr.bf16.gmra.mrb[4].mxu0 %v14608_v51  ;;  %v3108_v51 = vrot.slane %v3106_v20, 5 }
 0x1e0   : > { %13219 = vmatprep.mubr.bf16.mxu0 %v14609_v13  ;;  %13248 = vmatpush3.bf16.msra.mxu0 %v14610_v12  ;;  %v3117_v12 = vor.u32 %v3116_v59, %v3113_v5  ;;  %v3130_v13 = vshll.u32 %v16258_v29, 16  ;;  %v3207_v59 = vshrl.u32 %v3053_v48, 16 }
 0x1e1   : > { %13249 = vmatprep.subr.bf16.mxu0 %v14613_v15 }
 0x1e2   : > { %v3132_v1 = vrot.slane %v3130_v13, 5  ;;  %v3118_v47 = vrot.slane %v3117_v12, 4  ;;  %v3056_v12 = vld [vmem:[#allocation2 + $0x54] sm:$0xf]  ;;  %v16305_v13 = vld [vmem:[#allocation2 + $0x58] sm:$0xf] }
 0x1e3   : > { %v3234_v41 = vshll.u32 %v3056_v12, 16 }
 0x1e4   : > { %13250 = vmatpush3.bf16.msra.mxu0 %v14613_v15  ;;  %v3050_v15 = vld [vmem:[#allocation2 + $0x3c] sm:$0xf]  ;;  %v3123_v18 = vsel %vm15442_vm2, %v3118_v47, %v16260_v8  ;;  %v3059_v47 = vld [vmem:[#allocation2 + $0x60] sm:$0xf] }
 0x1e5   : > { %13251 = vmatprep.subr.bf16.mxu0 %v14616_v21  ;;  %v3183_v63 = vshrl.u32 %v3050_v15, 16  ;;  %v3186_v31 = vshll.u32 %v3050_v15, 16 }
 0x1e7   : > { %13220 = vmatmul.mubr.bf16.gmra.mrb[8].mxu0 %v14611_v54  ;;  %v3094_v54 = vrot.slane %v3093_v4, 4  ;;  %v3185_v5 = vrot.slane %v3183_v63, 4  ;;  %v3188_v2 = vrot.slane %v3186_v31, 5  ;;  %v16287_v4 = vld [vmem:[#allocation2 + $0x4c] sm:$0xf] }
 0x1e8   : > { %13223 = vmatprep.mubr.bf16.mxu0 %v14612_v24  ;;  %13252 = vmatpush3.bf16.msra.mxu0 %v14616_v21  ;;  %v3104_v21 = vrot.slane %v3103_v34, 4  ;;  %v3127_v24 = vor.u32 %v3126_v3, %v16260_v8  ;;  %v3210_v3 = vshll.u32 %v3053_v48, 16  ;;  %v3216_v7 = vshll.u32 %v16287_v4, 16 }
 0x1e9   : > { %13253 = vmatprep.subr.bf16.mxu0 %v14619_v10  ;;  %v3099_v37 = vsel %vm15442_vm2, %v3094_v54, %v16246_v57  ;;  %v16289_v57 = vld [vmem:[#allocation2 + $0x44] sm:$0x1]  ;;  %v16309_v8 = vrot.slane %v3178_v58, 5  ;;  %v3189_v54 = vor.u32 %v3188_v2, %v3185_v5  ;;  %v3062_v58 = vld [vmem:[#allocation2 + $0x6c] sm:$0xf] }
 0x1ea   : > { %v3109_v56 = vsel %vm15442_vm2, %v3104_v21, %v3108_v51  ;;  %v3128_v33 = vrot.slane %v3127_v24, 4  ;;  %v3220_v51 = vshrl.u32 %v16287_v4, 16  ;;  %v3202_v21 = vshll.u32 %v16289_v57, 16  ;;  %v16336_v2 = vld [vmem:[#allocation2 + $0x70] sm:$0xf] }
 0x1eb   : > { %v16319_v63 = vrot.slane %v3216_v7, 5 }
 0x1ec   : > { %13254 = vmatpush3.bf16.msra.mxu0 %v14619_v10  ;;  %v3154_v10 = vshll.u32 %v16262_v43, 16  ;;  %v3222_v31 = vrot.slane %v3220_v51, 4 }
 0x1ed   : > { %13255 = vmatprep.subr.bf16.mxu0 %v14622_v28 }
 0x1ef   : > { %13224 = vmatmul.mubr.bf16.gmra.mrb[12].mxu0 %v14614_v26  ;;  %v16271_v26 = vld [vmem:[#allocation2 + $0x40] sm:$0xf] }
 0x1f0   : > { %13227 = vmatprep.mubr.bf16.mxu0 %v14615_v38  ;;  %13256 = vmatpush3.bf16.msra.mxu0 %v14622_v28  ;;  %v14623_v28 = vld [vmem:[#allocation2 + $0xa8] sm:$0xff]   ;;  %v14624_v38 = vld [vmem:[#allocation2 + $0xb4] sm:$0xff]   ;;  %v3192_v52 = vshll.u32 %v16271_v26, 16  ;;  %v3196_v60 = vshrl.u32 %v16271_v26, 16 }
 0x1f1   : > { %13257 = vmatprep.subr.bf16.mxu0 %v14625_v39 }
 0x1f2   : > { %v16291_v34 = vrot.slane %v3192_v52, 5  ;;  %v3198_v20 = vrot.slane %v3196_v60, 4  ;;  %v3190_v60 = vrot.slane %v3189_v54, 4 }
 0x1f4   : > { %13258 = vmatpush3.bf16.msra.mxu0 %v14625_v39  ;;  %v3141_v39 = vor.u32 %v3140_v61, %v3137_v32  ;;  %v14626_v32 = vld [vmem:[#allocation2 + $0xc0] sm:$0xff]   ;;  %v11964_v61 = vcombine.low %v3099_v37, %v3109_v56  ;;  %v3204_v37 = vrot.slane %v3202_v21, 5  ;;  %v16325_v56 = vld [vmem:[#allocation2 + $0x5c] sm:$0x1]  ;;  %v3195_v7 = vsel %vm15442_vm2, %v3190_v60, %v16291_v34 }
 0x1f5   : > { %13291 = vmatprep.subr.bf16.mxu0 %v16235_v6 }
 0x1f6   : > { %v3142_v40 = vrot.slane %v3141_v39, 4  ;;  %v3231_v39 = vshrl.u32 %v3056_v12, 16  ;;  %v3288_v12 = vshll.u32 %v16336_v2, 16 }
 0x1f7   : > { %13228 = vmatmul.mubr.bf16.gmra.mrb[16].mxu0 %v14617_v45  ;;  %v3161_v45 = vrot.slane %v3159_v42, 4  ;;  %v3133_v42 = vsel %vm15442_vm2, %v3128_v33, %v3132_v1 }
 0x1f8   : > { %13231 = vmatprep.mubr.bf16.mxu0 %v14618_v27  ;;  %v3164_v27 = vrot.slane %v3162_v11, 5  ;;  %v3147_v11 = vsel %vm15442_vm2, %v3142_v40, %v16264_v19  ;;  %v3199_v19 = vor.u32 %v3198_v20, %v16291_v34  ;;  %v3223_v20 = vor.u32 %v3222_v31, %v16319_v63 }
 0x1fa   : > { %v3165_v55 = vor.u32 %v3164_v27, %v3161_v45  ;;  %v3240_v45 = vshll.u32 %v16305_v13, 16  ;;  %v3244_v27 = vshrl.u32 %v16305_v13, 16  ;;  %v3200_v48 = vrot.slane %v3199_v19, 4  ;;  %v3065_v19 = vld [vmem:[#allocation2 + $0x78] sm:$0xf] }
 0x1fc   : > { %v16307_v15 = vrot.slane %v3165_v55, 4  ;;  %v3233_v55 = vrot.slane %v3231_v39, 4  ;;  %v3246_v5 = vrot.slane %v3244_v27, 4 }
 0x1fe   : > { %v3171_v52 = vsel %vm15442_vm2, %v16307_v15, %v16276_v50  ;;  %v3292_v15 = vshrl.u32 %v16336_v2, 16 }
 0x1ff   : > { %13232 = vmatmul.mubr.bf16.gmra.mrb[20].mxu0 %v14620_v16  ;;  %v3156_v16 = vrot.slane %v3154_v10, 5  ;;  %v3209_v10 = vrot.slane %v3207_v59, 4  ;;  %v3250_v59 = vshll.u32 %v16325_v56, 16 }
 0x200   : > { %13235 = vmatprep.mubr.bf16.mxu0 %v14621_v62  ;;  %v3175_v62 = vor.u32 %v3174_v35, %v16276_v50  ;;  %v11965_v35 = vcombine.low %v3123_v18, %v3133_v42  ;;  %v16334_v50 = vrot.slane %v3240_v45, 5  ;;  %v3279_v42 = vshrl.u32 %v3062_v58, 16  ;;  %v14629_v45 = vld [vmem:[#allocation6 + $0x150] sm:$0xff]  }
 0x201   : > { %v3157_v0 = vsel %vm15442_vm2, %v3152_v53, %v3156_v16  ;;  %v16332_v16 = vld [vmem:[#allocation2 + $0x64] sm:$0xf] }
 0x202   : > { %v16312_v24 = vrot.slane %v3175_v62, 4  ;;  %v11966_v1 = vcombine.low %v3147_v11, %v3157_v0  ;;  %v3236_v62 = vrot.slane %v3234_v41, 5  ;;  %v3268_v18 = vshrl.u32 %v16332_v16, 16  ;;  %v14628_v0 = vld [vmem:[#allocation6 + $0x148] sm:$0xff]   ;;  %v16358_v41 = vld [vmem:[#allocation2 + $0x7c] sm:$0xf] }
 0x203   : > { %v3282_v11 = vshll.u32 %v3062_v58, 16  ;;  %v3281_v60 = vrot.slane %v3279_v42, 4 }
 0x204   : > { %v3181_v33 = vsel %vm15442_vm2, %v16312_v24, %v16309_v8  ;;  %v3205_v8 = vsel %vm15442_vm2, %v3200_v48, %v3204_v37  ;;  %v3237_v21 = vor.u32 %v3236_v62, %v3233_v55  ;;  %v3247_v24 = vor.u32 %v3246_v5, %v16334_v50  ;;  %v16367_v62 = vld [vmem:[#allocation2 + $0x74] sm:$0x1] }
 0x205   : > { %v3270_v31 = vrot.slane %v3268_v18, 4  ;;  %v3284_v37 = vrot.slane %v3282_v11, 5  ;;  %v3294_v48 = vrot.slane %v3292_v15, 4  ;;  %v11967_v5 = vcombine.low %v3171_v52, %v3181_v33  ;;  %v3068_v11 = vld [vmem:[#allocation2 + $0x84] sm:$0xf]  ;;  %v14630_v33 = vld [vmem:[#allocation6 + $0x158] sm:$0xff]  }
 0x206   : > { %v3238_v58 = vrot.slane %v3237_v21, 4  ;;  %v3248_v55 = vrot.slane %v3247_v24, 4  ;;  %v16381_v52 = vld [vmem:[#allocation2 + $0x88] sm:$0xf]  ;;  %v3327_v24 = vshrl.u32 %v3068_v11, 16 }
 0x207   : > { %13236 = vmatmul.mubr.bf16.gmra.mrb[24].mxu0 %v14623_v28  ;;  %v3212_v28 = vrot.slane %v3210_v3, 5  ;;  %v3255_v3 = vshrl.u32 %v3059_v47, 16  ;;  %v3285_v42 = vor.u32 %v3284_v37, %v3281_v60 }
 0x208   : > { %13239 = vmatprep.mubr.bf16.mxu0 %v14624_v38  ;;  %v16315_v38 = vld [vmem:[#allocation2 + $0x50] sm:$0x1] }
 0x209   : > { %v3213_v40 = vor.u32 %v3212_v28, %v3209_v10  ;;  %v3226_v53 = vshll.u32 %v16315_v38, 16  ;;  %v16354_v10 = vrot.slane %v3223_v20, 4  ;;  %v16356_v28 = vrot.slane %v3250_v59, 5 }
 0x20a   : > { %v3257_v34 = vrot.slane %v3255_v3, 4  ;;  %v11968_v20 = vcombine.low %v3195_v7, %v3205_v8  ;;  %v16391_v8 = vld [vmem:[#allocation2 + $0x80] sm:$0x1]  ;;  %v3286_v60 = vrot.slane %v3285_v42, 4 }
 0x20b   : > { %v16345_v51 = vrot.slane %v3213_v40, 4  ;;  %v16351_v54 = vrot.slane %v3226_v53, 5  ;;  %v3303_v40 = vshrl.u32 %v3065_v19, 16  ;;  %v3306_v53 = vshll.u32 %v3065_v19, 16 }
 0x20c   : > { %v3253_v15 = vsel %vm15442_vm2, %v3248_v55, %v16356_v28  ;;  %v3330_v19 = vshll.u32 %v3068_v11, 16 }
 0x20d   : > { %v3219_v59 = vsel %vm15442_vm2, %v16345_v51, %v16319_v63  ;;  %v3229_v3 = vsel %vm15442_vm2, %v16354_v10, %v16351_v54  ;;  %v3298_v63 = vshll.u32 %v16367_v62, 16  ;;  %v3305_v51 = vrot.slane %v3303_v40, 4 }
 0x20e   : > { %v3336_v10 = vshll.u32 %v16381_v52, 16  ;;  %v11969_v55 = vcombine.low %v3219_v59, %v3229_v3 }
 0x20f   : > { %13240 = vmatmul.mubr.bf16.gmra.mrb[28].mxu0 %v14626_v32  ;;  %v3258_v32 = vshll.u32 %v3059_v47, 16  ;;  %v16363_v47 = vld [vmem:[#allocation2 + $0x68] sm:$0x1]  ;;  %v3300_v37 = vrot.slane %v3298_v63, 5  ;;  %v16410_v63 = vld [vmem:[#allocation2 + $0xa0] sm:$0xf] }
 0x210   : > { %13259 = vmatprep.mubr.bf16.mxu0 %v11964_v61  ;;  %v3264_v61 = vshll.u32 %v16332_v16, 16  ;;  %v3274_v18 = vshll.u32 %v16363_v47, 16 }
 0x211   : > { %v3260_v39 = vrot.slane %v3258_v32, 5 }
 0x212   : > { %v16361_v27 = vrot.slane %v3264_v61, 5 }
 0x213   : > { %v3261_v32 = vor.u32 %v3260_v39, %v3257_v34  ;;  %v3340_v34 = vshrl.u32 %v16381_v52, 16 }
 0x214   : > { %v3271_v61 = vor.u32 %v3270_v31, %v16361_v27  ;;  %v3276_v31 = vrot.slane %v3274_v18, 5 }
 0x215   : > { %v3262_v39 = vrot.slane %v3261_v32, 4  ;;  %v3332_v32 = vrot.slane %v3330_v19, 5  ;;  %v3342_v18 = vrot.slane %v3340_v34, 4 }
 0x217   : > { %13260 = vmatmul.mubr.bf16.vlgmr.msra.gmra.mrb[0].mxu0 %v11965_v35  ;;  %v16365_v35 = vrot.slane %v3288_v12, 5  ;;  %v3308_v12 = vrot.slane %v3306_v53, 5  ;;  %v3322_v53 = vshll.u32 %v16391_v8, 16  ;;  %v3267_v42 = vsel %vm15442_vm2, %v3262_v39, %v16361_v27  ;;  %v14632_v27 = vld [vmem:[#allocation6 + $0x168] sm:$0xff]  }
 0x218   : > { %13292 = vmatpush3.bf16.msra.mxu0 %v16235_v6  ;;  %13263 = vmatprep.mubr.bf16.mxu0 %v11966_v1  ;;  %v3312_v6 = vshll.u32 %v16358_v41, 16  ;;  %v3316_v1 = vshrl.u32 %v16358_v41, 16  ;;  %v3384_v39 = vshll.u32 %v16410_v63, 16 }
 0x219   : > { %13293 = vmatprep.subr.bf16.mxu0 %v14628_v0  ;;  %v3295_v7 = vor.u32 %v3294_v48, %v16365_v35  ;;  %v14631_v48 = vld [vmem:[#allocation6 + $0x160] sm:$0xff]   ;;  %v3309_v40 = vor.u32 %v3308_v12, %v3305_v51  ;;  %v3291_v51 = vsel %vm15442_vm2, %v3286_v60, %v16365_v35  ;;  %v3388_v35 = vshrl.u32 %v16410_v63, 16 }
 0x21a   : > { %v16393_v54 = vrot.slane %v3312_v6, 5  ;;  %v3318_v21 = vrot.slane %v3316_v1, 4 }
 0x21b   : > { %v3296_v28 = vrot.slane %v3295_v7, 4  ;;  %v3074_v7 = vld [vmem:[#allocation2 + $0x9c] sm:$0xf] }
 0x21c   : > { %13294 = vmatpush3.bf16.msra.mxu0 %v14628_v0  ;;  %v3243_v0 = vsel %vm15442_vm2, %v3238_v58, %v16334_v50  ;;  %v3272_v50 = vrot.slane %v3271_v61, 4  ;;  %v3071_v58 = vld [vmem:[#allocation2 + $0x90] sm:$0xf]  ;;  %v3319_v1 = vor.u32 %v3318_v21, %v16393_v54  ;;  %v16403_v61 = vrot.slane %v3336_v10, 5 }
 0x21d   : > { %13295 = vmatprep.subr.bf16.mxu0 %v14629_v45  ;;  %v11970_v6 = vcombine.low %v3243_v0, %v3253_v15  ;;  %v3351_v59 = vshrl.u32 %v3071_v58, 16  ;;  %v3354_v3 = vshll.u32 %v3071_v58, 16  ;;  %v3301_v12 = vsel %vm15442_vm2, %v3296_v28, %v3300_v37  ;;  %v16426_v58 = vld [vmem:[#allocation2 + $0x98] sm:$0x1] }
 0x21e   : > { %v3277_v11 = vsel %vm15442_vm2, %v3272_v50, %v3276_v31  ;;  %v3310_v0 = vrot.slane %v3309_v40, 4  ;;  %v3324_v15 = vrot.slane %v3322_v53, 5  ;;  %v3320_v21 = vrot.slane %v3319_v1, 4 }
 0x21f   : > { %13264 = vmatmul.mubr.bf16.gmra.mrb[4].mxu0 %v11967_v5  ;;  %v16399_v5 = vld [vmem:[#allocation2 + $0x94] sm:$0xf]  ;;  %v3375_v10 = vshrl.u32 %v3074_v7, 16  ;;  %v3378_v34 = vshll.u32 %v3074_v7, 16  ;;  %v3343_v31 = vor.u32 %v3342_v18, %v16403_v61  ;;  %v3353_v60 = vrot.slane %v3351_v59, 4 }
 0x220   : > { %13267 = vmatprep.mubr.bf16.mxu0 %v11968_v20  ;;  %13296 = vmatpush3.bf16.msra.mxu0 %v14629_v45  ;;  %v16401_v20 = vld [vmem:[#allocation2 + $0x8c] sm:$0x1]  ;;  %v3329_v45 = vrot.slane %v3327_v24, 4  ;;  %v3364_v19 = vshrl.u32 %v16399_v5, 16  ;;  %v3356_v28 = vrot.slane %v3354_v3, 5  ;;  %v11971_v37 = vcombine.low %v3267_v42, %v3277_v11 }
 0x221   : > { %13297 = vmatprep.subr.bf16.mxu0 %v14630_v33  ;;  %v3346_v24 = vshll.u32 %v16401_v20, 16  ;;  %v11972_v40 = vcombine.low %v3291_v51, %v3301_v12  ;;  %v3315_v53 = vsel %vm15442_vm2, %v3310_v0, %v16393_v54  ;;  %v3325_v1 = vsel %vm15442_vm2, %v3320_v21, %v3324_v15  ;;  %v3077_v3 = vld [vmem:[#allocation2 + $0xa8] sm:$0xf]  ;;  %v16437_v0 = vld [vmem:[#allocation2 + $0xac] sm:$0xf]  ;;  %v14634_v21 = vld [vmem:[#allocation6 + $0x178] sm:$0xff]  }
 0x222   : > { %v3333_v50 = vor.u32 %v3332_v32, %v3329_v45  ;;  %v3366_v45 = vrot.slane %v3364_v19, 4  ;;  %v16432_v32 = vld [vmem:[#allocation2 + $0xa4] sm:$0x1]  ;;  %v3377_v18 = vrot.slane %v3375_v10, 4  ;;  %v3380_v42 = vrot.slane %v3378_v34, 5  ;;  %18877 = vst [vmem:[#allocation24_spill] sm:$0xff] %v16437_v0 }
 0x223   : > { %18876 = vst [vmem:[#allocation23_spill] sm:$0xff] %v16432_v32  ;;  %v16434_v11 = vrot.slane %v3384_v39, 5  ;;  %v3390_v59 = vrot.slane %v3388_v35, 4  ;;  %v3344_v7 = vrot.slane %v3343_v31, 4  ;;  %v3357_v51 = vor.u32 %v3356_v28, %v3353_v60  ;;  %v3080_v34 = vld [vmem:[#allocation2 + $0xb4] sm:$0xf] }
 0x224   : > { %13298 = vmatpush3.bf16.msra.mxu0 %v14630_v33  ;;  %v3360_v33 = vshll.u32 %v16399_v5, 16  ;;  %v3334_v54 = vrot.slane %v3333_v50, 4  ;;  %v3370_v12 = vshll.u32 %v16426_v58, 16  ;;  %v3394_v15 = vshll.u32 %v16432_v32, 16  ;;  %v16441_v39 = vld [vmem:[#allocation2 + $0xb8] sm:$0xf] }
 0x225   : > { %13299 = vmatprep.subr.bf16.mxu0 %v14631_v48  ;;  %v3399_v19 = vshrl.u32 %v3077_v3, 16  ;;  %v3402_v10 = vshll.u32 %v3077_v3, 16  ;;  %18878 = vst [vmem:[#allocation25_spill] sm:$0xff] %v16441_v39  ;;  %v3381_v35 = vor.u32 %v3380_v42, %v3377_v18  ;;  %v3391_v50 = vor.u32 %v3390_v59, %v16434_v11  ;;  %v16453_v59 = vld [vmem:[#allocation6 + $0x180] sm:$0xff]   ;;  %v16457_v32 = vld [vmem:[#allocation2 + $0xc4] sm:$0xf] }
 0x226   : > { %v3412_v31 = vshrl.u32 %v16437_v0, 16  ;;  %v3339_v60 = vsel %vm15442_vm2, %v3334_v54, %v16403_v61  ;;  %v3432_v18 = vshll.u32 %v16441_v39, 16  ;;  %v3436_v42 = vshrl.u32 %v16441_v39, 16 }
 0x227   : > { %13268 = vmatmul.mubr.bf16.gmra.mrb[8].mxu0 %v11969_v55  ;;  %v14633_v55 = vld [vmem:[#allocation6 + $0x170] sm:$0xff]   ;;  %v3396_v3 = vrot.slane %v3394_v15, 5  ;;  %v3401_v30 = vrot.slane %v3399_v19, 4  ;;  %v3404_v17 = vrot.slane %v3402_v10, 5  ;;  %v3382_v61 = vrot.slane %v3381_v35, 4 }
 0x228   : > { %13271 = vmatprep.mubr.bf16.mxu0 %v11970_v6  ;;  %13300 = vmatpush3.bf16.msra.mxu0 %v14631_v48  ;;  %v3348_v6 = vrot.slane %v3346_v24, 5  ;;  %v16430_v48 = vrot.slane %v3360_v33, 5  ;;  %v11973_v24 = vcombine.low %v3315_v53, %v3325_v1  ;;  %v3358_v53 = vrot.slane %v3357_v51, 4  ;;  %v16455_v51 = vld [vmem:[#allocation2 + $0xb0] sm:$0x1] }
 0x229   : > { %13301 = vmatprep.subr.bf16.mxu0 %v14632_v27  ;;  %v3372_v1 = vrot.slane %v3370_v12, 5  ;;  %v3392_v54 = vrot.slane %v3391_v50, 4  ;;  %v3438_v39 = vrot.slane %v3436_v42, 4  ;;  %v3405_v19 = vor.u32 %v3404_v17, %v3401_v30  ;;  %v16465_v10 = vld [vmem:[#allocation2 + $0xbc] sm:$0x1] }
 0x22a   : > { %v3367_v33 = vor.u32 %v3366_v45, %v16430_v48  ;;  %v3349_v28 = vsel %vm15442_vm2, %v3344_v7, %v3348_v6  ;;  %v3423_v45 = vshrl.u32 %v3080_v34, 16  ;;  %v3414_v6 = vrot.slane %v3412_v31, 4 }
 0x22b   : > { %v11974_v7 = vcombine.low %v3339_v60, %v3349_v28  ;;  %v3363_v15 = vsel %vm15442_vm2, %v3358_v53, %v16430_v48  ;;  %v3397_v35 = vsel %vm15442_vm2, %v3392_v54, %v3396_v3  ;;  %v3456_v60 = vshll.u32 %v16457_v32, 16 }
 0x22c   : > { %13302 = vmatpush3.bf16.msra.mxu0 %v14632_v27  ;;  %v3408_v27 = vshll.u32 %v16437_v0, 16  ;;  %v3425_v12 = vrot.slane %v3423_v45, 4  ;;  %v3434_v0 = vrot.slane %v3432_v18, 5  ;;  %v3460_v17 = vshrl.u32 %v16457_v32, 16 }
 0x22d   : > { %13303 = vmatprep.subr.bf16.mxu0 %v14633_v55 }
 0x22e   : > { %v3410_v25 = vrot.slane %v3408_v27, 5  ;;  %v3418_v27 = vshll.u32 %v16455_v51, 16  ;;  %v3439_v28 = vor.u32 %v3438_v39, %v3434_v0  ;;  %v3462_v3 = vrot.slane %v3460_v17, 4 }
 0x22f   : > { %13272 = vmatmul.mubr.bf16.gmra.mrb[12].mxu0 %v11971_v37  ;;  %v3426_v37 = vshll.u32 %v3080_v34, 16 }
 0x230   : > { %13275 = vmatprep.mubr.bf16.mxu0 %v11972_v40  ;;  %13304 = vmatpush3.bf16.msra.mxu0 %v14633_v55  ;;  %v3368_v40 = vrot.slane %v3367_v33, 4  ;;  %v3083_v55 = vld [vmem:[#allocation2 + $0xc0] sm:$0xf]  ;;  %v3415_v50 = vor.u32 %v3414_v6, %v3410_v25  ;;  %v3440_v54 = vrot.slane %v3439_v28, 4 }
 0x231   : > { %13305 = vmatprep.subr.bf16.mxu0 %v14634_v21  ;;  %v3428_v34 = vrot.slane %v3426_v37, 5  ;;  %v3447_v31 = vshrl.u32 %v3083_v55, 16  ;;  %v3450_v48 = vshll.u32 %v3083_v55, 16  ;;  %v3420_v37 = vrot.slane %v3418_v27, 5 }
 0x232   : > { %v3373_v33 = vsel %vm15442_vm2, %v3368_v40, %v3372_v1  ;;  %v3416_v45 = vrot.slane %v3415_v50, 4  ;;  %v3458_v40 = vrot.slane %v3456_v60, 5 }
 0x233   : > { %v3429_v30 = vor.u32 %v3428_v34, %v3425_v12  ;;  %v11975_v53 = vcombine.low %v3363_v15, %v3373_v33  ;;  %v3449_v18 = vrot.slane %v3447_v31, 4  ;;  %v3452_v42 = vrot.slane %v3450_v48, 5 }
 0x234   : > { %13306 = vmatpush3.bf16.msra.mxu0 %v14634_v21  ;;  %v3387_v21 = vsel %vm15442_vm2, %v3382_v61, %v16434_v11  ;;  %v3406_v11 = vrot.slane %v3405_v19, 4  ;;  %v3421_v55 = vsel %vm15442_vm2, %v3416_v45, %v3420_v37  ;;  %v3463_v34 = vor.u32 %v3462_v3, %v3458_v40 }
 0x235   : > { %13339 = vmatprep.subr.bf16.mxu0 %v16453_v59  ;;  %v11976_v1 = vcombine.low %v3387_v21, %v3397_v35  ;;  %v3430_v61 = vrot.slane %v3429_v30, 4  ;;  %v3453_v12 = vor.u32 %v3452_v42, %v3449_v18  ;;  %v3858_v21 = vrot.slane %v16237_v44, 5  ;;  %v3792_v35 = vld [vmem:[#allocation2 + $0xc] sm:$0xe] }
 0x236   : > { %v3411_v39 = vsel %vm15442_vm2, %v3406_v11, %v3410_v25  ;;  %v3464_v31 = vrot.slane %v3463_v34, 4  ;;  %v11988_v60 = vrot.slane %v3792_v35, 9  ;;  %v3861_v30 = vrot.slane %v16248_v22, 5  ;;  %v3794_v22 = vld [vmem:[#allocation2 + $0x24] sm:$0xe] }
 0x237   : > { %13276 = vmatmul.mubr.bf16.gmra.mrb[16].mxu0 %v11973_v24  ;;  %v3442_v24 = vshll.u32 %v16465_v10, 16  ;;  %v3435_v33 = vsel %vm15442_vm2, %v3430_v61, %v3434_v0  ;;  %v11977_v50 = vcombine.low %v3411_v39, %v3421_v55  ;;  %v3454_v25 = vrot.slane %v3453_v12, 4  ;;  %v3795_v55 = vld [vmem:[#allocation2 + $0x30] sm:$0xe]  ;;  %v14636_v35 = vld [vmem:[#allocation6 + $0x188] sm:$0xff]  }
 0x238   : > { %13279 = vmatprep.mubr.bf16.mxu0 %v11974_v7  ;;  %v16476_v7 = vld [vmem:[#allocation2 + $0xc8] sm:$0x1]  ;;  %v3860_v17 = vrot.slane %v3858_v21, 4  ;;  %v3865_v44 = vrot.slane %v16242_v49, 5  ;;  %v3872_v11 = vrot.slane %v16244_v14, 5  ;;  %v11990_v3 = vrot.slane %v3794_v22, 9 }
 0x239   : > { %v3444_v6 = vrot.slane %v3442_v24, 5  ;;  %v3466_v15 = vshll.u32 %v16476_v7, 16  ;;  %v3459_v0 = vsel %vm15442_vm2, %v3454_v25, %v3458_v40  ;;  %v3859_v24 = vsel %vm16140_vm1, %v11988_v60, %v3858_v21  ;;  %v3797_v60 = vld [vmem:[#allocation2 + $0x48] sm:$0xe] }
 0x23a   : > { %v3867_v42 = vrot.slane %v3865_v44, 4  ;;  %v3868_v40 = vrot.slane %v16258_v29, 5  ;;  %v3874_v61 = vrot.slane %v3872_v11, 4  ;;  %v3875_v49 = vrot.slane %v16262_v43, 5  ;;  %v3796_v43 = vld [vmem:[#allocation2 + $0x3c] sm:$0xe] }
 0x23b   : > { %v3445_v19 = vsel %vm15442_vm2, %v3440_v54, %v3444_v6  ;;  %v3468_v48 = vrot.slane %v3466_v15, 5  ;;  %v3879_v14 = vrot.slane %v16256_v36, 5  ;;  %v3873_v39 = vsel %vm16140_vm1, %v11990_v3, %v3872_v11  ;;  %v14638_v11 = vld [vmem:[#allocation6 + $0x198] sm:$0xff]  }
 0x23c   : > { %v11978_v27 = vcombine.low %v3435_v33, %v3445_v19  ;;  %v3869_v6 = vsel %vm16140_vm1, %v3867_v42, %v3868_v40  ;;  %v3876_v29 = vsel %vm16140_vm1, %v3874_v61, %v3875_v49  ;;  %v3886_v12 = vrot.slane %v16271_v26, 5  ;;  %v14639_v42 = vld [vmem:[#allocation6 + $0x1a0] sm:$0xff]   ;;  %v3800_v40 = vld [vmem:[#allocation2 + $0x6c] sm:$0xe] }
 0x23d   : > { %v3469_v28 = vsel %vm15442_vm2, %v3464_v31, %v3468_v48  ;;  %v12006_v15 = vcombine.low %v3873_v39, %v3876_v29  ;;  %v11991_v33 = vrot.slane %v3795_v55, 9  ;;  %v3881_v19 = vrot.slane %v3879_v14, 4  ;;  %v14640_v29 = vld [vmem:[#allocation6 + $0x1a8] sm:$0xff]  }
 0x23e   : > { %v11979_v45 = vcombine.low %v3459_v0, %v3469_v28  ;;  %v3882_v21 = vrot.slane %v16274_v46, 5  ;;  %v3889_v36 = vrot.slane %v16289_v57, 5  ;;  %v3893_v31 = vrot.slane %v16287_v4, 5  ;;  %v14637_v57 = vld [vmem:[#allocation6 + $0x190] sm:$0xff]  }
 0x23f   : > { %13280 = vmatmul.mubr.bf16.gmra.mrb[20].mxu0 %v11975_v53  ;;  %v3862_v53 = vsel %vm16140_vm1, %v3860_v17, %v3861_v30  ;;  %v3880_v25 = vsel %vm16140_vm1, %v11991_v33, %v3879_v14  ;;  %v3798_v17 = vld [vmem:[#allocation2 + $0x54] sm:$0xe]  ;;  %v11993_v28 = vrot.slane %v3797_v60, 9  ;;  %v3917_v39 = vrot.slane %v16367_v62, 5  ;;  %v3801_v62 = vld [vmem:[#allocation2 + $0x78] sm:$0xe] }
 0x240   : > { %13283 = vmatprep.mubr.bf16.mxu0 %v11976_v1  ;;  %v3793_v1 = vld [vmem:[#allocation2 + $0x18] sm:$0xe]  ;;  %v12004_v37 = vcombine.low %v3859_v24, %v3862_v53  ;;  %v3883_v26 = vsel %vm16140_vm1, %v3881_v19, %v3882_v21  ;;  %v3896_v24 = vrot.slane %v16315_v38, 5  ;;  %v11994_v4 = vrot.slane %v3798_v17, 9  ;;  %v3802_v33 = vld [vmem:[#allocation2 + $0x84] sm:$0xe] }
 0x241   : > { %v11989_v18 = vrot.slane %v3793_v1, 9  ;;  %v12007_v30 = vcombine.low %v3880_v25, %v3883_v26  ;;  %v3903_v1 = vrot.slane %v16325_v56, 5  ;;  %v3894_v22 = vsel %vm16140_vm1, %v11993_v28, %v3893_v31  ;;  %v3799_v56 = vld [vmem:[#allocation2 + $0x60] sm:$0xe]  ;;  %v14642_v26 = vld [vmem:[#allocation6 + $0x1b8] sm:$0xff]   ;;  %v14644_v60 = vld [vmem:[#allocation6 + $0x1c0] sm:$0xff]  }
 0x242   : > { %v11995_v49 = vrot.slane %v3799_v56, 9  ;;  %v3931_v25 = vrot.slane %v16401_v20, 5  ;;  %v3803_v20 = vld [vmem:[#allocation2 + $0x90] sm:$0xe]  ;;  %v3806_v56 = vld [vmem:[#allocation2 + $0xb4] sm:$0xe] }
 0x243   : > { %v3866_v54 = vsel %vm16140_vm1, %v11989_v18, %v3865_v44  ;;  %v3895_v44 = vrot.slane %v3893_v31, 4  ;;  %v3914_v18 = vrot.slane %v16336_v2, 5 }
 0x244   : > { %v12005_v34 = vcombine.low %v3866_v54, %v3869_v6  ;;  %v3910_v6 = vrot.slane %v16363_v47, 5 }
 0x245   : > { %v3916_v14 = vrot.slane %v3914_v18, 4 }
 0x247   : > { %13284 = vmatmul.mubr.bf16.gmra.mrb[24].mxu0 %v11977_v50  ;;  %v11992_v50 = vrot.slane %v3796_v43, 9  ;;  %v3918_v43 = vsel %vm16140_vm1, %v3916_v14, %v3917_v39  ;;  %v3963_v39 = vrot.slane %v16457_v32, 5 }
 0x248   : > { %13287 = vmatprep.mubr.bf16.mxu0 %v11978_v27  ;;  %v3888_v27 = vrot.slane %v3886_v12, 4 }
 0x249   : > { %v3887_v46 = vsel %vm16140_vm1, %v11992_v50, %v3886_v12  ;;  %v3921_v12 = vrot.slane %v16358_v41, 5  ;;  %v11998_v41 = vrot.slane %v3802_v33, 9  ;;  %v14645_v33 = vld [vmem:[#allocation2 + $0x24] sm:$0xff]  }
 0x24a   : > { %v3890_v48 = vsel %vm16140_vm1, %v3888_v27, %v3889_v36  ;;  %v3924_v27 = vrot.slane %v16391_v8, 5 }
 0x24b   : > { %v12008_v0 = vcombine.low %v3887_v46, %v3890_v48  ;;  %v3923_v50 = vrot.slane %v3921_v12, 4  ;;  %v3935_v46 = vrot.slane %v16399_v5, 5 }
 0x24d   : > { %v3925_v31 = vsel %vm16140_vm1, %v3923_v50, %v3924_v27  ;;  %v3937_v28 = vrot.slane %v3935_v46, 4  ;;  %v14649_v50 = vld [vmem:[#allocation2 + $0x48] sm:$0xff]   ;;  %v14653_v27 = vld [vmem:[#allocation6 + $0x1d8] sm:$0xff]  }
 0x24f   : > { %13288 = vmatmul.mubr.bf16.gmra.mrb[28].mxu0 %v11979_v45  ;;  %v3907_v45 = vrot.slane %v16332_v16, 5  ;;  %v11996_v16 = vrot.slane %v3800_v40, 9 }
 0x250   : > { %13307 = vmatprep.mubr.bf16.mxu0 %v12004_v37 }
 0x251   : > { %v3909_v54 = vrot.slane %v3907_v45, 4  ;;  %v3908_v2 = vsel %vm16140_vm1, %v11995_v49, %v3907_v45  ;;  %v3915_v47 = vsel %vm16140_vm1, %v11996_v16, %v3914_v18  ;;  %v3805_v45 = vld [vmem:[#allocation2 + $0xa8] sm:$0xe]  ;;  %v12002_v49 = vrot.slane %v3806_v56, 9 }
 0x252   : > { %v12012_v21 = vcombine.low %v3915_v47, %v3918_v43  ;;  %v12001_v40 = vrot.slane %v3805_v45, 9  ;;  %v3965_v47 = vrot.slane %v3963_v39, 4  ;;  %v3966_v43 = vrot.slane %v16476_v7, 5  ;;  %v14650_v7 = vld [vmem:[#allocation6 + $0x1d0] sm:$0xff]  }
 0x253   : > { %v3911_v55 = vsel %vm16140_vm1, %v3909_v54, %v3910_v6  ;;  %v3959_v6 = vrot.slane %v16465_v10, 5 }
 0x254   : > { %v12011_v19 = vcombine.low %v3908_v2, %v3911_v55  ;;  %v3807_v2 = vld [vmem:[#allocation2 + $0xc0] sm:$0xe]  ;;  %v3967_v32 = vsel %vm16140_vm1, %v3965_v47, %v3966_v43  ;;  %v16616_v43 = vld [vmem:[#allocation2 + $0x38] sm:$0x1] }
 0x255   : > { %v12003_v10 = vrot.slane %v3807_v2, 9 }
 0x257   : > { %13308 = vmatmul.mubr.bf16.vlgmr.msra.gmra.mrb[0].mxu0 %v12005_v34  ;;  %v3928_v34 = vrot.slane %v16381_v52, 5 }
 0x258   : > { %13340 = vmatpush3.bf16.msra.mxu0 %v16453_v59  ;;  %13311 = vmatprep.mubr.bf16.mxu0 %v12006_v15  ;;  %v3900_v59 = vrot.slane %v16305_v13, 5  ;;  %v3897_v13 = vsel %vm16140_vm1, %v3895_v44, %v3896_v24  ;;  %v14641_v15 = vld [vmem:[#allocation6 + $0x1b0] sm:$0xff]   ;;  %v3938_v44 = vrot.slane %v16426_v58, 5 }
 0x259   : > { %13341 = vmatprep.subr.bf16.mxu0 %v14636_v35  ;;  %v12009_v3 = vcombine.low %v3894_v22, %v3897_v13  ;;  %v3930_v36 = vrot.slane %v3928_v34, 4  ;;  %v3929_v8 = vsel %vm16140_vm1, %v11998_v41, %v3928_v34  ;;  %v14656_v41 = vld [vmem:[#allocation6 + $0x1e0] sm:$0xff]  }
 0x25a   : > { %v3902_v53 = vrot.slane %v3900_v59, 4  ;;  %v3901_v38 = vsel %vm16140_vm1, %v11994_v4, %v3900_v59  ;;  %v3804_v59 = vld [vmem:[#allocation2 + $0x9c] sm:$0xe]  ;;  %v18879_v4 = vld [vmem:[#allocation23_spill] sm:$0xff] }
 0x25b   : > { %v3932_v48 = vsel %vm16140_vm1, %v3930_v36, %v3931_v25  ;;  %v12000_v5 = vrot.slane %v3804_v59, 9  ;;  %v14651_v36 = vld [vmem:[#allocation2 + $0x54] sm:$0xff]   ;;  %v14652_v25 = vld [vmem:[#allocation2 + $0x60] sm:$0xff]  }
 0x25c   : > { %13342 = vmatpush3.bf16.msra.mxu0 %v14636_v35  ;;  %v3904_v37 = vsel %vm16140_vm1, %v3902_v53, %v3903_v1  ;;  %v11997_v35 = vrot.slane %v3801_v62, 9  ;;  %v3945_v53 = vrot.slane %v18879_v4, 5  ;;  %v3939_v1 = vsel %vm16140_vm1, %v3937_v28, %v3938_v44  ;;  %v14657_v59 = vld [vmem:[#allocation2 + $0x84] sm:$0xff]   ;;  %v14658_v44 = vld [vmem:[#allocation2 + $0x90] sm:$0xff]  }
 0x25d   : > { %13343 = vmatprep.subr.bf16.mxu0 %v14637_v57  ;;  %v12010_v61 = vcombine.low %v3901_v38, %v3904_v37  ;;  %v18881_v38 = vld [vmem:[#allocation25_spill] sm:$0xff]  ;;  %v3964_v62 = vsel %vm16140_vm1, %v12003_v10, %v3963_v39 }
 0x25e   : > { %v3922_v52 = vsel %vm16140_vm1, %v11997_v35, %v3921_v12  ;;  %v3956_v37 = vrot.slane %v18881_v38, 5  ;;  %v12019_v34 = vcombine.low %v3964_v62, %v3967_v32  ;;  %v14648_v35 = vld [vmem:[#allocation2 + $0x3c] sm:$0xff]  }
 0x25f   : > { %13312 = vmatmul.mubr.bf16.gmra.mrb[4].mxu0 %v12007_v30  ;;  %v12013_v17 = vcombine.low %v3922_v52, %v3925_v31  ;;  %v12014_v30 = vcombine.low %v3929_v8, %v3932_v48  ;;  %v14662_v52 = vld [vmem:[#allocation6 + $0x1f0] sm:$0xff]   ;;  %v14665_v8 = vld [vmem:[#allocation6 + $0x1f8] sm:$0xff]   ;;  %v4677_v48 = vld [vmem:[#allocation2 + $0x18] sm:$0xf] }
 0x260   : > { %13315 = vmatprep.mubr.bf16.mxu0 %v12008_v0  ;;  %13344 = vmatpush3.bf16.msra.mxu0 %v14637_v57  ;;  %v3942_v57 = vrot.slane %v16410_v63, 5  ;;  %v11999_v0 = vrot.slane %v3803_v20, 9  ;;  %v3958_v54 = vrot.slane %v3956_v37, 4  ;;  %v14654_v31 = vld [vmem:[#allocation2 + $0x6c] sm:$0xff]   ;;  %v16588_v20 = vld [vmem:[#allocation2 + $0x1c] sm:$0xf] }
 0x261   : > { %13345 = vmatprep.subr.bf16.mxu0 %v14638_v11  ;;  %v4739_v28 = vshrl.u32 %v16588_v20, 16  ;;  %v16613_v10 = vld [vmem:[#allocation2 + $0x40] sm:$0xf] }
 0x262   : > { %v3944_v24 = vrot.slane %v3942_v57, 4  ;;  %v3936_v63 = vsel %vm16140_vm1, %v11999_v0, %v3935_v46  ;;  %v3943_v13 = vsel %vm16140_vm1, %v12000_v5, %v3942_v57  ;;  %v14655_v46 = vld [vmem:[#allocation2 + $0x78] sm:$0xff]   ;;  %v4735_v0 = vshll.u32 %v16588_v20, 16  ;;  %v16595_v5 = vld [vmem:[#allocation2 + $0x28] sm:$0xf] }
 0x263   : > { %v12015_v18 = vcombine.low %v3936_v63, %v3939_v1  ;;  %v16590_v57 = vld [vmem:[#allocation6 + $0x200] sm:$0xff]   ;;  %v4759_v45 = vshll.u32 %v16595_v5, 16  ;;  %v4763_v38 = vshrl.u32 %v16595_v5, 16 }
 0x264   : > { %13346 = vmatpush3.bf16.msra.mxu0 %v14638_v11  ;;  %v18880_v11 = vld [vmem:[#allocation24_spill] sm:$0xff]  ;;  %v3946_v58 = vsel %vm16140_vm1, %v3944_v24, %v3945_v53  ;;  %v4683_v53 = vld [vmem:[#allocation2 + $0x30] sm:$0xf] }
 0x265   : > { %13347 = vmatprep.subr.bf16.mxu0 %v14639_v42  ;;  %v3949_v22 = vrot.slane %v18880_v11, 5  ;;  %v16597_v11 = vrot.slane %v4735_v0, 5  ;;  %v16611_v39 = vrot.slane %v4759_v45, 5 }
 0x267   : > { %13316 = vmatmul.mubr.bf16.gmra.mrb[8].mxu0 %v12009_v3  ;;  %v3951_v3 = vrot.slane %v3949_v22, 4  ;;  %v3950_v16 = vsel %vm16140_vm1, %v12001_v40, %v3949_v22  ;;  %v4741_v22 = vrot.slane %v4739_v28, 4  ;;  %v4692_v28 = vld [vmem:[#allocation2 + $0x54] sm:$0xf] }
 0x268   : > { %13319 = vmatprep.mubr.bf16.mxu0 %v12010_v61  ;;  %13348 = vmatpush3.bf16.msra.mxu0 %v14639_v42  ;;  %v12016_v42 = vcombine.low %v3943_v13, %v3946_v58  ;;  %v3952_v61 = vrot.slane %v16455_v51, 5  ;;  %v3960_v51 = vsel %vm16140_vm1, %v3958_v54, %v3959_v6  ;;  %v16599_v13 = vld [vmem:[#allocation2 + $0x34] sm:$0xf]  ;;  %v16601_v58 = vld [vmem:[#allocation2 + $0x20] sm:$0x1] }
 0x269   : > { %13349 = vmatprep.subr.bf16.mxu0 %v14640_v29  ;;  %v4783_v40 = vshll.u32 %v16599_v13, 16  ;;  %v4742_v54 = vor.u32 %v4741_v22, %v16597_v11  ;;  %v4745_v6 = vshll.u32 %v16601_v58, 16 }
 0x26a   : > { %v3953_v14 = vsel %vm16140_vm1, %v3951_v3, %v3952_v61  ;;  %v4787_v3 = vshrl.u32 %v16599_v13, 16  ;;  %v14660_v61 = vld [vmem:[#allocation2 + $0x9c] sm:$0xff]  }
 0x26b   : > { %v12017_v55 = vcombine.low %v3950_v16, %v3953_v14  ;;  %v16609_v16 = vld [vmem:[#allocation2 + $0x2c] sm:$0x1]  ;;  %v16618_v62 = vrot.slane %v4783_v40, 5  ;;  %v4846_v40 = vshrl.u32 %v4692_v28, 16 }
 0x26c   : > { %13350 = vmatpush3.bf16.msra.mxu0 %v14640_v29  ;;  %v3957_v29 = vsel %vm16140_vm1, %v12002_v49, %v3956_v37  ;;  %v14661_v14 = vld [vmem:[#allocation2 + $0xa8] sm:$0xff]   ;;  %v4769_v47 = vshll.u32 %v16609_v16, 16  ;;  %v4789_v32 = vrot.slane %v4787_v3, 4 }
 0x26d   : > { %13351 = vmatprep.subr.bf16.mxu0 %v14641_v15  ;;  %v12018_v12 = vcombine.low %v3957_v29, %v3960_v51  ;;  %v4765_v29 = vrot.slane %v4763_v38, 4  ;;  %v16649_v38 = vld [vmem:[#allocation2 + $0x58] sm:$0xf] }
 0x26f   : > { %13320 = vmatmul.mubr.bf16.gmra.mrb[12].mxu0 %v12011_v19  ;;  %v14646_v19 = vld [vmem:[#allocation2 + $0x30] sm:$0xff]  }
 0x270   : > { %13323 = vmatprep.mubr.bf16.mxu0 %v12012_v21  ;;  %13352 = vmatpush3.bf16.msra.mxu0 %v14641_v15  ;;  %v14643_v15 = vld [vmem:[#allocation2 + $0x18] sm:$0xff]   ;;  %v14647_v21 = vld [vmem:[#allocation6 + $0x1c8] sm:$0xff]  }
 0x271   : > { %13353 = vmatprep.subr.bf16.mxu0 %v14642_v26 }
 0x274   : > { %13354 = vmatpush3.bf16.msra.mxu0 %v14642_v26  ;;  %v14659_v26 = vld [vmem:[#allocation6 + $0x1e8] sm:$0xff]  }
 0x275   : > { %13387 = vmatprep.subr.bf16.mxu0 %v14644_v60 }
 0x277   : > { %13324 = vmatmul.mubr.bf16.gmra.mrb[16].mxu0 %v12013_v17  ;;  %v4726_v17 = vshrl.u32 %v4677_v48, 16 }
 0x278   : > { %13327 = vmatprep.mubr.bf16.mxu0 %v12014_v30  ;;  %v4729_v30 = vshll.u32 %v4677_v48, 16 }
 0x279   : > { %v4728_v63 = vrot.slane %v4726_v17, 4 }
 0x27a   : > { %v4731_v1 = vrot.slane %v4729_v30, 5 }
 0x27c   : > { %v4732_v49 = vor.u32 %v4731_v1, %v4728_v63 }
 0x27f   : > { %13328 = vmatmul.mubr.bf16.gmra.mrb[20].mxu0 %v12015_v18  ;;  %v4774_v18 = vshrl.u32 %v4683_v53, 16 }
 0x280   : > { %13331 = vmatprep.mubr.bf16.mxu0 %v12016_v42  ;;  %v4777_v42 = vshll.u32 %v4683_v53, 16 }
 0x281   : > { %v4776_v2 = vrot.slane %v4774_v18, 4 }
 0x287   : > { %13332 = vmatmul.mubr.bf16.gmra.mrb[24].mxu0 %v12017_v55  ;;  %v4779_v55 = vrot.slane %v4777_v42, 5 }
 0x288   : > { %13335 = vmatprep.mubr.bf16.mxu0 %v12018_v12  ;;  %v4686_v12 = vld [vmem:[#allocation2 + $0x3c] sm:$0xf] }
 0x28f   : > { %13336 = vmatmul.mubr.bf16.gmra.mrb[28].mxu0 %v12019_v34  ;;  %v4733_v34 = vrot.slane %v4732_v49, 4 }
 0x290   : > { %13355 = vmatprep.mubr.bf16.mxu0 %v14643_v15  ;;  %v4743_v15 = vrot.slane %v4742_v54, 4  ;;  %v16657_v54 = vld [vmem:[#allocation2 + $0xd0] sm:$0xf] }
 0x297   : > { %13356 = vmatmul.mubr.bf16.vlgmr.msra.gmra.mrb[0].mxu0 %v14645_v33  ;;  %v4747_v33 = vrot.slane %v4745_v6, 5  ;;  %v16659_v6 = vld [vmem:[#allocation2 + $0xd4] sm:$0x1] }
 0x298   : > { %13388 = vmatpush3.bf16.msra.mxu0 %v14644_v60  ;;  %13359 = vmatprep.mubr.bf16.mxu0 %v14646_v19  ;;  %v4680_v60 = vld [vmem:[#allocation2 + $0x24] sm:$0xf]  ;;  %v4689_v19 = vld [vmem:[#allocation2 + $0x48] sm:$0xf] }
 0x299   : > { %13389 = vmatprep.subr.bf16.mxu0 %v14647_v21  ;;  %v4750_v24 = vshrl.u32 %v4680_v60, 16  ;;  %v4753_v4 = vshll.u32 %v4680_v60, 16  ;;  %v4825_v48 = vshll.u32 %v4689_v19, 16  ;;  %v14663_v60 = vld [vmem:[#allocation2 + $0xb4] sm:$0xff]   ;;  %v4748_v17 = vsel %vm15442_vm2, %v4743_v15, %v4747_v33  ;;  %v16669_v15 = vld [vmem:[#allocation2 + $0x64] sm:$0xf] }
 0x29b   : > { %v4752_v37 = vrot.slane %v4750_v24, 4  ;;  %v4755_v56 = vrot.slane %v4753_v4, 5  ;;  %v4827_v42 = vrot.slane %v4825_v48, 5  ;;  %v4883_v48 = vshrl.u32 %v16669_v15, 16 }
 0x29c   : > { %13390 = vmatpush3.bf16.msra.mxu0 %v14647_v21  ;;  %v4766_v21 = vor.u32 %v4765_v29, %v16611_v39 }
 0x29d   : > { %13391 = vmatprep.subr.bf16.mxu0 %v14650_v7  ;;  %v4756_v51 = vor.u32 %v4755_v56, %v4752_v37  ;;  %v16653_v56 = vld [vmem:[#allocation2 + $0x50] sm:$0x1] }
 0x29e   : > { %v16640_v24 = vrot.slane %v4766_v21, 4  ;;  %v4841_v21 = vshll.u32 %v16653_v56, 16 }
 0x29f   : > { %13360 = vmatmul.mubr.bf16.gmra.mrb[4].mxu0 %v14648_v35  ;;  %v4801_v35 = vshll.u32 %v4686_v12, 16 }
 0x2a0   : > { %13363 = vmatprep.mubr.bf16.mxu0 %v14649_v50  ;;  %13392 = vmatpush3.bf16.msra.mxu0 %v14650_v7  ;;  %v4798_v7 = vshrl.u32 %v4686_v12, 16  ;;  %v4807_v50 = vshll.u32 %v16613_v10, 16  ;;  %v5605_v12 = vrot.slane %v16659_v6, 5 }
 0x2a1   : > { %13393 = vmatprep.subr.bf16.mxu0 %v14653_v27  ;;  %v4803_v53 = vrot.slane %v4801_v35, 5  ;;  %v14666_v35 = vld [vmem:[#allocation2 + $0xcc] sm:$0xff]  }
 0x2a2   : > { %v4800_v4 = vrot.slane %v4798_v7, 4  ;;  %v16642_v63 = vrot.slane %v4807_v50, 5 }
 0x2a4   : > { %13394 = vmatpush3.bf16.msra.mxu0 %v14653_v27  ;;  %v16622_v27 = vld [vmem:[#allocation2 + $0x4c] sm:$0xf]  ;;  %v4804_v29 = vor.u32 %v4803_v53, %v4800_v4 }
 0x2a5   : > { %13395 = vmatprep.subr.bf16.mxu0 %v14656_v41  ;;  %v4831_v30 = vshll.u32 %v16622_v27, 16  ;;  %v4835_v0 = vshrl.u32 %v16622_v27, 16 }
 0x2a6   : > { %v16698_v4 = vrot.slane %v4804_v29, 4 }
 0x2a7   : > { %13364 = vmatmul.mubr.bf16.gmra.mrb[8].mxu0 %v14651_v36  ;;  %v4780_v36 = vor.u32 %v4779_v55, %v4776_v2  ;;  %v4837_v49 = vrot.slane %v4835_v0, 4  ;;  %v5446_v2 = vld [vmem:[#allocation2 + $0xcc] sm:$0xe]  ;;  %v5602_v55 = vrot.slane %v16657_v54, 5 }
 0x2a8   : > { %13367 = vmatprep.mubr.bf16.mxu0 %v14652_v25  ;;  %13396 = vmatpush3.bf16.msra.mxu0 %v14656_v41  ;;  %v16624_v41 = vrot.slane %v4756_v51, 4  ;;  %v4793_v25 = vshll.u32 %v16616_v43, 16  ;;  %v4695_v51 = vld [vmem:[#allocation2 + $0x60] sm:$0xf]  ;;  %v12091_v33 = vrot.slane %v5446_v2, 9 }
 0x2a9   : > { %13397 = vmatprep.subr.bf16.mxu0 %v14659_v26  ;;  %v16644_v1 = vrot.slane %v4780_v36, 4  ;;  %v5604_v7 = vrot.slane %v5602_v55, 4  ;;  %v4870_v36 = vshrl.u32 %v4695_v51, 16 }
 0x2aa   : > { %v16646_v22 = vrot.slane %v4793_v25, 5  ;;  %v16676_v25 = vsel %vm16140_vm1, %v12091_v33, %v5602_v55 }
 0x2ab   : > { %18882 = vst [vmem:[#allocation23_spill] sm:$0xff] %v16676_v25  ;;  %v16830_v25 = vld [vmem:[#allocation2 + $0xb8] sm:$0xf] }
 0x2ac   : > { %13398 = vmatpush3.bf16.msra.mxu0 %v14659_v26  ;;  %v4811_v26 = vshrl.u32 %v16613_v10, 16  ;;  %18886 = vst [vmem:[#allocation27_spill] sm:$0xff] %v16830_v25 }
 0x2ad   : > { %13399 = vmatprep.subr.bf16.mxu0 %v14662_v52 }
 0x2af   : > { %13368 = vmatmul.mubr.bf16.gmra.mrb[12].mxu0 %v14654_v31  ;;  %v4790_v31 = vor.u32 %v4789_v32, %v16618_v62  ;;  %v4855_v32 = vshll.u32 %v16649_v38, 16 }
 0x2b0   : > { %13371 = vmatprep.mubr.bf16.mxu0 %v14655_v46  ;;  %13400 = vmatpush3.bf16.msra.mxu0 %v14662_v52  ;;  %v16628_v52 = vrot.slane %v4769_v47, 5  ;;  %v16631_v46 = vld [vmem:[#allocation2 + $0x44] sm:$0x1]  ;;  %v4849_v47 = vshll.u32 %v4692_v28, 16 }
 0x2b1   : > { %13401 = vmatprep.subr.bf16.mxu0 %v14665_v8  ;;  %v4817_v45 = vshll.u32 %v16631_v46, 16  ;;  %v16651_v37 = vrot.slane %v4790_v31, 4  ;;  %v4873_v31 = vshll.u32 %v4695_v51, 16 }
 0x2b2   : > { %v4772_v28 = vsel %vm15442_vm2, %v16640_v24, %v16628_v52  ;;  %v4698_v24 = vld [vmem:[#allocation2 + $0x6c] sm:$0xf] }
 0x2b3   : > { %v16700_v53 = vrot.slane %v4817_v45, 5  ;;  %v4885_v45 = vrot.slane %v4883_v48, 4  ;;  %v16742_v48 = vld [vmem:[#allocation2 + $0x74] sm:$0x1] }
 0x2b4   : > { %13402 = vmatpush3.bf16.msra.mxu0 %v14665_v8  ;;  %v4822_v8 = vshrl.u32 %v4689_v19, 16 }
 0x2b5   : > { %13435 = vmatprep.subr.bf16.mxu0 %v16590_v57 }
 0x2b6   : > { %v4824_v18 = vrot.slane %v4822_v8, 4  ;;  %v4879_v8 = vshll.u32 %v16669_v15, 16 }
 0x2b7   : > { %13372 = vmatmul.mubr.bf16.gmra.mrb[16].mxu0 %v14657_v59  ;;  %v4738_v59 = vsel %vm15442_vm2, %v4733_v34, %v16597_v11  ;;  %v4813_v11 = vrot.slane %v4811_v26, 4  ;;  %v4859_v34 = vshrl.u32 %v16649_v38, 16  ;;  %v16678_v26 = vld [vmem:[#allocation2 + $0x5c] sm:$0x1] }
 0x2b8   : > { %13375 = vmatprep.mubr.bf16.mxu0 %v14658_v44  ;;  %v14664_v44 = vld [vmem:[#allocation2 + $0xc0] sm:$0xff]   ;;  %v12052_v3 = vcombine.low %v4738_v59, %v4748_v17  ;;  %v4828_v50 = vor.u32 %v4827_v42, %v4824_v18  ;;  %v4851_v59 = vrot.slane %v4849_v47, 5  ;;  %v16686_v17 = vrot.slane %v4855_v32, 5 }
 0x2b9   : > { %v4814_v19 = vor.u32 %v4813_v11, %v16642_v63  ;;  %v4796_v11 = vsel %vm15442_vm2, %v16651_v37, %v16646_v22  ;;  %v16708_v42 = vrot.slane %v4841_v21, 5  ;;  %v4865_v52 = vshll.u32 %v16678_v26, 16  ;;  %v16716_v37 = vld [vmem:[#allocation2 + $0x68] sm:$0x1]  ;;  %v4701_v21 = vld [vmem:[#allocation2 + $0x78] sm:$0xf] }
 0x2ba   : > { %v4829_v29 = vrot.slane %v4828_v50, 4  ;;  %v4894_v47 = vshrl.u32 %v4698_v24, 16  ;;  %v4897_v32 = vshll.u32 %v4698_v24, 16 }
 0x2bb   : > { %v16706_v18 = vrot.slane %v4814_v19, 4 }
 0x2bf   : > { %13376 = vmatmul.mubr.bf16.gmra.mrb[20].mxu0 %v14660_v61  ;;  %v16655_v61 = vrot.slane %v4831_v30, 5  ;;  %v4861_v30 = vrot.slane %v4859_v34, 4  ;;  %v4820_v34 = vsel %vm15442_vm2, %v16706_v18, %v16700_v53  ;;  %v16746_v53 = vld [vmem:[#allocation2 + $0x88] sm:$0xf] }
 0x2c0   : > { %13379 = vmatprep.mubr.bf16.mxu0 %v14661_v14  ;;  %v4762_v14 = vsel %vm15442_vm2, %v16624_v41, %v16611_v39  ;;  %v4848_v39 = vrot.slane %v4846_v40, 4  ;;  %v4872_v40 = vrot.slane %v4870_v36, 4 }
 0x2c1   : > { %v4838_v41 = vor.u32 %v4837_v49, %v16655_v61  ;;  %v16713_v49 = vld [vmem:[#allocation2 + $0x70] sm:$0xf]  ;;  %v4862_v22 = vor.u32 %v4861_v30, %v16686_v17  ;;  %v12053_v55 = vcombine.low %v4762_v14, %v4772_v28  ;;  %v14668_v14 = vld [vmem:[#allocation6 + $0x208] sm:$0xff]   ;;  %v4918_v30 = vshrl.u32 %v4701_v21, 16 }
 0x2c2   : > { %v4852_v2 = vor.u32 %v4851_v59, %v4848_v39  ;;  %v4903_v33 = vshll.u32 %v16713_v49, 16  ;;  %v4907_v19 = vshrl.u32 %v16713_v49, 16  ;;  %v16728_v39 = vld [vmem:[#allocation2 + $0x7c] sm:$0xf]  ;;  %v4704_v59 = vld [vmem:[#allocation2 + $0x84] sm:$0xf] }
 0x2c3   : > { %v4839_v51 = vrot.slane %v4838_v41, 4  ;;  %v4834_v41 = vsel %vm15442_vm2, %v4829_v29, %v16655_v61  ;;  %v4921_v28 = vshll.u32 %v4701_v21, 16  ;;  %v4896_v61 = vrot.slane %v4894_v47, 4 }
 0x2c4   : > { %v16748_v18 = vrot.slane %v4903_v33, 5  ;;  %v4942_v29 = vshrl.u32 %v4704_v59, 16 }
 0x2c5   : > { %v4844_v36 = vsel %vm15442_vm2, %v4839_v51, %v16708_v42  ;;  %v4909_v42 = vrot.slane %v4907_v19, 4  ;;  %v4945_v51 = vshll.u32 %v4704_v59, 16  ;;  %v4923_v47 = vrot.slane %v4921_v28, 5 }
 0x2c6   : > { %v4944_v59 = vrot.slane %v4942_v29, 4 }
 0x2c7   : > { %13380 = vmatmul.mubr.bf16.gmra.mrb[24].mxu0 %v14663_v60  ;;  %v16684_v60 = vsel %vm16140_vm1, %v5604_v7, %v5605_v12  ;;  %v16730_v7 = vrot.slane %v4865_v52, 5  ;;  %v4910_v21 = vor.u32 %v4909_v42, %v16748_v18 }
 0x2c8   : > { %13383 = vmatprep.mubr.bf16.mxu0 %v14664_v44  ;;  %18883 = vst [vmem:[#allocation24_spill] sm:$0xff] %v16684_v60  ;;  %v4786_v44 = vsel %vm15442_vm2, %v16644_v1, %v16618_v62  ;;  %v4875_v62 = vrot.slane %v4873_v31, 5  ;;  %v16711_v1 = vrot.slane %v4879_v8, 5  ;;  %v16740_v31 = vrot.slane %v4852_v2, 4 }
 0x2c9   : > { %v12054_v12 = vcombine.low %v4786_v44, %v4796_v11  ;;  %v4863_v8 = vrot.slane %v4862_v22, 4  ;;  %v4927_v44 = vshll.u32 %v16728_v39, 16  ;;  %v4899_v11 = vrot.slane %v4897_v32, 5 }
 0x2ca   : > { %v4886_v50 = vor.u32 %v4885_v45, %v16711_v1  ;;  %v14669_v45 = vld [vmem:[#allocation6 + $0x210] sm:$0xff]   ;;  %v4951_v2 = vshll.u32 %v16746_v53, 16  ;;  %v4955_v22 = vshrl.u32 %v16746_v53, 16 }
 0x2cb   : > { %v16754_v32 = vrot.slane %v4927_v44, 5  ;;  %v4900_v19 = vor.u32 %v4899_v11, %v4896_v61  ;;  %v16773_v44 = vld [vmem:[#allocation2 + $0x94] sm:$0xf]  ;;  %v16783_v61 = vrot.slane %v4910_v21, 4 }
 0x2cc   : > { %v4887_v24 = vrot.slane %v4886_v50, 4  ;;  %v4858_v50 = vsel %vm15442_vm2, %v16740_v31, %v16686_v17  ;;  %v4957_v28 = vrot.slane %v4955_v22, 4  ;;  %v4710_v22 = vld [vmem:[#allocation2 + $0x9c] sm:$0xf] }
 0x2cf   : > { %13384 = vmatmul.mubr.bf16.gmra.mrb[28].mxu0 %v14666_v35  ;;  %v4876_v35 = vor.u32 %v4875_v62, %v4872_v40  ;;  %v4913_v62 = vshll.u32 %v16742_v48, 16 }
 0x2d0   : > { %13403 = vmatprep.mubr.bf16.mxu0 %v12052_v3  ;;  %v4810_v3 = vsel %vm15442_vm2, %v16698_v4, %v16642_v63  ;;  %v4889_v63 = vshll.u32 %v16716_v37, 16  ;;  %v4931_v4 = vshrl.u32 %v16728_v39, 16 }
 0x2d1   : > { %v4877_v52 = vrot.slane %v4876_v35, 4  ;;  %v16757_v35 = vld [vmem:[#allocation2 + $0x80] sm:$0x1] }
 0x2d2   : > { %v4891_v40 = vrot.slane %v4889_v63, 5  ;;  %v4933_v33 = vrot.slane %v4931_v4, 4  ;;  %v4868_v63 = vsel %vm15442_vm2, %v4863_v8, %v16730_v7  ;;  %v16779_v8 = vld [vmem:[#allocation2 + $0x8c] sm:$0x1]  ;;  %v16781_v4 = vrot.slane %v4900_v19, 4 }
 0x2d3   : > { %v16789_v19 = vld [vmem:[#allocation2 + $0x98] sm:$0x1] }
 0x2d4   : > { %v4892_v17 = vsel %vm15442_vm2, %v4887_v24, %v4891_v40  ;;  %v4934_v31 = vor.u32 %v4933_v33, %v16754_v32  ;;  %v4979_v24 = vshrl.u32 %v16773_v44, 16  ;;  %v12057_v40 = vcombine.low %v4858_v50, %v4868_v63  ;;  %v16799_v63 = vld [vmem:[#allocation2 + $0xa0] sm:$0xf] }
 0x2d6   : > { %v4935_v33 = vrot.slane %v4934_v31, 4 }
 0x2d7   : > { %13404 = vmatmul.mubr.bf16.vlgmr.msra.gmra.mrb[0].mxu0 %v12053_v55  ;;  %v4920_v55 = vrot.slane %v4918_v30, 4  ;;  %v16771_v30 = vrot.slane %v4951_v2, 5  ;;  %v4961_v2 = vshll.u32 %v16779_v8, 16 }
 0x2d8   : > { %13436 = vmatpush3.bf16.msra.mxu0 %v16590_v57  ;;  %13407 = vmatprep.mubr.bf16.mxu0 %v12054_v12  ;;  %v12055_v57 = vcombine.low %v4810_v3, %v4820_v34  ;;  %v12056_v12 = vcombine.low %v4834_v41, %v4844_v36  ;;  %v4882_v3 = vsel %vm15442_vm2, %v4877_v52, %v16711_v1  ;;  %v14670_v34 = vld [vmem:[#allocation6 + $0x218] sm:$0xff]   ;;  %v16769_v41 = vrot.slane %v4913_v62, 5  ;;  %v14671_v62 = vld [vmem:[#allocation6 + $0x220] sm:$0xff]  }
 0x2d9   : > { %13437 = vmatprep.subr.bf16.mxu0 %v14668_v14  ;;  %v4707_v36 = vld [vmem:[#allocation2 + $0x90] sm:$0xf]  ;;  %v4924_v7 = vor.u32 %v4923_v47, %v4920_v55  ;;  %v4937_v1 = vshll.u32 %v16757_v35, 16  ;;  %v4975_v52 = vshll.u32 %v16773_v44, 16  ;;  %v12058_v55 = vcombine.low %v4882_v3, %v4892_v17  ;;  %v4713_v3 = vld [vmem:[#allocation2 + $0xa8] sm:$0xf] }
 0x2da   : > { %v4966_v11 = vshrl.u32 %v4707_v36, 16  ;;  %v4969_v42 = vshll.u32 %v4707_v36, 16  ;;  %v16803_v17 = vld [vmem:[#allocation2 + $0xac] sm:$0xf]  ;;  %v4963_v31 = vrot.slane %v4961_v2, 5 }
 0x2db   : > { %v4925_v47 = vrot.slane %v4924_v7, 4  ;;  %v16801_v36 = vrot.slane %v4975_v52, 5 }
 0x2dc   : > { %13438 = vmatpush3.bf16.msra.mxu0 %v14668_v14  ;;  %v4947_v14 = vrot.slane %v4945_v51, 5  ;;  %v4958_v51 = vor.u32 %v4957_v28, %v16771_v30  ;;  %v4968_v21 = vrot.slane %v4966_v11, 4  ;;  %v4971_v50 = vrot.slane %v4969_v42, 5 }
 0x2dd   : > { %13439 = vmatprep.subr.bf16.mxu0 %v14669_v45  ;;  %v4993_v28 = vshll.u32 %v4710_v22, 16  ;;  %v5014_v11 = vshrl.u32 %v4713_v3, 16  ;;  %v4930_v42 = vsel %vm15442_vm2, %v4925_v47, %v16754_v32 }
 0x2de   : > { %v4948_v29 = vor.u32 %v4947_v14, %v4944_v59  ;;  %v4981_v59 = vrot.slane %v4979_v24, 4  ;;  %v4990_v14 = vshrl.u32 %v4710_v22, 16  ;;  %v4959_v7 = vrot.slane %v4958_v51, 4 }
 0x2df   : > { %13408 = vmatmul.mubr.bf16.gmra.mrb[4].mxu0 %v12055_v57  ;;  %v4939_v57 = vrot.slane %v4937_v1, 5  ;;  %v4985_v1 = vshll.u32 %v16789_v19, 16  ;;  %v5023_v24 = vshll.u32 %v16803_v17, 16  ;;  %v4972_v51 = vor.u32 %v4971_v50, %v4968_v21 }
 0x2e0   : > { %13411 = vmatprep.mubr.bf16.mxu0 %v12056_v12  ;;  %13440 = vmatpush3.bf16.msra.mxu0 %v14669_v45  ;;  %v4906_v45 = vsel %vm15442_vm2, %v16781_v4, %v16748_v18  ;;  %v4916_v12 = vsel %vm15442_vm2, %v16783_v61, %v16769_v41  ;;  %v4949_v18 = vrot.slane %v4948_v29, 4  ;;  %v14672_v41 = vld [vmem:[#allocation6 + $0x228] sm:$0xff]   ;;  %v4999_v4 = vshll.u32 %v16799_v63, 16 }
 0x2e1   : > { %13441 = vmatprep.subr.bf16.mxu0 %v14670_v34  ;;  %v5003_v61 = vshrl.u32 %v16799_v63, 16  ;;  %v4940_v52 = vsel %vm15442_vm2, %v4935_v33, %v4939_v57  ;;  %v5027_v29 = vshrl.u32 %v16803_v17, 16  ;;  %v4982_v2 = vor.u32 %v4981_v59, %v16801_v36  ;;  %v16821_v33 = vld [vmem:[#allocation2 + $0xa4] sm:$0x1]  ;;  %v14673_v57 = vld [vmem:[#allocation6 + $0x230] sm:$0xff]  }
 0x2e2   : > { %v4992_v22 = vrot.slane %v4990_v14, 4  ;;  %v4995_v0 = vrot.slane %v4993_v28, 5  ;;  %v4964_v32 = vsel %vm15442_vm2, %v4959_v7, %v4963_v31  ;;  %v4987_v47 = vrot.slane %v4985_v1, 5  ;;  %18884 = vst [vmem:[#allocation25_spill] sm:$0xff] %v16821_v33  ;;  %v16825_v14 = vld [vmem:[#allocation2 + $0xb0] sm:$0x1] }
 0x2e3   : > { %v12059_v50 = vcombine.low %v4906_v45, %v4916_v12  ;;  %v12060_v59 = vcombine.low %v4930_v42, %v4940_v52  ;;  %18885 = vst [vmem:[#allocation26_spill] sm:$0xff] %v16825_v14  ;;  %v16827_v28 = vrot.slane %v5023_v24, 5  ;;  %v4973_v60 = vrot.slane %v4972_v51, 4  ;;  %v4719_v42 = vld [vmem:[#allocation2 + $0xc0] sm:$0xf] }
 0x2e4   : > { %13442 = vmatpush3.bf16.msra.mxu0 %v14670_v34  ;;  %v5017_v34 = vshll.u32 %v4713_v3, 16  ;;  %v16823_v3 = vrot.slane %v4999_v4, 5  ;;  %v4983_v7 = vrot.slane %v4982_v2, 4  ;;  %v4996_v31 = vor.u32 %v4995_v0, %v4992_v22  ;;  %v16834_v52 = vld [vmem:[#allocation2 + $0xc4] sm:$0xf] }
 0x2e5   : > { %13443 = vmatprep.subr.bf16.mxu0 %v14671_v62  ;;  %v5009_v1 = vshll.u32 %v16821_v33, 16  ;;  %v4978_v51 = vsel %vm15442_vm2, %v4973_v60, %v16801_v36  ;;  %v4722_v33 = vld [vmem:[#allocation2 + $0xcc] sm:$0xf] }
 0x2e6   : > { %v5019_v21 = vrot.slane %v5017_v34, 5  ;;  %v4988_v2 = vsel %vm15442_vm2, %v4983_v7, %v4987_v47  ;;  %v4997_v22 = vrot.slane %v4996_v31, 4 }
 0x2e7   : > { %13412 = vmatmul.mubr.bf16.gmra.mrb[8].mxu0 %v12057_v40  ;;  %v4954_v40 = vsel %vm15442_vm2, %v4949_v18, %v16771_v30  ;;  %v5029_v30 = vrot.slane %v5027_v29, 4  ;;  %v4716_v18 = vld [vmem:[#allocation2 + $0xb4] sm:$0xf]  ;;  %v5051_v29 = vshrl.u32 %v16830_v25, 16  ;;  %v12062_v7 = vcombine.low %v4978_v51, %v4988_v2 }
 0x2e8   : > { %13415 = vmatprep.mubr.bf16.mxu0 %v12058_v55  ;;  %13444 = vmatpush3.bf16.msra.mxu0 %v14671_v62  ;;  %v5005_v62 = vrot.slane %v5003_v61, 4  ;;  %v5016_v55 = vrot.slane %v5014_v11, 4  ;;  %v12061_v4 = vcombine.low %v4954_v40, %v4964_v32  ;;  %v14674_v61 = vld [vmem:[#allocation6 + $0x238] sm:$0xff]   ;;  %v5033_v11 = vshll.u32 %v16825_v14, 16  ;;  %v16846_v14 = vld [vmem:[#allocation2 + $0xbc] sm:$0x1] }
 0x2e9   : > { %13445 = vmatprep.subr.bf16.mxu0 %v14672_v41  ;;  %v5038_v34 = vshrl.u32 %v4716_v18, 16  ;;  %v5030_v0 = vor.u32 %v5029_v30, %v16827_v28  ;;  %v5041_v24 = vshll.u32 %v4716_v18, 16  ;;  %v5011_v40 = vrot.slane %v5009_v1, 5 }
 0x2ea   : > { %v5006_v45 = vor.u32 %v5005_v62, %v16823_v3  ;;  %v5020_v12 = vor.u32 %v5019_v21, %v5016_v55  ;;  %v5062_v32 = vshrl.u32 %v4719_v42, 16  ;;  %v5065_v62 = vshll.u32 %v4719_v42, 16 }
 0x2eb   : > { %v5071_v55 = vshll.u32 %v16834_v52, 16  ;;  %v5075_v21 = vshrl.u32 %v16834_v52, 16  ;;  %v5040_v18 = vrot.slane %v5038_v34, 4  ;;  %v5043_v60 = vrot.slane %v5041_v24, 5  ;;  %v16854_v34 = vld [vmem:[#allocation2 + $0xc8] sm:$0x1] }
 0x2ec   : > { %13446 = vmatpush3.bf16.msra.mxu0 %v14672_v41  ;;  %v5047_v41 = vshll.u32 %v16830_v25, 16  ;;  %v5021_v30 = vrot.slane %v5020_v12, 4  ;;  %v5031_v25 = vrot.slane %v5030_v0, 4  ;;  %v5053_v47 = vrot.slane %v5051_v29, 4 }
 0x2ed   : > { %13447 = vmatprep.subr.bf16.mxu0 %v14673_v57  ;;  %v5067_v31 = vrot.slane %v5065_v62, 5  ;;  %v5073_v1 = vrot.slane %v5071_v55, 5  ;;  %v5077_v42 = vrot.slane %v5075_v21, 4  ;;  %v5044_v24 = vor.u32 %v5043_v60, %v5040_v18 }
 0x2ee   : > { %v5049_v36 = vrot.slane %v5047_v41, 5  ;;  %v5086_v29 = vshrl.u32 %v4722_v33, 16  ;;  %v5095_v51 = vshll.u32 %v16657_v54, 16  ;;  %v5099_v2 = vshrl.u32 %v16657_v54, 16 }
 0x2ef   : > { %13416 = vmatmul.mubr.bf16.gmra.mrb[12].mxu0 %v12059_v50  ;;  %v5007_v50 = vrot.slane %v5006_v45, 4  ;;  %v5002_v45 = vsel %vm15442_vm2, %v4997_v22, %v16823_v3  ;;  %v5089_v3 = vshll.u32 %v4722_v33, 16  ;;  %v5045_v55 = vrot.slane %v5044_v24, 4 }
 0x2f0   : > { %13419 = vmatprep.mubr.bf16.mxu0 %v12060_v59  ;;  %13448 = vmatpush3.bf16.msra.mxu0 %v14673_v57  ;;  %v5035_v59 = vrot.slane %v5033_v11, 5  ;;  %v5064_v57 = vrot.slane %v5062_v32, 4  ;;  %v5057_v11 = vshll.u32 %v16846_v14, 16  ;;  %v5054_v41 = vor.u32 %v5053_v47, %v5049_v36 }
 0x2f1   : > { %13449 = vmatprep.subr.bf16.mxu0 %v14674_v61  ;;  %v5012_v12 = vsel %vm15442_vm2, %v5007_v50, %v5011_v40  ;;  %v5078_v40 = vor.u32 %v5077_v42, %v5073_v1  ;;  %v5088_v50 = vrot.slane %v5086_v29, 4  ;;  %v5050_v54 = vsel %vm15442_vm2, %v5045_v55, %v5049_v36 }
 0x2f2   : > { %v5036_v0 = vsel %vm15442_vm2, %v5031_v25, %v5035_v59  ;;  %v5068_v22 = vor.u32 %v5067_v31, %v5064_v57  ;;  %v12063_v32 = vcombine.low %v5002_v45, %v5012_v12  ;;  %v5059_v21 = vrot.slane %v5057_v11, 5  ;;  %v5431_v11 = vld [vmem:[#allocation2 + $0x18] sm:$0xe] }
 0x2f3   : > { %v5091_v25 = vrot.slane %v5089_v3, 5  ;;  %v5101_v59 = vrot.slane %v5099_v2, 4  ;;  %v5079_v60 = vrot.slane %v5078_v40, 4  ;;  %v5105_v31 = vshll.u32 %v16659_v6, 16  ;;  %v5432_v40 = vld [vmem:[#allocation2 + $0x24] sm:$0xe] }
 0x2f4   : > { %13450 = vmatpush3.bf16.msra.mxu0 %v14674_v61  ;;  %v5026_v61 = vsel %vm15442_vm2, %v5021_v30, %v16827_v28  ;;  %v5055_v28 = vrot.slane %v5054_v41, 4  ;;  %v5097_v30 = vrot.slane %v5095_v51, 5  ;;  %v5069_v18 = vrot.slane %v5068_v22, 4 }
 0x2f5   : > { %v12064_v62 = vcombine.low %v5026_v61, %v5036_v0  ;;  %v5497_v12 = vrot.slane %v16588_v20, 5  ;;  %v5107_v41 = vrot.slane %v5105_v31, 5  ;;  %v12076_v29 = vrot.slane %v5431_v11, 9 }
 0x2f6   : > { %v5060_v47 = vsel %vm15442_vm2, %v5055_v28, %v5059_v21  ;;  %v5102_v57 = vor.u32 %v5101_v59, %v5097_v30  ;;  %v5074_v42 = vsel %vm15442_vm2, %v5069_v18, %v5073_v1  ;;  %v5500_v51 = vrot.slane %v16601_v58, 5  ;;  %v5433_v58 = vld [vmem:[#allocation2 + $0x30] sm:$0xe] }
 0x2f7   : > { %13420 = vmatmul.mubr.bf16.gmra.mrb[16].mxu0 %v12061_v4  ;;  %v5081_v4 = vshll.u32 %v16854_v34, 16  ;;  %v12065_v61 = vcombine.low %v5050_v54, %v5060_v47  ;;  %v5499_v3 = vrot.slane %v5497_v12, 4  ;;  %v5504_v20 = vrot.slane %v16595_v5, 5 }
 0x2f8   : > { %13423 = vmatprep.mubr.bf16.mxu0 %v12062_v7  ;;  %v5092_v7 = vor.u32 %v5091_v25, %v5088_v50  ;;  %v5103_v24 = vrot.slane %v5102_v57, 4  ;;  %v5498_v2 = vsel %vm16140_vm1, %v12076_v29, %v5497_v12  ;;  %v12077_v55 = vrot.slane %v5432_v40, 9  ;;  %v5438_v40 = vld [vmem:[#allocation2 + $0x6c] sm:$0xe] }
 0x2f9   : > { %v5083_v33 = vrot.slane %v5081_v4, 5  ;;  %v5501_v22 = vsel %vm16140_vm1, %v5499_v3, %v5500_v51  ;;  %v5511_v4 = vrot.slane %v16599_v13, 5  ;;  %v5506_v28 = vrot.slane %v5504_v20, 4 }
 0x2fa   : > { %v5093_v36 = vrot.slane %v5092_v7, 4  ;;  %v5108_v1 = vsel %vm15442_vm2, %v5103_v24, %v5107_v41  ;;  %v5507_v21 = vrot.slane %v16609_v16, 5  ;;  %v12078_v50 = vrot.slane %v5433_v58, 9 }
 0x2fb   : > { %v5084_v45 = vsel %vm15442_vm2, %v5079_v60, %v5083_v33  ;;  %v5513_v25 = vrot.slane %v5511_v4, 4  ;;  %v5514_v5 = vrot.slane %v16616_v43, 5  ;;  %v5518_v13 = vrot.slane %v16613_v10, 5  ;;  %v5434_v60 = vld [vmem:[#allocation2 + $0x3c] sm:$0xe] }
 0x2fc   : > { %v12066_v0 = vcombine.low %v5074_v42, %v5084_v45  ;;  %v5098_v6 = vsel %vm15442_vm2, %v5093_v36, %v5097_v30  ;;  %v5505_v30 = vsel %vm16140_vm1, %v12077_v55, %v5504_v20  ;;  %v5508_v59 = vsel %vm16140_vm1, %v5506_v28, %v5507_v21  ;;  %v5435_v43 = vld [vmem:[#allocation2 + $0x48] sm:$0xe] }
 0x2fd   : > { %v5512_v18 = vsel %vm16140_vm1, %v12078_v50, %v5511_v4  ;;  %v5515_v16 = vsel %vm16140_vm1, %v5513_v25, %v5514_v5  ;;  %v5525_v33 = vrot.slane %v16622_v27, 5  ;;  %v12093_v54 = vcombine.low %v5505_v30, %v5508_v59  ;;  %v5440_v59 = vld [vmem:[#allocation2 + $0x84] sm:$0xe] }
 0x2fe   : > { %v12094_v47 = vcombine.low %v5512_v18, %v5515_v16  ;;  %v12079_v7 = vrot.slane %v5434_v60, 9  ;;  %v5520_v57 = vrot.slane %v5518_v13, 4  ;;  %v5521_v31 = vrot.slane %v16631_v46, 5 }
 0x2ff   : > { %13424 = vmatmul.mubr.bf16.gmra.mrb[20].mxu0 %v12063_v32  ;;  %v12067_v32 = vcombine.low %v5098_v6, %v5108_v1  ;;  %v12080_v42 = vrot.slane %v5435_v43, 9  ;;  %v5527_v45 = vrot.slane %v5525_v33, 4  ;;  %v5528_v10 = vrot.slane %v16653_v56, 5  ;;  %v5437_v56 = vld [vmem:[#allocation2 + $0x60] sm:$0xe] }
 0x300   : > { %13427 = vmatprep.mubr.bf16.mxu0 %v12064_v62  ;;  %v12092_v62 = vcombine.low %v5498_v2, %v5501_v22  ;;  %v5519_v12 = vsel %vm16140_vm1, %v12079_v7, %v5518_v13  ;;  %v5522_v11 = vsel %vm16140_vm1, %v5520_v57, %v5521_v31  ;;  %v5532_v27 = vrot.slane %v16649_v38, 5 }
 0x301   : > { %v5529_v46 = vsel %vm16140_vm1, %v5527_v45, %v5528_v10  ;;  %v5539_v36 = vrot.slane %v16669_v15, 5  ;;  %v12095_v24 = vcombine.low %v5519_v12, %v5522_v11  ;;  %v5535_v51 = vrot.slane %v16678_v26, 5 }
 0x302   : > { %v5534_v3 = vrot.slane %v5532_v27, 4  ;;  %v12082_v6 = vrot.slane %v5437_v56, 9  ;;  %v5542_v38 = vrot.slane %v16716_v37, 5  ;;  %v5546_v15 = vrot.slane %v16713_v49, 5  ;;  %v5439_v37 = vld [vmem:[#allocation2 + $0x78] sm:$0xe] }
 0x303   : > { %v5541_v1 = vrot.slane %v5539_v36, 4  ;;  %v5553_v4 = vrot.slane %v16728_v39, 5  ;;  %v5549_v28 = vrot.slane %v16742_v48, 5  ;;  %v12084_v21 = vrot.slane %v5439_v37, 9  ;;  %v18888_v56 = vld [vmem:[#allocation26_spill] sm:$0xff] }
 0x304   : > { %v5536_v2 = vsel %vm16140_vm1, %v5534_v3, %v5535_v51  ;;  %v5540_v22 = vsel %vm16140_vm1, %v12082_v6, %v5539_v36  ;;  %v5548_v55 = vrot.slane %v5546_v15, 4  ;;  %v5556_v49 = vrot.slane %v16757_v35, 5  ;;  %v5441_v35 = vld [vmem:[#allocation2 + $0x90] sm:$0xe]  ;;  %v5444_v6 = vld [vmem:[#allocation2 + $0xb4] sm:$0xe] }
 0x305   : > { %v5543_v26 = vsel %vm16140_vm1, %v5541_v1, %v5542_v38  ;;  %v5555_v50 = vrot.slane %v5553_v4, 4  ;;  %v5560_v39 = vrot.slane %v16746_v53, 5  ;;  %v5554_v30 = vsel %vm16140_vm1, %v12084_v21, %v5553_v4  ;;  %v5445_v38 = vld [vmem:[#allocation2 + $0xc0] sm:$0xe] }
 0x306   : > { %v5550_v5 = vsel %vm16140_vm1, %v5548_v55, %v5549_v28  ;;  %v5567_v13 = vrot.slane %v16773_v44, 5  ;;  %v12085_v60 = vrot.slane %v5440_v59, 9  ;;  %v5563_v43 = vrot.slane %v16779_v8, 5  ;;  %v18890_v28 = vld [vmem:[#allocation23_spill] sm:$0xff]  ;;  %v6566_v59 = vld [vmem:[#allocation2] sm:$0xf] }
 0x307   : > { %13428 = vmatmul.mubr.bf16.gmra.mrb[24].mxu0 %v12065_v61  ;;  %v5526_v61 = vsel %vm16140_vm1, %v12080_v42, %v5525_v33  ;;  %v5557_v48 = vsel %vm16140_vm1, %v5555_v50, %v5556_v49  ;;  %v5562_v33 = vrot.slane %v5560_v39, 4  ;;  %v5570_v53 = vrot.slane %v16789_v19, 5  ;;  %v5442_v42 = vld [vmem:[#allocation2 + $0x9c] sm:$0xe]  ;;  %v5443_v19 = vld [vmem:[#allocation2 + $0xa8] sm:$0xe] }
 0x308   : > { %13431 = vmatprep.mubr.bf16.mxu0 %v12066_v0  ;;  %v5436_v0 = vld [vmem:[#allocation2 + $0x54] sm:$0xe]  ;;  %v12096_v41 = vcombine.low %v5526_v61, %v5529_v46  ;;  %v12100_v16 = vcombine.low %v5554_v30, %v5557_v48  ;;  %v5561_v7 = vsel %vm16140_vm1, %v12085_v60, %v5560_v39  ;;  %v5574_v44 = vrot.slane %v16799_v63, 5  ;;  %v18887_v61 = vld [vmem:[#allocation25_spill] sm:$0xff]  ;;  %v14675_v50 = vld [vmem:[#allocation8 + $0x40] sm:$0xff]  }
 0x309   : > { %v12081_v29 = vrot.slane %v5436_v0, 9  ;;  %v5564_v57 = vsel %vm16140_vm1, %v5562_v33, %v5563_v43  ;;  %v5581_v45 = vrot.slane %v16803_v17, 5  ;;  %v12087_v11 = vrot.slane %v5442_v42, 9  ;;  %v18889_v17 = vld [vmem:[#allocation27_spill] sm:$0xff]  ;;  %13483 = vmatprep.subr.bf16.mxu1 %v14675_v50  ;;  %v14676_v49 = vld [vmem:[#allocation8 + $0x48] sm:$0xff]   ;;  %v14679_v39 = vld [vmem:[#allocation8 + $0x60] sm:$0xff]  }
 0x30a   : > { %v12101_v10 = vcombine.low %v5561_v7, %v5564_v57  ;;  %v5577_v46 = vrot.slane %v18887_v61, 5  ;;  %v12088_v0 = vrot.slane %v5443_v19, 9  ;;  %v5584_v63 = vrot.slane %v18888_v56, 5  ;;  %13484 = vmatpush3.bf16.msra.mxu1 %v14675_v50  ;;  %v14680_v30 = vld [vmem:[#allocation8 + $0x68] sm:$0xff]   ;;  %v14681_v48 = vld [vmem:[#allocation8 + $0x70] sm:$0xff]  }
 0x30b   : > { %v5533_v20 = vsel %vm16140_vm1, %v12081_v29, %v5532_v27  ;;  %v5576_v27 = vrot.slane %v5574_v44, 4  ;;  %v5583_v36 = vrot.slane %v5581_v45, 4  ;;  %v5588_v29 = vrot.slane %v18889_v17, 5  ;;  %13485 = vmatprep.subr.bf16.mxu1 %v14676_v49  ;;  %v6614_v7 = vld [vmem:[#allocation2 + $0x8] sm:$0x1] }
 0x30c   : > { %v12097_v58 = vcombine.low %v5533_v20, %v5536_v2  ;;  %v5582_v3 = vsel %vm16140_vm1, %v12088_v0, %v5581_v45  ;;  %v5595_v1 = vrot.slane %v16834_v52, 5  ;;  %v5598_v37 = vrot.slane %v16854_v34, 5  ;;  %v18891_v34 = vld [vmem:[#allocation24_spill] sm:$0xff] }
 0x30d   : > { %v5585_v51 = vsel %vm16140_vm1, %v5583_v36, %v5584_v63  ;;  %v18892_v21 = vcombine.low %v18890_v28, %v18891_v34 }
 0x30e   : > { %v12104_v2 = vcombine.low %v5582_v3, %v5585_v51  ;;  %v5597_v4 = vrot.slane %v5595_v1, 4  ;;  %13486 = vmatpush3.bf16.msra.mxu1 %v14676_v49 }
 0x30f   : > { %13432 = vmatmul.mubr.bf16.gmra.mrb[28].mxu0 %v12067_v32  ;;  %v12098_v32 = vcombine.low %v5540_v22, %v5543_v26  ;;  %v5590_v22 = vrot.slane %v5588_v29, 4  ;;  %v5591_v26 = vrot.slane %v16846_v14, 5 }
 0x310   : > { %13451 = vmatprep.mubr.bf16.mxu0 %v12092_v62  ;;  %v12083_v62 = vrot.slane %v5438_v40, 9  ;;  %v12090_v40 = vrot.slane %v5445_v38, 9 }
 0x312   : > { %v5547_v25 = vsel %vm16140_vm1, %v12083_v62, %v5546_v15  ;;  %v12089_v15 = vrot.slane %v5444_v6, 9  ;;  %v5596_v52 = vsel %vm16140_vm1, %v12090_v40, %v5595_v1  ;;  %v5599_v62 = vsel %vm16140_vm1, %v5597_v4, %v5598_v37 }
 0x313   : > { %v12099_v18 = vcombine.low %v5547_v25, %v5550_v5  ;;  %v12106_v14 = vcombine.low %v5596_v52, %v5599_v62  ;;  %v14677_v25 = vld [vmem:[#allocation8 + $0x50] sm:$0xff]   ;;  %v14678_v5 = vld [vmem:[#allocation8 + $0x58] sm:$0xff]  }
 0x314   : > { %13487 = vmatprep.subr.bf16.mxu1 %v14677_v25 }
 0x315   : > { %13488 = vmatpush3.bf16.msra.mxu1 %v14677_v25 }
 0x316   : > { %13489 = vmatprep.subr.bf16.mxu1 %v14678_v5 }
 0x317   : > { %13452 = vmatmul.mubr.bf16.vlgmr.msra.gmra.mrb[0].mxu0 %v12093_v54  ;;  %v12086_v54 = vrot.slane %v5441_v35, 9  ;;  %v6631_v35 = vshrl.u32 %v6566_v59, 16 }
 0x318   : > { %13455 = vmatprep.mubr.bf16.mxu0 %v12094_v47  ;;  %v5569_v47 = vrot.slane %v5567_v13, 4 }
 0x319   : > { %v5568_v31 = vsel %vm16140_vm1, %v12086_v54, %v5567_v13  ;;  %13490 = vmatpush3.bf16.msra.mxu1 %v14678_v5  ;;  %v6567_v13 = vld [vmem:[#allocation2 + $0x4] sm:$0xf]  ;;  %v6633_v33 = vrot.slane %v6631_v35, 4  ;;  %v6461_v5 = vld [vmem:[#allocation2 + $0x18] sm:$0xf] }
 0x31a   : > { %v5571_v8 = vsel %vm16140_vm1, %v5569_v47, %v5570_v53  ;;  %13491 = vmatprep.subr.bf16.mxu1 %v14679_v39  ;;  %v6644_v60 = vshrl.u32 %v6567_v13, 16  ;;  %v14682_v53 = vld [vmem:[#allocation8 + $0x78] sm:$0xff]  }
 0x31b   : > { %v12102_v12 = vcombine.low %v5568_v31, %v5571_v8  ;;  %v6650_v31 = vshll.u32 %v6614_v7, 16 }
 0x31c   : > { %v6646_v47 = vrot.slane %v6644_v60, 4 }
 0x31d   : > { %13492 = vmatpush3.bf16.msra.mxu1 %v14679_v39  ;;  %v6652_v45 = vrot.slane %v6650_v31, 5  ;;  %v6458_v31 = vld [vmem:[#allocation2 + $0x14] sm:$0x1] }
 0x31e   : > { %13493 = vmatprep.subr.bf16.mxu1 %v14680_v30 }
 0x31f   : > { %13456 = vmatmul.mubr.bf16.gmra.mrb[4].mxu0 %v12095_v24  ;;  %v5575_v24 = vsel %vm16140_vm1, %v12087_v11, %v5574_v44  ;;  %v16974_v11 = vld [vmem:[#allocation8] sm:$0xff]  }
 0x320   : > { %13459 = vmatprep.mubr.bf16.mxu0 %v12096_v41  ;;  %v5578_v41 = vsel %vm16140_vm1, %v5576_v27, %v5577_v46  ;;  %v16980_v27 = vld [vmem:[%s18731_s2] ss:$0 sm:$0xff] }
 0x321   : > { %v12103_v20 = vcombine.low %v5575_v24, %v5578_v41  ;;  %13494 = vmatpush3.bf16.msra.mxu1 %v14680_v30  ;;  %v16985_v46 = vld [vmem:[%s18732_s3] ss:$0 sm:$0xff] }
 0x322   : > { %13495 = vmatprep.subr.bf16.mxu1 %v14681_v48 }
 0x325   : > { %13496 = vmatpush3.bf16.msra.mxu1 %v14681_v48 }
 0x326   : > { %13497 = vmatprep.subr.bf16.mxu1 %v14682_v53 }
 0x327   : > { %13460 = vmatmul.mubr.bf16.gmra.mrb[8].mxu0 %v12097_v58  ;;  %v5589_v58 = vsel %vm16140_vm1, %v12089_v15, %v5588_v29 }
 0x328   : > { %13463 = vmatprep.mubr.bf16.mxu0 %v12098_v32  ;;  %v5592_v32 = vsel %vm16140_vm1, %v5590_v22, %v5591_v26 }
 0x329   : > { %v12105_v55 = vcombine.low %v5589_v58, %v5592_v32  ;;  %13498 = vmatpush3.bf16.msra.mxu1 %v14682_v53 }
 0x32a   : > { %13531 = vmatprep.subr.bf16.mxu1 %v16974_v11 }
 0x32f   : > { %13464 = vmatmul.mubr.bf16.gmra.mrb[12].mxu0 %v12099_v18  ;;  %v6634_v18 = vshll.u32 %v6566_v59, 16 }
 0x330   : > { %13467 = vmatprep.mubr.bf16.mxu0 %v12100_v16  ;;  %v6640_v16 = vshll.u32 %v6567_v13, 16 }
 0x331   : > { %v6636_v43 = vrot.slane %v6634_v18, 5 }
 0x332   : > { %v6642_v54 = vrot.slane %v6640_v16, 5 }
 0x333   : > { %v6637_v57 = vor.u32 %v6636_v43, %v6633_v33  ;;  %v6465_v43 = vld [vmem:[#allocation2 + $0x20] sm:$0x1] }
 0x334   : > { %v6647_v44 = vor.u32 %v6646_v47, %v6642_v54 }
 0x335   : > { %v6638_v8 = vrot.slane %v6637_v57, 4 }
 0x336   : > { %v6648_v42 = vrot.slane %v6647_v44, 4 }
 0x337   : > { %13468 = vmatmul.mubr.bf16.gmra.mrb[16].mxu0 %v12101_v10  ;;  %v6643_v19 = vsel %vm15442_vm2, %v6638_v8, %v6642_v54 }
 0x338   : > { %13471 = vmatprep.mubr.bf16.mxu0 %v12102_v12  ;;  %v6653_v10 = vsel %vm15442_vm2, %v6648_v42, %v6652_v45  ;;  %v14831_v42 = vld [vmem:[#allocation2 + $0xc] sm:$0xf] }
 0x339   : > { %v12150_v12 = vcombine.low %v6643_v19, %v6653_v10 }
 0x33b   : > { %13499 = vmatprep.mubr.bf16.mxu1 %v12150_v12 }
 0x33f   : > { %13472 = vmatmul.mubr.bf16.gmra.mrb[20].mxu0 %v12103_v20 }
 0x340   : > { %13475 = vmatprep.mubr.bf16.mxu0 %v12104_v2 }
 0x347   : > { %13476 = vmatmul.mubr.bf16.gmra.mrb[24].mxu0 %v12105_v55 }
 0x348   : > { %13479 = vmatprep.mubr.bf16.mxu0 %v12106_v14 }
 0x34f   : > { %13480 = vmatmul.mubr.bf16.gmra.mrb[28].mxu0 %v18892_v21 }
 0x3ea   : > { %v13453_v61 = vpop.f32.mrb[0].mxu0 }
 0x3eb   : > { %v5938_v0 = vmul.f32 %v13453_v61, %v16980_v27  ;;  %v5770_v36 = vpop.f32.mrb[1].mxu0 }
 0x3ec   : > { %v5936_v56 = vmul.f32 %v16980_v27, %v5770_v36  ;;  %v13454_v63 = vpop.f32.mrb[2].mxu0 }
 0x3ed   : > { %v5977_v24 = vadd.f32 %v16985_v46, %v5938_v0  ;;  %v5939_v41 = vmul.f32 %v13454_v63, %v16980_v27  ;;  %v5773_v17 = vpop.f32.mrb[3].mxu0 }
 0x3ee   : > { %v5975_v29 = vadd.f32 %v16985_v46, %v5936_v56  ;;  %v5937_v3 = vmul.f32 %v16980_v27, %v5773_v17 }
 0x3ef   : > { %v6009_v51 = vmax.f32 %v5977_v24, 0.0  ;;  %v5978_v6 = vadd.f32 %v16985_v46, %v5939_v41 }
 0x3f0   : > { %v6007_v1 = vmax.f32 %v5975_v29, 0.0  ;;  %v5976_v38 = vadd.f32 %v16985_v46, %v5937_v3 }
 0x3f1   : > { %v12461_v20 = vpack.c.bf16 %v6009_v51, %v6009_v51  ;;  %v6010_v2 = vmax.f32 %v5978_v6, 0.0 }
 0x3f2   : > { %v12459_v15 = vpack.c.bf16 %v6007_v1, %v6007_v1  ;;  %v6008_v22 = vmax.f32 %v5976_v38, 0.0  ;;  %v13457_v26 = vpop.f32.mrb[4].mxu0 }
 0x3f3   : > { %v6153_v40 = vshrl.u32 %v12461_v20, 16  ;;  %v6156_v4 = vshll.u32 %v12461_v20, 16  ;;  %v12462_v37 = vpack.c.bf16 %v6010_v2, %v6010_v2  ;;  %v5942_v58 = vmul.f32 %v13457_v26, %v16980_v27  ;;  %v5786_v32 = vpop.f32.mrb[5].mxu0  ;;  %v6475_v26 = vld [vmem:[#allocation2 + $0x30] sm:$0xf] }
 0x3f4   : > { %v6136_v52 = vshrl.u32 %v12459_v15, 16  ;;  %v6139_v62 = vshll.u32 %v12459_v15, 16  ;;  %v12460_v55 = vpack.c.bf16 %v6008_v22, %v6008_v22  ;;  %v5940_v14 = vmul.f32 %v16980_v27, %v5786_v32  ;;  %v13458_v28 = vpop.f32.mrb[6].mxu0 }
 0x3f5   : > { %v6155_v34 = vrot.slane %v6153_v40, 7  ;;  %v6161_v21 = vshrl.u32 %v12462_v37, 16  ;;  %v6164_v50 = vshll.u32 %v12462_v37, 16  ;;  %v5981_v49 = vadd.f32 %v16985_v46, %v5942_v58  ;;  %v5789_v25 = vpop.f32.mrb[7].mxu0 }
 0x3f6   : > { %v6138_v39 = vrot.slane %v6136_v52, 7  ;;  %v6144_v30 = vshrl.u32 %v12460_v55, 16  ;;  %v6147_v48 = vshll.u32 %v12460_v55, 16  ;;  %v5979_v59 = vadd.f32 %v16985_v46, %v5940_v14 }
 0x3f7   : > { %v6158_v13 = vor.u32 %v6156_v4, %v6155_v34  ;;  %v6159_v35 = vrot.slane %v6155_v34, 4  ;;  %v6163_v18 = vrot.slane %v6161_v21, 7  ;;  %v6013_v16 = vmax.f32 %v5981_v49, 0.0 }
 0x3f8   : > { %v6141_v60 = vor.u32 %v6139_v62, %v6138_v39  ;;  %v6142_v33 = vrot.slane %v6138_v39, 4  ;;  %v6146_v54 = vrot.slane %v6144_v30, 7  ;;  %v6011_v47 = vmax.f32 %v5979_v59, 0.0  ;;  %v6468_v62 = vld [vmem:[#allocation2 + $0x24] sm:$0xf] }
 0x3f9   : > { %v6462_v7 = vsel %vm15548_vm13, %v6158_v13, %v6461_v5  ;;  %v6166_v57 = vor.u32 %v6164_v50, %v6163_v18  ;;  %v6168_v44 = vrot.slane %v6163_v18, 4  ;;  %v12465_v8 = vpack.c.bf16 %v6013_v16, %v6013_v16 }
 0x3fa   : > { %6463 = vst [vmem:[#allocation2 + $0x18] sm:$0xf] %v6462_v7  ;;  %v6455_v45 = vsel %vm15548_vm13, %v6141_v60, %v14831_v42  ;;  %v6149_v19 = vor.u32 %v6147_v48, %v6146_v54  ;;  %v6151_v10 = vrot.slane %v6146_v54, 4  ;;  %v12463_v12 = vpack.c.bf16 %v6011_v47, %v6011_v47  ;;  %v13461_v61 = vpop.f32.mrb[8].mxu0 }
 0x3fb   : > { %6456 = vst [vmem:[#allocation2 + $0xc] sm:$0xf] %v6455_v45  ;;  %v6167_v36 = vsel %vm15538_vm12, %v6159_v35, %v6166_v57  ;;  %v6466_v63 = vsel %vm15554_vm14, %v6168_v44, %v6465_v43  ;;  %v6187_v24 = vshrl.u32 %v12465_v8, 16  ;;  %v6190_v41 = vshll.u32 %v12465_v8, 16  ;;  %v5802_v17 = vpop.f32.mrb[9].mxu0 }
 0x3fc   : > { %6464 = vst [vmem:[#allocation2 + $0x1c] sm:$0xf] %v6167_v36  ;;  %6467 = vst [vmem:[#allocation2 + $0x20] sm:$0x1] %v6466_v63  ;;  %v6150_v29 = vsel %vm15538_vm12, %v6142_v33, %v6149_v19  ;;  %v6459_v3 = vsel %vm15554_vm14, %v6151_v10, %v6458_v31  ;;  %v6170_v51 = vshrl.u32 %v12463_v12, 16  ;;  %v6173_v6 = vshll.u32 %v12463_v12, 16 }
 0x3fd   : > { %v13462_v1 = vpop.f32.mrb[10].mxu0  ;;  %6457 = vst [vmem:[#allocation2 + $0x10] sm:$0xf] %v6150_v29  ;;  %6460 = vst [vmem:[#allocation2 + $0x14] sm:$0x1] %v6459_v3  ;;  %v17011_v38 = vrot.slane %v6187_v24, 7  ;;  %v5943_v20 = vmul.f32 %v13458_v28, %v16980_v27  ;;  %v5941_v2 = vmul.f32 %v16980_v27, %v5789_v25  ;;  %v5946_v15 = vmul.f32 %v13461_v61, %v16980_v27 }
 0x3fe   : > { %v5805_v22 = vpop.f32.mrb[11].mxu0  ;;  %v17016_v40 = vrot.slane %v6170_v51, 7  ;;  %v5944_v4 = vmul.f32 %v16980_v27, %v5802_v17  ;;  %v5947_v37 = vmul.f32 %v13462_v1, %v16980_v27  ;;  %v6479_v10 = vld [vmem:[#allocation2 + $0x38] sm:$0x1]  ;;  %v6472_v17 = vld [vmem:[#allocation2 + $0x2c] sm:$0x1] }
 0x3ff   : > { %v5945_v58 = vmul.f32 %v16980_v27, %v5805_v22  ;;  %v6192_v32 = vor.u32 %v6190_v41, %v17011_v38  ;;  %v6193_v52 = vrot.slane %v17011_v38, 4  ;;  %v5982_v55 = vadd.f32 %v16985_v46, %v5943_v20  ;;  %v6489_v29 = vld [vmem:[#allocation2 + $0x48] sm:$0xf] }
 0x400   : > { %v5980_v14 = vadd.f32 %v16985_v46, %v5941_v2  ;;  %v6175_v28 = vor.u32 %v6173_v6, %v17016_v40  ;;  %v6176_v34 = vrot.slane %v17016_v40, 4  ;;  %v5985_v21 = vadd.f32 %v16985_v46, %v5946_v15  ;;  %v6482_v40 = vld [vmem:[#allocation2 + $0x3c] sm:$0xf] }
 0x401   : > { %v5983_v50 = vadd.f32 %v16985_v46, %v5944_v4  ;;  %v6476_v49 = vsel %vm15548_vm13, %v6192_v32, %v6475_v26  ;;  %v6014_v25 = vmax.f32 %v5982_v55, 0.0  ;;  %v5986_v39 = vadd.f32 %v16985_v46, %v5947_v37 }
 0x402   : > { %v6012_v5 = vmax.f32 %v5980_v14, 0.0  ;;  %6477 = vst [vmem:[#allocation2 + $0x30] sm:$0xf] %v6476_v49  ;;  %v6469_v30 = vsel %vm15548_vm13, %v6175_v28, %v6468_v62  ;;  %v6017_v48 = vmax.f32 %v5985_v21, 0.0  ;;  %v5984_v13 = vadd.f32 %v16985_v46, %v5945_v58  ;;  %v13465_v35 = vpop.f32.mrb[12].mxu0 }
 0x403   : > { %v6015_v59 = vmax.f32 %v5983_v50, 0.0  ;;  %6470 = vst [vmem:[#allocation2 + $0x24] sm:$0xf] %v6469_v30  ;;  %v12466_v18 = vpack.c.bf16 %v6014_v25, %v6014_v25  ;;  %v6018_v60 = vmax.f32 %v5986_v39, 0.0  ;;  %v5950_v33 = vmul.f32 %v13465_v35, %v16980_v27  ;;  %v5818_v43 = vpop.f32.mrb[13].mxu0 }
 0x404   : > { %v12464_v16 = vpack.c.bf16 %v6012_v5, %v6012_v5  ;;  %v12469_v54 = vpack.c.bf16 %v6017_v48, %v6017_v48  ;;  %v6016_v7 = vmax.f32 %v5984_v13, 0.0  ;;  %v5948_v57 = vmul.f32 %v16980_v27, %v5818_v43  ;;  %v13466_v44 = vpop.f32.mrb[14].mxu0 }
 0x405   : > { %v12467_v47 = vpack.c.bf16 %v6015_v59, %v6015_v59  ;;  %v6195_v31 = vshrl.u32 %v12466_v18, 16  ;;  %v6198_v8 = vshll.u32 %v12466_v18, 16  ;;  %v5821_v19 = vpop.f32.mrb[15].mxu0  ;;  %v12470_v3 = vpack.c.bf16 %v6018_v60, %v6018_v60 }
 0x406   : > { %v6178_v42 = vshrl.u32 %v12464_v16, 16  ;;  %v6181_v45 = vshll.u32 %v12464_v16, 16  ;;  %v6221_v12 = vshrl.u32 %v12469_v54, 16  ;;  %v6224_v61 = vshll.u32 %v12469_v54, 16 }
 0x407   : > { %v6204_v36 = vshrl.u32 %v12467_v47, 16  ;;  %v6207_v63 = vshll.u32 %v12467_v47, 16  ;;  %v6197_v24 = vrot.slane %v6195_v31, 7  ;;  %v12468_v51 = vpack.c.bf16 %v6016_v7, %v6016_v7 }
 0x408   : > { %v6180_v41 = vrot.slane %v6178_v42, 7  ;;  %v6223_v6 = vrot.slane %v6221_v12, 7  ;;  %v5989_v38 = vadd.f32 %v16985_v46, %v5950_v33  ;;  %v5987_v20 = vadd.f32 %v16985_v46, %v5948_v57  ;;  %v6493_v33 = vld [vmem:[#allocation2 + $0x50] sm:$0x1] }
 0x409   : > { %v6206_v1 = vrot.slane %v6204_v36, 7  ;;  %v6200_v2 = vor.u32 %v6198_v8, %v6197_v24  ;;  %v6202_v15 = vrot.slane %v6197_v24, 4  ;;  %v6229_v25 = vshrl.u32 %v12470_v3, 16  ;;  %v6486_v8 = vld [vmem:[#allocation2 + $0x44] sm:$0x1] }
 0x40a   : > { %v6183_v22 = vor.u32 %v6181_v45, %v6180_v41  ;;  %v6185_v26 = vrot.slane %v6180_v41, 4  ;;  %v6226_v4 = vor.u32 %v6224_v61, %v6223_v6  ;;  %v6227_v37 = vrot.slane %v6223_v6, 4  ;;  %v13469_v62 = vpop.f32.mrb[16].mxu0 }
 0x40b   : > { %v6209_v58 = vor.u32 %v6207_v63, %v6206_v1  ;;  %v6210_v32 = vrot.slane %v6206_v1, 4  ;;  %v6201_v55 = vsel %vm15538_vm12, %v6193_v52, %v6200_v2  ;;  %v6480_v14 = vsel %vm15554_vm14, %v6202_v15, %v6479_v10  ;;  %v5834_v50 = vpop.f32.mrb[17].mxu0  ;;  %v6503_v1 = vld [vmem:[#allocation2 + $0x60] sm:$0xf] }
 0x40c   : > { %v6184_v28 = vsel %vm15538_vm12, %v6176_v34, %v6183_v22  ;;  %v6473_v21 = vsel %vm15554_vm14, %v6185_v26, %v6472_v17  ;;  %6478 = vst [vmem:[#allocation2 + $0x34] sm:$0xf] %v6201_v55  ;;  %6481 = vst [vmem:[#allocation2 + $0x38] sm:$0x1] %v6480_v14  ;;  %v6490_v49 = vsel %vm15548_vm13, %v6226_v4, %v6489_v29  ;;  %v6232_v5 = vshll.u32 %v12470_v3, 16  ;;  %v13470_v39 = vpop.f32.mrb[18].mxu0 }
 0x40d   : > { %6471 = vst [vmem:[#allocation2 + $0x28] sm:$0xf] %v6184_v28  ;;  %6474 = vst [vmem:[#allocation2 + $0x2c] sm:$0x1] %v6473_v21  ;;  %v6483_v52 = vsel %vm15548_vm13, %v6209_v58, %v6482_v40  ;;  %v6212_v34 = vshrl.u32 %v12468_v51, 16  ;;  %v6215_v30 = vshll.u32 %v12468_v51, 16  ;;  %v5951_v18 = vmul.f32 %v13466_v44, %v16980_v27 }
 0x40e   : > { %6491 = vst [vmem:[#allocation2 + $0x48] sm:$0xf] %v6490_v49  ;;  %6484 = vst [vmem:[#allocation2 + $0x3c] sm:$0xf] %v6483_v52  ;;  %v6021_v48 = vmax.f32 %v5989_v38, 0.0  ;;  %v6019_v59 = vmax.f32 %v5987_v20, 0.0  ;;  %v5949_v16 = vmul.f32 %v16980_v27, %v5821_v19  ;;  %v5954_v60 = vmul.f32 %v13469_v62, %v16980_v27 }
 0x40f   : > { %v17051_v13 = vpop.f32.mrb[19].mxu0  ;;  %v6231_v35 = vrot.slane %v6229_v25, 7  ;;  %v6214_v43 = vrot.slane %v6212_v34, 7  ;;  %v5952_v7 = vmul.f32 %v16980_v27, %v5834_v50  ;;  %v5990_v42 = vadd.f32 %v16985_v46, %v5951_v18  ;;  %v6496_v4 = vld [vmem:[#allocation2 + $0x54] sm:$0xf] }
 0x410   : > { %v12473_v54 = vpack.c.bf16 %v6021_v48, %v6021_v48  ;;  %v12471_v47 = vpack.c.bf16 %v6019_v59, %v6019_v59  ;;  %v5988_v45 = vadd.f32 %v16985_v46, %v5949_v16  ;;  %v5993_v2 = vadd.f32 %v16985_v46, %v5954_v60  ;;  %v6568_v25 = vld [vmem:[#allocation2 + $0xc] sm:$0xf]  ;;  %v6507_v34 = vld [vmem:[#allocation2 + $0x68] sm:$0x1] }
 0x411   : > { %v6234_v57 = vor.u32 %v6232_v5, %v6231_v35  ;;  %v6236_v31 = vrot.slane %v6231_v35, 4  ;;  %v6217_v10 = vor.u32 %v6215_v30, %v6214_v43  ;;  %v6219_v12 = vrot.slane %v6214_v43, 4 }
 0x412   : > { %v6255_v44 = vshrl.u32 %v12473_v54, 16  ;;  %v6258_v61 = vshll.u32 %v12473_v54, 16  ;;  %v6238_v63 = vshrl.u32 %v12471_v47, 16  ;;  %v6241_v24 = vshll.u32 %v12471_v47, 16  ;;  %v17063_v41 = vpop.f32.mrb[20].mxu0 }
 0x413   : > { %v6235_v19 = vsel %vm15538_vm12, %v6227_v37, %v6234_v57  ;;  %v6494_v36 = vsel %vm15554_vm14, %v6236_v31, %v6493_v33  ;;  %v6218_v17 = vsel %vm15538_vm12, %v6210_v32, %v6217_v10  ;;  %v6487_v29 = vsel %vm15554_vm14, %v6219_v12, %v6486_v8  ;;  %v17069_v6 = vpop.f32.mrb[21].mxu0  ;;  %v6500_v31 = vld [vmem:[#allocation2 + $0x5c] sm:$0x1] }
 0x414   : > { %6492 = vst [vmem:[#allocation2 + $0x4c] sm:$0xf] %v6235_v19  ;;  %6495 = vst [vmem:[#allocation2 + $0x50] sm:$0x1] %v6494_v36  ;;  %v6257_v3 = vrot.slane %v6255_v44, 7  ;;  %v6022_v51 = vmax.f32 %v5990_v42, 0.0  ;;  %v5991_v15 = vadd.f32 %v16985_v46, %v5952_v7  ;;  %v5955_v58 = vmul.f32 %v13470_v39, %v16980_v27 }
 0x415   : > { %6485 = vst [vmem:[#allocation2 + $0x40] sm:$0xf] %v6218_v17  ;;  %6488 = vst [vmem:[#allocation2 + $0x44] sm:$0x1] %v6487_v29  ;;  %v6240_v38 = vrot.slane %v6238_v63, 7  ;;  %v6020_v20 = vmax.f32 %v5988_v45, 0.0  ;;  %v5953_v16 = vmul.f32 %v16980_v27, %v17051_v13 }
 0x416   : > { %v17073_v22 = vpop.f32.mrb[22].mxu0  ;;  %v6260_v26 = vor.u32 %v6258_v61, %v6257_v3  ;;  %v6261_v40 = vrot.slane %v6257_v3, 4  ;;  %v12474_v37 = vpack.c.bf16 %v6022_v51, %v6022_v51  ;;  %v6025_v28 = vmax.f32 %v5993_v2, 0.0  ;;  %v6517_v63 = vld [vmem:[#allocation2 + $0x78] sm:$0xf] }
 0x417   : > { %v17076_v32 = vpop.f32.mrb[23].mxu0  ;;  %v6243_v62 = vor.u32 %v6241_v24, %v6240_v38  ;;  %v6244_v55 = vrot.slane %v6240_v38, 4  ;;  %v12472_v14 = vpack.c.bf16 %v6020_v20, %v6020_v20  ;;  %v6023_v52 = vmax.f32 %v5991_v15, 0.0  ;;  %v6569_v29 = vld [vmem:[#allocation2 + $0x10] sm:$0xf] }
 0x418   : > { %v6504_v21 = vsel %vm15548_vm13, %v6260_v26, %v6503_v1  ;;  %v6263_v50 = vshrl.u32 %v12474_v37, 16  ;;  %v6266_v49 = vshll.u32 %v12474_v37, 16  ;;  %v12477_v48 = vpack.c.bf16 %v6025_v28, %v6025_v28  ;;  %v6510_v20 = vld [vmem:[#allocation2 + $0x6c] sm:$0xf] }
 0x419   : > { %6505 = vst [vmem:[#allocation2 + $0x60] sm:$0xf] %v6504_v21  ;;  %v6497_v5 = vsel %vm15548_vm13, %v6243_v62, %v6496_v4  ;;  %v6246_v30 = vshrl.u32 %v12472_v14, 16  ;;  %v6249_v39 = vshll.u32 %v12472_v14, 16  ;;  %v12475_v35 = vpack.c.bf16 %v6023_v52, %v6023_v52  ;;  %v6615_v4 = vld [vmem:[#allocation2 + $0x14] sm:$0x1] }
 0x41a   : > { %6498 = vst [vmem:[#allocation2 + $0x54] sm:$0xf] %v6497_v5  ;;  %v6265_v59 = vrot.slane %v6263_v50, 7  ;;  %v5994_v18 = vadd.f32 %v16985_v46, %v5955_v58  ;;  %v6289_v33 = vshrl.u32 %v12477_v48, 16  ;;  %v6292_v43 = vshll.u32 %v12477_v48, 16  ;;  %v17085_v47 = vpop.f32.mrb[24].mxu0 }
 0x41b   : > { %v6248_v60 = vrot.slane %v6246_v30, 7  ;;  %v6655_v54 = vshrl.u32 %v6568_v25, 16  ;;  %v6272_v8 = vshrl.u32 %v12475_v35, 16  ;;  %v6275_v42 = vshll.u32 %v12475_v35, 16  ;;  %v17087_v45 = vpop.f32.mrb[25].mxu0 }
 0x41c   : > { %v6268_v7 = vor.u32 %v6266_v49, %v6265_v59  ;;  %v6270_v57 = vrot.slane %v6265_v59, 4  ;;  %v17089_v44 = vrot.slane %v6289_v33, 7  ;;  %v6026_v61 = vmax.f32 %v5994_v18, 0.0  ;;  %v17091_v19 = vpop.f32.mrb[26].mxu0  ;;  %v6570_v14 = vld [vmem:[#allocation2 + $0x18] sm:$0xf] }
 0x41d   : > { %v6251_v10 = vor.u32 %v6249_v39, %v6248_v60  ;;  %v6253_v12 = vrot.slane %v6248_v60, 4  ;;  %v17097_v24 = vrot.slane %v6272_v8, 7  ;;  %v5992_v17 = vadd.f32 %v16985_v46, %v5953_v16  ;;  %v17100_v3 = vpop.f32.mrb[27].mxu0  ;;  %v6571_v52 = vld [vmem:[#allocation2 + $0x1c] sm:$0xf] }
 0x41e   : > { %v6269_v13 = vsel %vm15538_vm12, %v6261_v40, %v6268_v7  ;;  %v6508_v36 = vsel %vm15554_vm14, %v6270_v57, %v6507_v34  ;;  %v6294_v38 = vor.u32 %v6292_v43, %v17089_v44  ;;  %v6295_v2 = vrot.slane %v17089_v44, 4  ;;  %v6521_v5 = vld [vmem:[#allocation2 + $0x80] sm:$0x1] }
 0x41f   : > { %6506 = vst [vmem:[#allocation2 + $0x64] sm:$0xf] %v6269_v13  ;;  %6509 = vst [vmem:[#allocation2 + $0x68] sm:$0x1] %v6508_v36  ;;  %v6252_v51 = vsel %vm15538_vm12, %v6244_v55, %v6251_v10  ;;  %v6501_v1 = vsel %vm15554_vm14, %v6253_v12, %v6500_v31  ;;  %v6277_v15 = vor.u32 %v6275_v42, %v17097_v24  ;;  %v6024_v40 = vmax.f32 %v5992_v17, 0.0 }
 0x420   : > { %6499 = vst [vmem:[#allocation2 + $0x58] sm:$0xf] %v6252_v51  ;;  %6502 = vst [vmem:[#allocation2 + $0x5c] sm:$0x1] %v6501_v1  ;;  %v12478_v26 = vpack.c.bf16 %v6026_v61, %v6026_v61  ;;  %v6518_v37 = vsel %vm15548_vm13, %v6294_v38, %v6517_v63  ;;  %v6657_v58 = vrot.slane %v6655_v54, 4  ;;  %v6658_v62 = vshll.u32 %v6568_v25, 16 }
 0x421   : > { %v6664_v55 = vshll.u32 %v6569_v29, 16  ;;  %6519 = vst [vmem:[#allocation2 + $0x78] sm:$0xf] %v6518_v37  ;;  %v6278_v28 = vrot.slane %v17097_v24, 4  ;;  %v6511_v21 = vsel %vm15548_vm13, %v6277_v15, %v6510_v20  ;;  %v12476_v49 = vpack.c.bf16 %v6024_v40, %v6024_v40  ;;  %v6514_v10 = vld [vmem:[#allocation2 + $0x74] sm:$0x1] }
 0x422   : > { %v6297_v50 = vshrl.u32 %v12478_v26, 16  ;;  %6512 = vst [vmem:[#allocation2 + $0x6c] sm:$0xf] %v6511_v21  ;;  %v6660_v34 = vrot.slane %v6658_v62, 5  ;;  %v6668_v39 = vshrl.u32 %v6569_v29, 16  ;;  %v6674_v48 = vshll.u32 %v6615_v4, 16 }
 0x423   : > { %v6666_v30 = vrot.slane %v6664_v55, 5  ;;  %v17114_v59 = vpop.f32.mrb[28].mxu0  ;;  %v6300_v35 = vshll.u32 %v12478_v26, 16  ;;  %v6280_v18 = vshrl.u32 %v12476_v49, 16  ;;  %v6283_v16 = vshll.u32 %v12476_v49, 16 }
 0x424   : > { %v6299_v25 = vrot.slane %v6297_v50, 7  ;;  %v17116_v60 = vpop.f32.mrb[29].mxu0  ;;  %v6661_v33 = vor.u32 %v6660_v34, %v6657_v58  ;;  %v6670_v43 = vrot.slane %v6668_v39, 4  ;;  %v6676_v54 = vrot.slane %v6674_v48, 5  ;;  %v6616_v36 = vld [vmem:[#allocation2 + $0x20] sm:$0x1] }
 0x425   : > { %v6679_v7 = vshrl.u32 %v6570_v14, 16  ;;  %v17118_v57 = vpop.f32.mrb[30].mxu0  ;;  %v6282_v42 = vrot.slane %v6280_v18, 7  ;;  %v6682_v12 = vshll.u32 %v6570_v14, 16  ;;  %v6688_v24 = vshll.u32 %v6571_v52, 16 }
 0x426   : > { %v6302_v31 = vor.u32 %v6300_v35, %v6299_v25  ;;  %v6304_v8 = vrot.slane %v6299_v25, 4  ;;  %v17120_v44 = vpop.f32.mrb[31].mxu0  ;;  %v6662_v61 = vrot.slane %v6661_v33, 4  ;;  %v6671_v13 = vor.u32 %v6670_v43, %v6666_v30  ;;  %v6572_v21 = vld [vmem:[#allocation2 + $0x24] sm:$0xf] }
 0x427   : > { %v6681_v63 = vrot.slane %v6679_v7, 4  ;;  %v6285_v51 = vor.u32 %v6283_v16, %v6282_v42  ;;  %v6287_v1 = vrot.slane %v6282_v42, 4  ;;  %v6684_v15 = vrot.slane %v6682_v12, 5  ;;  %v6573_v25 = vld [vmem:[#allocation2 + $0x28] sm:$0xf] }
 0x428   : > { %v6303_v17 = vsel %vm15538_vm12, %v6295_v2, %v6302_v31  ;;  %v6522_v29 = vsel %vm15554_vm14, %v6304_v8, %v6521_v5  ;;  %v6667_v38 = vsel %vm15442_vm2, %v6662_v61, %v6666_v30  ;;  %v6672_v20 = vrot.slane %v6671_v13, 4  ;;  %v14684_v5 = vld [vmem:[#allocation8 + $0x8] sm:$0xff]   ;;  %v14685_v8 = vld [vmem:[#allocation8 + $0x10] sm:$0xff]  }
 0x429   : > { %6520 = vst [vmem:[#allocation2 + $0x7c] sm:$0xf] %v6303_v17  ;;  %6523 = vst [vmem:[#allocation2 + $0x80] sm:$0x1] %v6522_v29  ;;  %v6690_v26 = vrot.slane %v6688_v24, 5  ;;  %v6286_v40 = vsel %vm15538_vm12, %v6278_v28, %v6285_v51  ;;  %v6515_v4 = vsel %vm15554_vm14, %v6287_v1, %v6514_v10  ;;  %v6692_v2 = vshrl.u32 %v6571_v52, 16 }
 0x42a   : > { %v6698_v37 = vshll.u32 %v6616_v36, 16  ;;  %6513 = vst [vmem:[#allocation2 + $0x70] sm:$0xf] %v6286_v40  ;;  %6516 = vst [vmem:[#allocation2 + $0x74] sm:$0x1] %v6515_v4  ;;  %v6677_v58 = vsel %vm15442_vm2, %v6672_v20, %v6676_v54  ;;  %v6685_v62 = vor.u32 %v6684_v15, %v6681_v63  ;;  %v5958_v55 = vmul.f32 %v17063_v41, %v16980_v27  ;;  %v14686_v40 = vld [vmem:[#allocation8 + $0x18] sm:$0xff]  }
 0x42b   : > { %v5956_v14 = vmul.f32 %v16980_v27, %v17069_v6  ;;  %v12151_v50 = vcombine.low %v6667_v38, %v6677_v58  ;;  %v6694_v28 = vrot.slane %v6692_v2, 4  ;;  %v5959_v52 = vmul.f32 %v17073_v22, %v16980_v27  ;;  %v6531_v1 = vld [vmem:[#allocation2 + $0x90] sm:$0xf] }
 0x42c   : > { %v6700_v49 = vrot.slane %v6698_v37, 5  ;;  %v6686_v34 = vrot.slane %v6685_v62, 4  ;;  %v5997_v30 = vadd.f32 %v16985_v46, %v5958_v55  ;;  %v5957_v48 = vmul.f32 %v16980_v27, %v17076_v32  ;;  %v6524_v37 = vld [vmem:[#allocation2 + $0x84] sm:$0xf] }
 0x42d   : > { %v5995_v39 = vadd.f32 %v16985_v46, %v5956_v14  ;;  %13500 = vmatmul.mubr.bf16.vlgmr.msra.gmra.mrb[0].mxu1 %v12151_v50  ;;  %v6695_v41 = vor.u32 %v6694_v28, %v6690_v26  ;;  %v5998_v6 = vadd.f32 %v16985_v46, %v5959_v52  ;;  %v6703_v35 = vshrl.u32 %v6572_v21, 16  ;;  %v6617_v50 = vld [vmem:[#allocation2 + $0x2c] sm:$0x1] }
 0x42e   : > { %v6706_v18 = vshll.u32 %v6572_v21, 16  ;;  %13532 = vmatpush3.bf16.msra.mxu1 %v16974_v11  ;;  %v6691_v22 = vsel %vm15442_vm2, %v6686_v34, %v6690_v26  ;;  %v6029_v16 = vmax.f32 %v5997_v30, 0.0  ;;  %v5996_v43 = vadd.f32 %v16985_v46, %v5957_v48  ;;  %v6535_v30 = vld [vmem:[#allocation2 + $0x98] sm:$0x1] }
 0x42f   : > { %v6027_v33 = vmax.f32 %v5995_v39, 0.0  ;;  %v6696_v54 = vrot.slane %v6695_v41, 4  ;;  %v6030_v7 = vmax.f32 %v5998_v6, 0.0  ;;  %13533 = vmatprep.subr.bf16.mxu1 %v14684_v5  ;;  %v6705_v32 = vrot.slane %v6703_v35, 4  ;;  %v14687_v35 = vld [vmem:[#allocation8 + $0x20] sm:$0xff]  }
 0x430   : > { %v6708_v31 = vrot.slane %v6706_v18, 5  ;;  %v12481_v42 = vpack.c.bf16 %v6029_v16, %v6029_v16  ;;  %v6028_v12 = vmax.f32 %v5996_v43, 0.0  ;;  %v6712_v61 = vshll.u32 %v6573_v25, 16  ;;  %v6528_v16 = vld [vmem:[#allocation2 + $0x8c] sm:$0x1] }
 0x431   : > { %v12479_v10 = vpack.c.bf16 %v6027_v33, %v6027_v33  ;;  %v6701_v11 = vsel %vm15442_vm2, %v6696_v54, %v6700_v49  ;;  %v12482_v13 = vpack.c.bf16 %v6030_v7, %v6030_v7  ;;  %v6716_v63 = vshrl.u32 %v6573_v25, 16  ;;  %v17153_v25 = vld [vmem:[#allocation2 + $0x30] sm:$0xf]  ;;  %v17159_v54 = vld [vmem:[#allocation2 + $0x34] sm:$0xf] }
 0x432   : > { %v6709_v36 = vor.u32 %v6708_v31, %v6705_v32  ;;  %v12152_v24 = vcombine.low %v6691_v22, %v6701_v11  ;;  %v6323_v17 = vshrl.u32 %v12481_v42, 16  ;;  %v6326_v29 = vshll.u32 %v12481_v42, 16  ;;  %13534 = vmatpush3.bf16.msra.mxu1 %v14684_v5  ;;  %v6618_v42 = vld [vmem:[#allocation2 + $0x38] sm:$0x1] }
 0x433   : > { %v6306_v51 = vshrl.u32 %v12479_v10, 16  ;;  %v6309_v38 = vshll.u32 %v12479_v10, 16  ;;  %v6331_v20 = vshrl.u32 %v12482_v13, 16  ;;  %v6334_v15 = vshll.u32 %v12482_v13, 16  ;;  %13535 = vmatprep.subr.bf16.mxu1 %v14685_v8 }
 0x434   : > { %v12480_v26 = vpack.c.bf16 %v6028_v12, %v6028_v12  ;;  %13503 = vmatprep.mubr.bf16.mxu1 %v12152_v24  ;;  %v6325_v4 = vrot.slane %v6323_v17, 7  ;;  %v6710_v58 = vrot.slane %v6709_v36, 4  ;;  %v6714_v62 = vrot.slane %v6712_v61, 5  ;;  %v17173_v17 = vld [vmem:[#allocation2 + $0x3c] sm:$0xf] }
 0x435   : > { %v6308_v2 = vrot.slane %v6306_v51, 7  ;;  %v6333_v55 = vrot.slane %v6331_v20, 7  ;;  %v6718_v28 = vrot.slane %v6716_v63, 4  ;;  %v6722_v43 = vshll.u32 %v6617_v50, 16 }
 0x436   : > { %v6314_v14 = vshrl.u32 %v12480_v26, 16  ;;  %v6317_v21 = vshll.u32 %v12480_v26, 16  ;;  %v6328_v49 = vor.u32 %v6326_v29, %v6325_v4  ;;  %v6329_v52 = vrot.slane %v6325_v4, 4  ;;  %13536 = vmatpush3.bf16.msra.mxu1 %v14685_v8  ;;  %v14688_v29 = vld [vmem:[#allocation8 + $0x28] sm:$0xff]  }
 0x437   : > { %v6311_v5 = vor.u32 %v6309_v38, %v6308_v2  ;;  %v6312_v34 = vrot.slane %v6308_v2, 4  ;;  %v6336_v39 = vor.u32 %v6334_v15, %v6333_v55  ;;  %v6338_v48 = vrot.slane %v6333_v55, 4  ;;  %13537 = vmatprep.subr.bf16.mxu1 %v14686_v40 }
 0x438   : > { %v6316_v41 = vrot.slane %v6314_v14, 7  ;;  %v6715_v6 = vsel %vm15442_vm2, %v6710_v58, %v6714_v62  ;;  %v6532_v18 = vsel %vm15548_vm13, %v6328_v49, %v6531_v1  ;;  %v6719_v33 = vor.u32 %v6718_v28, %v6714_v62 }
 0x439   : > { %v6525_v22 = vsel %vm15548_vm13, %v6311_v5, %v6524_v37  ;;  %6533 = vst [vmem:[#allocation2 + $0x90] sm:$0xf] %v6532_v18  ;;  %v6337_v7 = vsel %vm15538_vm12, %v6329_v52, %v6336_v39  ;;  %v6536_v32 = vsel %vm15554_vm14, %v6338_v48, %v6535_v30  ;;  %v6724_v12 = vrot.slane %v6722_v43, 5  ;;  %v17189_v52 = vld [vmem:[#allocation2 + $0x40] sm:$0xf] }
 0x43a   : > { %6526 = vst [vmem:[#allocation2 + $0x84] sm:$0xf] %v6525_v22  ;;  %v6319_v31 = vor.u32 %v6317_v21, %v6316_v41  ;;  %v6321_v8 = vrot.slane %v6316_v41, 4  ;;  %6534 = vst [vmem:[#allocation2 + $0x94] sm:$0xf] %v6337_v7  ;;  %v6720_v10 = vrot.slane %v6719_v33, 4  ;;  %13538 = vmatpush3.bf16.msra.mxu1 %v14686_v40  ;;  %v5962_v4 = vmul.f32 %v17085_v47, %v16980_v27 }
 0x43b   : > { %6537 = vst [vmem:[#allocation2 + $0x98] sm:$0x1] %v6536_v32  ;;  %v6727_v61 = vshrl.u32 %v17153_v25, 16  ;;  %v6730_v11 = vshll.u32 %v17153_v25, 16  ;;  %v6736_v63 = vshll.u32 %v17159_v54, 16  ;;  %v6740_v24 = vshrl.u32 %v17159_v54, 16  ;;  %13539 = vmatprep.subr.bf16.mxu1 %v14687_v35 }
 0x43c   : > { %v6320_v13 = vsel %vm15538_vm12, %v6312_v34, %v6319_v31  ;;  %v6529_v36 = vsel %vm15554_vm14, %v6321_v8, %v6528_v16  ;;  %v6725_v51 = vsel %vm15442_vm2, %v6720_v10, %v6724_v12  ;;  %v6746_v20 = vshll.u32 %v6618_v42, 16  ;;  %v14689_v47 = vld [vmem:[#allocation8 + $0x30] sm:$0xff]   ;;  %v14690_v16 = vld [vmem:[#allocation8 + $0x38] sm:$0xff]   ;;  %v6619_v7 = vld [vmem:[#allocation2 + $0x44] sm:$0x1] }
 0x43d   : > { %6527 = vst [vmem:[#allocation2 + $0x88] sm:$0xf] %v6320_v13  ;;  %6530 = vst [vmem:[#allocation2 + $0x8c] sm:$0x1] %v6529_v36  ;;  %v6729_v1 = vrot.slane %v6727_v61, 4  ;;  %v6732_v38 = vrot.slane %v6730_v11, 5  ;;  %v12153_v15 = vcombine.low %v6715_v6, %v6725_v51  ;;  %v5960_v58 = vmul.f32 %v16980_v27, %v17087_v45 }
 0x43e   : > { %v6738_v26 = vrot.slane %v6736_v63, 5  ;;  %v6742_v40 = vrot.slane %v6740_v24, 4  ;;  %v6748_v37 = vrot.slane %v6746_v20, 5  ;;  %v5963_v62 = vmul.f32 %v17091_v19, %v16980_v27  ;;  %13540 = vmatpush3.bf16.msra.mxu1 %v14687_v35  ;;  %v17200_v12 = vld [vmem:[#allocation8 + $0x80] sm:$0xff]   ;;  %v6545_v61 = vld [vmem:[#allocation2 + $0xa8] sm:$0xf] }
 0x43f   : > { %v6733_v2 = vor.u32 %v6732_v38, %v6729_v1  ;;  %13504 = vmatmul.mubr.bf16.gmra.mrb[4].mxu1 %v12153_v15  ;;  %v6001_v14 = vadd.f32 %v16985_v46, %v5962_v4  ;;  %v5961_v21 = vmul.f32 %v16980_v27, %v17100_v3  ;;  %v6751_v50 = vshrl.u32 %v17173_v17, 16  ;;  %13541 = vmatprep.subr.bf16.mxu1 %v14688_v29 }
 0x440   : > { %v6743_v55 = vor.u32 %v6742_v40, %v6738_v26  ;;  %v5999_v49 = vadd.f32 %v16985_v46, %v5960_v58  ;;  %v6002_v45 = vadd.f32 %v16985_v46, %v5963_v62  ;;  %v6754_v19 = vshll.u32 %v17173_v17, 16 }
 0x441   : > { %v6734_v28 = vrot.slane %v6733_v2, 4  ;;  %v6033_v34 = vmax.f32 %v6001_v14, 0.0  ;;  %v6000_v30 = vadd.f32 %v16985_v46, %v5961_v21  ;;  %v6753_v39 = vrot.slane %v6751_v50, 4  ;;  %v6538_v2 = vld [vmem:[#allocation2 + $0x9c] sm:$0xf] }
 0x442   : > { %v6744_v5 = vrot.slane %v6743_v55, 4  ;;  %v6031_v3 = vmax.f32 %v5999_v49, 0.0  ;;  %v6034_v48 = vmax.f32 %v6002_v45, 0.0  ;;  %v6756_v41 = vrot.slane %v6754_v19, 5  ;;  %13542 = vmatpush3.bf16.msra.mxu1 %v14688_v29 }
 0x443   : > { %v6739_v27 = vsel %vm15442_vm2, %v6734_v28, %v6738_v26  ;;  %v12485_v35 = vpack.c.bf16 %v6033_v34, %v6033_v34  ;;  %v6032_v18 = vmax.f32 %v6000_v30, 0.0  ;;  %v6760_v22 = vshll.u32 %v17189_v52, 16  ;;  %13543 = vmatprep.subr.bf16.mxu1 %v14689_v47  ;;  %v17206_v28 = vld [vmem:[#allocation2 + $0x48] sm:$0xf]  ;;  %v17210_v34 = vld [vmem:[#allocation2 + $0x4c] sm:$0xf] }
 0x444   : > { %v6749_v6 = vsel %vm15442_vm2, %v6744_v5, %v6748_v37  ;;  %v12483_v43 = vpack.c.bf16 %v6031_v3, %v6031_v3  ;;  %v12486_v46 = vpack.c.bf16 %v6034_v48, %v6034_v48  ;;  %v6757_v32 = vor.u32 %v6756_v41, %v6753_v39  ;;  %v6549_v37 = vld [vmem:[#allocation2 + $0xb0] sm:$0x1] }
 0x445   : > { %v12154_v33 = vcombine.low %v6739_v27, %v6749_v6  ;;  %v6357_v31 = vshrl.u32 %v12485_v35, 16  ;;  %v6360_v8 = vshll.u32 %v12485_v35, 16  ;;  %v12484_v42 = vpack.c.bf16 %v6032_v18, %v6032_v18  ;;  %v17212_v30 = vld [vmem:[#allocation2 + $0x50] sm:$0x1] }
 0x446   : > { %v17198_v10 = vrot.slane %v6760_v22, 5  ;;  %v6340_v11 = vshrl.u32 %v12483_v43, 16  ;;  %v6343_v13 = vshll.u32 %v12483_v43, 16  ;;  %v6365_v36 = vshrl.u32 %v12486_v46, 16  ;;  %13544 = vmatpush3.bf16.msra.mxu1 %v14689_v47  ;;  %v6542_v47 = vld [vmem:[#allocation2 + $0xa4] sm:$0x1] }
 0x447   : > { %13507 = vmatprep.mubr.bf16.mxu1 %v12154_v33  ;;  %v6368_v63 = vshll.u32 %v12486_v46, 16  ;;  %v6359_v24 = vrot.slane %v6357_v31, 7  ;;  %v6348_v29 = vshrl.u32 %v12484_v42, 16  ;;  %v6351_v51 = vshll.u32 %v12484_v42, 16  ;;  %13545 = vmatprep.subr.bf16.mxu1 %v14690_v16 }
 0x448   : > { %v6758_v1 = vrot.slane %v6757_v32, 4  ;;  %v6342_v38 = vrot.slane %v6340_v11, 7  ;;  %v6367_v20 = vrot.slane %v6365_v36, 7  ;;  %v6764_v15 = vshrl.u32 %v17189_v52, 16  ;;  %v14832_v32 = vld [vmem:[%s18731_s2] ss:$0 sm:$0xff] }
 0x449   : > { %v6770_v26 = vshll.u32 %v6619_v7, 16  ;;  %v6362_v40 = vor.u32 %v6360_v8, %v6359_v24  ;;  %v6363_v4 = vrot.slane %v6359_v24, 4  ;;  %v6350_v58 = vrot.slane %v6348_v29, 7 }
 0x44a   : > { %v6763_v62 = vsel %vm15442_vm2, %v6758_v1, %v17198_v10  ;;  %v6345_v55 = vor.u32 %v6343_v13, %v6342_v38  ;;  %v6346_v14 = vrot.slane %v6342_v38, 4  ;;  %v6370_v21 = vor.u32 %v6368_v63, %v6367_v20  ;;  %13546 = vmatpush3.bf16.msra.mxu1 %v14690_v16  ;;  %v17236_v13 = vld [vmem:[#allocation2 + $0x54] sm:$0xf]  ;;  %v14833_v63 = vld [vmem:[%s18732_s3] ss:$0 sm:$0xff] }
 0x44b   : > { %v6372_v50 = vrot.slane %v6367_v20, 4  ;;  %v6546_v49 = vsel %vm15548_vm13, %v6362_v40, %v6545_v61  ;;  %v6353_v45 = vor.u32 %v6351_v51, %v6350_v58  ;;  %v6355_v19 = vrot.slane %v6350_v58, 4  ;;  %13579 = vmatprep.subr.bf16.mxu1 %v17200_v12 }
 0x44c   : > { %v6766_v5 = vrot.slane %v6764_v15, 4  ;;  %6547 = vst [vmem:[#allocation2 + $0xa8] sm:$0xf] %v6546_v49  ;;  %v6539_v39 = vsel %vm15548_vm13, %v6345_v55, %v6538_v2  ;;  %v6371_v27 = vsel %vm15538_vm12, %v6363_v4, %v6370_v21  ;;  %v6772_v48 = vrot.slane %v6770_v26, 5 }
 0x44d   : > { %v6550_v3 = vsel %vm15554_vm14, %v6372_v50, %v6549_v37  ;;  %6540 = vst [vmem:[#allocation2 + $0x9c] sm:$0xf] %v6539_v39  ;;  %6548 = vst [vmem:[#allocation2 + $0xac] sm:$0xf] %v6371_v27  ;;  %v6354_v41 = vsel %vm15538_vm12, %v6346_v14, %v6353_v45  ;;  %v6543_v6 = vsel %vm15554_vm14, %v6355_v19, %v6542_v47  ;;  %v6775_v18 = vshrl.u32 %v17206_v28, 16 }
 0x44e   : > { %6551 = vst [vmem:[#allocation2 + $0xb0] sm:$0x1] %v6550_v3  ;;  %v6767_v35 = vor.u32 %v6766_v5, %v17198_v10  ;;  %6541 = vst [vmem:[#allocation2 + $0xa0] sm:$0xf] %v6354_v41  ;;  %v6778_v22 = vshll.u32 %v17206_v28, 16  ;;  %v6784_v16 = vshll.u32 %v17210_v34, 16  ;;  %v5966_v31 = vmul.f32 %v14832_v32, %v17114_v59 }
 0x44f   : > { %6544 = vst [vmem:[#allocation2 + $0xa4] sm:$0x1] %v6543_v6  ;;  %v6788_v33 = vshrl.u32 %v17210_v34, 16  ;;  %v6794_v43 = vshll.u32 %v17212_v30, 16  ;;  %v6777_v7 = vrot.slane %v6775_v18, 4  ;;  %v5964_v8 = vmul.f32 %v14832_v32, %v17116_v60 }
 0x450   : > { %v6768_v46 = vrot.slane %v6767_v35, 4  ;;  %v6780_v42 = vrot.slane %v6778_v22, 5  ;;  %v6786_v10 = vrot.slane %v6784_v16, 5  ;;  %v6005_v24 = vadd.f32 %v14833_v63, %v5966_v31  ;;  %v17251_v47 = vld [vmem:[#allocation2 + $0x58] sm:$0xf] }
 0x451   : > { %v6790_v61 = vrot.slane %v6788_v33, 4  ;;  %v6796_v11 = vrot.slane %v6794_v43, 5  ;;  %v6003_v29 = vadd.f32 %v14833_v63, %v5964_v8  ;;  %v5967_v51 = vmul.f32 %v14832_v32, %v17118_v57  ;;  %v6559_v27 = vld [vmem:[#allocation2 + $0xc0] sm:$0xf]  ;;  %v17253_v35 = vld [vmem:[#allocation2 + $0x5c] sm:$0x1] }
 0x452   : > { %v6773_v36 = vsel %vm15442_vm2, %v6768_v46, %v6772_v48  ;;  %v6781_v1 = vor.u32 %v6780_v42, %v6777_v7  ;;  %v5965_v38 = vmul.f32 %v14832_v32, %v17120_v44  ;;  %v6037_v20 = vmax.f32 %v6005_v24, 0.0  ;;  %v6552_v48 = vld [vmem:[#allocation2 + $0xb4] sm:$0xf] }
 0x453   : > { %v12155_v59 = vcombine.low %v6763_v62, %v6773_v36  ;;  %v6791_v60 = vor.u32 %v6790_v61, %v6786_v10  ;;  %v6035_v15 = vmax.f32 %v6003_v29, 0.0  ;;  %v6006_v26 = vadd.f32 %v14833_v63, %v5967_v51  ;;  %v17257_v51 = vld [vmem:[#allocation2 + $0x60] sm:$0xf] }
 0x454   : > { %v6799_v40 = vshrl.u32 %v17236_v13, 16  ;;  %v6782_v4 = vrot.slane %v6781_v1, 4  ;;  %v6004_v37 = vadd.f32 %v14833_v63, %v5965_v38  ;;  %v6802_v58 = vshll.u32 %v17236_v13, 16 }
 0x455   : > { %13508 = vmatmul.mubr.bf16.gmra.mrb[8].mxu1 %v12155_v59  ;;  %v6792_v2 = vrot.slane %v6791_v60, 4  ;;  %v12489_v55 = vpack.c.bf16 %v6037_v20, %v6037_v20  ;;  %v12487_v14 = vpack.c.bf16 %v6035_v15, %v6035_v15  ;;  %v6038_v21 = vmax.f32 %v6006_v26, 0.0  ;;  %v6556_v60 = vld [vmem:[#allocation2 + $0xbc] sm:$0x1]  ;;  %v17264_v15 = vld [vmem:[#allocation2 + $0x64] sm:$0xf] }
 0x456   : > { %v6801_v57 = vrot.slane %v6799_v40, 4  ;;  %v6787_v62 = vsel %vm15442_vm2, %v6782_v4, %v6786_v10  ;;  %v6036_v50 = vmax.f32 %v6004_v37, 0.0  ;;  %v6804_v49 = vrot.slane %v6802_v58, 5  ;;  %v17266_v37 = vld [vmem:[#allocation2 + $0x68] sm:$0x1] }
 0x457   : > { %v6797_v44 = vsel %vm15442_vm2, %v6792_v2, %v6796_v11  ;;  %v6391_v19 = vshrl.u32 %v12489_v55, 16  ;;  %v6394_v5 = vshll.u32 %v12489_v55, 16  ;;  %v6374_v39 = vshrl.u32 %v12487_v14, 16  ;;  %v6563_v11 = vld [vmem:[#allocation2 + $0xc8] sm:$0x1] }
 0x458   : > { %v12156_v45 = vcombine.low %v6787_v62, %v6797_v44  ;;  %v6377_v3 = vshll.u32 %v12487_v14, 16  ;;  %v12490_v41 = vpack.c.bf16 %v6038_v21, %v6038_v21  ;;  %v12488_v6 = vpack.c.bf16 %v6036_v50, %v6036_v50  ;;  %v17268_v58 = vld [vmem:[#allocation2 + $0x6c] sm:$0xf] }
 0x459   : > { %v6805_v18 = vor.u32 %v6804_v49, %v6801_v57  ;;  %v6393_v22 = vrot.slane %v6391_v19, 7  ;;  %v6376_v16 = vrot.slane %v6374_v39, 7  ;;  %v6808_v33 = vshll.u32 %v17251_v47, 16  ;;  %v17273_v57 = vld [vmem:[#allocation2 + $0x70] sm:$0xf] }
 0x45a   : > { %13511 = vmatprep.mubr.bf16.mxu1 %v12156_v45  ;;  %v6812_v43 = vshrl.u32 %v17251_v47, 16  ;;  %v6399_v46 = vshrl.u32 %v12490_v41, 16  ;;  %v6402_v7 = vshll.u32 %v12490_v41, 16  ;;  %v6382_v32 = vshrl.u32 %v12488_v6, 16 }
 0x45b   : > { %v6385_v31 = vshll.u32 %v12488_v6, 16  ;;  %v6396_v8 = vor.u32 %v6394_v5, %v6393_v22  ;;  %v6397_v42 = vrot.slane %v6393_v22, 4  ;;  %v6379_v10 = vor.u32 %v6377_v3, %v6376_v16  ;;  %v17293_v6 = vld [vmem:[#allocation2 + $0x7c] sm:$0xf] }
 0x45c   : > { %v6380_v61 = vrot.slane %v6376_v16, 4  ;;  %v6401_v36 = vrot.slane %v6399_v46, 7  ;;  %v6384_v63 = vrot.slane %v6382_v32, 7  ;;  %v6806_v24 = vrot.slane %v6805_v18, 4 }
 0x45d   : > { %v6810_v29 = vrot.slane %v6808_v33, 5  ;;  %v6560_v59 = vsel %vm15548_vm13, %v6396_v8, %v6559_v27  ;;  %v6553_v1 = vsel %vm15548_vm13, %v6379_v10, %v6552_v48  ;;  %v6814_v38 = vrot.slane %v6812_v43, 4  ;;  %v17285_v27 = vld [vmem:[#allocation2 + $0x78] sm:$0xf]  ;;  %v17289_v48 = vld [vmem:[#allocation2 + $0x74] sm:$0x1] }
 0x45e   : > { %v6818_v20 = vshll.u32 %v17253_v35, 16  ;;  %6561 = vst [vmem:[#allocation2 + $0xc0] sm:$0xf] %v6560_v59  ;;  %6554 = vst [vmem:[#allocation2 + $0xb4] sm:$0xf] %v6553_v1  ;;  %v6404_v26 = vor.u32 %v6402_v7, %v6401_v36  ;;  %v6406_v40 = vrot.slane %v6401_v36, 4  ;;  %v6387_v4 = vor.u32 %v6385_v31, %v6384_v63 }
 0x45f   : > { %v6389_v2 = vrot.slane %v6384_v63, 4  ;;  %v6811_v53 = vsel %vm15442_vm2, %v6806_v24, %v6810_v29  ;;  %v6815_v55 = vor.u32 %v6814_v38, %v6810_v29  ;;  %v6823_v21 = vshrl.u32 %v17257_v51, 16  ;;  %v17300_v36 = vld [vmem:[#allocation2 + $0x80] sm:$0x1] }
 0x460   : > { %v6820_v14 = vrot.slane %v6818_v20, 5  ;;  %v6405_v62 = vsel %vm15538_vm12, %v6397_v42, %v6404_v26  ;;  %v6564_v44 = vsel %vm15554_vm14, %v6406_v40, %v6563_v11  ;;  %v6388_v50 = vsel %vm15538_vm12, %v6380_v61, %v6387_v4  ;;  %v17305_v4 = vld [vmem:[#allocation2 + $0x84] sm:$0xf] }
 0x461   : > { %v6557_v49 = vsel %vm15554_vm14, %v6389_v2, %v6556_v60  ;;  %6562 = vst [vmem:[#allocation2 + $0xc4] sm:$0xf] %v6405_v62  ;;  %6565 = vst [vmem:[#allocation2 + $0xc8] sm:$0x1] %v6564_v44  ;;  %v6816_v45 = vrot.slane %v6815_v55, 4  ;;  %v6825_v19 = vrot.slane %v6823_v21, 4 }
 0x462   : > { %6555 = vst [vmem:[#allocation2 + $0xb8] sm:$0xf] %v6388_v50  ;;  %6558 = vst [vmem:[#allocation2 + $0xbc] sm:$0x1] %v6557_v49  ;;  %v6826_v5 = vshll.u32 %v17257_v51, 16  ;;  %v6832_v39 = vshll.u32 %v17264_v15, 16 }
 0x463   : > { %v6836_v3 = vshrl.u32 %v17264_v15, 16  ;;  %v6842_v0 = vshll.u32 %v17266_v37, 16  ;;  %v6847_v56 = vshrl.u32 %v17268_v58, 16  ;;  %v6850_v41 = vshll.u32 %v17268_v58, 16  ;;  %v17313_v49 = vld [vmem:[#allocation2 + $0x88] sm:$0xf] }
 0x464   : > { %v6821_v18 = vsel %vm15442_vm2, %v6816_v45, %v6820_v14  ;;  %v6828_v22 = vrot.slane %v6826_v5, 5  ;;  %v6834_v16 = vrot.slane %v6832_v39, 5  ;;  %v6856_v33 = vshll.u32 %v17273_v57, 16 }
 0x465   : > { %v12157_v43 = vcombine.low %v6811_v53, %v6821_v18  ;;  %v6838_v46 = vrot.slane %v6836_v3, 4  ;;  %v6844_v7 = vrot.slane %v6842_v0, 5  ;;  %v6849_v32 = vrot.slane %v6847_v56, 4  ;;  %v17318_v3 = vld [vmem:[#allocation2 + $0x90] sm:$0xf] }
 0x466   : > { %v6829_v31 = vor.u32 %v6828_v22, %v6825_v19  ;;  %v6852_v8 = vrot.slane %v6850_v41, 5  ;;  %v6858_v42 = vrot.slane %v6856_v33, 5  ;;  %v6860_v10 = vshrl.u32 %v17273_v57, 16  ;;  %v17320_v18 = vld [vmem:[#allocation2 + $0x8c] sm:$0x1] }
 0x467   : > { %13512 = vmatmul.mubr.bf16.gmra.mrb[12].mxu1 %v12157_v43  ;;  %v6839_v61 = vor.u32 %v6838_v46, %v6834_v16  ;;  %v6866_v11 = vshll.u32 %v17289_v48, 16  ;;  %v6871_v63 = vshrl.u32 %v17285_v27, 16  ;;  %v6874_v24 = vshll.u32 %v17285_v27, 16 }
 0x468   : > { %v6830_v29 = vrot.slane %v6829_v31, 4  ;;  %v6853_v59 = vor.u32 %v6852_v8, %v6849_v32  ;;  %v6862_v1 = vrot.slane %v6860_v10, 4  ;;  %v6880_v60 = vshll.u32 %v17293_v6, 16 }
 0x469   : > { %v6840_v38 = vrot.slane %v6839_v61, 4  ;;  %v6868_v20 = vrot.slane %v6866_v11, 5  ;;  %v6873_v26 = vrot.slane %v6871_v63, 4  ;;  %v6876_v40 = vrot.slane %v6874_v24, 5  ;;  %v17332_v63 = vld [vmem:[#allocation2 + $0x98] sm:$0x1] }
 0x46a   : > { %v6835_v2 = vsel %vm15442_vm2, %v6830_v29, %v6834_v16  ;;  %v6854_v53 = vrot.slane %v6853_v59, 4  ;;  %v6863_v55 = vor.u32 %v6862_v1, %v6858_v42  ;;  %v6882_v14 = vrot.slane %v6880_v60, 5 }
 0x46b   : > { %v6845_v21 = vsel %vm15442_vm2, %v6840_v38, %v6844_v7  ;;  %v6877_v62 = vor.u32 %v6876_v40, %v6873_v26  ;;  %v6884_v44 = vshrl.u32 %v17293_v6, 16  ;;  %v6890_v50 = vshll.u32 %v17300_v36, 16  ;;  %v17327_v7 = vld [vmem:[#allocation2 + $0x94] sm:$0xf]  ;;  %v17337_v38 = vld [vmem:[#allocation2 + $0x9c] sm:$0xf] }
 0x46c   : > { %v12158_v45 = vcombine.low %v6835_v2, %v6845_v21  ;;  %v6859_v19 = vsel %vm15442_vm2, %v6854_v53, %v6858_v42  ;;  %v6864_v5 = vrot.slane %v6863_v55, 4  ;;  %v6895_v39 = vshrl.u32 %v17305_v4, 16  ;;  %v17340_v53 = vld [vmem:[#allocation2 + $0xa0] sm:$0xf] }
 0x46d   : > { %v6878_v0 = vrot.slane %v6877_v62, 4  ;;  %v6886_v56 = vrot.slane %v6884_v44, 4  ;;  %v6892_v41 = vrot.slane %v6890_v50, 5  ;;  %v6898_v22 = vshll.u32 %v17305_v4, 16  ;;  %v17344_v44 = vld [vmem:[#allocation2 + $0xa4] sm:$0x1] }
 0x46e   : > { %13515 = vmatprep.mubr.bf16.mxu1 %v12158_v45  ;;  %v6869_v16 = vsel %vm15442_vm2, %v6864_v5, %v6868_v20  ;;  %v6897_v33 = vrot.slane %v6895_v39, 4  ;;  %v6904_v43 = vshll.u32 %v17313_v49, 16  ;;  %v6908_v46 = vshrl.u32 %v17313_v49, 16  ;;  %v17347_v39 = vld [vmem:[#allocation2 + $0xa8] sm:$0xf] }
 0x46f   : > { %v12159_v32 = vcombine.low %v6859_v19, %v6869_v16  ;;  %v6883_v31 = vsel %vm15442_vm2, %v6878_v0, %v6882_v14  ;;  %v6887_v8 = vor.u32 %v6886_v56, %v6882_v14  ;;  %v6900_v42 = vrot.slane %v6898_v22, 5 }
 0x470   : > { %v6906_v10 = vrot.slane %v6904_v43, 5  ;;  %v6910_v61 = vrot.slane %v6908_v46, 4  ;;  %v6914_v11 = vshll.u32 %v17320_v18, 16  ;;  %v6919_v24 = vshrl.u32 %v17318_v3, 16 }
 0x471   : > { %13516 = vmatmul.mubr.bf16.gmra.mrb[16].mxu1 %v12159_v32  ;;  %v6888_v29 = vrot.slane %v6887_v8, 4  ;;  %v6901_v59 = vor.u32 %v6900_v42, %v6897_v33  ;;  %v6922_v1 = vshll.u32 %v17318_v3, 16  ;;  %v6928_v60 = vshll.u32 %v17327_v7, 16  ;;  %v17356_v32 = vld [vmem:[#allocation2 + $0xac] sm:$0xf] }
 0x472   : > { %v6911_v20 = vor.u32 %v6910_v61, %v6906_v10  ;;  %v6916_v26 = vrot.slane %v6914_v11, 5  ;;  %v6921_v40 = vrot.slane %v6919_v24, 4  ;;  %v6932_v2 = vshrl.u32 %v17327_v7, 16 }
 0x473   : > { %v6893_v55 = vsel %vm15442_vm2, %v6888_v29, %v6892_v41  ;;  %v6902_v14 = vrot.slane %v6901_v59, 4  ;;  %v6924_v21 = vrot.slane %v6922_v1, 5  ;;  %v6930_v62 = vrot.slane %v6928_v60, 5  ;;  %v17362_v1 = vld [vmem:[#allocation2 + $0xb4] sm:$0xf] }
 0x474   : > { %v12160_v50 = vcombine.low %v6883_v31, %v6893_v55  ;;  %v6912_v45 = vrot.slane %v6911_v20, 4  ;;  %v6934_v19 = vrot.slane %v6932_v2, 4  ;;  %v6938_v5 = vshll.u32 %v17332_v63, 16  ;;  %v17368_v2 = vld [vmem:[#allocation2 + $0xb8] sm:$0xf] }
 0x475   : > { %v6907_v0 = vsel %vm15442_vm2, %v6902_v14, %v6906_v10  ;;  %v6925_v56 = vor.u32 %v6924_v21, %v6921_v40  ;;  %v6943_v22 = vshrl.u32 %v17337_v38, 16  ;;  %v6946_v41 = vshll.u32 %v17337_v38, 16  ;;  %v17358_v10 = vld [vmem:[#allocation2 + $0xb0] sm:$0x1] }
 0x476   : > { %13519 = vmatprep.mubr.bf16.mxu1 %v12160_v50  ;;  %v6917_v16 = vsel %vm15442_vm2, %v6912_v45, %v6916_v26  ;;  %v6935_v33 = vor.u32 %v6934_v19, %v6930_v62  ;;  %v6940_v43 = vrot.slane %v6938_v5, 5  ;;  %v6952_v46 = vshll.u32 %v17340_v53, 16 }
 0x477   : > { %v12161_v31 = vcombine.low %v6907_v0, %v6917_v16  ;;  %v6926_v8 = vrot.slane %v6925_v56, 4  ;;  %v6945_v42 = vrot.slane %v6943_v22, 4  ;;  %v6948_v61 = vrot.slane %v6946_v41, 5  ;;  %v17373_v56 = vld [vmem:[#allocation2 + $0xbc] sm:$0x1] }
 0x478   : > { %v6936_v11 = vrot.slane %v6935_v33, 4  ;;  %v6954_v24 = vrot.slane %v6952_v46, 5  ;;  %v6956_v29 = vshrl.u32 %v17340_v53, 16  ;;  %v6962_v59 = vshll.u32 %v17344_v44, 16 }
 0x479   : > { %13520 = vmatmul.mubr.bf16.gmra.mrb[20].mxu1 %v12161_v31  ;;  %v6931_v60 = vsel %vm15442_vm2, %v6926_v8, %v6930_v62  ;;  %v6949_v20 = vor.u32 %v6948_v61, %v6945_v42  ;;  %v6967_v26 = vshrl.u32 %v17347_v39, 16  ;;  %v6970_v40 = vshll.u32 %v17347_v39, 16 }
 0x47a   : > { %v6941_v55 = vsel %vm15442_vm2, %v6936_v11, %v6940_v43  ;;  %v6958_v14 = vrot.slane %v6956_v29, 4  ;;  %v6964_v21 = vrot.slane %v6962_v59, 5  ;;  %v6976_v50 = vshll.u32 %v17356_v32, 16 }
 0x47b   : > { %v12162_v45 = vcombine.low %v6931_v60, %v6941_v55  ;;  %v6950_v19 = vrot.slane %v6949_v20, 4  ;;  %v6969_v5 = vrot.slane %v6967_v26, 4  ;;  %v6972_v0 = vrot.slane %v6970_v40, 5 }
 0x47c   : > { %v6959_v62 = vor.u32 %v6958_v14, %v6954_v24  ;;  %v6978_v22 = vrot.slane %v6976_v50, 5  ;;  %v6980_v41 = vshrl.u32 %v17356_v32, 16  ;;  %v6986_v16 = vshll.u32 %v17358_v10, 16 }
 0x47d   : > { %13523 = vmatprep.mubr.bf16.mxu1 %v12162_v45  ;;  %v6973_v33 = vor.u32 %v6972_v0, %v6969_v5  ;;  %v6991_v43 = vshrl.u32 %v17362_v1, 16  ;;  %v6994_v46 = vshll.u32 %v17362_v1, 16  ;;  %v6955_v31 = vsel %vm15442_vm2, %v6950_v19, %v6954_v24 }
 0x47e   : > { %v6960_v8 = vrot.slane %v6959_v62, 4  ;;  %v6982_v42 = vrot.slane %v6980_v41, 4  ;;  %v7000_v61 = vshll.u32 %v17368_v2, 16  ;;  %v7004_v60 = vshrl.u32 %v17368_v2, 16 }
 0x47f   : > { %v6974_v11 = vrot.slane %v6973_v33, 4  ;;  %v6993_v29 = vrot.slane %v6991_v43, 4  ;;  %v6996_v59 = vrot.slane %v6994_v46, 5  ;;  %v7010_v55 = vshll.u32 %v17373_v56, 16 }
 0x480   : > { %v6965_v20 = vsel %vm15442_vm2, %v6960_v8, %v6964_v21  ;;  %v6983_v26 = vor.u32 %v6982_v42, %v6978_v22  ;;  %v7002_v40 = vrot.slane %v7000_v61, 5  ;;  %v7006_v45 = vrot.slane %v7004_v60, 4 }
 0x481   : > { %v12163_v14 = vcombine.low %v6955_v31, %v6965_v20  ;;  %v6997_v50 = vor.u32 %v6996_v59, %v6993_v29  ;;  %v6988_v19 = vrot.slane %v6986_v16, 5  ;;  %v6979_v62 = vsel %vm15442_vm2, %v6974_v11, %v6978_v22  ;;  %v14834_v20 = vld [vmem:[#allocation2] sm:$0xf]  ;;  %v7619_v59 = vld [vmem:[#allocation2 + $0x78] sm:$0xe] }
 0x482   : > { %v6984_v24 = vrot.slane %v6983_v26, 4  ;;  %v7007_v0 = vor.u32 %v7006_v45, %v7002_v40  ;;  %v7012_v33 = vrot.slane %v7010_v55, 5  ;;  %v12181_v31 = vcombine.low %v17236_v13, %v17251_v47  ;;  %v17410_v26 = vld [vmem:[#allocation2 + $0x4] sm:$0xf] }
 0x483   : > { %13524 = vmatmul.mubr.bf16.gmra.mrb[24].mxu1 %v12163_v14  ;;  %v6998_v5 = vrot.slane %v6997_v50, 4  ;;  %v12182_v16 = vcombine.low %v17257_v51, %v17264_v15  ;;  %v12183_v8 = vcombine.low %v17268_v58, %v17273_v57  ;;  %v12184_v22 = vcombine.low %v17285_v27, %v17293_v6  ;;  %v14836_v14 = vld [vmem:[#allocation2 + $0xc] sm:$0xf]  ;;  %v17415_v50 = vld [vmem:[#allocation2 + $0x10] sm:$0xf] }
 0x484   : > { %v6989_v41 = vsel %vm15442_vm2, %v6984_v24, %v6988_v19  ;;  %v7008_v46 = vrot.slane %v7007_v0, 4  ;;  %v12175_v45 = vcombine.low %v14836_v14, %v17415_v50  ;;  %v14695_v24 = vld [vmem:[#allocation8 + $0x88] sm:$0xff]   ;;  %v7616_v19 = vld [vmem:[#allocation2 + $0x54] sm:$0xe]  ;;  %v17418_v0 = vld [vmem:[#allocation2 + $0x1c] sm:$0xf]  ;;  %v12178_v55 = vcombine.low %v17153_v25, %v17159_v54 }
 0x485   : > { %v12164_v21 = vcombine.low %v6979_v62, %v6989_v41  ;;  %v7003_v43 = vsel %vm15442_vm2, %v6998_v5, %v7002_v40  ;;  %v12174_v40 = vcombine.low %v14834_v20, %v17410_v26  ;;  %v14838_v5 = vld [vmem:[#allocation2 + $0x18] sm:$0xf]  ;;  %v7617_v41 = vld [vmem:[#allocation2 + $0x60] sm:$0xe]  ;;  %v7620_v25 = vld [vmem:[#allocation2 + $0x84] sm:$0xe]  ;;  %v18896_v13 = vcombine.low %v17305_v4, %v17313_v49 }
 0x486   : > { %v7013_v61 = vsel %vm15442_vm2, %v7008_v46, %v7012_v33  ;;  %v12176_v62 = vcombine.low %v14838_v5, %v17418_v0  ;;  %v7708_v33 = vrot.slane %v17251_v47, 5  ;;  %v7618_v46 = vld [vmem:[#allocation2 + $0x6c] sm:$0xe]  ;;  %v7711_v5 = vrot.slane %v17253_v35, 5 }
 0x487   : > { %13527 = vmatprep.mubr.bf16.mxu1 %v12164_v21  ;;  %v12165_v60 = vcombine.low %v7003_v43, %v7013_v61  ;;  %v12205_v21 = vrot.slane %v7616_v19, 9  ;;  %v7715_v43 = vrot.slane %v17264_v15, 5  ;;  %v14840_v61 = vld [vmem:[#allocation2 + $0x24] sm:$0xf]  ;;  %v12207_v35 = vrot.slane %v7618_v46, 9 }
 0x488   : > { %v7710_v14 = vrot.slane %v7708_v33, 4  ;;  %v18897_v47 = vcombine.low %v17318_v3, %v17327_v7  ;;  %v7659_v51 = vrot.slane %v17410_v26, 5  ;;  %v7609_v15 = vld [vmem:[#allocation2] sm:$0xe]  ;;  %v18899_v27 = vcombine.low %v17347_v39, %v17356_v32  ;;  %v14843_v39 = vld [vmem:[#allocation2 + $0x14] sm:$0x1] }
 0x489   : > { %v7717_v19 = vrot.slane %v7715_v43, 4  ;;  %v7673_v3 = vrot.slane %v17418_v0, 5  ;;  %v7611_v26 = vld [vmem:[#allocation2 + $0x18] sm:$0xe] }
 0x48a   : > { %v17437_v29 = vsel %vm16140_vm1, %v7710_v14, %v7711_v5  ;;  %v14701_v14 = vld [vmem:[#allocation8 + $0x98] sm:$0xff]   ;;  %v12208_v5 = vrot.slane %v7619_v59, 9  ;;  %v7743_v59 = vrot.slane %v17327_v7, 5  ;;  %v7661_v58 = vrot.slane %v7659_v51, 4 }
 0x48b   : > { %13528 = vmatmul.mubr.bf16.gmra.mrb[28].mxu1 %v12165_v60  ;;  %v17424_v60 = vld [vmem:[#allocation2 + $0x28] sm:$0xf] }
 0x48c   : > { %13547 = vmatprep.mubr.bf16.mxu1 %v12174_v40  ;;  %v12177_v20 = vcombine.low %v14840_v61, %v17424_v60  ;;  %v14698_v40 = vld [vmem:[#allocation8 + $0x90] sm:$0xff]   ;;  %v7680_v0 = vrot.slane %v17424_v60, 5 }
 0x48d   : > { %v14846_v60 = vld [vmem:[#allocation2 + $0x2c] sm:$0x1] }
 0x493   : > { %13548 = vmatmul.mubr.bf16.vlgmr.msra.gmra.mrb[0].mxu1 %v12175_v45  ;;  %v12206_v45 = vrot.slane %v7617_v41, 9  ;;  %v7722_v41 = vrot.slane %v17273_v57, 5  ;;  %v18898_v57 = vcombine.low %v17337_v38, %v17340_v53  ;;  %v18900_v38 = vcombine.low %v17362_v1, %v17368_v2  ;;  %v14845_v1 = vld [vmem:[#allocation2 + $0x34] sm:$0xf] }
 0x494   : > { %13580 = vmatpush3.bf16.msra.mxu1 %v17200_v12  ;;  %13551 = vmatprep.mubr.bf16.mxu1 %v12176_v62  ;;  %v17432_v12 = vsel %vm16140_vm1, %v12205_v21, %v7708_v33  ;;  %v7718_v62 = vrot.slane %v17266_v37, 5  ;;  %v7725_v33 = vrot.slane %v17289_v48, 5  ;;  %v7729_v21 = vrot.slane %v17293_v6, 5 }
 0x495   : > { %13581 = vmatprep.subr.bf16.mxu1 %v14695_v24  ;;  %v17441_v61 = vsel %vm16140_vm1, %v12206_v45, %v7715_v43  ;;  %v7724_v46 = vrot.slane %v7722_v41, 4  ;;  %v7621_v45 = vld [vmem:[#allocation2 + $0x90] sm:$0xe]  ;;  %v17457_v54 = vsel %vm16140_vm1, %v12207_v35, %v7722_v41  ;;  %v7736_v48 = vrot.slane %v17313_v49, 5 }
 0x496   : > { %v17448_v37 = vsel %vm16140_vm1, %v7717_v19, %v7718_v62  ;;  %v7731_v19 = vrot.slane %v7729_v21, 4  ;;  %v12209_v62 = vrot.slane %v7620_v25, 9  ;;  %v17466_v43 = vsel %vm16140_vm1, %v12208_v5, %v7729_v21  ;;  %v7623_v5 = vld [vmem:[#allocation2 + $0xa8] sm:$0xe] }
 0x497   : > { %v17462_v11 = vsel %vm16140_vm1, %v7724_v46, %v7725_v33  ;;  %v7738_v41 = vrot.slane %v7736_v48, 4  ;;  %v12210_v25 = vrot.slane %v7621_v45, 9  ;;  %v7622_v33 = vld [vmem:[#allocation2 + $0x9c] sm:$0xe]  ;;  %v12179_v21 = vcombine.low %v17173_v17, %v17189_v52  ;;  %v14707_v45 = vld [vmem:[#allocation8 + $0xa8] sm:$0xff]  }
 0x498   : > { %13582 = vmatpush3.bf16.msra.mxu1 %v14695_v24  ;;  %v7732_v24 = vrot.slane %v17300_v36, 5  ;;  %v7739_v36 = vrot.slane %v17320_v18, 5  ;;  %v14704_v46 = vld [vmem:[#allocation8 + $0xa0] sm:$0xff]   ;;  %v17483_v35 = vsel %vm16140_vm1, %v12209_v62, %v7736_v48  ;;  %v7750_v52 = vrot.slane %v17340_v53, 5  ;;  %v7624_v48 = vld [vmem:[#allocation2 + $0xb4] sm:$0xe] }
 0x499   : > { %13583 = vmatprep.subr.bf16.mxu1 %v14698_v40  ;;  %v17491_v17 = vsel %vm16140_vm1, %v12210_v25, %v7743_v59  ;;  %v7757_v62 = vrot.slane %v17356_v32, 5  ;;  %v12212_v25 = vrot.slane %v7623_v5, 9  ;;  %v12180_v18 = vcombine.low %v17206_v28, %v17210_v34  ;;  %v7610_v53 = vld [vmem:[#allocation2 + $0xc] sm:$0xe] }
 0x49a   : > { %v12213_v28 = vrot.slane %v7624_v48, 9  ;;  %v7666_v49 = vrot.slane %v17415_v50, 5  ;;  %v7669_v32 = vrot.slane %v14843_v39, 5  ;;  %v7614_v39 = vld [vmem:[#allocation2 + $0x3c] sm:$0xe] }
 0x49b   : > { %13552 = vmatmul.mubr.bf16.gmra.mrb[4].mxu1 %v12177_v20  ;;  %v17474_v20 = vsel %vm16140_vm1, %v7731_v19, %v7732_v24  ;;  %v17487_v24 = vsel %vm16140_vm1, %v7738_v41, %v7739_v36  ;;  %v12211_v19 = vrot.slane %v7622_v33, 9  ;;  %v7752_v41 = vrot.slane %v7750_v52, 4 }
 0x49c   : > { %13555 = vmatprep.mubr.bf16.mxu1 %v12178_v55  ;;  %13584 = vmatpush3.bf16.msra.mxu1 %v14698_v40  ;;  %v7745_v55 = vrot.slane %v7743_v59, 4  ;;  %v7746_v40 = vrot.slane %v17332_v63, 5  ;;  %v7753_v59 = vrot.slane %v17344_v44, 5  ;;  %v7759_v42 = vrot.slane %v7757_v62, 4 }
 0x49d   : > { %13585 = vmatprep.subr.bf16.mxu1 %v14701_v14  ;;  %v7764_v33 = vrot.slane %v17368_v2, 5  ;;  %v17518_v44 = vsel %vm16140_vm1, %v12212_v25, %v7757_v62  ;;  %v14710_v62 = vld [vmem:[#allocation8 + $0xb0] sm:$0xff]   ;;  %v7687_v2 = vrot.slane %v14845_v1, 5 }
 0x49e   : > { %v17498_v63 = vsel %vm16140_vm1, %v7745_v55, %v7746_v40  ;;  %v7760_v55 = vrot.slane %v17358_v10, 5  ;;  %v17514_v40 = vsel %vm16140_vm1, %v7752_v41, %v7753_v59  ;;  %v12199_v41 = vrot.slane %v7610_v53, 9 }
 0x49f   : > { %v7766_v36 = vrot.slane %v7764_v33, 4  ;;  %v12200_v59 = vrot.slane %v7611_v26, 9  ;;  %v14849_v26 = vld [vmem:[#allocation2 + $0x44] sm:$0x1] }
 0x4a0   : > { %13586 = vmatpush3.bf16.msra.mxu1 %v14701_v14  ;;  %v17510_v14 = vsel %vm16140_vm1, %v12211_v19, %v7750_v52  ;;  %v17524_v10 = vsel %vm16140_vm1, %v7759_v42, %v7760_v55  ;;  %v7767_v52 = vrot.slane %v17373_v56, 5  ;;  %v14713_v56 = vld [vmem:[#allocation8 + $0xb8] sm:$0xff]   ;;  %v7667_v55 = vsel %vm16140_vm1, %v12199_v41, %v7666_v49  ;;  %v14719_v41 = vld [vmem:[#allocation8 + $0xe0] sm:$0xff]   ;;  %v8517_v19 = vld [vmem:[#allocation2 + $0xac] sm:$0xf] }
 0x4a1   : > { %13587 = vmatprep.subr.bf16.mxu1 %v14704_v46 }
 0x4a2   : > { %v17535_v48 = vsel %vm16140_vm1, %v7766_v36, %v7767_v52  ;;  %v14716_v52 = vld [vmem:[#allocation8 + $0xc8] sm:$0xff]  }
 0x4a3   : > { %13556 = vmatmul.mubr.bf16.gmra.mrb[8].mxu1 %v12179_v21  ;;  %v17531_v21 = vsel %vm16140_vm1, %v12213_v28, %v7764_v33  ;;  %v7674_v28 = vsel %vm16140_vm1, %v12200_v59, %v7673_v3 }
 0x4a4   : > { %13559 = vmatprep.mubr.bf16.mxu1 %v12180_v18  ;;  %13588 = vmatpush3.bf16.msra.mxu1 %v14704_v46  ;;  %v14715_v46 = vld [vmem:[#allocation8 + $0xc0] sm:$0xff]   ;;  %v12198_v18 = vrot.slane %v7609_v15, 9  ;;  %v7613_v15 = vld [vmem:[#allocation2 + $0x30] sm:$0xe] }
 0x4a5   : > { %13589 = vmatprep.subr.bf16.mxu1 %v14707_v45 }
 0x4a6   : > { %v7660_v6 = vsel %vm16140_vm1, %v12198_v18, %v7659_v51  ;;  %v7683_v51 = vrot.slane %v14846_v60, 5  ;;  %v14717_v18 = vld [vmem:[#allocation8 + $0xd0] sm:$0xff]   ;;  %v17606_v60 = vld [vmem:[#allocation2 + $0x38] sm:$0x1] }
 0x4a8   : > { %13590 = vmatpush3.bf16.msra.mxu1 %v14707_v45  ;;  %v14844_v45 = vld [vmem:[#allocation2 + $0x20] sm:$0x1] }
 0x4a9   : > { %13591 = vmatprep.subr.bf16.mxu1 %v14710_v62  ;;  %v7676_v36 = vrot.slane %v14844_v45, 5  ;;  %v7697_v45 = vrot.slane %v14849_v26, 5 }
 0x4ab   : > { %13560 = vmatmul.mubr.bf16.gmra.mrb[12].mxu1 %v12181_v31  ;;  %v14842_v31 = vld [vmem:[#allocation2 + $0x8] sm:$0x1] }
 0x4ac   : > { %13563 = vmatprep.mubr.bf16.mxu1 %v12182_v16  ;;  %13592 = vmatpush3.bf16.msra.mxu1 %v14710_v62  ;;  %v7662_v16 = vrot.slane %v14842_v31, 5  ;;  %v14847_v31 = vld [vmem:[#allocation2 + $0x38] sm:$0x1] }
 0x4ad   : > { %13593 = vmatprep.subr.bf16.mxu1 %v14713_v56 }
 0x4ae   : > { %v7663_v4 = vsel %vm16140_vm1, %v7661_v58, %v7662_v16  ;;  %v7690_v16 = vrot.slane %v14847_v31, 5  ;;  %v17611_v31 = vld [vmem:[#allocation2 + $0x44] sm:$0x1] }
 0x4af   : > { %v12214_v7 = vcombine.low %v7660_v6, %v7663_v4  ;;  %v12202_v4 = vrot.slane %v7613_v15, 9 }
 0x4b0   : > { %13594 = vmatpush3.bf16.msra.mxu1 %v14713_v56  ;;  %v7682_v56 = vrot.slane %v7680_v0, 4 }
 0x4b1   : > { %13627 = vmatprep.subr.bf16.mxu1 %v14715_v46 }
 0x4b3   : > { %13564 = vmatmul.mubr.bf16.gmra.mrb[16].mxu1 %v12183_v8  ;;  %v7668_v8 = vrot.slane %v7666_v49, 4 }
 0x4b4   : > { %13567 = vmatprep.mubr.bf16.mxu1 %v12184_v22  ;;  %v7675_v22 = vrot.slane %v7673_v3, 4 }
 0x4b5   : > { %v7670_v50 = vsel %vm16140_vm1, %v7668_v8, %v7669_v32  ;;  %v7688_v8 = vsel %vm16140_vm1, %v12202_v4, %v7687_v2 }
 0x4b6   : > { %v7677_v25 = vsel %vm16140_vm1, %v7675_v22, %v7676_v36  ;;  %v12215_v33 = vcombine.low %v7667_v55, %v7670_v50  ;;  %v7704_v36 = vrot.slane %v17212_v30, 5  ;;  %v12203_v50 = vrot.slane %v7614_v39, 9  ;;  %v14720_v30 = vld [vmem:[#allocation8 + $0xe8] sm:$0xff]  }
 0x4b7   : > { %v12216_v62 = vcombine.low %v7674_v28, %v7677_v25  ;;  %v14721_v28 = vld [vmem:[#allocation8 + $0xf0] sm:$0xff]  }
 0x4bb   : > { %13568 = vmatmul.mubr.bf16.gmra.mrb[20].mxu1 %v18896_v13  ;;  %v7612_v13 = vld [vmem:[#allocation2 + $0x24] sm:$0xe] }
 0x4bc   : > { %13571 = vmatprep.mubr.bf16.mxu1 %v18897_v47  ;;  %v7689_v47 = vrot.slane %v7687_v2, 4  ;;  %v12201_v58 = vrot.slane %v7612_v13, 9  ;;  %v9233_v13 = vld [vmem:[#allocation2 + $0x24] sm:$0xe] }
 0x4be   : > { %v7691_v49 = vsel %vm16140_vm1, %v7689_v47, %v7690_v16  ;;  %v7681_v3 = vsel %vm16140_vm1, %v12201_v58, %v7680_v0  ;;  %v14722_v47 = vld [vmem:[#allocation8 + $0xf8] sm:$0xff]   ;;  %v17613_v16 = vld [vmem:[#allocation2 + $0x4c] sm:$0xf]  ;;  %v18901_v58 = vcombine.low %v17432_v12, %v17437_v29  ;;  %v17627_v29 = vld [vmem:[#allocation8 + $0x100] sm:$0xff]  }
 0x4bf   : > { %v12218_v53 = vcombine.low %v7688_v8, %v7691_v49  ;;  %v9235_v49 = vld [vmem:[#allocation2 + $0x3c] sm:$0xe]  ;;  %v9236_v8 = vld [vmem:[#allocation2 + $0x48] sm:$0xe]  ;;  %v17629_v12 = vld [vmem:[#allocation2 + $0x5c] sm:$0x1] }
 0x4c3   : > { %13572 = vmatmul.mubr.bf16.gmra.mrb[24].mxu1 %v18898_v57  ;;  %v7684_v57 = vsel %vm16140_vm1, %v7682_v56, %v7683_v51  ;;  %v17604_v56 = vld [vmem:[#allocation2 + $0x34] sm:$0xf]  ;;  %v17608_v51 = vld [vmem:[#allocation2 + $0x40] sm:$0xf] }
 0x4c4   : > { %13575 = vmatprep.mubr.bf16.mxu1 %v18899_v27  ;;  %v14848_v27 = vld [vmem:[#allocation2 + $0x40] sm:$0xf]  ;;  %v9325_v26 = vrot.slane %v17608_v51, 5 }
 0x4c5   : > { %v7694_v6 = vrot.slane %v14848_v27, 5  ;;  %v12288_v27 = vrot.slane %v9233_v13, 9 }
 0x4c7   : > { %v7696_v22 = vrot.slane %v7694_v6, 4  ;;  %v7695_v1 = vsel %vm16140_vm1, %v12203_v50, %v7694_v6  ;;  %v12291_v50 = vrot.slane %v9236_v8, 9 }
 0x4c9   : > { %v7698_v0 = vsel %vm16140_vm1, %v7696_v22, %v7697_v45  ;;  %v9237_v45 = vld [vmem:[#allocation2 + $0x54] sm:$0xe] }
 0x4ca   : > { %v12219_v2 = vcombine.low %v7695_v1, %v7698_v0  ;;  %v9332_v0 = vrot.slane %v17613_v16, 5  ;;  %v9327_v1 = vrot.slane %v9325_v26, 4  ;;  %v12292_v13 = vrot.slane %v9237_v45, 9 }
 0x4cb   : > { %13576 = vmatmul.mubr.bf16.gmra.mrb[28].mxu1 %v18900_v38  ;;  %v14718_v38 = vld [vmem:[#allocation8 + $0xd8] sm:$0xff]  }
 0x4cc   : > { %13595 = vmatprep.mubr.bf16.mxu1 %v12214_v7  ;;  %v12217_v7 = vcombine.low %v7681_v3, %v7684_v57  ;;  %v17618_v57 = vld [vmem:[#allocation2 + $0x50] sm:$0x1]  ;;  %v17624_v3 = vld [vmem:[#allocation2 + $0x58] sm:$0xf] }
 0x4d3   : > { %13596 = vmatmul.mubr.bf16.vlgmr.msra.gmra.mrb[0].mxu1 %v12215_v33 }
 0x4d4   : > { %13628 = vmatpush3.bf16.msra.mxu1 %v14715_v46  ;;  %13599 = vmatprep.mubr.bf16.mxu1 %v12216_v62  ;;  %v7701_v46 = vrot.slane %v17210_v34, 5  ;;  %v7615_v34 = vld [vmem:[#allocation2 + $0x48] sm:$0xe]  ;;  %v17602_v62 = vld [vmem:[#allocation2 + $0x2c] sm:$0x1] }
 0x4d5   : > { %13629 = vmatprep.subr.bf16.mxu1 %v14716_v52  ;;  %v12204_v59 = vrot.slane %v7615_v34, 9  ;;  %v9314_v4 = vrot.slane %v17602_v62, 5  ;;  %v17643_v34 = vld [vmem:[#allocation2 + $0x64] sm:$0xf] }
 0x4d6   : > { %v7703_v32 = vrot.slane %v7701_v46, 4 }
 0x4d7   : > { %v7702_v55 = vsel %vm16140_vm1, %v12204_v59, %v7701_v46  ;;  %v18902_v46 = vcombine.low %v17441_v61, %v17448_v37  ;;  %v9321_v37 = vrot.slane %v17606_v60, 5 }
 0x4d8   : > { %13630 = vmatpush3.bf16.msra.mxu1 %v14716_v52  ;;  %v7705_v25 = vsel %vm16140_vm1, %v7703_v32, %v7704_v36  ;;  %v17600_v52 = vld [vmem:[#allocation2 + $0x28] sm:$0xf]  ;;  %v12290_v32 = vrot.slane %v9235_v49, 9  ;;  %v18905_v49 = vcombine.low %v17457_v54, %v17462_v11  ;;  %v17694_v11 = vld [vmem:[#allocation2 + $0x80] sm:$0x1] }
 0x4d9   : > { %13631 = vmatprep.subr.bf16.mxu1 %v14717_v18  ;;  %v12220_v33 = vcombine.low %v7702_v55, %v7705_v25  ;;  %v9311_v15 = vrot.slane %v17600_v52, 5  ;;  %v9238_v55 = vld [vmem:[#allocation2 + $0x60] sm:$0xe] }
 0x4da   : > { %v17657_v25 = vsel %vm16140_vm1, %v12290_v32, %v9325_v26  ;;  %v18907_v32 = vcombine.low %v17466_v43, %v17474_v20  ;;  %v17692_v26 = vld [vmem:[#allocation2 + $0x74] sm:$0x1] }
 0x4db   : > { %13600 = vmatmul.mubr.bf16.gmra.mrb[4].mxu1 %v12217_v7  ;;  %v9313_v6 = vrot.slane %v9311_v15, 4  ;;  %v9318_v7 = vrot.slane %v17604_v56, 5  ;;  %v9356_v54 = vrot.slane %v17692_v26, 5 }
 0x4dc   : > { %13603 = vmatprep.mubr.bf16.mxu1 %v12218_v53  ;;  %13632 = vmatpush3.bf16.msra.mxu1 %v14717_v18  ;;  %v9234_v18 = vld [vmem:[#allocation2 + $0x30] sm:$0xe] }
 0x4dd   : > { %13633 = vmatprep.subr.bf16.mxu1 %v14718_v38  ;;  %v17637_v53 = vsel %vm16140_vm1, %v9313_v6, %v9314_v4  ;;  %v12289_v61 = vrot.slane %v9234_v18, 9  ;;  %v9320_v39 = vrot.slane %v9318_v7, 4  ;;  %v9346_v6 = vrot.slane %v17643_v34, 5  ;;  %v9239_v4 = vld [vmem:[#allocation2 + $0x6c] sm:$0xe] }
 0x4df   : > { %v17647_v36 = vsel %vm16140_vm1, %v12289_v61, %v9318_v7  ;;  %v17653_v59 = vsel %vm16140_vm1, %v9320_v39, %v9321_v37  ;;  %v12293_v37 = vrot.slane %v9238_v55, 9  ;;  %v9240_v39 = vld [vmem:[#allocation2 + $0x78] sm:$0xe]  ;;  %v17732_v7 = vld [vmem:[#allocation2 + $0xa0] sm:$0xf] }
 0x4e0   : > { %13634 = vmatpush3.bf16.msra.mxu1 %v14718_v38  ;;  %v17633_v38 = vsel %vm16140_vm1, %v12288_v27, %v9311_v15  ;;  %v17666_v15 = vld [vmem:[#allocation2 + $0x70] sm:$0xf]  ;;  %v9342_v27 = vrot.slane %v17629_v12, 5 }
 0x4e1   : > { %13635 = vmatprep.subr.bf16.mxu1 %v14719_v41  ;;  %v17713_v20 = vsel %vm16140_vm1, %v12293_v37, %v9346_v6  ;;  %v9353_v55 = vrot.slane %v17666_v15, 5 }
 0x4e2   : > { %18910 = vst [vmem:[#allocation21_spill] sm:$0xff] %v17713_v20  ;;  %v9243_v20 = vld [vmem:[#allocation2 + $0x9c] sm:$0xe] }
 0x4e3   : > { %13604 = vmatmul.mubr.bf16.gmra.mrb[8].mxu1 %v12219_v2  ;;  %v9335_v2 = vrot.slane %v17618_v57, 5  ;;  %v9355_v37 = vrot.slane %v9353_v55, 4 }
 0x4e4   : > { %13607 = vmatprep.mubr.bf16.mxu1 %v12220_v33  ;;  %13636 = vmatpush3.bf16.msra.mxu1 %v14719_v41  ;;  %v9328_v41 = vrot.slane %v17611_v31, 5 }
 0x4e5   : > { %13637 = vmatprep.subr.bf16.mxu1 %v14720_v30 }
 0x4e6   : > { %v17670_v18 = vsel %vm16140_vm1, %v9327_v1, %v9328_v41  ;;  %v9348_v41 = vrot.slane %v9346_v6, 4  ;;  %v17705_v1 = vld [vmem:[#allocation2 + $0x94] sm:$0xf]  ;;  %v8515_v6 = vld [vmem:[#allocation2 + $0xa4] sm:$0x1] }
 0x4e7   : > { %18903 = vst [vmem:[#allocation25_spill] sm:$0xff] %v17670_v18  ;;  %v9374_v42 = vrot.slane %v17705_v1, 5  ;;  %v10138_v18 = vld [vmem:[#allocation2 + $0x74] sm:$0x1] }
 0x4e8   : > { %13638 = vmatpush3.bf16.msra.mxu1 %v14720_v30  ;;  %v17661_v30 = vld [vmem:[#allocation2 + $0x68] sm:$0x1] }
 0x4e9   : > { %13639 = vmatprep.subr.bf16.mxu1 %v14721_v28 }
 0x4eb   : > { %13608 = vmatmul.mubr.bf16.gmra.mrb[12].mxu1 %v18901_v58  ;;  %v17674_v58 = vsel %vm16140_vm1, %v12291_v50, %v9332_v0  ;;  %v9349_v50 = vrot.slane %v17661_v30, 5 }
 0x4ec   : > { %13611 = vmatprep.mubr.bf16.mxu1 %v18902_v46  ;;  %13640 = vmatpush3.bf16.msra.mxu1 %v14721_v28  ;;  %v9334_v28 = vrot.slane %v9332_v0, 4  ;;  %18904 = vst [vmem:[#allocation26_spill] sm:$0xff] %v17674_v58  ;;  %v17681_v46 = vld [vmem:[#allocation2 + $0x7c] sm:$0xf]  ;;  %v17703_v0 = vld [vmem:[#allocation2 + $0x88] sm:$0xf] }
 0x4ed   : > { %13641 = vmatprep.subr.bf16.mxu1 %v14722_v47  ;;  %v9367_v33 = vrot.slane %v17703_v0, 5  ;;  %v10876_v58 = vld [vmem:[#allocation2 + $0x6c] sm:$0xe] }
 0x4ee   : > { %v17687_v8 = vsel %vm16140_vm1, %v9334_v28, %v9335_v2  ;;  %v12294_v2 = vrot.slane %v9239_v4, 9  ;;  %v17716_v28 = vld [vmem:[#allocation2 + $0x8c] sm:$0x1] }
 0x4ef   : > { %18906 = vst [vmem:[#allocation27_spill] sm:$0xff] %v17687_v8  ;;  %v9370_v22 = vrot.slane %v17716_v28, 5  ;;  %v9369_v5 = vrot.slane %v9367_v33, 4  ;;  %v9244_v8 = vld [vmem:[#allocation2 + $0xa8] sm:$0xe] }
 0x4f0   : > { %13642 = vmatpush3.bf16.msra.mxu1 %v14722_v47  ;;  %v9339_v47 = vrot.slane %v17624_v3, 5  ;;  %v17729_v4 = vsel %vm16140_vm1, %v12294_v2, %v9353_v55  ;;  %v17742_v2 = vsel %vm16140_vm1, %v9355_v37, %v9356_v54  ;;  %v18916_v54 = vcombine.low %v17483_v35, %v17487_v24  ;;  %v8524_v37 = vld [vmem:[#allocation2 + $0xc8] sm:$0x1] }
 0x4f1   : > { %13675 = vmatprep.subr.bf16.mxu1 %v17627_v29  ;;  %18912 = vst [vmem:[#allocation22_spill] sm:$0xff] %v17729_v4  ;;  %18914 = vst [vmem:[#allocation29_spill] sm:$0xff] %v17742_v2  ;;  %v17768_v35 = vsel %vm16140_vm1, %v9369_v5, %v9370_v22  ;;  %v14731_v5 = vld [vmem:[#allocation2 + $0x48] sm:$0xff]   ;;  %v14737_v2 = vld [vmem:[#allocation2 + $0x78] sm:$0xff]  }
 0x4f2   : > { %v9341_v61 = vrot.slane %v9339_v47, 4  ;;  %v17700_v45 = vsel %vm16140_vm1, %v12292_v13, %v9339_v47  ;;  %v17722_v47 = vsel %vm16140_vm1, %v9348_v41, %v9349_v50  ;;  %v9242_v13 = vld [vmem:[#allocation2 + $0x90] sm:$0xe]  ;;  %v9363_v50 = vrot.slane %v17694_v11, 5  ;;  %18919 = vst [vmem:[#allocation32_spill] sm:$0xff] %v17768_v35 }
 0x4f3   : > { %13612 = vmatmul.mubr.bf16.gmra.mrb[16].mxu1 %v18905_v49  ;;  %18908 = vst [vmem:[#allocation23_spill] sm:$0xff] %v17700_v45  ;;  %18911 = vst [vmem:[#allocation20_spill] sm:$0xff] %v17722_v47  ;;  %v12295_v49 = vrot.slane %v9240_v39, 9  ;;  %v12297_v47 = vrot.slane %v9242_v13, 9  ;;  %v18024_v4 = vld [vmem:[#allocation2 + $0x64] sm:$0xf] }
 0x4f4   : > { %13615 = vmatprep.mubr.bf16.mxu1 %v18907_v32  ;;  %v17709_v43 = vsel %vm16140_vm1, %v9341_v61, %v9342_v27  ;;  %v9360_v27 = vrot.slane %v17681_v46, 5  ;;  %v9241_v61 = vld [vmem:[#allocation2 + $0x84] sm:$0xe]  ;;  %v8512_v32 = vld [vmem:[#allocation2 + $0x98] sm:$0x1]  ;;  %18949 = vst [vmem:[#allocation59_spill] sm:$0xff] %v18024_v4 }
 0x4f5   : > { %18909 = vst [vmem:[#allocation24_spill] sm:$0xff] %v17709_v43  ;;  %v12296_v55 = vrot.slane %v9241_v61, 9  ;;  %v8518_v61 = vld [vmem:[#allocation2 + $0xb0] sm:$0x1]  ;;  %v9376_v43 = vrot.slane %v9374_v42, 4  ;;  %v9377_v45 = vrot.slane %v8512_v32, 5  ;;  %v17772_v24 = vsel %vm16140_vm1, %v12297_v47, %v9374_v42 }
 0x4f6   : > { %v17736_v39 = vsel %vm16140_vm1, %v12295_v49, %v9360_v27  ;;  %v9362_v41 = vrot.slane %v9360_v27, 4  ;;  %v18917_v49 = vcombine.low %v17491_v17, %v17498_v63  ;;  %18920 = vst [vmem:[#allocation33_spill] sm:$0xff] %v17772_v24  ;;  %v9381_v32 = vrot.slane %v17732_v7, 5 }
 0x4f7   : > { %18913 = vst [vmem:[#allocation28_spill] sm:$0xff] %v17736_v39  ;;  %v17764_v13 = vsel %vm16140_vm1, %v12296_v55, %v9367_v33  ;;  %v17779_v63 = vsel %vm16140_vm1, %v9376_v43, %v9377_v45  ;;  %v12298_v33 = vrot.slane %v9243_v20, 9  ;;  %v9388_v55 = vrot.slane %v8517_v19, 5  ;;  %v9246_v45 = vld [vmem:[#allocation2 + $0xc0] sm:$0xe] }
 0x4f8   : > { %v17750_v27 = vsel %vm16140_vm1, %v9362_v41, %v9363_v50  ;;  %v17760_v41 = vld [vmem:[#allocation2 + $0xb8] sm:$0xf]  ;;  %v8521_v50 = vld [vmem:[#allocation2 + $0xbc] sm:$0x1]  ;;  %18918 = vst [vmem:[#allocation31_spill] sm:$0xff] %v17764_v13  ;;  %18921 = vst [vmem:[#allocation34_spill] sm:$0xff] %v17779_v63 }
 0x4f9   : > { %18915 = vst [vmem:[#allocation30_spill] sm:$0xff] %v17750_v27  ;;  %v9383_v22 = vrot.slane %v9381_v32, 4  ;;  %v9384_v42 = vrot.slane %v8515_v6, 5  ;;  %v12299_v47 = vrot.slane %v9244_v8, 9  ;;  %v17785_v27 = vsel %vm16140_vm1, %v12298_v33, %v9381_v32  ;;  %v17836_v8 = vld [vmem:[#allocation2 + $0x14] sm:$0x1] }
 0x4fa   : > { %18922 = vst [vmem:[#allocation35_spill] sm:$0xff] %v17785_v27  ;;  %v9390_v39 = vrot.slane %v9388_v55, 4  ;;  %v9391_v17 = vrot.slane %v8518_v61, 5  ;;  %v9395_v35 = vrot.slane %v17760_v41, 5  ;;  %v9398_v33 = vrot.slane %v8521_v50, 5 }
 0x4fb   : > { %13616 = vmatmul.mubr.bf16.gmra.mrb[20].mxu1 %v18916_v54  ;;  %v8523_v54 = vld [vmem:[#allocation2 + $0xc4] sm:$0xf]  ;;  %v17790_v19 = vsel %vm16140_vm1, %v9383_v22, %v9384_v42  ;;  %v17794_v43 = vsel %vm16140_vm1, %v12299_v47, %v9388_v55  ;;  %v12301_v22 = vrot.slane %v9246_v45, 9  ;;  %v9405_v63 = vrot.slane %v8524_v37, 5  ;;  %v14730_v45 = vld [vmem:[#allocation8 + $0x110] sm:$0xff]  }
 0x4fc   : > { %13619 = vmatprep.mubr.bf16.mxu1 %v18917_v49  ;;  %v9245_v49 = vld [vmem:[#allocation2 + $0xb4] sm:$0xe]  ;;  %18923 = vst [vmem:[#allocation36_spill] sm:$0xff] %v17790_v19  ;;  %18924 = vst [vmem:[#allocation37_spill] sm:$0xff] %v17794_v43  ;;  %v9402_v6 = vrot.slane %v8523_v54, 5  ;;  %v17800_v32 = vsel %vm16140_vm1, %v9390_v39, %v9391_v17  ;;  %v9397_v61 = vrot.slane %v9395_v35, 4  ;;  %v18926_v55 = vcombine.low %v17510_v14, %v17514_v40 }
 0x4fd   : > { %v12300_v20 = vrot.slane %v9245_v49, 9  ;;  %18925 = vst [vmem:[#allocation38_spill] sm:$0xff] %v17800_v32  ;;  %v18929_v50 = vcombine.low %v17518_v44, %v17524_v10  ;;  %v18932_v49 = vcombine.low %v17531_v21, %v17535_v48  ;;  %v14725_v44 = vld [vmem:[#allocation2 + $0x18] sm:$0xff]   ;;  %v14727_v10 = vld [vmem:[#allocation8 + $0x108] sm:$0xff]   ;;  %v14733_v21 = vld [vmem:[#allocation8 + $0x118] sm:$0xff]   ;;  %v8611_v24 = vshrl.u32 %v17604_v56, 16 }
 0x4fe   : > { %v9404_v42 = vrot.slane %v9402_v6, 4  ;;  %v17813_v39 = vsel %vm16140_vm1, %v9397_v61, %v9398_v33  ;;  %v17822_v37 = vsel %vm16140_vm1, %v12301_v22, %v9402_v6  ;;  %v14726_v47 = vld [vmem:[#allocation2 + $0x24] sm:$0xff]   ;;  %v14728_v33 = vld [vmem:[#allocation2 + $0x30] sm:$0xff]   ;;  %v14729_v22 = vld [vmem:[#allocation2 + $0x3c] sm:$0xff]  }
 0x4ff   : > { %v17809_v54 = vsel %vm16140_vm1, %v12300_v20, %v9395_v35  ;;  %18928 = vst [vmem:[#allocation40_spill] sm:$0xff] %v17813_v39  ;;  %18930 = vst [vmem:[#allocation41_spill] sm:$0xff] %v17822_v37  ;;  %v14723_v35 = vld [vmem:[#allocation2 + $0xc] sm:$0xff]   ;;  %v8483_v37 = vld [vmem:[#allocation2 + $0x24] sm:$0xf] }
 0x500   : > { %18927 = vst [vmem:[#allocation39_spill] sm:$0xff] %v17809_v54  ;;  %v17826_v14 = vsel %vm16140_vm1, %v9404_v42, %v9405_v63  ;;  %v8477_v63 = vld [vmem:[#allocation2 + $0xc] sm:$0xf]  ;;  %v8478_v20 = vld [vmem:[#allocation2 + $0x10] sm:$0xf]  ;;  %v8574_v39 = vshrl.u32 %v8483_v37, 16 }
 0x501   : > { %18931 = vst [vmem:[#allocation42_spill] sm:$0xff] %v17826_v14  ;;  %v8526_v6 = vshrl.u32 %v8477_v63, 16  ;;  %v8529_v61 = vshll.u32 %v8477_v63, 16  ;;  %v8535_v48 = vshll.u32 %v8478_v20, 16  ;;  %v8539_v42 = vshrl.u32 %v8478_v20, 16  ;;  %v14732_v14 = vld [vmem:[#allocation2 + $0x54] sm:$0xff]  }
 0x502   : > { %v8489_v43 = vld [vmem:[#allocation2 + $0x3c] sm:$0xf] }
 0x503   : > { %13620 = vmatmul.mubr.bf16.gmra.mrb[24].mxu1 %v18926_v55  ;;  %v8480_v55 = vld [vmem:[#allocation2 + $0x18] sm:$0xf]  ;;  %v17834_v40 = vrot.slane %v8535_v48, 5  ;;  %v8541_v63 = vrot.slane %v8539_v42, 4  ;;  %v8583_v42 = vshll.u32 %v17600_v52, 16 }
 0x504   : > { %13623 = vmatprep.mubr.bf16.mxu1 %v18929_v50  ;;  %v8481_v50 = vld [vmem:[#allocation2 + $0x1c] sm:$0xf] }
 0x505   : > { %v8563_v17 = vshrl.u32 %v8481_v50, 16  ;;  %v17848_v32 = vrot.slane %v8583_v42, 5 }
 0x507   : > { %v8565_v48 = vrot.slane %v8563_v17, 4 }
 0x50b   : > { %13624 = vmatmul.mubr.bf16.gmra.mrb[28].mxu1 %v18932_v49  ;;  %v14736_v49 = vld [vmem:[#allocation8 + $0x120] sm:$0xff]  }
 0x50c   : > { %13643 = vmatprep.mubr.bf16.mxu1 %v14723_v35  ;;  %v8531_v35 = vrot.slane %v8529_v61, 5 }
 0x513   : > { %13644 = vmatmul.mubr.bf16.vlgmr.msra.gmra.mrb[0].mxu1 %v14725_v44  ;;  %v8550_v44 = vshrl.u32 %v8480_v55, 16 }
 0x514   : > { %13676 = vmatpush3.bf16.msra.mxu1 %v17627_v29  ;;  %13647 = vmatprep.mubr.bf16.mxu1 %v14726_v47  ;;  %v8528_v29 = vrot.slane %v8526_v6, 4  ;;  %v8553_v47 = vshll.u32 %v8480_v55, 16  ;;  %v8542_v55 = vor.u32 %v8541_v63, %v17834_v40  ;;  %v8577_v63 = vshll.u32 %v8483_v37, 16 }
 0x515   : > { %13677 = vmatprep.subr.bf16.mxu1 %v14727_v10 }
 0x516   : > { %v8532_v20 = vor.u32 %v8531_v35, %v8528_v29  ;;  %v8555_v6 = vrot.slane %v8553_v47, 5  ;;  %v8545_v29 = vshll.u32 %v17836_v8, 16  ;;  %v8486_v35 = vld [vmem:[#allocation2 + $0x30] sm:$0xf]  ;;  %v8543_v17 = vrot.slane %v8542_v55, 4 }
 0x517   : > { %v8576_v55 = vrot.slane %v8574_v39, 4  ;;  %v8579_v27 = vrot.slane %v8577_v63, 5  ;;  %v8622_v39 = vshrl.u32 %v8489_v43, 16  ;;  %v8635_v63 = vshrl.u32 %v17608_v51, 16 }
 0x518   : > { %13678 = vmatpush3.bf16.msra.mxu1 %v14727_v10  ;;  %v8559_v10 = vshll.u32 %v8481_v50, 16  ;;  %v8533_v50 = vrot.slane %v8532_v20, 4  ;;  %v8547_v20 = vrot.slane %v8545_v29, 5 }
 0x519   : > { %13679 = vmatprep.subr.bf16.mxu1 %v14730_v45 }
 0x51a   : > { %v17840_v61 = vrot.slane %v8559_v10, 5  ;;  %v8548_v42 = vsel %vm15442_vm2, %v8543_v17, %v8547_v20  ;;  %v8580_v20 = vor.u32 %v8579_v27, %v8576_v55  ;;  %v8624_v27 = vrot.slane %v8622_v39, 4 }
 0x51b   : > { %13648 = vmatmul.mubr.bf16.gmra.mrb[4].mxu1 %v14728_v33  ;;  %v14739_v33 = vld [vmem:[#allocation8 + $0x128] sm:$0xff]   ;;  %v8617_v39 = vshll.u32 %v17606_v60, 16 }
 0x51c   : > { %13651 = vmatprep.mubr.bf16.mxu1 %v14729_v22  ;;  %13680 = vmatpush3.bf16.msra.mxu1 %v14730_v45  ;;  %v17838_v22 = vld [vmem:[#allocation2 + $0x20] sm:$0x1]  ;;  %v8552_v45 = vrot.slane %v8550_v44, 4  ;;  %v14742_v44 = vld [vmem:[#allocation8 + $0x130] sm:$0xff]   ;;  %v8566_v54 = vor.u32 %v8565_v48, %v17840_v61 }
 0x51d   : > { %13681 = vmatprep.subr.bf16.mxu1 %v14733_v21  ;;  %v8569_v10 = vshll.u32 %v17838_v22, 16  ;;  %v14735_v48 = vld [vmem:[#allocation2 + $0x6c] sm:$0xff]  }
 0x51e   : > { %v8556_v47 = vor.u32 %v8555_v6, %v8552_v45  ;;  %v14734_v45 = vld [vmem:[#allocation2 + $0x60] sm:$0xff]   ;;  %v14745_v6 = vld [vmem:[#allocation8 + $0x138] sm:$0xff]  }
 0x51f   : > { %v8571_v37 = vrot.slane %v8569_v10, 5  ;;  %v8631_v10 = vshll.u32 %v17608_v51, 16 }
 0x520   : > { %13682 = vmatpush3.bf16.msra.mxu1 %v14733_v21  ;;  %v8587_v21 = vshrl.u32 %v17600_v52, 16  ;;  %v8557_v19 = vrot.slane %v8556_v47, 4  ;;  %v8625_v47 = vshll.u32 %v8489_v43, 16 }
 0x521   : > { %13683 = vmatprep.subr.bf16.mxu1 %v14736_v49  ;;  %v17874_v13 = vrot.slane %v8631_v10, 5 }
 0x522   : > { %v8589_v52 = vrot.slane %v8587_v21, 4  ;;  %v8567_v21 = vrot.slane %v8566_v54, 4  ;;  %v8492_v54 = vld [vmem:[#allocation2 + $0x48] sm:$0xf]  ;;  %v8627_v55 = vrot.slane %v8625_v47, 5 }
 0x523   : > { %13652 = vmatmul.mubr.bf16.gmra.mrb[8].mxu1 %v14731_v5  ;;  %v8598_v5 = vshrl.u32 %v8486_v35, 16 }
 0x524   : > { %13655 = vmatprep.mubr.bf16.mxu1 %v14732_v14  ;;  %13684 = vmatpush3.bf16.msra.mxu1 %v14736_v49  ;;  %v8601_v14 = vshll.u32 %v8486_v35, 16  ;;  %v8538_v49 = vsel %vm15442_vm2, %v8533_v50, %v17834_v40  ;;  %v8607_v35 = vshll.u32 %v17604_v56, 16  ;;  %v8593_v40 = vshll.u32 %v17602_v62, 16 }
 0x525   : > { %13685 = vmatprep.subr.bf16.mxu1 %v14739_v33  ;;  %v8600_v50 = vrot.slane %v8598_v5, 4  ;;  %v17861_v17 = vcombine.low %v8538_v49, %v8548_v42  ;;  %v8655_v62 = vshll.u32 %v17613_v16, 16  ;;  %v8659_v5 = vshrl.u32 %v17613_v16, 16 }
 0x526   : > { %v8603_v29 = vrot.slane %v8601_v14, 5  ;;  %v8562_v56 = vsel %vm15442_vm2, %v8557_v19, %v17840_v61  ;;  %v8572_v43 = vsel %vm15442_vm2, %v8567_v21, %v8571_v37  ;;  %v17872_v51 = vrot.slane %v8607_v35, 5  ;;  %v8495_v14 = vld [vmem:[#allocation2 + $0x54] sm:$0xf] }
 0x527   : > { %v8649_v42 = vshll.u32 %v8492_v54, 16  ;;  %v8637_v16 = vrot.slane %v8635_v63, 4  ;;  %v17877_v19 = vrot.slane %v8655_v62, 5  ;;  %v8661_v61 = vrot.slane %v8659_v5, 4 }
 0x528   : > { %13686 = vmatpush3.bf16.msra.mxu1 %v14739_v33  ;;  %v8590_v33 = vor.u32 %v8589_v52, %v17848_v32  ;;  %v17863_v52 = vld [vmem:[#allocation8 + $0x140] sm:$0xff]   ;;  %v8604_v49 = vor.u32 %v8603_v29, %v8600_v50  ;;  %v8670_v37 = vshrl.u32 %v8495_v14, 16  ;;  %v8673_v21 = vshll.u32 %v8495_v14, 16 }
 0x529   : > { %13687 = vmatprep.subr.bf16.mxu1 %v14742_v44  ;;  %v8581_v35 = vrot.slane %v8580_v20, 4  ;;  %v8595_v50 = vrot.slane %v8593_v40, 5  ;;  %v8651_v10 = vrot.slane %v8649_v42, 5  ;;  %v17883_v63 = vcombine.low %v8562_v56, %v8572_v43  ;;  %v8498_v43 = vld [vmem:[#allocation2 + $0x60] sm:$0xf] }
 0x52a   : > { %v8628_v62 = vor.u32 %v8627_v55, %v8624_v27  ;;  %v8638_v5 = vor.u32 %v8637_v16, %v17874_v13  ;;  %v8662_v20 = vor.u32 %v8661_v61, %v17877_v19  ;;  %v8641_v14 = vshll.u32 %v17611_v31, 16 }
 0x52b   : > { %13656 = vmatmul.mubr.bf16.gmra.mrb[12].mxu1 %v14734_v45  ;;  %v8613_v45 = vrot.slane %v8611_v24, 4  ;;  %v8679_v24 = vshll.u32 %v17624_v3, 16  ;;  %v8586_v60 = vsel %vm15442_vm2, %v8581_v35, %v17848_v32  ;;  %v8665_v27 = vshll.u32 %v17618_v57, 16  ;;  %v14740_v32 = vld [vmem:[#allocation2 + $0x90] sm:$0xff]   ;;  %v8501_v35 = vld [vmem:[#allocation2 + $0x6c] sm:$0xf] }
 0x52c   : > { %13659 = vmatprep.mubr.bf16.mxu1 %v14735_v48  ;;  %13688 = vmatpush3.bf16.msra.mxu1 %v14742_v44  ;;  %v8591_v44 = vrot.slane %v8590_v33, 4  ;;  %v8646_v48 = vshrl.u32 %v8492_v54, 16  ;;  %v14738_v33 = vld [vmem:[#allocation2 + $0x84] sm:$0xff]   ;;  %v8605_v54 = vrot.slane %v8604_v49, 4  ;;  %v8629_v16 = vrot.slane %v8628_v62, 4 }
 0x52d   : > { %13689 = vmatprep.subr.bf16.mxu1 %v14745_v6  ;;  %v8614_v29 = vor.u32 %v8613_v45, %v17872_v51  ;;  %v17893_v45 = vrot.slane %v8679_v24, 5  ;;  %v8639_v61 = vrot.slane %v8638_v5, 4  ;;  %v8643_v24 = vrot.slane %v8641_v14, 5 }
 0x52e   : > { %v8648_v47 = vrot.slane %v8646_v48, 4  ;;  %v8596_v40 = vsel %vm15442_vm2, %v8591_v44, %v8595_v50  ;;  %v8619_v48 = vrot.slane %v8617_v39, 5  ;;  %v8610_v55 = vsel %vm15442_vm2, %v8605_v54, %v17872_v51  ;;  %v14741_v50 = vld [vmem:[#allocation2 + $0x9c] sm:$0xff]  }
 0x52f   : > { %v8615_v49 = vrot.slane %v8614_v29, 4  ;;  %v17896_v44 = vcombine.low %v8586_v60, %v8596_v40  ;;  %v8703_v57 = vshll.u32 %v17643_v34, 16  ;;  %v8707_v29 = vshrl.u32 %v17643_v34, 16 }
 0x530   : > { %13690 = vmatpush3.bf16.msra.mxu1 %v14745_v6  ;;  %v8683_v6 = vshrl.u32 %v17624_v3, 16  ;;  %v8672_v3 = vrot.slane %v8670_v37, 4  ;;  %v8652_v42 = vor.u32 %v8651_v10, %v8648_v47  ;;  %v8663_v37 = vrot.slane %v8662_v20, 4 }
 0x531   : > { %13723 = vmatprep.subr.bf16.mxu1 %v17863_v52  ;;  %v8620_v51 = vsel %vm15442_vm2, %v8615_v49, %v8619_v48  ;;  %v8667_v47 = vrot.slane %v8665_v27, 5  ;;  %v8689_v10 = vshll.u32 %v17629_v12, 16  ;;  %v8634_v54 = vsel %vm15442_vm2, %v8629_v16, %v17874_v13  ;;  %v17920_v12 = vld [vmem:[#allocation2 + $0x78] sm:$0xf]  ;;  %v17940_v16 = vld [vmem:[#allocation2 + $0x20] sm:$0x1] }
 0x532   : > { %v8685_v56 = vrot.slane %v8683_v6, 4  ;;  %v8653_v39 = vrot.slane %v8652_v42, 4  ;;  %v8644_v62 = vsel %vm15442_vm2, %v8639_v61, %v8643_v24  ;;  %v8718_v5 = vshrl.u32 %v8501_v35, 16  ;;  %18934 = vst [vmem:[#allocation44_spill] sm:$0xff] %v17940_v16  ;;  %v10869_v61 = vld [vmem:[#allocation2 + $0x18] sm:$0xe] }
 0x533   : > { %13660 = vmatmul.mubr.bf16.gmra.mrb[16].mxu1 %v14737_v2  ;;  %v8675_v2 = vrot.slane %v8673_v21, 5  ;;  %v8694_v21 = vshrl.u32 %v8498_v43, 16  ;;  %v8721_v40 = vshll.u32 %v8501_v35, 16  ;;  %v8668_v34 = vsel %vm15442_vm2, %v8663_v37, %v8667_v47  ;;  %v14744_v35 = vld [vmem:[#allocation2 + $0xb4] sm:$0xff]   ;;  %v17968_v47 = vld [vmem:[#allocation2 + $0x2c] sm:$0x1] }
 0x534   : > { %13663 = vmatprep.mubr.bf16.mxu1 %v14738_v33  ;;  %v8697_v33 = vshll.u32 %v8498_v43, 16  ;;  %v8686_v6 = vor.u32 %v8685_v56, %v17893_v45  ;;  %v17924_v14 = vrot.slane %v8703_v57, 5  ;;  %v17926_v13 = vrot.slane %v8707_v29, 4  ;;  %v17929_v43 = vld [vmem:[#allocation2 + $0x1c] sm:$0xf]  ;;  %18936 = vst [vmem:[#allocation46_spill] sm:$0xff] %v17968_v47 }
 0x535   : > { %v8676_v31 = vor.u32 %v8675_v2, %v8672_v3  ;;  %v17916_v3 = vrot.slane %v8694_v21, 4  ;;  %v8727_v56 = vshll.u32 %v17666_v15, 16  ;;  %18933 = vst [vmem:[#allocation43_spill] sm:$0xff] %v17929_v43  ;;  %v17931_v49 = vcombine.low %v8610_v55, %v8620_v51  ;;  %v17949_v21 = vld [vmem:[#allocation2 + $0x28] sm:$0xf] }
 0x536   : > { %v17918_v2 = vrot.slane %v8697_v33, 5  ;;  %v17922_v60 = vrot.slane %v8686_v6, 4  ;;  %v17933_v48 = vcombine.low %v8634_v54, %v8644_v62  ;;  %v8658_v42 = vsel %vm15442_vm2, %v8653_v39, %v17877_v19  ;;  %18935 = vst [vmem:[#allocation45_spill] sm:$0xff] %v17949_v21  ;;  %v14743_v33 = vld [vmem:[#allocation2 + $0xa8] sm:$0xff]   ;;  %v10870_v57 = vld [vmem:[#allocation2 + $0x24] sm:$0xe] }
 0x537   : > { %v17914_v20 = vrot.slane %v8676_v31, 4  ;;  %v17938_v27 = vrot.slane %v8689_v10, 5  ;;  %v17944_v37 = vrot.slane %v8718_v5, 4  ;;  %v17946_v31 = vrot.slane %v8721_v40, 5  ;;  %v17970_v10 = vld [vmem:[#allocation2 + $0x34] sm:$0xf] }
 0x538   : > { %v8731_v55 = vshrl.u32 %v17666_v15, 16  ;;  %v10935_v6 = vrot.slane %v17929_v43, 5  ;;  %v17965_v51 = vrot.slane %v8727_v56, 5  ;;  %18937 = vst [vmem:[#allocation47_spill] sm:$0xff] %v17970_v10  ;;  %v17972_v54 = vld [vmem:[#allocation2 + $0x38] sm:$0x1] }
 0x539   : > { %18938 = vst [vmem:[#allocation48_spill] sm:$0xff] %v17972_v54  ;;  %v17974_v62 = vld [vmem:[#allocation2 + $0x40] sm:$0xf]  ;;  %v12374_v5 = vrot.slane %v10869_v61, 9  ;;  %v12375_v15 = vrot.slane %v10870_v57, 9 }
 0x53a   : > { %18939 = vst [vmem:[#allocation49_spill] sm:$0xff] %v17974_v62  ;;  %v10937_v40 = vrot.slane %v10935_v6, 4  ;;  %v17980_v24 = vrot.slane %v8731_v55, 4  ;;  %v17983_v29 = vld [vmem:[#allocation2 + $0x4c] sm:$0xf]  ;;  %v10956_v55 = vrot.slane %v17974_v62, 5 }
 0x53b   : > { %13664 = vmatmul.mubr.bf16.gmra.mrb[20].mxu1 %v14740_v32  ;;  %v17942_v32 = vcombine.low %v8658_v42, %v8668_v34  ;;  %v10938_v34 = vrot.slane %v17940_v16, 5  ;;  %v10942_v42 = vrot.slane %v17949_v21, 5  ;;  %18940 = vst [vmem:[#allocation50_spill] sm:$0xff] %v17983_v29  ;;  %v17987_v61 = vsel %vm16140_vm1, %v12374_v5, %v10935_v6  ;;  %v10872_v56 = vld [vmem:[#allocation2 + $0x3c] sm:$0xe]  ;;  %v14746_v21 = vld [vmem:[#allocation2 + $0xc0] sm:$0xff]  }
 0x53c   : > { %13667 = vmatprep.mubr.bf16.mxu1 %v14741_v50  ;;  %18941 = vst [vmem:[#allocation51_spill] sm:$0xff] %v17987_v61  ;;  %v10945_v50 = vrot.slane %v17968_v47, 5  ;;  %v17996_v57 = vld [vmem:[#allocation2 + $0x44] sm:$0x1]  ;;  %v10949_v6 = vrot.slane %v17970_v10, 5  ;;  %v10952_v61 = vrot.slane %v17972_v54, 5 }
 0x53d   : > { %v17991_v39 = vsel %vm16140_vm1, %v10937_v40, %v10938_v34  ;;  %18943 = vst [vmem:[#allocation53_spill] sm:$0xff] %v17996_v57  ;;  %v10129_v5 = vld [vmem:[#allocation2 + $0x50] sm:$0x1]  ;;  %v18003_v40 = vsel %vm16140_vm1, %v12375_v15, %v10942_v42  ;;  %v10873_v19 = vld [vmem:[#allocation2 + $0x48] sm:$0xe]  ;;  %v12377_v10 = vrot.slane %v10872_v56, 9 }
 0x53e   : > { %18942 = vst [vmem:[#allocation52_spill] sm:$0xff] %v17991_v39  ;;  %18944 = vst [vmem:[#allocation54_spill] sm:$0xff] %v18003_v40  ;;  %v18010_v43 = vld [vmem:[#allocation2 + $0x58] sm:$0xf]  ;;  %v10951_v39 = vrot.slane %v10949_v6, 4  ;;  %v12378_v15 = vrot.slane %v10873_v19, 9 }
 0x53f   : > { %18946 = vst [vmem:[#allocation56_spill] sm:$0xff] %v18010_v43  ;;  %v10874_v62 = vld [vmem:[#allocation2 + $0x54] sm:$0xe]  ;;  %v18032_v56 = vsel %vm16140_vm1, %v12377_v10, %v10956_v55  ;;  %v10875_v40 = vld [vmem:[#allocation2 + $0x60] sm:$0xe] }
 0x540   : > { %v18028_v16 = vsel %vm16140_vm1, %v10951_v39, %v10952_v61  ;;  %18951 = vst [vmem:[#allocation61_spill] sm:$0xff] %v18032_v56  ;;  %v10966_v39 = vrot.slane %v10129_v5, 5  ;;  %v10970_v61 = vrot.slane %v18010_v43, 5  ;;  %v10140_v19 = vld [vmem:[#allocation2 + $0x7c] sm:$0xf]  ;;  %v12380_v5 = vrot.slane %v10875_v40, 9 }
 0x541   : > { %18950 = vst [vmem:[#allocation60_spill] sm:$0xff] %v18028_v16  ;;  %v10141_v16 = vld [vmem:[#allocation2 + $0x80] sm:$0x1]  ;;  %v10877_v56 = vld [vmem:[#allocation2 + $0x78] sm:$0xe] }
 0x542   : > { %v14748_v43 = vld [vmem:[#allocation8 + $0x148] sm:$0xff]  }
 0x543   : > { %13668 = vmatmul.mubr.bf16.gmra.mrb[24].mxu1 %v14743_v33  ;;  %v10871_v33 = vld [vmem:[#allocation2 + $0x30] sm:$0xe] }
 0x544   : > { %13671 = vmatprep.mubr.bf16.mxu1 %v14744_v35  ;;  %v10944_v35 = vrot.slane %v10942_v42, 4  ;;  %v12376_v47 = vrot.slane %v10871_v33, 9  ;;  %v18017_v42 = vld [vmem:[#allocation2 + $0x5c] sm:$0x1]  ;;  %v10958_v33 = vrot.slane %v10956_v55, 4  ;;  %v12379_v55 = vrot.slane %v10874_v62, 9 }
 0x545   : > { %18947 = vst [vmem:[#allocation57_spill] sm:$0xff] %v18017_v42 }
 0x546   : > { %v18007_v34 = vsel %vm16140_vm1, %v10944_v35, %v10945_v50  ;;  %v18021_v50 = vsel %vm16140_vm1, %v12376_v47, %v10949_v6  ;;  %v10959_v35 = vrot.slane %v17996_v57, 5  ;;  %v10135_v47 = vld [vmem:[#allocation2 + $0x68] sm:$0x1]  ;;  %v18035_v6 = vld [vmem:[#allocation2 + $0x70] sm:$0xf]  ;;  %v18059_v62 = vsel %vm16140_vm1, %v12379_v55, %v10970_v61 }
 0x547   : > { %18945 = vst [vmem:[#allocation55_spill] sm:$0xff] %v18007_v34  ;;  %18948 = vst [vmem:[#allocation58_spill] sm:$0xff] %v18021_v50  ;;  %v10963_v34 = vrot.slane %v17983_v29, 5  ;;  %v10973_v29 = vrot.slane %v18017_v42, 5  ;;  %v10980_v10 = vrot.slane %v10135_v47, 5 }
 0x548   : > { %18952 = vst [vmem:[#allocation62_spill] sm:$0xff] %v18035_v6  ;;  %v18041_v54 = vsel %vm16140_vm1, %v10958_v33, %v10959_v35  ;;  %v10972_v33 = vrot.slane %v10970_v61, 4  ;;  %v10977_v35 = vrot.slane %v18024_v4, 5  ;;  %18955 = vst [vmem:[#allocation65_spill] sm:$0xff] %v18059_v62  ;;  %v10143_v50 = vld [vmem:[#allocation2 + $0x88] sm:$0xf] }
 0x549   : > { %18953 = vst [vmem:[#allocation63_spill] sm:$0xff] %v18041_v54  ;;  %v18050_v57 = vsel %vm16140_vm1, %v12378_v15, %v10963_v34  ;;  %v10984_v54 = vrot.slane %v18035_v6, 5  ;;  %v10987_v6 = vrot.slane %v10138_v18, 5  ;;  %v10878_v4 = vld [vmem:[#allocation2 + $0x84] sm:$0xe]  ;;  %v10998_v62 = vrot.slane %v10143_v50, 5 }
 0x54a   : > { %v18066_v15 = vsel %vm16140_vm1, %v10972_v33, %v10973_v29  ;;  %v10979_v42 = vrot.slane %v10977_v35, 4  ;;  %v18072_v47 = vsel %vm16140_vm1, %v12380_v5, %v10977_v35  ;;  %v10991_v33 = vrot.slane %v10140_v19, 5  ;;  %v10147_v61 = vld [vmem:[#allocation2 + $0x98] sm:$0x1]  ;;  %v10150_v5 = vld [vmem:[#allocation2 + $0xa4] sm:$0x1] }
 0x54b   : > { %13672 = vmatmul.mubr.bf16.gmra.mrb[28].mxu1 %v14746_v21  ;;  %v10965_v21 = vrot.slane %v10963_v34, 4  ;;  %v10146_v34 = vld [vmem:[#allocation2 + $0x94] sm:$0xf]  ;;  %18956 = vst [vmem:[#allocation66_spill] sm:$0xff] %v18066_v15  ;;  %v10986_v55 = vrot.slane %v10984_v54, 4  ;;  %v10994_v35 = vrot.slane %v10141_v16, 5 }
 0x54c   : > { %13691 = vmatprep.mubr.bf16.mxu1 %v17861_v17  ;;  %v18076_v40 = vsel %vm16140_vm1, %v10979_v42, %v10980_v10  ;;  %v10149_v15 = vld [vmem:[#allocation2 + $0xa0] sm:$0xf]  ;;  %v10152_v42 = vld [vmem:[#allocation2 + $0xac] sm:$0xf]  ;;  %v12383_v19 = vrot.slane %v10878_v4, 9  ;;  %v11000_v16 = vrot.slane %v10998_v62, 4 }
 0x54d   : > { %v18055_v17 = vsel %vm16140_vm1, %v10965_v21, %v10966_v39  ;;  %v12381_v39 = vrot.slane %v10876_v58, 9  ;;  %v10144_v21 = vld [vmem:[#allocation2 + $0x8c] sm:$0x1]  ;;  %18957 = vst [vmem:[#allocation67_spill] sm:$0xff] %v18076_v40  ;;  %v12382_v58 = vrot.slane %v10877_v56, 9  ;;  %v18086_v18 = vsel %vm16140_vm1, %v10986_v55, %v10987_v6 }
 0x54e   : > { %18954 = vst [vmem:[#allocation64_spill] sm:$0xff] %v18055_v17  ;;  %v10879_v17 = vld [vmem:[#allocation2 + $0x90] sm:$0xe]  ;;  %18959 = vst [vmem:[#allocation69_spill] sm:$0xff] %v18086_v18  ;;  %v10993_v56 = vrot.slane %v10991_v33, 4  ;;  %v11001_v10 = vrot.slane %v10144_v21, 5 }
 0x54f   : > { %v18080_v29 = vsel %vm16140_vm1, %v12381_v39, %v10984_v54  ;;  %v10880_v39 = vld [vmem:[#allocation2 + $0x9c] sm:$0xe]  ;;  %v18095_v6 = vsel %vm16140_vm1, %v12382_v58, %v10991_v33  ;;  %v12384_v50 = vrot.slane %v10879_v17, 9  ;;  %v14749_v55 = vld [vmem:[#allocation8 + $0x150] sm:$0xff]   ;;  %v10153_v40 = vld [vmem:[#allocation2 + $0xb0] sm:$0x1] }
 0x550   : > { %18958 = vst [vmem:[#allocation68_spill] sm:$0xff] %v18080_v29  ;;  %v18099_v4 = vsel %vm16140_vm1, %v10993_v56, %v10994_v35  ;;  %v11012_v21 = vrot.slane %v10149_v15, 5  ;;  %v10155_v54 = vld [vmem:[#allocation2 + $0xb8] sm:$0xf]  ;;  %v18109_v17 = vsel %vm16140_vm1, %v11000_v16, %v11001_v10  ;;  %v12385_v33 = vrot.slane %v10880_v39, 9 }
 0x551   : > { %18960 = vst [vmem:[#allocation70_spill] sm:$0xff] %v18099_v4  ;;  %18962 = vst [vmem:[#allocation72_spill] sm:$0xff] %v18109_v17  ;;  %v10881_v18 = vld [vmem:[#allocation2 + $0xa8] sm:$0xe]  ;;  %v18963_v35 = vshll.u32 %v17681_v46, 16  ;;  %v11015_v15 = vrot.slane %v10150_v5, 5 }
 0x552   : > { %v10156_v29 = vld [vmem:[#allocation2 + $0xbc] sm:$0x1]  ;;  %v10158_v58 = vld [vmem:[#allocation2 + $0xc4] sm:$0xf]  ;;  %v18127_v16 = vsel %vm16140_vm1, %v12385_v33, %v11012_v21  ;;  %v10883_v17 = vld [vmem:[#allocation2 + $0xc0] sm:$0xe] }
 0x553   : > { %13692 = vmatmul.mubr.bf16.vlgmr.msra.gmra.mrb[0].mxu1 %v17883_v63  ;;  %v11005_v63 = vrot.slane %v10146_v34, 5  ;;  %v18113_v56 = vrot.slane %v18963_v35, 5  ;;  %v11019_v35 = vrot.slane %v10152_v42, 5  ;;  %v18966_v42 = vshrl.u32 %v17681_v46, 16 }
 0x554   : > { %13724 = vmatpush3.bf16.msra.mxu1 %v17863_v52  ;;  %13695 = vmatprep.mubr.bf16.mxu1 %v17896_v44  ;;  %v18103_v52 = vsel %vm16140_vm1, %v12383_v19, %v10998_v62  ;;  %v11008_v44 = vrot.slane %v10147_v61, 5  ;;  %v11014_v61 = vrot.slane %v11012_v21, 4  ;;  %v10882_v19 = vld [vmem:[#allocation2 + $0xb4] sm:$0xe]  ;;  %v11022_v21 = vrot.slane %v10153_v40, 5  ;;  %v14751_v40 = vld [vmem:[#allocation8 + $0x160] sm:$0xff]  }
 0x555   : > { %13725 = vmatprep.subr.bf16.mxu1 %v14748_v43  ;;  %18961 = vst [vmem:[#allocation71_spill] sm:$0xff] %v18103_v52  ;;  %v11007_v34 = vrot.slane %v11005_v63, 4  ;;  %v18119_v10 = vsel %vm16140_vm1, %v12384_v50, %v11005_v63  ;;  %v14750_v62 = vld [vmem:[#allocation8 + $0x158] sm:$0xff]   ;;  %v12386_v50 = vrot.slane %v10881_v18, 9  ;;  %v11026_v63 = vrot.slane %v10155_v54, 5  ;;  %v19038_v23 = vld [vmem:[#allocation64_spill] sm:$0xff] }
 0x556   : > { %18964 = vst [vmem:[#allocation73_spill] sm:$0xff] %v18119_v10  ;;  %v18133_v5 = vsel %vm16140_vm1, %v11014_v61, %v11015_v15  ;;  %v10159_v52 = vld [vmem:[#allocation2 + $0xc8] sm:$0x1]  ;;  %v12387_v33 = vrot.slane %v10882_v19, 9  ;;  %v8757_v4 = vrot.slane %v18966_v42, 4  ;;  %v11033_v10 = vrot.slane %v10158_v58, 5 }
 0x557   : > { %v18123_v39 = vsel %vm16140_vm1, %v11007_v34, %v11008_v44  ;;  %v12401_v44 = vcombine.low %v18127_v16, %v18133_v5  ;;  %v11021_v34 = vrot.slane %v11019_v35, 4  ;;  %v18143_v18 = vsel %vm16140_vm1, %v12386_v50, %v11019_v35  ;;  %v18537_v16 = vld [vmem:[%s19057_s1] ss:$0 sm:$0xff] }
 0x558   : > { %13726 = vmatpush3.bf16.msra.mxu1 %v14748_v43  ;;  %18965 = vst [vmem:[#allocation74_spill] sm:$0xff] %v18123_v39  ;;  %v11028_v43 = vrot.slane %v11026_v63, 4  ;;  %v11029_v39 = vrot.slane %v10156_v29, 5  ;;  %v12388_v46 = vrot.slane %v10883_v17, 9  ;;  %v8507_v29 = vld [vmem:[#allocation2 + $0x84] sm:$0xf]  ;;  %v18967_v15 = vor.u32 %v17918_v2, %v17916_v3 }
 0x559   : > { %13727 = vmatprep.subr.bf16.mxu1 %v14749_v55  ;;  %v18147_v54 = vsel %vm16140_vm1, %v11021_v34, %v11022_v21  ;;  %v11035_v58 = vrot.slane %v11033_v10, 4  ;;  %v11036_v61 = vrot.slane %v10159_v52, 5  ;;  %v8737_v35 = vshll.u32 %v17692_v26, 16 }
 0x55a   : > { %v8701_v19 = vrot.slane %v18967_v15, 4  ;;  %v18968_v17 = vshrl.u32 %v17920_v12, 16  ;;  %v8775_v34 = vshll.u32 %v17703_v0, 16  ;;  %v8779_v21 = vshrl.u32 %v17703_v0, 16 }
 0x55b   : > { %13696 = vmatmul.mubr.bf16.gmra.mrb[4].mxu1 %v17931_v49  ;;  %v18151_v49 = vsel %vm16140_vm1, %v12387_v33, %v11026_v63  ;;  %v18175_v3 = vsel %vm16140_vm1, %v11035_v58, %v11036_v61  ;;  %v18969_v26 = vshll.u32 %v17920_v12, 16  ;;  %v8766_v52 = vshrl.u32 %v8507_v29, 16  ;;  %v14752_v61 = vld [vmem:[#allocation8 + $0x168] sm:$0xff]  }
 0x55c   : > { %13699 = vmatprep.mubr.bf16.mxu1 %v17933_v48  ;;  %13728 = vmatpush3.bf16.msra.mxu1 %v14749_v55  ;;  %v12402_v48 = vcombine.low %v18143_v18, %v18147_v54  ;;  %v18157_v55 = vsel %vm16140_vm1, %v11028_v43, %v11029_v39  ;;  %v8744_v50 = vrot.slane %v18968_v17, 4  ;;  %v18171_v39 = vsel %vm16140_vm1, %v12388_v46, %v11033_v10 }
 0x55d   : > { %13729 = vmatprep.subr.bf16.mxu1 %v14750_v62  ;;  %v12403_v63 = vcombine.low %v18151_v49, %v18157_v55  ;;  %v8747_v2 = vrot.slane %v18969_v26, 5  ;;  %v8769_v43 = vshll.u32 %v8507_v29, 16  ;;  %v12404_v33 = vcombine.low %v18171_v39, %v18175_v3 }
 0x55e   : > { %v18970_v0 = vor.u32 %v17926_v13, %v17924_v14  ;;  %v18971_v10 = vor.u32 %v17946_v31, %v17944_v37  ;;  %v18972_v58 = vor.u32 %v17980_v24, %v17965_v51  ;;  %v8758_v12 = vor.u32 %v8757_v4, %v18113_v56 }
 0x55f   : > { %v18973_v29 = vsel %vm15442_vm2, %v17922_v60, %v17938_v27  ;;  %v18974_v13 = vsel %vm15442_vm2, %v17914_v20, %v17893_v45  ;;  %v18975_v31 = vshll.u32 %v17661_v30, 16  ;;  %v8739_v24 = vrot.slane %v8737_v35, 5 }
 0x560   : > { %13730 = vmatpush3.bf16.msra.mxu1 %v14750_v62  ;;  %v8711_v42 = vrot.slane %v18970_v0, 4  ;;  %v8725_v46 = vrot.slane %v18971_v10, 4  ;;  %v8735_v62 = vrot.slane %v18972_v58, 4  ;;  %v12268_v37 = vcombine.low %v18974_v13, %v18973_v29  ;;  %v8510_v0 = vld [vmem:[#allocation2 + $0x90] sm:$0xf] }
 0x561   : > { %13731 = vmatprep.subr.bf16.mxu1 %v14751_v40  ;;  %v8715_v15 = vrot.slane %v18975_v31, 5  ;;  %v8761_v4 = vshll.u32 %v17694_v11, 16  ;;  %v18205_v17 = vrot.slane %v8775_v34, 5  ;;  %v8781_v26 = vrot.slane %v8779_v21, 4  ;;  %v14753_v34 = vld [vmem:[#allocation8 + $0x170] sm:$0xff]   ;;  %v14754_v13 = vld [vmem:[#allocation8 + $0x178] sm:$0xff]  }
 0x562   : > { %v8706_v60 = vsel %vm15442_vm2, %v8701_v19, %v17924_v14  ;;  %v8748_v27 = vor.u32 %v8747_v2, %v8744_v50  ;;  %v8768_v45 = vrot.slane %v8766_v52, 4  ;;  %v8771_v20 = vrot.slane %v8769_v43, 5  ;;  %v8513_v19 = vld [vmem:[#allocation2 + $0x9c] sm:$0xf] }
 0x563   : > { %13700 = vmatmul.mubr.bf16.gmra.mrb[8].mxu1 %v17942_v32  ;;  %v8716_v30 = vsel %vm15442_vm2, %v8711_v42, %v8715_v15  ;;  %v8730_v11 = vsel %vm15442_vm2, %v8725_v46, %v17965_v51  ;;  %v8740_v32 = vsel %vm15442_vm2, %v8735_v62, %v8739_v24  ;;  %v8759_v35 = vrot.slane %v8758_v12, 4 }
 0x564   : > { %13703 = vmatprep.mubr.bf16.mxu1 %v12268_v37  ;;  %13732 = vmatpush3.bf16.msra.mxu1 %v14751_v40  ;;  %v8790_v21 = vshrl.u32 %v8510_v0, 16  ;;  %v8793_v10 = vshll.u32 %v8510_v0, 16  ;;  %v8799_v14 = vshll.u32 %v17705_v1, 16  ;;  %v8803_v40 = vshrl.u32 %v17705_v1, 16 }
 0x565   : > { %13733 = vmatprep.subr.bf16.mxu1 %v14752_v61  ;;  %v8763_v50 = vrot.slane %v8761_v4, 5  ;;  %v8782_v2 = vor.u32 %v8781_v26, %v18205_v17  ;;  %v8823_v52 = vshll.u32 %v17732_v7, 16  ;;  %v8827_v51 = vshrl.u32 %v17732_v7, 16 }
 0x566   : > { %v12269_v43 = vcombine.low %v8706_v60, %v8716_v30  ;;  %v12270_v42 = vcombine.low %v8730_v11, %v8740_v32  ;;  %v8749_v46 = vrot.slane %v8748_v27, 4  ;;  %v8772_v58 = vor.u32 %v8771_v20, %v8768_v45  ;;  %v8516_v20 = vld [vmem:[#allocation2 + $0xa8] sm:$0xf]  ;;  %v18232_v30 = vld [vmem:[#allocation8 + $0x180] sm:$0xff]  }
 0x567   : > { %v8764_v62 = vsel %vm15442_vm2, %v8759_v35, %v8763_v50  ;;  %v8785_v12 = vshll.u32 %v17716_v28, 16  ;;  %v8814_v29 = vshrl.u32 %v8513_v19, 16  ;;  %v8817_v1 = vshll.u32 %v8513_v19, 16  ;;  %v14850_v35 = vld [vmem:[#allocation2 + $0xac] sm:$0xf] }
 0x568   : > { %13734 = vmatpush3.bf16.msra.mxu1 %v14752_v61  ;;  %v8792_v37 = vrot.slane %v8790_v21, 4  ;;  %v8795_v31 = vrot.slane %v8793_v10, 5  ;;  %v18225_v15 = vrot.slane %v8799_v14, 5  ;;  %v8805_v24 = vrot.slane %v8803_v40, 4  ;;  %v8519_v14 = vld [vmem:[#allocation2 + $0xb4] sm:$0xf] }
 0x569   : > { %13735 = vmatprep.subr.bf16.mxu1 %v14753_v34  ;;  %v8783_v7 = vrot.slane %v8782_v2, 4  ;;  %v18227_v4 = vrot.slane %v8823_v52, 5  ;;  %v8829_v26 = vrot.slane %v8827_v51, 4  ;;  %v8754_v61 = vsel %vm15442_vm2, %v8749_v46, %v18113_v56  ;;  %v14851_v2 = vld [vmem:[#allocation2 + $0x98] sm:$0x1] }
 0x56a   : > { %v8773_v28 = vrot.slane %v8772_v58, 4  ;;  %v12271_v0 = vcombine.low %v8754_v61, %v8764_v62  ;;  %v8787_v60 = vrot.slane %v8785_v12, 5  ;;  %v8816_v27 = vrot.slane %v8814_v29, 4  ;;  %v14852_v46 = vld [vmem:[#allocation2 + $0xa4] sm:$0x1] }
 0x56b   : > { %13704 = vmatmul.mubr.bf16.gmra.mrb[12].mxu1 %v12269_v43  ;;  %v8819_v45 = vrot.slane %v8817_v1, 5  ;;  %v8796_v11 = vor.u32 %v8795_v31, %v8792_v37  ;;  %v8806_v32 = vor.u32 %v8805_v24, %v18225_v15  ;;  %v8847_v21 = vshll.u32 %v14850_v35, 16 }
 0x56c   : > { %13707 = vmatprep.mubr.bf16.mxu1 %v12270_v42  ;;  %13736 = vmatpush3.bf16.msra.mxu1 %v14753_v34  ;;  %v8851_v10 = vshrl.u32 %v14850_v35, 16  ;;  %v8788_v56 = vsel %vm15442_vm2, %v8783_v7, %v8787_v60  ;;  %v8830_v34 = vor.u32 %v8829_v26, %v18227_v4  ;;  %v8871_v40 = vshll.u32 %v17760_v41, 16 }
 0x56d   : > { %13737 = vmatprep.subr.bf16.mxu1 %v14754_v13  ;;  %v8875_v19 = vshrl.u32 %v17760_v41, 16  ;;  %v8778_v50 = vsel %vm15442_vm2, %v8773_v28, %v18205_v17  ;;  %v8809_v52 = vshll.u32 %v14851_v2, 16  ;;  %v8838_v51 = vshrl.u32 %v8516_v20, 16 }
 0x56e   : > { %v8841_v43 = vshll.u32 %v8516_v20, 16  ;;  %v8820_v42 = vor.u32 %v8819_v45, %v8816_v27  ;;  %v8833_v58 = vshll.u32 %v14852_v46, 16  ;;  %v8862_v62 = vshrl.u32 %v8519_v14, 16  ;;  %v8522_v20 = vld [vmem:[#allocation2 + $0xc0] sm:$0xf] }
 0x56f   : > { %v8865_v12 = vshll.u32 %v8519_v14, 16  ;;  %v12272_v29 = vcombine.low %v8778_v50, %v8788_v56  ;;  %v8807_v1 = vrot.slane %v8806_v32, 4  ;;  %v8849_v37 = vrot.slane %v8847_v21, 5  ;;  %v14853_v21 = vld [vmem:[#allocation2 + $0xc4] sm:$0xf] }
 0x570   : > { %13738 = vmatpush3.bf16.msra.mxu1 %v14754_v13  ;;  %v8853_v41 = vrot.slane %v8851_v10, 4  ;;  %v8797_v31 = vrot.slane %v8796_v11, 4  ;;  %v8831_v24 = vrot.slane %v8830_v34, 4  ;;  %v8873_v17 = vrot.slane %v8871_v40, 5  ;;  %v14854_v40 = vld [vmem:[#allocation2 + $0xb0] sm:$0x1] }
 0x571   : > { %13771 = vmatprep.subr.bf16.mxu1 %v18232_v30  ;;  %v8877_v7 = vrot.slane %v8875_v19, 4  ;;  %v8811_v26 = vrot.slane %v8809_v52, 5  ;;  %v8840_v61 = vrot.slane %v8838_v51, 4  ;;  %v8843_v13 = vrot.slane %v8841_v43, 5 }
 0x572   : > { %v8821_v28 = vrot.slane %v8820_v42, 4  ;;  %v8835_v60 = vrot.slane %v8833_v58, 5  ;;  %v8864_v27 = vrot.slane %v8862_v62, 4  ;;  %v8867_v45 = vrot.slane %v8865_v12, 5  ;;  %v14855_v42 = vld [vmem:[#allocation2 + $0xbc] sm:$0x1] }
 0x573   : > { %13708 = vmatmul.mubr.bf16.gmra.mrb[16].mxu1 %v12271_v0  ;;  %v8812_v35 = vsel %vm15442_vm2, %v8807_v1, %v8811_v26  ;;  %v8854_v32 = vor.u32 %v8853_v41, %v8849_v37  ;;  %v8895_v10 = vshll.u32 %v14853_v21, 16  ;;  %v8899_v0 = vshrl.u32 %v14853_v21, 16 }
 0x574   : > { %13711 = vmatprep.mubr.bf16.mxu1 %v12272_v29  ;;  %v8802_v11 = vsel %vm15442_vm2, %v8797_v31, %v18225_v15  ;;  %v8836_v14 = vsel %vm15442_vm2, %v8831_v24, %v8835_v60  ;;  %v8878_v56 = vor.u32 %v8877_v7, %v8873_v17  ;;  %v8844_v34 = vor.u32 %v8843_v13, %v8840_v61 }
 0x575   : > { %v8857_v19 = vshll.u32 %v14854_v40, 16  ;;  %v8886_v50 = vshrl.u32 %v8522_v20, 16  ;;  %v8889_v2 = vshll.u32 %v8522_v20, 16  ;;  %v12273_v52 = vcombine.low %v8802_v11, %v8812_v35  ;;  %v14857_v20 = vld [vmem:[#allocation2 + $0xc8] sm:$0x1] }
 0x576   : > { %v8826_v51 = vsel %vm15442_vm2, %v8821_v28, %v18227_v4  ;;  %v8868_v43 = vor.u32 %v8867_v45, %v8864_v27  ;;  %v8881_v46 = vshll.u32 %v14855_v42, 16  ;;  %v8855_v62 = vrot.slane %v8854_v32, 4  ;;  %v14856_v28 = vld [vmem:[#allocation2 + $0x10] sm:$0xf] }
 0x577   : > { %v12274_v58 = vcombine.low %v8826_v51, %v8836_v14  ;;  %v8897_v15 = vrot.slane %v8895_v10, 5  ;;  %v8901_v12 = vrot.slane %v8899_v0, 4  ;;  %v8879_v29 = vrot.slane %v8878_v56, 4 }
 0x578   : > { %v8845_v1 = vrot.slane %v8844_v34, 4  ;;  %v8859_v41 = vrot.slane %v8857_v19, 5  ;;  %v8888_v31 = vrot.slane %v8886_v50, 4  ;;  %v8891_v24 = vrot.slane %v8889_v2, 5  ;;  %v9231_v34 = vld [vmem:[#allocation2 + $0xc] sm:$0xe] }
 0x579   : > { %v8869_v7 = vrot.slane %v8868_v43, 4  ;;  %v8883_v26 = vrot.slane %v8881_v46, 5  ;;  %v8902_v4 = vor.u32 %v8901_v12, %v8897_v15  ;;  %v9297_v60 = vrot.slane %v14856_v28, 5  ;;  %v14858_v19 = vld [vmem:[#allocation2 + $0x1c] sm:$0xf] }
 0x57a   : > { %v8860_v61 = vsel %vm15442_vm2, %v8855_v62, %v8859_v41  ;;  %v8850_v27 = vsel %vm15442_vm2, %v8845_v1, %v8849_v37  ;;  %v8892_v45 = vor.u32 %v8891_v24, %v8888_v31  ;;  %v8905_v35 = vshll.u32 %v14857_v20, 16  ;;  %v14757_v31 = vld [vmem:[#allocation8 + $0x190] sm:$0xff]   ;;  %v18984_v28 = vld [vmem:[#allocation24_spill] sm:$0xff] }
 0x57b   : > { %13712 = vmatmul.mubr.bf16.gmra.mrb[20].mxu1 %v12273_v52  ;;  %v8884_v13 = vsel %vm15442_vm2, %v8879_v29, %v8883_v26  ;;  %v12275_v32 = vcombine.low %v8850_v27, %v8860_v61  ;;  %v8874_v21 = vsel %vm15442_vm2, %v8869_v7, %v8873_v17  ;;  %v8903_v0 = vrot.slane %v8902_v4, 4  ;;  %v18978_v7 = vld [vmem:[#allocation25_spill] sm:$0xff]  ;;  %v18981_v61 = vld [vmem:[#allocation27_spill] sm:$0xff]  ;;  %v18987_v27 = vld [vmem:[#allocation20_spill] sm:$0xff] }
 0x57c   : > { %13715 = vmatprep.mubr.bf16.mxu1 %v12274_v58  ;;  %v12276_v10 = vcombine.low %v8874_v21, %v8884_v13  ;;  %v9299_v11 = vrot.slane %v9297_v60, 4  ;;  %v8893_v14 = vrot.slane %v8892_v45, 4  ;;  %v8907_v56 = vrot.slane %v8905_v35, 5  ;;  %v18983_v13 = vld [vmem:[#allocation23_spill] sm:$0xff]  ;;  %v18989_v20 = vld [vmem:[#allocation22_spill] sm:$0xff]  ;;  %v18990_v35 = vld [vmem:[#allocation29_spill] sm:$0xff] }
 0x57d   : > { %v9300_v40 = vrot.slane %v17836_v8, 5  ;;  %v9304_v50 = vrot.slane %v14858_v19, 5  ;;  %v12286_v2 = vrot.slane %v9231_v34, 9  ;;  %v9232_v8 = vld [vmem:[#allocation2 + $0x18] sm:$0xe]  ;;  %v9307_v58 = vrot.slane %v17838_v22, 5 }
 0x57e   : > { %v8908_v37 = vsel %vm15442_vm2, %v8903_v0, %v8907_v56  ;;  %v8898_v17 = vsel %vm15442_vm2, %v8893_v14, %v8897_v15  ;;  %v12287_v62 = vrot.slane %v9232_v8, 9  ;;  %v14756_v15 = vld [vmem:[#allocation8 + $0x188] sm:$0xff]   ;;  %v18976_v41 = vcombine.low %v17633_v38, %v17637_v53  ;;  %v14758_v22 = vld [vmem:[#allocation8 + $0x198] sm:$0xff]   ;;  %v18980_v53 = vld [vmem:[#allocation26_spill] sm:$0xff] }
 0x57f   : > { %v9301_v52 = vsel %vm16140_vm1, %v9299_v11, %v9300_v40  ;;  %v12277_v51 = vcombine.low %v8898_v17, %v8908_v37  ;;  %v9298_v43 = vsel %vm16140_vm1, %v12286_v2, %v9297_v60  ;;  %v9306_v46 = vrot.slane %v9304_v50, 4  ;;  %v14760_v38 = vld [vmem:[#allocation8 + $0x1a8] sm:$0xff]   ;;  %v14764_v21 = vld [vmem:[#allocation8 + $0x1c0] sm:$0xff]   ;;  %v18993_v0 = vld [vmem:[#allocation30_spill] sm:$0xff] }
 0x580   : > { %v12302_v42 = vcombine.low %v9298_v43, %v9301_v52  ;;  %v9305_v29 = vsel %vm16140_vm1, %v12287_v62, %v9304_v50  ;;  %v18977_v24 = vcombine.low %v17647_v36, %v17653_v59  ;;  %v18979_v26 = vcombine.low %v17657_v25, %v18978_v7  ;;  %v14761_v36 = vld [vmem:[#allocation8 + $0x1b0] sm:$0xff]   ;;  %v14762_v59 = vld [vmem:[#allocation8 + $0x1b8] sm:$0xff]   ;;  %v18986_v25 = vld [vmem:[#allocation21_spill] sm:$0xff] }
 0x581   : > { %v9308_v12 = vsel %vm16140_vm1, %v9306_v46, %v9307_v58  ;;  %v18982_v4 = vcombine.low %v18980_v53, %v18981_v61  ;;  %v18985_v60 = vcombine.low %v18983_v13, %v18984_v28  ;;  %v18988_v45 = vcombine.low %v18986_v25, %v18987_v27  ;;  %v18995_v14 = vld [vmem:[#allocation31_spill] sm:$0xff]  ;;  %v18996_v56 = vld [vmem:[#allocation32_spill] sm:$0xff]  ;;  %v18998_v40 = vld [vmem:[#allocation33_spill] sm:$0xff] }
 0x582   : > { %v12303_v1 = vcombine.low %v9305_v29, %v9308_v12  ;;  %v18997_v34 = vcombine.low %v18995_v14, %v18996_v56  ;;  %v18999_v37 = vld [vmem:[#allocation34_spill] sm:$0xff]  ;;  %v19001_v50 = vld [vmem:[#allocation35_spill] sm:$0xff]  ;;  %v19002_v2 = vld [vmem:[#allocation36_spill] sm:$0xff] }
 0x583   : > { %13716 = vmatmul.mubr.bf16.gmra.mrb[24].mxu1 %v12275_v32  ;;  %v18991_v32 = vcombine.low %v18989_v20, %v18990_v35  ;;  %v19000_v19 = vcombine.low %v18998_v40, %v18999_v37  ;;  %v19003_v52 = vcombine.low %v19001_v50, %v19002_v2  ;;  %v19004_v17 = vld [vmem:[#allocation37_spill] sm:$0xff]  ;;  %v19008_v46 = vld [vmem:[#allocation40_spill] sm:$0xff]  ;;  %v19011_v12 = vld [vmem:[#allocation42_spill] sm:$0xff] }
 0x584   : > { %13719 = vmatprep.mubr.bf16.mxu1 %v12276_v10  ;;  %v18992_v10 = vld [vmem:[#allocation28_spill] sm:$0xff]  ;;  %v19010_v62 = vld [vmem:[#allocation41_spill] sm:$0xff]  ;;  %v14769_v7 = vld [vmem:[#allocation2 + $0x48] sm:$0xff]  }
 0x585   : > { %v18994_v11 = vcombine.low %v18992_v10, %v18993_v0  ;;  %v14763_v58 = vld [vmem:[#allocation2 + $0x18] sm:$0xff]   ;;  %v19012_v29 = vcombine.low %v19010_v62, %v19011_v12  ;;  %v14772_v53 = vld [vmem:[#allocation2 + $0x60] sm:$0xff]   ;;  %v14782_v61 = vld [vmem:[#allocation8 + $0x1f0] sm:$0xff]  }
 0x586   : > { %v14785_v13 = vld [vmem:[#allocation8 + $0x1f8] sm:$0xff]   ;;  %v14775_v28 = vld [vmem:[#allocation2 + $0x78] sm:$0xff]   ;;  %v14777_v20 = vld [vmem:[#allocation2 + $0x84] sm:$0xff]  }
 0x587   : > { %v19014_v40 = vld [vmem:[#allocation45_spill] sm:$0xff] }
 0x588   : > { %v10197_v37 = vshll.u32 %v19014_v40, 16 }
 0x58b   : > { %13720 = vmatmul.mubr.bf16.gmra.mrb[28].mxu1 %v12277_v51  ;;  %v19005_v51 = vld [vmem:[#allocation38_spill] sm:$0xff] }
 0x58c   : > { %13739 = vmatprep.mubr.bf16.mxu1 %v12302_v42  ;;  %v19006_v43 = vcombine.low %v19004_v17, %v19005_v51  ;;  %v19007_v42 = vld [vmem:[#allocation39_spill] sm:$0xff]  ;;  %v14780_v51 = vld [vmem:[#allocation2 + $0x9c] sm:$0xff]  }
 0x58d   : > { %v19009_v8 = vcombine.low %v19007_v42, %v19008_v46  ;;  %v10121_v17 = vld [vmem:[#allocation2 + $0x30] sm:$0xf]  ;;  %v19015_v42 = vld [vmem:[#allocation44_spill] sm:$0xff] }
 0x58e   : > { %v10183_v46 = vshll.u32 %v19015_v42, 16  ;;  %v10212_v62 = vshrl.u32 %v10121_v17, 16  ;;  %v10884_v42 = vld [vmem:[#allocation2 + $0xcc] sm:$0xe] }
 0x593   : > { %13740 = vmatmul.mubr.bf16.vlgmr.msra.gmra.mrb[0].mxu1 %v12303_v1  ;;  %v14765_v1 = vld [vmem:[#allocation2 + $0x24] sm:$0xff]  }
 0x594   : > { %13772 = vmatpush3.bf16.msra.mxu1 %v18232_v30  ;;  %13743 = vmatprep.mubr.bf16.mxu1 %v18976_v41  ;;  %v14759_v30 = vld [vmem:[#allocation8 + $0x1a0] sm:$0xff]   ;;  %v14766_v41 = vld [vmem:[#allocation2 + $0x30] sm:$0xff]  }
 0x595   : > { %13773 = vmatprep.subr.bf16.mxu1 %v14756_v15 }
 0x598   : > { %13774 = vmatpush3.bf16.msra.mxu1 %v14756_v15  ;;  %v14767_v15 = vld [vmem:[#allocation8 + $0x1c8] sm:$0xff]  }
 0x599   : > { %13775 = vmatprep.subr.bf16.mxu1 %v14757_v31 }
 0x59b   : > { %13744 = vmatmul.mubr.bf16.gmra.mrb[4].mxu1 %v18977_v24  ;;  %v14773_v24 = vld [vmem:[#allocation8 + $0x1d8] sm:$0xff]  }
 0x59c   : > { %13747 = vmatprep.mubr.bf16.mxu1 %v18979_v26  ;;  %13776 = vmatpush3.bf16.msra.mxu1 %v14757_v31  ;;  %v14770_v31 = vld [vmem:[#allocation8 + $0x1d0] sm:$0xff]   ;;  %v14776_v26 = vld [vmem:[#allocation8 + $0x1e0] sm:$0xff]  }
 0x59d   : > { %13777 = vmatprep.subr.bf16.mxu1 %v14758_v22 }
 0x5a0   : > { %13778 = vmatpush3.bf16.msra.mxu1 %v14758_v22  ;;  %v14768_v22 = vld [vmem:[#allocation2 + $0x3c] sm:$0xff]  }
 0x5a1   : > { %13779 = vmatprep.subr.bf16.mxu1 %v14759_v30 }
 0x5a3   : > { %13748 = vmatmul.mubr.bf16.gmra.mrb[8].mxu1 %v18982_v4  ;;  %v14774_v4 = vld [vmem:[#allocation2 + $0x6c] sm:$0xff]  }
 0x5a4   : > { %13751 = vmatprep.mubr.bf16.mxu1 %v18985_v60  ;;  %13780 = vmatpush3.bf16.msra.mxu1 %v14759_v30  ;;  %v14771_v30 = vld [vmem:[#allocation2 + $0x54] sm:$0xff]  }
 0x5a5   : > { %13781 = vmatprep.subr.bf16.mxu1 %v14760_v38  ;;  %v18319_v60 = vld [vmem:[#allocation8 + $0x200] sm:$0xff]  }
 0x5a8   : > { %13782 = vmatpush3.bf16.msra.mxu1 %v14760_v38  ;;  %v14779_v38 = vld [vmem:[#allocation8 + $0x1e8] sm:$0xff]  }
 0x5a9   : > { %13783 = vmatprep.subr.bf16.mxu1 %v14761_v36 }
 0x5ab   : > { %13752 = vmatmul.mubr.bf16.gmra.mrb[12].mxu1 %v18988_v45  ;;  %v10118_v45 = vld [vmem:[#allocation2 + $0x24] sm:$0xf] }
 0x5ac   : > { %13755 = vmatprep.mubr.bf16.mxu1 %v18991_v32  ;;  %13784 = vmatpush3.bf16.msra.mxu1 %v14761_v36  ;;  %v10115_v36 = vld [vmem:[#allocation2 + $0x18] sm:$0xf]  ;;  %v10191_v14 = vshll.u32 %v10118_v45, 16 }
 0x5ad   : > { %13785 = vmatprep.subr.bf16.mxu1 %v14762_v59  ;;  %v10164_v35 = vshrl.u32 %v10115_v36, 16  ;;  %v10167_v32 = vshll.u32 %v10115_v36, 16 }
 0x5ae   : > { %v10193_v2 = vrot.slane %v10191_v14, 5  ;;  %v19019_v14 = vld [vmem:[#allocation49_spill] sm:$0xff] }
 0x5af   : > { %v10166_v56 = vrot.slane %v10164_v35, 4 }
 0x5b0   : > { %13786 = vmatpush3.bf16.msra.mxu1 %v14762_v59  ;;  %v19013_v59 = vld [vmem:[#allocation43_spill] sm:$0xff] }
 0x5b1   : > { %13819 = vmatprep.subr.bf16.mxu1 %v14764_v21  ;;  %v10173_v25 = vshll.u32 %v19013_v59, 16  ;;  %v10177_v27 = vshrl.u32 %v19013_v59, 16 }
 0x5b3   : > { %13756 = vmatmul.mubr.bf16.gmra.mrb[16].mxu1 %v18994_v11  ;;  %v10175_v10 = vrot.slane %v10173_v25, 5  ;;  %v10179_v0 = vrot.slane %v10177_v27, 4  ;;  %v10188_v11 = vshrl.u32 %v10118_v45, 16  ;;  %v14783_v25 = vld [vmem:[#allocation2 + $0xb4] sm:$0xff]  }
 0x5b4   : > { %13759 = vmatprep.mubr.bf16.mxu1 %v18997_v34  ;;  %v10169_v34 = vrot.slane %v10167_v32, 5 }
 0x5b5   : > { %v10190_v50 = vrot.slane %v10188_v11, 4 }
 0x5bb   : > { %13760 = vmatmul.mubr.bf16.gmra.mrb[20].mxu1 %v19000_v19  ;;  %v10180_v19 = vor.u32 %v10179_v0, %v10175_v10 }
 0x5bc   : > { %13763 = vmatprep.mubr.bf16.mxu1 %v19003_v52  ;;  %v10201_v52 = vshrl.u32 %v19014_v40, 16  ;;  %v10127_v40 = vld [vmem:[#allocation2 + $0x48] sm:$0xf] }
 0x5bd   : > { %v10181_v12 = vrot.slane %v10180_v19, 4 }
 0x5c3   : > { %13764 = vmatmul.mubr.bf16.gmra.mrb[24].mxu1 %v19006_v43  ;;  %v10170_v43 = vor.u32 %v10169_v34, %v10166_v56  ;;  %v10245_v56 = vshll.u32 %v19019_v14, 16  ;;  %v10249_v34 = vshrl.u32 %v19019_v14, 16 }
 0x5c4   : > { %13767 = vmatprep.mubr.bf16.mxu1 %v19009_v8  ;;  %v14781_v8 = vld [vmem:[#allocation2 + $0xa8] sm:$0xff]  }
 0x5cb   : > { %13768 = vmatmul.mubr.bf16.gmra.mrb[28].mxu1 %v19012_v29  ;;  %v10194_v29 = vor.u32 %v10193_v2, %v10190_v50  ;;  %v19020_v50 = vld [vmem:[#allocation50_spill] sm:$0xff] }
 0x5cc   : > { %13787 = vmatprep.mubr.bf16.mxu1 %v14763_v58  ;;  %v18327_v58 = vrot.slane %v10197_v37, 5  ;;  %v10269_v2 = vshll.u32 %v19020_v50, 16 }
 0x5d3   : > { %13788 = vmatmul.mubr.bf16.vlgmr.msra.gmra.mrb[0].mxu1 %v14765_v1  ;;  %v10203_v1 = vrot.slane %v10201_v52, 4  ;;  %v18351_v52 = vld [vmem:[#allocation2 + $0xd0] sm:$0xf] }
 0x5d4   : > { %13820 = vmatpush3.bf16.msra.mxu1 %v14764_v21  ;;  %13791 = vmatprep.mubr.bf16.mxu1 %v14766_v41  ;;  %v14778_v21 = vld [vmem:[#allocation2 + $0x90] sm:$0xff]  }
 0x5d5   : > { %13821 = vmatprep.subr.bf16.mxu1 %v14767_v15  ;;  %v19016_v41 = vld [vmem:[#allocation47_spill] sm:$0xff] }
 0x5d8   : > { %13822 = vmatpush3.bf16.msra.mxu1 %v14767_v15  ;;  %v10215_v15 = vshll.u32 %v10121_v17, 16  ;;  %v18353_v17 = vld [vmem:[#allocation2 + $0xd4] sm:$0x1] }
 0x5d9   : > { %13823 = vmatprep.subr.bf16.mxu1 %v14770_v31 }
 0x5db   : > { %13792 = vmatmul.mubr.bf16.gmra.mrb[4].mxu1 %v14768_v22  ;;  %v10225_v22 = vshrl.u32 %v19016_v41, 16 }
 0x5dc   : > { %13795 = vmatprep.mubr.bf16.mxu1 %v14769_v7  ;;  %13824 = vmatpush3.bf16.msra.mxu1 %v14770_v31  ;;  %v10221_v31 = vshll.u32 %v19016_v41, 16  ;;  %v10185_v7 = vrot.slane %v10183_v46, 5  ;;  %v11040_v46 = vrot.slane %v18351_v52, 5 }
 0x5dd   : > { %13825 = vmatprep.subr.bf16.mxu1 %v14773_v24  ;;  %v10227_v59 = vrot.slane %v10225_v22, 4  ;;  %v10251_v22 = vrot.slane %v10249_v34, 4 }
 0x5de   : > { %v18337_v36 = vrot.slane %v10221_v31, 5  ;;  %v18361_v31 = vrot.slane %v10245_v56, 5  ;;  %v19022_v56 = vld [vmem:[#allocation53_spill] sm:$0xff] }
 0x5df   : > { %v10255_v34 = vshll.u32 %v19022_v56, 16 }
 0x5e0   : > { %13826 = vmatpush3.bf16.msra.mxu1 %v14773_v24  ;;  %v10171_v24 = vrot.slane %v10170_v43, 4  ;;  %v10273_v43 = vshrl.u32 %v19020_v50, 16 }
 0x5e1   : > { %13827 = vmatprep.subr.bf16.mxu1 %v14776_v26 }
 0x5e2   : > { %v10176_v27 = vsel %vm15442_vm2, %v10171_v24, %v10175_v10  ;;  %v11042_v24 = vrot.slane %v11040_v46, 4 }
 0x5e3   : > { %13796 = vmatmul.mubr.bf16.gmra.mrb[8].mxu1 %v14771_v30 }
 0x5e4   : > { %13799 = vmatprep.mubr.bf16.mxu1 %v14772_v53  ;;  %13828 = vmatpush3.bf16.msra.mxu1 %v14776_v26  ;;  %v19017_v26 = vld [vmem:[#allocation46_spill] sm:$0xff]  ;;  %v10124_v53 = vld [vmem:[#allocation2 + $0x3c] sm:$0xf] }
 0x5e5   : > { %13829 = vmatprep.subr.bf16.mxu1 %v14779_v38  ;;  %v10207_v30 = vshll.u32 %v19017_v26, 16  ;;  %v10236_v32 = vshrl.u32 %v10124_v53, 16  ;;  %v10239_v11 = vshll.u32 %v10124_v53, 16  ;;  %v10260_v26 = vshrl.u32 %v10127_v40, 16 }
 0x5e7   : > { %v18341_v45 = vrot.slane %v10207_v30, 5  ;;  %v10241_v41 = vrot.slane %v10239_v11, 5  ;;  %v10263_v30 = vshll.u32 %v10127_v40, 16  ;;  %v10252_v40 = vor.u32 %v10251_v22, %v18361_v31  ;;  %v19024_v22 = vld [vmem:[#allocation57_spill] sm:$0xff] }
 0x5e8   : > { %13830 = vmatpush3.bf16.msra.mxu1 %v14779_v38  ;;  %v10214_v38 = vrot.slane %v10212_v62, 4  ;;  %v10238_v62 = vrot.slane %v10236_v32, 4 }
 0x5e9   : > { %13831 = vmatprep.subr.bf16.mxu1 %v14782_v61  ;;  %v10265_v50 = vrot.slane %v10263_v30, 5 }
 0x5ea   : > { %v10242_v9 = vor.u32 %v10241_v41, %v10238_v62  ;;  %v10257_v41 = vrot.slane %v10255_v34, 5 }
 0x5eb   : > { %13800 = vmatmul.mubr.bf16.gmra.mrb[12].mxu1 %v14774_v4  ;;  %v18334_v4 = vrot.slane %v10194_v29, 4 }
 0x5ec   : > { %13803 = vmatprep.mubr.bf16.mxu1 %v14775_v28  ;;  %13832 = vmatpush3.bf16.msra.mxu1 %v14782_v61  ;;  %v10186_v61 = vsel %vm15442_vm2, %v10181_v12, %v10185_v7  ;;  %v10217_v28 = vrot.slane %v10215_v15, 5  ;;  %v19021_v12 = vld [vmem:[#allocation56_spill] sm:$0xff]  ;;  %v12389_v15 = vrot.slane %v10884_v42, 9  ;;  %v14786_v7 = vld [vmem:[#allocation2 + $0xcc] sm:$0xff]  }
 0x5ed   : > { %13833 = vmatprep.subr.bf16.mxu1 %v14785_v13  ;;  %v12350_v0 = vcombine.low %v10176_v27, %v10186_v61  ;;  %v10200_v37 = vsel %vm15442_vm2, %v18334_v4, %v18327_v58  ;;  %v10293_v29 = vshll.u32 %v19021_v12, 16  ;;  %v10275_v61 = vrot.slane %v10273_v43, 4 }
 0x5ee   : > { %v10218_v19 = vor.u32 %v10217_v28, %v10214_v38  ;;  %v18363_v38 = vrot.slane %v10269_v2, 5  ;;  %v18367_v53 = vsel %vm16140_vm1, %v12389_v15, %v11040_v46  ;;  %v10253_v15 = vrot.slane %v10252_v40, 4 }
 0x5f0   : > { %13834 = vmatpush3.bf16.msra.mxu1 %v14785_v13  ;;  %v10204_v13 = vor.u32 %v10203_v1, %v18327_v58  ;;  %v10130_v58 = vld [vmem:[#allocation2 + $0x54] sm:$0xf]  ;;  %v10297_v1 = vshrl.u32 %v19021_v12, 16  ;;  %v10219_v11 = vrot.slane %v10218_v19, 4  ;;  %v10276_v2 = vor.u32 %v10275_v61, %v18363_v38  ;;  %v14859_v12 = vld [vmem:[#allocation2 + $0x50] sm:$0x1] }
 0x5f1   : > { %13867 = vmatprep.subr.bf16.mxu1 %v18319_v60  ;;  %v10284_v4 = vshrl.u32 %v10130_v58, 16 }
 0x5f2   : > { %v10205_v10 = vrot.slane %v10204_v13, 4  ;;  %v10287_v13 = vshll.u32 %v10130_v58, 16  ;;  %v10299_v27 = vrot.slane %v10297_v1, 4  ;;  %v10224_v62 = vsel %vm15442_vm2, %v10219_v11, %v18337_v36  ;;  %v19025_v11 = vld [vmem:[#allocation62_spill] sm:$0xff] }
 0x5f3   : > { %13804 = vmatmul.mubr.bf16.gmra.mrb[16].mxu1 %v14777_v20  ;;  %v19018_v20 = vld [vmem:[#allocation48_spill] sm:$0xff]  ;;  %v10286_v43 = vrot.slane %v10284_v4, 4  ;;  %v10243_v1 = vrot.slane %v10242_v9, 4  ;;  %v10136_v4 = vld [vmem:[#allocation2 + $0x6c] sm:$0xf]  ;;  %v10345_v56 = vshrl.u32 %v19025_v11, 16 }
 0x5f4   : > { %13807 = vmatprep.mubr.bf16.mxu1 %v14778_v21  ;;  %v10231_v35 = vshll.u32 %v19018_v20, 16  ;;  %v14784_v21 = vld [vmem:[#allocation2 + $0xc0] sm:$0xff]   ;;  %v10289_v42 = vrot.slane %v10287_v13, 5  ;;  %v10332_v40 = vshrl.u32 %v10136_v4, 16 }
 0x5f5   : > { %v10133_v20 = vld [vmem:[#allocation2 + $0x60] sm:$0xf]  ;;  %v10248_v34 = vsel %vm15442_vm2, %v10243_v1, %v18361_v31  ;;  %v14861_v1 = vld [vmem:[#allocation2 + $0x7c] sm:$0xf] }
 0x5f6   : > { %v10308_v46 = vshrl.u32 %v10133_v20, 16  ;;  %v10311_v58 = vshll.u32 %v10133_v20, 16  ;;  %v10290_v30 = vor.u32 %v10289_v42, %v10286_v43 }
 0x5f8   : > { %v10310_v61 = vrot.slane %v10308_v46, 4  ;;  %v10291_v46 = vrot.slane %v10290_v30, 4 }
 0x5fb   : > { %13808 = vmatmul.mubr.bf16.gmra.mrb[20].mxu1 %v14780_v51  ;;  %v10228_v51 = vor.u32 %v10227_v59, %v18337_v36  ;;  %v10233_v59 = vrot.slane %v10231_v35, 5  ;;  %v10262_v35 = vrot.slane %v10260_v26, 4  ;;  %v10277_v26 = vrot.slane %v10276_v2, 4 }
 0x5fc   : > { %13811 = vmatprep.mubr.bf16.mxu1 %v14781_v8  ;;  %v11043_v8 = vrot.slane %v18353_v17, 5  ;;  %v10258_v2 = vsel %vm15442_vm2, %v10253_v15, %v10257_v41  ;;  %v10365_v15 = vshll.u32 %v14861_v1, 16  ;;  %v10369_v41 = vshrl.u32 %v14861_v1, 16 }
 0x5fd   : > { %v10229_v14 = vrot.slane %v10228_v51, 4 }
 0x5fe   : > { %v18371_v28 = vsel %vm16140_vm1, %v11042_v24, %v11043_v8  ;;  %v10303_v24 = vshll.u32 %v19024_v22, 16  ;;  %v12353_v22 = vcombine.low %v10248_v34, %v10258_v2  ;;  %v18416_v34 = vrot.slane %v10365_v15, 5 }
 0x5ff   : > { %v12405_v32 = vcombine.low %v18367_v53, %v18371_v28 }
 0x600   : > { %v10305_v9 = vrot.slane %v10303_v24, 5 }
 0x603   : > { %13812 = vmatmul.mubr.bf16.gmra.mrb[24].mxu1 %v14783_v25  ;;  %v18373_v25 = vrot.slane %v10293_v29, 5  ;;  %v10279_v29 = vshll.u32 %v14859_v12, 16  ;;  %v10334_v12 = vrot.slane %v10332_v40, 4 }
 0x604   : > { %13815 = vmatprep.mubr.bf16.mxu1 %v14784_v21  ;;  %v10210_v21 = vsel %vm15442_vm2, %v10205_v10, %v18341_v45  ;;  %v19023_v45 = vld [vmem:[#allocation59_spill] sm:$0xff] }
 0x605   : > { %v10300_v8 = vor.u32 %v10299_v27, %v18373_v25  ;;  %v10317_v10 = vshll.u32 %v19023_v45, 16  ;;  %v10321_v19 = vshrl.u32 %v19023_v45, 16  ;;  %v12351_v51 = vcombine.low %v10200_v37, %v10210_v21  ;;  %v14788_v37 = vld [vmem:[#allocation8 + $0x208] sm:$0xff]  }
 0x606   : > { %v10313_v27 = vrot.slane %v10311_v58, 5 }
 0x607   : > { %v10301_v13 = vrot.slane %v10300_v8, 4  ;;  %v18392_v20 = vrot.slane %v10317_v10, 5  ;;  %v10323_v36 = vrot.slane %v10321_v19, 4  ;;  %v14789_v8 = vld [vmem:[#allocation8 + $0x210] sm:$0xff]  }
 0x608   : > { %v10314_v58 = vor.u32 %v10313_v27, %v10310_v61  ;;  %v14860_v10 = vld [vmem:[#allocation2 + $0x68] sm:$0x1]  ;;  %v10142_v27 = vld [vmem:[#allocation2 + $0x84] sm:$0xf] }
 0x609   : > { %v10306_v31 = vsel %vm15442_vm2, %v10301_v13, %v10305_v9  ;;  %v10324_v45 = vor.u32 %v10323_v36, %v18392_v20  ;;  %v10327_v19 = vshll.u32 %v14860_v10, 16  ;;  %v14790_v13 = vld [vmem:[#allocation8 + $0x218] sm:$0xff]   ;;  %v10380_v9 = vshrl.u32 %v10142_v27, 16 }
 0x60a   : > { %v10315_v61 = vrot.slane %v10314_v58, 4  ;;  %v10383_v40 = vshll.u32 %v10142_v27, 16  ;;  %v14792_v27 = vld [vmem:[#allocation8 + $0x228] sm:$0xff]  }
 0x60b   : > { %13816 = vmatmul.mubr.bf16.gmra.mrb[28].mxu1 %v14786_v7  ;;  %v10266_v7 = vor.u32 %v10265_v50, %v10262_v35  ;;  %v10335_v35 = vshll.u32 %v10136_v4, 16  ;;  %v10139_v50 = vld [vmem:[#allocation2 + $0x78] sm:$0xf]  ;;  %v10329_v4 = vrot.slane %v10327_v19, 5  ;;  %v10325_v36 = vrot.slane %v10324_v45, 4 }
 0x60c   : > { %13835 = vmatprep.mubr.bf16.mxu1 %v12350_v0  ;;  %v10234_v0 = vsel %vm15442_vm2, %v10229_v14, %v10233_v59  ;;  %v10281_v59 = vrot.slane %v10279_v29, 5  ;;  %v10341_v14 = vshll.u32 %v19025_v11, 16  ;;  %v10145_v11 = vld [vmem:[#allocation2 + $0x90] sm:$0xf]  ;;  %v10320_v10 = vsel %vm15442_vm2, %v10315_v61, %v18392_v20 }
 0x60d   : > { %v12352_v21 = vcombine.low %v10224_v62, %v10234_v0  ;;  %v10267_v43 = vrot.slane %v10266_v7, 4  ;;  %v10356_v62 = vshrl.u32 %v10139_v50, 16  ;;  %v10359_v0 = vshll.u32 %v10139_v50, 16 }
 0x60e   : > { %v10282_v42 = vsel %vm15442_vm2, %v10277_v26, %v10281_v59  ;;  %v10337_v29 = vrot.slane %v10335_v35, 5  ;;  %v10296_v7 = vsel %vm15442_vm2, %v10291_v46, %v18373_v25  ;;  %v10371_v25 = vrot.slane %v10369_v41, 4  ;;  %v14863_v35 = vld [vmem:[#allocation2 + $0x88] sm:$0xf] }
 0x60f   : > { %v10272_v24 = vsel %vm15442_vm2, %v10267_v43, %v18363_v38  ;;  %v12355_v30 = vcombine.low %v10296_v7, %v10306_v31  ;;  %v10358_v59 = vrot.slane %v10356_v62, 4  ;;  %v14862_v38 = vld [vmem:[#allocation2 + $0x74] sm:$0x1]  ;;  %v10389_v50 = vshll.u32 %v14863_v35, 16  ;;  %v14791_v43 = vld [vmem:[#allocation8 + $0x220] sm:$0xff]  }
 0x610   : > { %v12354_v26 = vcombine.low %v10272_v24, %v10282_v42  ;;  %v10393_v2 = vshrl.u32 %v14863_v35, 16  ;;  %v10404_v42 = vshrl.u32 %v10145_v11, 16  ;;  %v10407_v46 = vshll.u32 %v10145_v11, 16  ;;  %v14864_v31 = vld [vmem:[#allocation2 + $0x94] sm:$0xf] }
 0x611   : > { %v10413_v58 = vshll.u32 %v14864_v31, 16  ;;  %v10417_v45 = vshrl.u32 %v14864_v31, 16  ;;  %v10330_v19 = vsel %vm15442_vm2, %v10325_v36, %v10329_v4  ;;  %v10382_v15 = vrot.slane %v10380_v9, 4  ;;  %v10148_v7 = vld [vmem:[#allocation2 + $0x9c] sm:$0xf] }
 0x612   : > { %v10385_v41 = vrot.slane %v10383_v40, 5  ;;  %v10395_v24 = vrot.slane %v10393_v2, 4  ;;  %v10406_v20 = vrot.slane %v10404_v42, 4  ;;  %v12356_v36 = vcombine.low %v10320_v10, %v10330_v19  ;;  %v14867_v42 = vld [vmem:[#allocation2 + $0xa0] sm:$0xf] }
 0x613   : > { %13836 = vmatmul.mubr.bf16.vlgmr.msra.gmra.mrb[0].mxu1 %v12351_v51  ;;  %v10347_v51 = vrot.slane %v10345_v56, 4  ;;  %v10351_v56 = vshll.u32 %v14862_v38, 16  ;;  %v18426_v61 = vrot.slane %v10413_v58, 5  ;;  %v10419_v4 = vrot.slane %v10417_v45, 4  ;;  %v10151_v58 = vld [vmem:[#allocation2 + $0xa8] sm:$0xf] }
 0x614   : > { %13868 = vmatpush3.bf16.msra.mxu1 %v18319_v60  ;;  %13839 = vmatprep.mubr.bf16.mxu1 %v12352_v21  ;;  %v18407_v60 = vrot.slane %v10341_v14, 5  ;;  %v10338_v14 = vor.u32 %v10337_v29, %v10334_v12  ;;  %v10372_v12 = vor.u32 %v10371_v25, %v18416_v34  ;;  %v14865_v29 = vld [vmem:[#allocation2 + $0x80] sm:$0x1]  ;;  %v10386_v11 = vor.u32 %v10385_v41, %v10382_v15  ;;  %v14868_v45 = vld [vmem:[#allocation2 + $0x98] sm:$0x1] }
 0x615   : > { %13869 = vmatprep.subr.bf16.mxu1 %v14788_v37  ;;  %v10375_v1 = vshll.u32 %v14865_v29, 16  ;;  %v10428_v38 = vshrl.u32 %v10148_v7, 16  ;;  %v10420_v35 = vor.u32 %v10419_v4, %v18426_v61  ;;  %v10441_v31 = vshrl.u32 %v14867_v42, 16  ;;  %v14869_v19 = vld [vmem:[#allocation2 + $0xac] sm:$0xf] }
 0x616   : > { %v10348_v21 = vor.u32 %v10347_v51, %v18407_v60  ;;  %v10339_v62 = vrot.slane %v10338_v14, 4  ;;  %v10423_v10 = vshll.u32 %v14868_v45, 16  ;;  %v10452_v15 = vshrl.u32 %v10151_v58, 16 }
 0x617   : > { %v10377_v9 = vrot.slane %v10375_v1, 5  ;;  %v10421_v1 = vrot.slane %v10420_v35, 4  ;;  %v10455_v41 = vshll.u32 %v10151_v58, 16  ;;  %v10443_v4 = vrot.slane %v10441_v31, 4  ;;  %v14872_v31 = vld [vmem:[#allocation2 + $0xc4] sm:$0xf] }
 0x618   : > { %13870 = vmatpush3.bf16.msra.mxu1 %v14788_v37  ;;  %v10361_v37 = vrot.slane %v10359_v0, 5  ;;  %v10353_v0 = vrot.slane %v10351_v56, 5  ;;  %v10431_v56 = vshll.u32 %v10148_v7, 16  ;;  %v10509_v58 = vshll.u32 %v14872_v31, 16 }
 0x619   : > { %13871 = vmatprep.subr.bf16.mxu1 %v14789_v8 }
 0x61a   : > { %v10362_v51 = vor.u32 %v10361_v37, %v10358_v59  ;;  %v10373_v37 = vrot.slane %v10372_v12, 4  ;;  %v10430_v12 = vrot.slane %v10428_v38, 4  ;;  %v10433_v29 = vrot.slane %v10431_v56, 5 }
 0x61b   : > { %13840 = vmatmul.mubr.bf16.gmra.mrb[4].mxu1 %v12353_v22  ;;  %v18424_v22 = vrot.slane %v10389_v50, 5  ;;  %v14793_v50 = vld [vmem:[#allocation8 + $0x230] sm:$0xff]  }
 0x61c   : > { %13843 = vmatprep.mubr.bf16.mxu1 %v12354_v26  ;;  %13872 = vmatpush3.bf16.msra.mxu1 %v14789_v8  ;;  %v10349_v8 = vrot.slane %v10348_v21, 4  ;;  %v10409_v26 = vrot.slane %v10407_v46, 5  ;;  %v10363_v59 = vrot.slane %v10362_v51, 4  ;;  %v10437_v46 = vshll.u32 %v14867_v42, 16  ;;  %v10157_v42 = vld [vmem:[#allocation2 + $0xc0] sm:$0xf] }
 0x61d   : > { %13873 = vmatprep.subr.bf16.mxu1 %v14790_v13  ;;  %v10396_v14 = vor.u32 %v10395_v24, %v18424_v22  ;;  %v10465_v51 = vshrl.u32 %v14869_v19, 16  ;;  %v14794_v24 = vld [vmem:[#allocation8 + $0x238] sm:$0xff]  }
 0x61e   : > { %v10354_v21 = vsel %vm15442_vm2, %v10349_v8, %v10353_v0  ;;  %v10410_v40 = vor.u32 %v10409_v26, %v10406_v20  ;;  %v10461_v8 = vshll.u32 %v14869_v19, 16  ;;  %v18440_v26 = vrot.slane %v10437_v46, 5 }
 0x61f   : > { %v10397_v0 = vrot.slane %v10396_v14, 4  ;;  %v14870_v14 = vld [vmem:[#allocation2 + $0xa4] sm:$0x1] }
 0x620   : > { %13874 = vmatpush3.bf16.msra.mxu1 %v14790_v13  ;;  %v10344_v13 = vsel %vm15442_vm2, %v10339_v62, %v18407_v60  ;;  %v14866_v60 = vld [vmem:[#allocation2 + $0x8c] sm:$0x1]  ;;  %v10387_v62 = vrot.slane %v10386_v11, 4  ;;  %v10434_v11 = vor.u32 %v10433_v29, %v10430_v12  ;;  %v10447_v38 = vshll.u32 %v14870_v14, 16 }
 0x621   : > { %13875 = vmatprep.subr.bf16.mxu1 %v14791_v43  ;;  %v12357_v25 = vcombine.low %v10344_v13, %v10354_v21  ;;  %v10399_v2 = vshll.u32 %v14866_v60, 16  ;;  %v18442_v21 = vrot.slane %v10461_v8, 5  ;;  %v10154_v13 = vld [vmem:[#allocation2 + $0xb4] sm:$0xf]  ;;  %v10444_v35 = vor.u32 %v10443_v4, %v18440_v26  ;;  %v10160_v29 = vld [vmem:[#allocation2 + $0xcc] sm:$0xf] }
 0x622   : > { %v10449_v19 = vrot.slane %v10447_v38, 5  ;;  %v10503_v12 = vshll.u32 %v10157_v42, 16  ;;  %v10511_v4 = vrot.slane %v10509_v58, 5  ;;  %v14875_v58 = vld [vmem:[#allocation2 + $0xc8] sm:$0x1] }
 0x623   : > { %13844 = vmatmul.mubr.bf16.gmra.mrb[8].mxu1 %v12355_v30  ;;  %v10368_v30 = vsel %vm15442_vm2, %v10363_v59, %v18416_v34  ;;  %v10411_v34 = vrot.slane %v10410_v40, 4  ;;  %v10401_v20 = vrot.slane %v10399_v2, 5  ;;  %v10467_v59 = vrot.slane %v10465_v51, 4  ;;  %v14873_v51 = vld [vmem:[#allocation2 + $0xb0] sm:$0x1] }
 0x624   : > { %13847 = vmatprep.mubr.bf16.mxu1 %v12356_v36  ;;  %13876 = vmatpush3.bf16.msra.mxu1 %v14791_v43  ;;  %v10378_v43 = vsel %vm15442_vm2, %v10373_v37, %v10377_v9  ;;  %v10425_v36 = vrot.slane %v10423_v10, 5  ;;  %v10454_v9 = vrot.slane %v10452_v15, 4  ;;  %v10457_v40 = vrot.slane %v10455_v41, 5 }
 0x625   : > { %13877 = vmatprep.subr.bf16.mxu1 %v14792_v27  ;;  %v12358_v7 = vcombine.low %v10368_v30, %v10378_v43  ;;  %v10402_v37 = vsel %vm15442_vm2, %v10397_v0, %v10401_v20  ;;  %v10416_v56 = vsel %vm15442_vm2, %v10411_v34, %v18426_v61  ;;  %v14871_v30 = vld [vmem:[#allocation2 + $0xb8] sm:$0xf]  ;;  %v10468_v46 = vor.u32 %v10467_v59, %v18442_v21 }
 0x626   : > { %v10485_v60 = vshll.u32 %v14871_v30, 16  ;;  %v10489_v2 = vshrl.u32 %v14871_v30, 16  ;;  %v10513_v43 = vshrl.u32 %v14872_v31, 16  ;;  %v10435_v10 = vrot.slane %v10434_v11, 4 }
 0x627   : > { %v10458_v8 = vor.u32 %v10457_v40, %v10454_v9  ;;  %v10500_v0 = vshrl.u32 %v10157_v42, 16  ;;  %v10445_v34 = vrot.slane %v10444_v35, 4  ;;  %v10524_v59 = vshrl.u32 %v10160_v29, 16 }
 0x628   : > { %13878 = vmatpush3.bf16.msra.mxu1 %v14792_v27  ;;  %v10392_v27 = vsel %vm15442_vm2, %v10387_v62, %v18424_v22  ;;  %v10476_v22 = vshrl.u32 %v10154_v13, 16  ;;  %v10471_v62 = vshll.u32 %v14873_v51, 16  ;;  %v10487_v15 = vrot.slane %v10485_v60, 5 }
 0x629   : > { %13879 = vmatprep.subr.bf16.mxu1 %v14793_v50  ;;  %v12359_v61 = vcombine.low %v10392_v27, %v10402_v37  ;;  %v10491_v41 = vrot.slane %v10489_v2, 4  ;;  %v10537_v27 = vshrl.u32 %v18351_v52, 16  ;;  %v10459_v37 = vrot.slane %v10458_v8, 4 }
 0x62a   : > { %v10473_v11 = vrot.slane %v10471_v62, 5  ;;  %v10502_v14 = vrot.slane %v10500_v0, 4  ;;  %v10505_v38 = vrot.slane %v10503_v12, 5  ;;  %v10543_v0 = vshll.u32 %v18353_v17, 16 }
 0x62b   : > { %13848 = vmatmul.mubr.bf16.gmra.mrb[12].mxu1 %v12357_v25  ;;  %v10426_v25 = vsel %vm15442_vm2, %v10421_v1, %v10425_v36  ;;  %v10478_v1 = vrot.slane %v10476_v22, 4  ;;  %v10515_v36 = vrot.slane %v10513_v43, 4  ;;  %v10492_v9 = vor.u32 %v10491_v41, %v10487_v15  ;;  %v14874_v22 = vld [vmem:[#allocation2 + $0xbc] sm:$0x1] }
 0x62c   : > { %13851 = vmatprep.mubr.bf16.mxu1 %v12358_v7  ;;  %13880 = vmatpush3.bf16.msra.mxu1 %v14793_v50  ;;  %v10479_v50 = vshll.u32 %v10154_v13, 16  ;;  %v12360_v45 = vcombine.low %v10416_v56, %v10426_v25  ;;  %v10469_v7 = vrot.slane %v10468_v46, 4  ;;  %v10527_v13 = vshll.u32 %v10160_v29, 16 }
 0x62d   : > { %13881 = vmatprep.subr.bf16.mxu1 %v14794_v24  ;;  %v10440_v56 = vsel %vm15442_vm2, %v10435_v10, %v18440_v26  ;;  %v10450_v25 = vsel %vm15442_vm2, %v10445_v34, %v10449_v19  ;;  %v10495_v30 = vshll.u32 %v14874_v22, 16  ;;  %v10516_v60 = vor.u32 %v10515_v36, %v10511_v4 }
 0x62e   : > { %v10481_v20 = vrot.slane %v10479_v50, 5  ;;  %v10474_v40 = vsel %vm15442_vm2, %v10469_v7, %v10473_v11  ;;  %v10529_v2 = vrot.slane %v10527_v13, 5  ;;  %v10539_v46 = vrot.slane %v10537_v27, 4 }
 0x62f   : > { %v12361_v50 = vcombine.low %v10440_v56, %v10450_v25  ;;  %v10464_v26 = vsel %vm15442_vm2, %v10459_v37, %v18442_v21  ;;  %v10506_v31 = vor.u32 %v10505_v38, %v10502_v14  ;;  %v10519_v43 = vshll.u32 %v14875_v58, 16  ;;  %v19026_v37 = vld [vmem:[#allocation51_spill] sm:$0xff]  ;;  %v19029_v14 = vld [vmem:[#allocation54_spill] sm:$0xff]  ;;  %v19033_v25 = vld [vmem:[#allocation60_spill] sm:$0xff] }
 0x630   : > { %13882 = vmatpush3.bf16.msra.mxu1 %v14794_v24  ;;  %v10533_v24 = vshll.u32 %v18351_v52, 16  ;;  %v10482_v35 = vor.u32 %v10481_v20, %v10478_v1  ;;  %v10526_v52 = vrot.slane %v10524_v59, 4  ;;  %v10497_v10 = vrot.slane %v10495_v30, 5  ;;  %v19030_v38 = vld [vmem:[#allocation55_spill] sm:$0xff]  ;;  %v19048_v58 = vld [vmem:[#allocation70_spill] sm:$0xff] }
 0x631   : > { %v10517_v19 = vrot.slane %v10516_v60, 4  ;;  %v10507_v12 = vrot.slane %v10506_v31, 4  ;;  %v10521_v29 = vrot.slane %v10519_v43, 5  ;;  %v10545_v20 = vrot.slane %v10543_v0, 5  ;;  %v19040_v60 = vld [vmem:[#allocation65_spill] sm:$0xff] }
 0x632   : > { %v10535_v42 = vrot.slane %v10533_v24, 5  ;;  %v10483_v8 = vrot.slane %v10482_v35, 4  ;;  %v10530_v51 = vor.u32 %v10529_v2, %v10526_v52  ;;  %v19031_v56 = vcombine.low %v19029_v14, %v19030_v38  ;;  %v19036_v35 = vld [vmem:[#allocation63_spill] sm:$0xff]  ;;  %v19041_v52 = vld [vmem:[#allocation66_spill] sm:$0xff] }
 0x633   : > { %13852 = vmatmul.mubr.bf16.gmra.mrb[16].mxu1 %v12359_v61  ;;  %v12362_v61 = vcombine.low %v10464_v26, %v10474_v40  ;;  %v10522_v21 = vsel %vm15442_vm2, %v10517_v19, %v10521_v29  ;;  %v10512_v59 = vsel %vm15442_vm2, %v10507_v12, %v10511_v4  ;;  %v19032_v4 = vld [vmem:[#allocation58_spill] sm:$0xff]  ;;  %v19035_v40 = vld [vmem:[#allocation61_spill] sm:$0xff]  ;;  %v19039_v30 = vcombine.low %v18050_v57, %v19038_v23  ;;  %v19051_v57 = vld [vmem:[#allocation72_spill] sm:$0xff] }
 0x634   : > { %13855 = vmatprep.mubr.bf16.mxu1 %v12360_v45  ;;  %v10493_v45 = vrot.slane %v10492_v9, 4  ;;  %v10540_v62 = vor.u32 %v10539_v46, %v10535_v42  ;;  %v10488_v1 = vsel %vm15442_vm2, %v10483_v8, %v10487_v15  ;;  %v10531_v41 = vrot.slane %v10530_v51, 4  ;;  %v19027_v15 = vld [vmem:[#allocation52_spill] sm:$0xff]  ;;  %v19046_v26 = vld [vmem:[#allocation69_spill] sm:$0xff]  ;;  %v19054_v19 = vld [vmem:[#allocation74_spill] sm:$0xff] }
 0x635   : > { %v12364_v13 = vcombine.low %v10512_v59, %v10522_v21  ;;  %v19028_v11 = vcombine.low %v19026_v37, %v19027_v15  ;;  %v19034_v9 = vcombine.low %v19032_v4, %v19033_v25  ;;  %v19037_v22 = vcombine.low %v19035_v40, %v19036_v35 }
 0x636   : > { %v10498_v34 = vsel %vm15442_vm2, %v10493_v45, %v10497_v10  ;;  %v10541_v7 = vrot.slane %v10540_v62, 4  ;;  %v10536_v17 = vsel %vm15442_vm2, %v10531_v41, %v10535_v42  ;;  %v19042_v2 = vcombine.low %v19040_v60, %v19041_v52  ;;  %v19043_v42 = vld [vmem:[#allocation67_spill] sm:$0xff]  ;;  %v19053_v10 = vld [vmem:[#allocation73_spill] sm:$0xff] }
 0x637   : > { %v12363_v36 = vcombine.low %v10488_v1, %v10498_v34  ;;  %v19044_v46 = vcombine.low %v18072_v47, %v19043_v42  ;;  %v19049_v43 = vcombine.low %v18095_v6, %v19048_v58  ;;  %v19055_v8 = vcombine.low %v19053_v10, %v19054_v19  ;;  %v18532_v47 = vld [vmem:[%s19056_s16] ss:$0 sm:$0xff]  ;;  %v14879_v62 = vld [vmem:[%s15421_s15 + $0x4] sm:$0xf]  ;;  %v14883_v60 = vld [vmem:[%s15421_s15 + $0x14] sm:$0xf] }
 0x638   : > { %v10546_v24 = vsel %vm15442_vm2, %v10541_v7, %v10545_v20  ;;  %v11446_v0 = vunpack.c.l.bf16 %v14879_v62  ;;  %v11450_v52 = vunpack.c.l.bf16 %v14883_v60  ;;  %s15128_s16 = smov [#allocation9]  }
 0x639   : > { %v12365_v27 = vcombine.low %v10536_v17, %v10546_v24  ;;  %s14998_s19 = sshll.u32 %s15128_s16, 4  ;;  %s14999_s19 = int_to_ptr.vmem [resolvable:$false] %s14998_s19 }
 0x63a   : > { %s15000_s7 = scalar_lea.vmem %s14999_s19, 4096  ;;  %p15001_p2 = scmp.lt.s32.totalorder %s18657_s12, %s14999_s19 }
 0x63b   : > { %13856 = vmatmul.mubr.bf16.gmra.mrb[20].mxu1 %v12361_v50  ;;  %v19045_v50 = vld [vmem:[#allocation68_spill] sm:$0xff]  ;;  %p15002_p6 = scmp.lt.s32.totalorder %s15000_s7, %s14994_s14 }
 0x63c   : > { %13859 = vmatprep.mubr.bf16.mxu1 %v12362_v61  ;;  %v19047_v31 = vcombine.low %v19045_v50, %v19046_v26  ;;  %v19050_v61 = vld [vmem:[#allocation71_spill] sm:$0xff] }
 0x63d   : > { %v19052_v45 = vcombine.low %v19050_v61, %v19051_v57  ;;  %p15003_p10 = por %p15002_p6, %p15001_p2 }
 0x63f   : > { %p15004_p1 = pnand %p15003_p10, %p14997_p12 }
 0x643   : > { %13860 = vmatmul.mubr.bf16.gmra.mrb[24].mxu1 %v12363_v36 }
 0x644   : > { %13863 = vmatprep.mubr.bf16.mxu1 %v12364_v13  ;;  %v14880_v13 = vld [vmem:[%s15421_s15 + $0x18] sm:$0xf] }
 0x645   : > { %v11451_v17 = vunpack.c.l.bf16 %v14880_v13 }
 0x64b   : > { %13864 = vmatmul.mubr.bf16.gmra.mrb[28].mxu1 %v12365_v27 }
 0x64c   : > { %13883 = vmatprep.mubr.bf16.mxu1 %v19028_v11  ;;  %v14881_v11 = vld [vmem:[%s15421_s15 + $0x10] sm:$0xf] }
 0x64d   : > { %v11449_v14 = vunpack.c.l.bf16 %v14881_v11 }
 0x653   : > { %13884 = vmatmul.mubr.bf16.vlgmr.msra.gmra.mrb[0].mxu1 %v19031_v56 }
 0x654   : > { %13887 = vmatprep.mubr.bf16.mxu1 %v19034_v9  ;;  %v14882_v9 = vld [vmem:[%s15421_s15 + $0x1c] sm:$0xf] }
 0x655   : > { %v11452_v40 = vunpack.c.l.bf16 %v14882_v9 }
 0x65b   : > { %13888 = vmatmul.mubr.bf16.gmra.mrb[4].mxu1 %v19037_v22 }
 0x65c   : > { %13891 = vmatprep.mubr.bf16.mxu1 %v19039_v30 }
 0x663   : > { %13892 = vmatmul.mubr.bf16.gmra.mrb[8].mxu1 %v19042_v2 }
 0x664   : > { %13895 = vmatprep.mubr.bf16.mxu1 %v19044_v46 }
 0x66b   : > { %13896 = vmatmul.mubr.bf16.gmra.mrb[12].mxu1 %v19047_v31 }
 0x66c   : > { %13899 = vmatprep.mubr.bf16.mxu1 %v19049_v43 }
 0x673   : > { %13900 = vmatmul.mubr.bf16.gmra.mrb[16].mxu1 %v19052_v45  ;;  %v14884_v45 = vld [vmem:[%s15421_s15 + $0x28] sm:$0xf] }
 0x674   : > { %13903 = vmatprep.mubr.bf16.mxu1 %v19055_v8  ;;  %v11455_v10 = vunpack.c.l.bf16 %v14884_v45 }
 0x67b   : > { %13904 = vmatmul.mubr.bf16.gmra.mrb[20].mxu1 %v12401_v44  ;;  %v14876_v44 = vld [vmem:[%s15421_s15 + $0x8] sm:$0xf] }
 0x67c   : > { %13907 = vmatprep.mubr.bf16.mxu1 %v12402_v48  ;;  %v11447_v18 = vunpack.c.l.bf16 %v14876_v44  ;;  %v14877_v48 = vld [vmem:[%s15421_s15] sm:$0xf] }
 0x67d   : > { %v11445_v55 = vunpack.c.l.bf16 %v14877_v48  ;;  %v14885_v44 = vld [vmem:[%s15421_s15 + $0x20] sm:$0xf] }
 0x683   : > { %13908 = vmatmul.mubr.bf16.gmra.mrb[24].mxu1 %v12403_v63 }
 0x684   : > { %13911 = vmatprep.mubr.bf16.mxu1 %v12404_v33  ;;  %v14878_v33 = vld [vmem:[%s15421_s15 + $0xc] sm:$0xf] }
 0x685   : > { %v11448_v53 = vunpack.c.l.bf16 %v14878_v33 }
 0x68b   : > { %13912 = vmatmul.mubr.bf16.gmra.mrb[28].mxu1 %v12405_v32 }
 0x726   : > { %v13885_v6 = vpop.f32.mrb[0].mxu1 }
 0x727   : > { %v11376_v5 = vmul.f32 %v13885_v6, %v18532_v47  ;;  %v11208_v54 = vpop.f32.mrb[1].mxu1 }
 0x728   : > { %v11374_v49 = vmul.f32 %v18532_v47, %v11208_v54  ;;  %v13886_v63 = vpop.f32.mrb[2].mxu1 }
 0x729   : > { %v11415_v39 = vadd.f32 %v18537_v16, %v11376_v5  ;;  %v11377_v3 = vmul.f32 %v13886_v63, %v18532_v47  ;;  %v11211_v28 = vpop.f32.mrb[3].mxu1  ;;  %v14886_v63 = vld [vmem:[%s15421_s15 + $0x2c] sm:$0xf] }
 0x72a   : > { %v11413_v32 = vadd.f32 %v18537_v16, %v11374_v49  ;;  %v11375_v51 = vmul.f32 %v18532_v47, %v11211_v28 }
 0x72b   : > { %v11479_v12 = vadd.f32 %v11447_v18, %v11415_v39  ;;  %v11416_v29 = vadd.f32 %v18537_v16, %v11377_v3  ;;  %v11453_v18 = vunpack.c.l.bf16 %v14885_v44  ;;  %v11456_v39 = vunpack.c.l.bf16 %v14886_v63 }
 0x72c   : > { %v11477_v34 = vadd.f32 %v11445_v55, %v11413_v32  ;;  %v11414_v21 = vadd.f32 %v18537_v16, %v11375_v51  ;;  %v14887_v32 = vld [vmem:[%s15421_s15 + $0x24] sm:$0xf] }
 0x72d   : > { %v11480_v1 = vadd.f32 %v11448_v53, %v11416_v29  ;;  %v11511_v20 = vmax.f32 %v11479_v12, 0.0  ;;  %v11454_v51 = vunpack.c.l.bf16 %v14887_v32 }
 0x72e   : > { %v11478_v41 = vadd.f32 %v11446_v0, %v11414_v21  ;;  %v13889_v7 = vpop.f32.mrb[4].mxu1  ;;  %v11509_v27 = vmax.f32 %v11477_v34, 0.0 }
 0x72f   : > { %v11512_v36 = vmax.f32 %v11480_v1, 0.0  ;;  %v11380_v59 = vmul.f32 %v13889_v7, %v18532_v47  ;;  %v11224_v24 = vpop.f32.mrb[5].mxu1 }
 0x730   : > { %v11510_v37 = vmax.f32 %v11478_v41, 0.0  ;;  %v11378_v15 = vmul.f32 %v18532_v47, %v11224_v24  ;;  %v13890_v38 = vpop.f32.mrb[6].mxu1 }
 0x731   : > { %v12532_v56 = vpack.c.bf16 %v11512_v36, %v11511_v20  ;;  %v11419_v4 = vadd.f32 %v18537_v16, %v11380_v59  ;;  %v11381_v25 = vmul.f32 %v13890_v38, %v18532_v47  ;;  %v11227_v35 = vpop.f32.mrb[7].mxu1  ;;  %v14888_v36 = vld [vmem:[%s15421_s15 + $0x38] sm:$0xf] }
 0x732   : > { %v12527_v22 = vpack.c.bf16 %v11510_v37, %v11509_v27  ;;  %v11417_v23 = vadd.f32 %v18537_v16, %v11378_v15  ;;  %v11379_v30 = vmul.f32 %v18532_v47, %v11227_v35  ;;  %v11459_v59 = vunpack.c.l.bf16 %v14888_v36  ;;  %v14889_v37 = vld [vmem:[%s15421_s15 + $0x30] sm:$0xf] }
 0x733   : > { %12604 = vst [vmem:[%s18564_s23 + $0x8] sm:$0xff] %v12532_v56   ;;  %v11483_v2 = vadd.f32 %v11451_v17, %v11419_v4  ;;  %v11420_v42 = vadd.f32 %v18537_v16, %v11381_v25  ;;  %v11457_v15 = vunpack.c.l.bf16 %v14889_v37  ;;  %v14890_v4 = vld [vmem:[%s15421_s15 + $0x3c] sm:$0xf] }
 0x734   : > { %12528 = vst [vmem:[%s18564_s23] sm:$0xff] %v12527_v22   ;;  %v11481_v46 = vadd.f32 %v11449_v14, %v11417_v23  ;;  %v11418_v50 = vadd.f32 %v18537_v16, %v11379_v30  ;;  %v11460_v25 = vunpack.c.l.bf16 %v14890_v4  ;;  %v14891_v23 = vld [vmem:[%s15421_s15 + $0x34] sm:$0xf] }
 0x735   : > { %v11484_v26 = vadd.f32 %v11452_v40, %v11420_v42  ;;  %v11515_v43 = vmax.f32 %v11483_v2, 0.0  ;;  %v11458_v30 = vunpack.c.l.bf16 %v14891_v23 }
 0x736   : > { %v11482_v31 = vadd.f32 %v11450_v52, %v11418_v50  ;;  %v13893_v58 = vpop.f32.mrb[8].mxu1  ;;  %v11513_v8 = vmax.f32 %v11481_v46, 0.0 }
 0x737   : > { %v11516_v61 = vmax.f32 %v11484_v26, 0.0  ;;  %v11384_v57 = vmul.f32 %v13893_v58, %v18532_v47  ;;  %v11240_v19 = vpop.f32.mrb[9].mxu1 }
 0x738   : > { %v11514_v6 = vmax.f32 %v11482_v31, 0.0  ;;  %v11382_v5 = vmul.f32 %v18532_v47, %v11240_v19  ;;  %v13894_v54 = vpop.f32.mrb[10].mxu1 }
 0x739   : > { %v12542_v49 = vpack.c.bf16 %v11516_v61, %v11515_v43  ;;  %v11423_v48 = vadd.f32 %v18537_v16, %v11384_v57  ;;  %v11385_v55 = vmul.f32 %v13894_v54, %v18532_v47  ;;  %v11243_v3 = vpop.f32.mrb[11].mxu1  ;;  %v14892_v61 = vld [vmem:[%s15421_s15 + $0x48] sm:$0xf] }
 0x73a   : > { %v12537_v33 = vpack.c.bf16 %v11514_v6, %v11513_v8  ;;  %v11421_v53 = vadd.f32 %v18537_v16, %v11382_v5  ;;  %v11383_v28 = vmul.f32 %v18532_v47, %v11243_v3  ;;  %v11463_v57 = vunpack.c.l.bf16 %v14892_v61  ;;  %v14893_v6 = vld [vmem:[%s15421_s15 + $0x40] sm:$0xf] }
 0x73b   : > { %12606 = vst [vmem:[%s18564_s23 + $0x18] sm:$0xff] %v12542_v49   ;;  %v11487_v62 = vadd.f32 %v11455_v10, %v11423_v48  ;;  %v11424_v0 = vadd.f32 %v18537_v16, %v11385_v55  ;;  %v11461_v5 = vunpack.c.l.bf16 %v14893_v6  ;;  %v14894_v48 = vld [vmem:[%s15421_s15 + $0x4c] sm:$0xf] }
 0x73c   : > { %12605 = vst [vmem:[%s18564_s23 + $0x10] sm:$0xff] %v12537_v33   ;;  %v11485_v12 = vadd.f32 %v11453_v18, %v11421_v53  ;;  %v11422_v29 = vadd.f32 %v18537_v16, %v11383_v28  ;;  %v11464_v55 = vunpack.c.l.bf16 %v14894_v48  ;;  %v14895_v53 = vld [vmem:[%s15421_s15 + $0x44] sm:$0xf] }
 0x73d   : > { %v11488_v34 = vadd.f32 %v11456_v39, %v11424_v0  ;;  %v11519_v41 = vmax.f32 %v11487_v62, 0.0  ;;  %v11462_v28 = vunpack.c.l.bf16 %v14895_v53 }
 0x73e   : > { %v11486_v21 = vadd.f32 %v11454_v51, %v11422_v29  ;;  %v13897_v1 = vpop.f32.mrb[12].mxu1  ;;  %v11517_v17 = vmax.f32 %v11485_v12, 0.0 }
 0x73f   : > { %v11520_v7 = vmax.f32 %v11488_v34, 0.0  ;;  %v11388_v20 = vmul.f32 %v13897_v1, %v18532_v47  ;;  %v11256_v13 = vpop.f32.mrb[13].mxu1 }
 0x740   : > { %v11518_v24 = vmax.f32 %v11486_v21, 0.0  ;;  %v11386_v27 = vmul.f32 %v18532_v47, %v11256_v13  ;;  %v13898_v11 = vpop.f32.mrb[14].mxu1 }
 0x741   : > { %v12552_v14 = vpack.c.bf16 %v11520_v7, %v11519_v41  ;;  %v11427_v38 = vadd.f32 %v18537_v16, %v11388_v20  ;;  %v11389_v56 = vmul.f32 %v13898_v11, %v18532_v47  ;;  %v11259_v9 = vpop.f32.mrb[15].mxu1  ;;  %v14896_v7 = vld [vmem:[%s15421_s15 + $0x58] sm:$0xf] }
 0x742   : > { %v12547_v40 = vpack.c.bf16 %v11518_v24, %v11517_v17  ;;  %v11425_v35 = vadd.f32 %v18537_v16, %v11386_v27  ;;  %v11387_v22 = vmul.f32 %v18532_v47, %v11259_v9  ;;  %v11467_v20 = vunpack.c.l.bf16 %v14896_v7  ;;  %v14897_v24 = vld [vmem:[%s15421_s15 + $0x50] sm:$0xf] }
 0x743   : > { %12608 = vst [vmem:[%s18564_s23 + $0x28] sm:$0xff] %v12552_v14   ;;  %v11491_v60 = vadd.f32 %v11459_v59, %v11427_v38  ;;  %v11428_v52 = vadd.f32 %v18537_v16, %v11389_v56  ;;  %v11465_v27 = vunpack.c.l.bf16 %v14897_v24  ;;  %v14898_v38 = vld [vmem:[%s15421_s15 + $0x5c] sm:$0xf] }
 0x744   : > { %12607 = vst [vmem:[%s18564_s23 + $0x20] sm:$0xff] %v12547_v40   ;;  %v11489_v2 = vadd.f32 %v11457_v15, %v11425_v35  ;;  %v11426_v42 = vadd.f32 %v18537_v16, %v11387_v22  ;;  %v11468_v56 = vunpack.c.l.bf16 %v14898_v38  ;;  %v14899_v35 = vld [vmem:[%s15421_s15 + $0x54] sm:$0xf] }
 0x745   : > { %v11492_v46 = vadd.f32 %v11460_v25, %v11428_v52  ;;  %v11523_v31 = vmax.f32 %v11491_v60, 0.0  ;;  %v11466_v22 = vunpack.c.l.bf16 %v14899_v35 }
 0x746   : > { %v11490_v50 = vadd.f32 %v11458_v30, %v11426_v42  ;;  %v13901_v26 = vpop.f32.mrb[16].mxu1  ;;  %v11521_v10 = vmax.f32 %v11489_v2, 0.0 }
 0x747   : > { %v11524_v58 = vmax.f32 %v11492_v46, 0.0  ;;  %v11392_v43 = vmul.f32 %v13901_v26, %v18532_v47  ;;  %v11272_v45 = vpop.f32.mrb[17].mxu1 }
 0x748   : > { %v11522_v19 = vmax.f32 %v11490_v50, 0.0  ;;  %v11390_v8 = vmul.f32 %v18532_v47, %v11272_v45  ;;  %v13902_v44 = vpop.f32.mrb[18].mxu1 }
 0x749   : > { %v12562_v18 = vpack.c.bf16 %v11524_v58, %v11523_v31  ;;  %v11431_v54 = vadd.f32 %v18537_v16, %v11392_v43  ;;  %v11393_v49 = vmul.f32 %v13902_v44, %v18532_v47  ;;  %v11275_v63 = vpop.f32.mrb[19].mxu1  ;;  %v14900_v58 = vld [vmem:[%s15421_s15 + $0x68] sm:$0xf] }
 0x74a   : > { %v12557_v39 = vpack.c.bf16 %v11522_v19, %v11521_v10  ;;  %v11429_v3 = vadd.f32 %v18537_v16, %v11390_v8  ;;  %v11391_v33 = vmul.f32 %v18532_v47, %v11275_v63  ;;  %v11471_v43 = vunpack.c.l.bf16 %v14900_v58  ;;  %v14901_v19 = vld [vmem:[%s15421_s15 + $0x60] sm:$0xf] }
 0x74b   : > { %12610 = vst [vmem:[%s18564_s23 + $0x38] sm:$0xff] %v12562_v18   ;;  %v11495_v32 = vadd.f32 %v11463_v57, %v11431_v54  ;;  %v11432_v51 = vadd.f32 %v18537_v16, %v11393_v49  ;;  %v11469_v8 = vunpack.c.l.bf16 %v14901_v19  ;;  %v14902_v54 = vld [vmem:[%s15421_s15 + $0x6c] sm:$0xf] }
 0x74c   : > { %12609 = vst [vmem:[%s18564_s23 + $0x30] sm:$0xff] %v12557_v39   ;;  %v11493_v62 = vadd.f32 %v11461_v5, %v11429_v3  ;;  %v11430_v0 = vadd.f32 %v18537_v16, %v11391_v33  ;;  %v11472_v49 = vunpack.c.l.bf16 %v14902_v54  ;;  %v14903_v3 = vld [vmem:[%s15421_s15 + $0x64] sm:$0xf] }
 0x74d   : > { %v11496_v12 = vadd.f32 %v11464_v55, %v11432_v51  ;;  %v11527_v21 = vmax.f32 %v11495_v32, 0.0  ;;  %v11470_v33 = vunpack.c.l.bf16 %v14903_v3 }
 0x74e   : > { %v11494_v29 = vadd.f32 %v11462_v28, %v11430_v0  ;;  %v13905_v34 = vpop.f32.mrb[20].mxu1  ;;  %v11525_v59 = vmax.f32 %v11493_v62, 0.0 }
 0x74f   : > { %v11528_v1 = vmax.f32 %v11496_v12, 0.0  ;;  %v11396_v41 = vmul.f32 %v13905_v34, %v18532_v47  ;;  %v11288_v36 = vpop.f32.mrb[21].mxu1 }
 0x750   : > { %v11526_v13 = vmax.f32 %v11494_v29, 0.0  ;;  %v11394_v17 = vmul.f32 %v18532_v47, %v11288_v36  ;;  %v13906_v37 = vpop.f32.mrb[22].mxu1 }
 0x751   : > { %v12572_v15 = vpack.c.bf16 %v11528_v1, %v11527_v21  ;;  %v11435_v11 = vadd.f32 %v18537_v16, %v11396_v41  ;;  %v11397_v14 = vmul.f32 %v13906_v37, %v18532_v47  ;;  %v11291_v4 = vpop.f32.mrb[23].mxu1  ;;  %v14904_v1 = vld [vmem:[%s15421_s15 + $0x78] sm:$0xf] }
 0x752   : > { %v12567_v25 = vpack.c.bf16 %v11526_v13, %v11525_v59  ;;  %v11433_v9 = vadd.f32 %v18537_v16, %v11394_v17  ;;  %v11395_v40 = vmul.f32 %v18532_v47, %v11291_v4  ;;  %v11475_v41 = vunpack.c.l.bf16 %v14904_v1  ;;  %v14905_v13 = vld [vmem:[%s15421_s15 + $0x70] sm:$0xf] }
 0x753   : > { %12612 = vst [vmem:[%s18564_s23 + $0x48] sm:$0xff] %v12572_v15   ;;  %v11499_v23 = vadd.f32 %v11467_v20, %v11435_v11  ;;  %v11436_v30 = vadd.f32 %v18537_v16, %v11397_v14  ;;  %v11473_v17 = vunpack.c.l.bf16 %v14905_v13  ;;  %v14906_v11 = vld [vmem:[%s15421_s15 + $0x7c] sm:$0xf] }
 0x754   : > { %12611 = vst [vmem:[%s18564_s23 + $0x40] sm:$0xff] %v12567_v25   ;;  %v11497_v60 = vadd.f32 %v11465_v27, %v11433_v9  ;;  %v11434_v52 = vadd.f32 %v18537_v16, %v11395_v40  ;;  %v11476_v14 = vunpack.c.l.bf16 %v14906_v11  ;;  %v14907_v9 = vld [vmem:[%s15421_s15 + $0x74] sm:$0xf]  ;;  %s12523_s15 = sshll.u32 %s11710_s25, 11 }
 0x755   : > { %v11500_v2 = vadd.f32 %v11468_v56, %v11436_v30  ;;  %v11531_v50 = vmax.f32 %v11499_v23, 0.0  ;;  %v11474_v40 = vunpack.c.l.bf16 %v14907_v9  ;;  %s18662_s30 = scalar_lea.hbm %s19061_s4, %s12523_s15 }
 0x756   : > { %v11498_v42 = vadd.f32 %v11466_v22, %v11434_v52  ;;  %v13909_v46 = vpop.f32.mrb[24].mxu1  ;;  %v11529_v57 = vmax.f32 %v11497_v60, 0.0 }
 0x757   : > { %v11532_v26 = vmax.f32 %v11500_v2, 0.0  ;;  %v11400_v31 = vmul.f32 %v13909_v46, %v18532_v47  ;;  %v11304_v61 = vpop.f32.mrb[25].mxu1 }
 0x758   : > { %v11530_v45 = vmax.f32 %v11498_v42, 0.0  ;;  %v11398_v10 = vmul.f32 %v18532_v47, %v11304_v61  ;;  %v13910_v6 = vpop.f32.mrb[26].mxu1 }
 0x759   : > { %v12582_v5 = vpack.c.bf16 %v11532_v26, %v11531_v50  ;;  %v11439_v44 = vadd.f32 %v18537_v16, %v11400_v31  ;;  %v11401_v18 = vmul.f32 %v13910_v6, %v18532_v47  ;;  %v11307_v48 = vpop.f32.mrb[27].mxu1 }
 0x75a   : > { %v12577_v55 = vpack.c.bf16 %v11530_v45, %v11529_v57  ;;  %v11437_v63 = vadd.f32 %v18537_v16, %v11398_v10  ;;  %v11399_v39 = vmul.f32 %v18532_v47, %v11307_v48 }
 0x75b   : > { %12614 = vst [vmem:[%s18564_s23 + $0x58] sm:$0xff] %v12582_v5   ;;  %v11503_v53 = vadd.f32 %v11471_v43, %v11439_v44  ;;  %v11440_v28 = vadd.f32 %v18537_v16, %v11401_v18 }
 0x75c   : > { %12613 = vst [vmem:[%s18564_s23 + $0x50] sm:$0xff] %v12577_v55   ;;  %v11501_v32 = vadd.f32 %v11469_v8, %v11437_v63  ;;  %v11438_v51 = vadd.f32 %v18537_v16, %v11399_v39 }
 0x75d   : > { %v11504_v62 = vadd.f32 %v11472_v49, %v11440_v28  ;;  %v11535_v29 = vmax.f32 %v11503_v53, 0.0 }
 0x75e   : > { %v11502_v0 = vadd.f32 %v11470_v33, %v11438_v51  ;;  %v13913_v12 = vpop.f32.mrb[28].mxu1  ;;  %v11533_v20 = vmax.f32 %v11501_v32, 0.0 }
 0x75f   : > { %v11536_v34 = vmax.f32 %v11504_v62, 0.0  ;;  %v11404_v21 = vmul.f32 %v13913_v12, %v18532_v47  ;;  %v11320_v7 = vpop.f32.mrb[29].mxu1 }
 0x760   : > { %v11534_v36 = vmax.f32 %v11502_v0, 0.0  ;;  %v11402_v59 = vmul.f32 %v18532_v47, %v11320_v7  ;;  %v13914_v24 = vpop.f32.mrb[30].mxu1 }
 0x761   : > { %v12592_v27 = vpack.c.bf16 %v11536_v34, %v11535_v29  ;;  %v11443_v37 = vadd.f32 %v18537_v16, %v11404_v21  ;;  %v11405_v15 = vmul.f32 %v13914_v24, %v18532_v47  ;;  %v11323_v38 = vpop.f32.mrb[31].mxu1 }
 0x762   : > { %v12587_v56 = vpack.c.bf16 %v11534_v36, %v11533_v20  ;;  %v11441_v4 = vadd.f32 %v18537_v16, %v11402_v59  ;;  %v11403_v25 = vmul.f32 %v18532_v47, %v11323_v38 }
 0x763   : > { %12616 = vst [vmem:[%s18564_s23 + $0x68] sm:$0xff] %v12592_v27   ;;  %v11507_v35 = vadd.f32 %v11475_v41, %v11443_v37  ;;  %v11444_v22 = vadd.f32 %v18537_v16, %v11405_v15 }
 0x764   : > { %12615 = vst [vmem:[%s18564_s23 + $0x60] sm:$0xff] %v12587_v56   ;;  %v11505_v23 = vadd.f32 %v11473_v17, %v11441_v4  ;;  %v11442_v30 = vadd.f32 %v18537_v16, %v11403_v25 }
 0x765   : > { %v11508_v60 = vadd.f32 %v11476_v14, %v11444_v22  ;;  %v11539_v2 = vmax.f32 %v11507_v35, 0.0 }
 0x766   : > { %v11506_v52 = vadd.f32 %v11474_v40, %v11442_v30  ;;  %v11537_v42 = vmax.f32 %v11505_v23, 0.0 }
 0x767   : > { %v11540_v47 = vmax.f32 %v11508_v60, 0.0 }
 0x768   : > { %v11538_v46 = vmax.f32 %v11506_v52, 0.0 }
 0x769   : > { %v12602_v50 = vpack.c.bf16 %v11540_v47, %v11539_v2 }
 0x76a   : > { %v12597_v26 = vpack.c.bf16 %v11538_v46, %v11537_v42 }
 0x76b   : > { %12618 = vst [vmem:[%s18564_s23 + $0x78] sm:$0xff] %v12602_v50  }
 0x76c   : > { %12617 = vst [vmem:[%s18564_s23 + $0x70] sm:$0xff] %v12597_v26  }
 0x76d   : > { %15007 = shalt.err (!%p15004_p1)
}
 0x76e   : > { %s15008_s1 = scalar_lea.hbm %s18662_s30, 2048  ;;  %s15012_s13 = scalar_lea.hbm %s19061_s4, 16384 }
 0x76f   : > { %p15009_p4 = scmp.ne.s32.totalorder %s18662_s30, %s15008_s1  ;;  %p15013_p9 = scmp.lt.u32.totalorder %s18662_s30, %s19061_s4 }
 0x770   : > { %p15014_p13 = scmp.lt.u32.totalorder %s15012_s13, %s15008_s1  ;;  %p15016_p0 = scmp.lt.u32.totalorder %s15008_s1, %s18662_s30 }
 0x771   : > { %p15010_p3 = pnand %p15009_p4, %p19062_p5 }
 0x772   : > { %p15015_p11 = por %p15014_p13, %p15013_p9 }
 0x773   : > { %p15011_p7 = pneg %p15010_p3 }
 0x774   : > { %p15017_p8 = por %p15016_p0, %p15015_p11 }
 0x776   : > { %p15018_p12 = pnand %p15017_p8, %p15011_p7 }
 0x778   : > { %15021 = shalt.err (!%p15018_p12)
}
 0x779   : > { %s15129_s21 = smov 64   ;;  %s15130_s25 = smov 4  }
 0x77a   : > { %14437 = dma.vmem_to_hbm [thread:$0]  (%p19062_p5), %s18657_s12, 2048, %s18662_s30, %s18668_s6, %s15129_s21, %s15129_s21, %s15130_s25  }
 0x77b PF: > { %s19063_s15 = sld [smem:[#allocation13_spill]]  ;;  %s19064_s5 = sld [smem:[#allocation18_spill]] }
 0x77c   : > { %p14459_p2 = scmp.ge.s32.totalorder %s15120_s11, 2 }
 0x781   : > { %s11732_s9 = sand.u32 1, %s19063_s15   ;;  %p19065_p6 = scmp.ne.s32.totalorder %s19064_s5, 0 }
 0x782   : > { %s11733_s14 = scalar_lea.sflag [#allocation5], %s11732_s9 }
 0x783   : > { %p14451_p10 = pnand %p14459_p2, %p19065_p6 }
 0x785   : > { %15075 = dma.done.wait (!%p14451_p10), %s11733_s14, 2048  }
 0x786   : > { %15077 = vsyncadd (!%p14451_p10), %s11733_s14, 4294965248  ;;  %s24_s11 = sadd.s32 1, %s15120_s11   ;;  %s19066_s24 = sld [smem:[#allocation14_spill]] }
 0x787   : > { %p21_p1 = scmp.ge.s32.totalorder %s24_s11, 10   ;;  %s19067_s30 = sld [smem:[#allocation16_spill]] }
 0x788   : > { %s19068_s12 = sld [smem:[#allocation19_spill]]  ;;  %s19069_s25 = smov %s15088_s26 }
 0x789   : > { %s19070_s26 = smov %s15354_s22  ;;  %s19071_s27 = smov %s15096_s28 }
 0x78a   : > { %s19072_s28 = smov %s15100_s29  ;;  %s19073_s29 = smov %s15343_s18 }
 0x78b   : > { %s19074_s8 = smov %s15116_s10  ;;  %s19075_s9 = smov %s19078_s17 }
 0x78c   :  { %23 = sbr.rel (!%p21_p1) target bundleno = 16 (0x10), region = 122 }
 0x78e   : > { %s19076_s10 = smov %s19068_s12 }
 0x793   :  { %11738 = vsyncpa [#allocation4], 1 }
 0x794   :  { %11740 = vsyncpa [#allocation4 + $0x1], 1 }
 0x795   :  { %11741 = vsyncpa [#allocation7], 1 }
 0x796   :  { %11742 = vsyncpa [#allocation5], 1 }
 0x797   :  { %11744 = vsyncpa [#allocation5 + $0x1], 1 }

</bundles_post_ra>
